<compile_context>
chip_gen: v7x
topology: tpu7x:2x2x1
jax: 0.10.0
libtpu: 0.0.40
codegen_flags: <defaults>
</compile_context>

<pallas_src>
import jax
import jax.numpy as jnp
from jax import lax
from jax.experimental import pallas as pl
from jax.experimental.pallas import tpu as pltpu

EPS = 1e-5
LANE = 128


def _conv_block_kernel(x_ref, w1_ref, g1_ref, b1_ref, w2_ref, g2_ref, b2_ref,
                       o_ref, xpad_ref, ypad_ref):
    """Fused (conv3x3 -> BN(batch stats) -> ReLU) x 2.

    x_ref   : (N, H, W, Cin)      f32   NHWC input
    w1_ref  : (9*Cin, Cp)         bf16  stage-1 taps, stacked row-major over (ky, kx)
    g1_ref, b1_ref : (1, Cp)      f32   stage-1 BN gamma / beta (zero padded)
    w2_ref  : (9*Cp, Cp)          bf16  stage-2 taps (in & out channels zero padded)
    g2_ref, b2_ref : (1, Cp)      f32
    o_ref   : (N*H*W, Cp)         f32   lane-dense output (Cp multiple of 128)
    xpad_ref: (N, H+2, W+2, Cin)  f32   VMEM scratch: zero-padded input
    ypad_ref: (N, H+2, W+2, Cp)   f32   VMEM scratch: zero-padded stage-1 output
    """
    N, H, W, Cin = x_ref.shape
    Cp = o_ref.shape[1]
    M = N * H * W

    # In-kernel zero padding (padding=1): zero the scratch, copy the interior.
    xpad_ref[...] = jnp.zeros_like(xpad_ref)
    xpad_ref[:, 1:H + 1, 1:W + 1, :] = x_ref[...]
    ypad_ref[...] = jnp.zeros_like(ypad_ref)

    def conv_bn_relu(src_ref, c_in, w_ref, g_ref, b_ref):
        # im2col: 9 shifted views concatenated along the contraction axis, then a
        # single bf16 MXU dot with f32 accumulation.
        cols = [src_ref[:, ky:ky + H, kx:kx + W, :].astype(jnp.bfloat16)
                for ky in range(3) for kx in range(3)]
        patches = jnp.concatenate(cols, axis=-1).reshape(M, 9 * c_in)
        acc = jnp.dot(patches, w_ref[...],
                      preferred_element_type=jnp.float32)          # (M, Cp) f32

        # BatchNorm2d (training-mode batch statistics), folded affine.
        inv_m = 1.0 / M
        mean = jnp.sum(acc, axis=0, keepdims=True) * inv_m
        var = jnp.maximum(
            jnp.sum(acc * acc, axis=0, keepdims=True) * inv_m - mean * mean, 0.0)
        scale = g_ref[...] * lax.rsqrt(var + EPS)
        bias = b_ref[...] - mean * scale
        return jnp.maximum(acc * scale + bias, 0.0)                 # ReLU

    y1 = conv_bn_relu(xpad_ref, Cin, w1_ref, g1_ref, b1_ref)        # (M, Cp)
    ypad_ref[:, 1:H + 1, 1:W + 1, :] = y1.reshape(N, H, W, Cp)
    o_ref[...] = conv_bn_relu(ypad_ref, Cp, w2_ref, g2_ref, b2_ref)


def _round_up(x, m):
    return (x + m - 1) // m * m


@jax.jit
def conv_block(x_nchw, params):
    """ConvBlock.forward. Input/output in PyTorch NCHW layout."""
    N, Cin, H, W = x_nchw.shape
    Cout = params["w1"].shape[-1]
    Cp = _round_up(Cout, LANE)              # lane-dense channel axis in-kernel

    # One layout pass on entry; NHWC through both fused stages.
    x = jnp.transpose(x_nchw, (0, 2, 3, 1)).astype(jnp.float32)

    # Weights / BN params: zero-pad the channel axis to Cp and stack taps
    # (ky, kx, cin) row-major to match the in-kernel im2col concatenation order.
    w1 = jnp.pad(params["w1"].astype(jnp.float32),
                 ((0, 0), (0, 0), (0, 0), (0, Cp - Cout)))
    w2 = jnp.pad(params["w2"].astype(jnp.float32),
                 ((0, 0), (0, 0), (0, Cp - Cout), (0, Cp - Cout)))
    w1 = w1.reshape(9 * Cin, Cp).astype(jnp.bfloat16)
    w2 = w2.reshape(9 * Cp, Cp).astype(jnp.bfloat16)

    def pad_vec(v):
        return jnp.pad(v.astype(jnp.float32), (0, Cp - Cout)).reshape(1, Cp)

    g1, b1 = pad_vec(params["g1"]), pad_vec(params["b1"])
    g2, b2 = pad_vec(params["g2"]), pad_vec(params["b2"])

    out = pl.pallas_call(
        _conv_block_kernel,
        out_shape=jax.ShapeDtypeStruct((N * H * W, Cp), jnp.float32),
        in_specs=[pl.BlockSpec(memory_space=pltpu.MemorySpace.VMEM)] * 7,
        out_specs=pl.BlockSpec(memory_space=pltpu.MemorySpace.VMEM),
        scratch_shapes=[
            pltpu.VMEM((N, H + 2, W + 2, Cin), jnp.float32),   # padded input
            pltpu.VMEM((N, H + 2, W + 2, Cp), jnp.float32),    # padded stage-1 output
        ],
        compiler_params=pltpu.CompilerParams(vmem_limit_bytes=32 * 1024 * 1024),
    )(x, w1, g1, b1, w2, g2, b2)

    out = out.reshape(N, H, W, Cp)[..., :Cout]   # drop lane padding (free bitcast+slice)
    return jnp.transpose(out, (0, 3, 1, 2))      # NHWC -> NCHW


# ---------------------------------------------------------------------------
# Pure-JAX f32 reference (correctness check only).
# ---------------------------------------------------------------------------
def _ref_stage(x_nchw, w_taps, gamma, beta):
    w_oihw = jnp.transpose(w_taps, (3, 2, 0, 1))   # (ky,kx,ci,co) -> (co,ci,ky,kx)
    y = lax.conv_general_dilated(
        x_nchw, w_oihw, window_strides=(1, 1), padding=((1, 1), (1, 1)),
        dimension_numbers=("NCHW", "OIHW", "NCHW"))
    mean = jnp.mean(y, axis=(0, 2, 3), keepdims=True)
    var = jnp.mean((y - mean) ** 2, axis=(0, 2, 3), keepdims=True)
    y = (y - mean) * lax.rsqrt(var + EPS) * gamma.reshape(1, -1, 1, 1) \
        + beta.reshape(1, -1, 1, 1)
    return jnp.maximum(y, 0.0)


def conv_block_ref(x_nchw, params):
    y = _ref_stage(x_nchw, params["w1"], params["g1"], params["b1"])
    return _ref_stage(y, params["w2"], params["g2"], params["b2"])


if __name__ == "__main__":
    N, C_IN, C_OUT, H, W = 2, 4, 8, 16, 16

    key = jax.random.PRNGKey(0)
    kx_, kw1, kw2 = jax.random.split(key, 3)

    x = jax.random.normal(kx_, (N, C_IN, H, W), dtype=jnp.float32)

    # Conv weights in (ky, kx, Cin, Cout) layout; BN params per nn.BatchNorm2d defaults.
    params = {
        "w1": jax.random.normal(kw1, (3, 3, C_IN, C_OUT), jnp.float32)
              * (1.0 / jnp.sqrt(9.0 * C_IN)),
        "g1": jnp.ones((C_OUT,), jnp.float32),
        "b1": jnp.zeros((C_OUT,), jnp.float32),
        "w2": jax.random.normal(kw2, (3, 3, C_OUT, C_OUT), jnp.float32)
              * (1.0 / jnp.sqrt(9.0 * C_OUT)),
        "g2": jnp.ones((C_OUT,), jnp.float32),
        "b2": jnp.zeros((C_OUT,), jnp.float32),
    }

    out = jax.block_until_ready(conv_block(x, params))
    ref = jax.block_until_ready(conv_block_ref(x, params))

    assert out.shape == (N, C_OUT, H, W), out.shape
    # Kernel feeds the MXU in bf16 (f32 accumulation); the reference is pure f32,
    # so allow a few e-2 of slack on O(1) batch-normalized activations.
    assert jnp.allclose(out, ref, atol=3e-2, rtol=3e-2), \
        f"max abs err {jnp.max(jnp.abs(out - ref))}"

    print("KERNEL_OK")
</pallas_src>

<mosaic_0001>
module attributes {stable_mosaic.version = 11 : i64} {
  func.func @_conv_block_kernel(%arg0: memref<2x16x16x4xf32, #tpu.memory_space<vmem>>, %arg1: memref<36x128xbf16, #tpu.memory_space<vmem>>, %arg2: memref<1x128xf32, #tpu.memory_space<vmem>>, %arg3: memref<1x128xf32, #tpu.memory_space<vmem>>, %arg4: memref<1152x128xbf16, #tpu.memory_space<vmem>>, %arg5: memref<1x128xf32, #tpu.memory_space<vmem>>, %arg6: memref<1x128xf32, #tpu.memory_space<vmem>>, %arg7: memref<512x128xf32, #tpu.memory_space<vmem>>, %arg8: memref<2x18x18x4xf32, #tpu.memory_space<vmem>>, %arg9: memref<2x18x18x128xf32, #tpu.memory_space<vmem>>) attributes {dimension_semantics = [], scalar_prefetch = 0 : i64, scratch_operands = 2 : i64, tpu.core_type = #tpu.core_type<tc>} {
    %cst = arith.constant 0.000000e+00 : f32
    %0 = vector.broadcast %cst : f32 to vector<2x18x18x4xf32>
    %c0 = arith.constant 0 : index
    %c0_0 = arith.constant 0 : index
    %c0_1 = arith.constant 0 : index
    %c0_2 = arith.constant 0 : index
    %1 = vector.load %arg8[%c0, %c0_0, %c0_1, %c0_2] : memref<2x18x18x4xf32, #tpu.memory_space<vmem>>, vector<2x18x18x4xf32>
    tpu.vector_store %arg8[%c0, %c0_0, %c0_1, %c0_2], %0 {strides = array<i32>} : memref<2x18x18x4xf32, #tpu.memory_space<vmem>>, vector<2x18x18x4xf32>,
    %c0_3 = arith.constant 0 : index
    %c0_4 = arith.constant 0 : index
    %c0_5 = arith.constant 0 : index
    %c0_6 = arith.constant 0 : index
    %2 = vector.load %arg0[%c0_3, %c0_4, %c0_5, %c0_6] : memref<2x16x16x4xf32, #tpu.memory_space<vmem>>, vector<2x16x16x4xf32>
    %c0_7 = arith.constant 0 : index
    %c1 = arith.constant 1 : index
    %c1_8 = arith.constant 1 : index
    %c0_9 = arith.constant 0 : index
    %3 = vector.load %arg8[%c0_7, %c1, %c1_8, %c0_9] : memref<2x18x18x4xf32, #tpu.memory_space<vmem>>, vector<2x16x16x4xf32>
    tpu.vector_store %arg8[%c0_7, %c1, %c1_8, %c0_9], %2 {strides = array<i32>} : memref<2x18x18x4xf32, #tpu.memory_space<vmem>>, vector<2x16x16x4xf32>,
    %cst_10 = arith.constant 0.000000e+00 : f32
    %4 = vector.broadcast %cst_10 : f32 to vector<2x18x18x128xf32>
    %c0_11 = arith.constant 0 : index
    %c0_12 = arith.constant 0 : index
    %c0_13 = arith.constant 0 : index
    %c0_14 = arith.constant 0 : index
    %5 = vector.load %arg9[%c0_11, %c0_12, %c0_13, %c0_14] : memref<2x18x18x128xf32, #tpu.memory_space<vmem>>, vector<2x18x18x128xf32>
    tpu.vector_store %arg9[%c0_11, %c0_12, %c0_13, %c0_14], %4 {strides = array<i32>} : memref<2x18x18x128xf32, #tpu.memory_space<vmem>>, vector<2x18x18x128xf32>,
    %c0_15 = arith.constant 0 : index
    %c0_16 = arith.constant 0 : index
    %c0_17 = arith.constant 0 : index
    %c0_18 = arith.constant 0 : index
    %6 = vector.load %arg8[%c0_15, %c0_16, %c0_17, %c0_18] : memref<2x18x18x4xf32, #tpu.memory_space<vmem>>, vector<2x16x16x4xf32>
    %7 = arith.truncf %6 : vector<2x16x16x4xf32> to vector<2x16x16x4xbf16>
    %c0_19 = arith.constant 0 : index
    %c0_20 = arith.constant 0 : index
    %c1_21 = arith.constant 1 : index
    %c0_22 = arith.constant 0 : index
    %8 = vector.load %arg8[%c0_19, %c0_20, %c1_21, %c0_22] : memref<2x18x18x4xf32, #tpu.memory_space<vmem>>, vector<2x16x16x4xf32>
    %9 = arith.truncf %8 : vector<2x16x16x4xf32> to vector<2x16x16x4xbf16>
    %c0_23 = arith.constant 0 : index
    %c0_24 = arith.constant 0 : index
    %c2 = arith.constant 2 : index
    %c0_25 = arith.constant 0 : index
    %10 = vector.load %arg8[%c0_23, %c0_24, %c2, %c0_25] : memref<2x18x18x4xf32, #tpu.memory_space<vmem>>, vector<2x16x16x4xf32>
    %11 = arith.truncf %10 : vector<2x16x16x4xf32> to vector<2x16x16x4xbf16>
    %c0_26 = arith.constant 0 : index
    %c1_27 = arith.constant 1 : index
    %c0_28 = arith.constant 0 : index
    %c0_29 = arith.constant 0 : index
    %12 = vector.load %arg8[%c0_26, %c1_27, %c0_28, %c0_29] : memref<2x18x18x4xf32, #tpu.memory_space<vmem>>, vector<2x16x16x4xf32>
    %13 = arith.truncf %12 : vector<2x16x16x4xf32> to vector<2x16x16x4xbf16>
    %c0_30 = arith.constant 0 : index
    %c1_31 = arith.constant 1 : index
    %c1_32 = arith.constant 1 : index
    %c0_33 = arith.constant 0 : index
    %14 = vector.load %arg8[%c0_30, %c1_31, %c1_32, %c0_33] : memref<2x18x18x4xf32, #tpu.memory_space<vmem>>, vector<2x16x16x4xf32>
    %15 = arith.truncf %14 : vector<2x16x16x4xf32> to vector<2x16x16x4xbf16>
    %c0_34 = arith.constant 0 : index
    %c1_35 = arith.constant 1 : index
    %c2_36 = arith.constant 2 : index
    %c0_37 = arith.constant 0 : index
    %16 = vector.load %arg8[%c0_34, %c1_35, %c2_36, %c0_37] : memref<2x18x18x4xf32, #tpu.memory_space<vmem>>, vector<2x16x16x4xf32>
    %17 = arith.truncf %16 : vector<2x16x16x4xf32> to vector<2x16x16x4xbf16>
    %c0_38 = arith.constant 0 : index
    %c2_39 = arith.constant 2 : index
    %c0_40 = arith.constant 0 : index
    %c0_41 = arith.constant 0 : index
    %18 = vector.load %arg8[%c0_38, %c2_39, %c0_40, %c0_41] : memref<2x18x18x4xf32, #tpu.memory_space<vmem>>, vector<2x16x16x4xf32>
    %19 = arith.truncf %18 : vector<2x16x16x4xf32> to vector<2x16x16x4xbf16>
    %c0_42 = arith.constant 0 : index
    %c2_43 = arith.constant 2 : index
    %c1_44 = arith.constant 1 : index
    %c0_45 = arith.constant 0 : index
    %20 = vector.load %arg8[%c0_42, %c2_43, %c1_44, %c0_45] : memref<2x18x18x4xf32, #tpu.memory_space<vmem>>, vector<2x16x16x4xf32>
    %21 = arith.truncf %20 : vector<2x16x16x4xf32> to vector<2x16x16x4xbf16>
    %c0_46 = arith.constant 0 : index
    %c2_47 = arith.constant 2 : index
    %c2_48 = arith.constant 2 : index
    %c0_49 = arith.constant 0 : index
    %22 = vector.load %arg8[%c0_46, %c2_47, %c2_48, %c0_49] : memref<2x18x18x4xf32, #tpu.memory_space<vmem>>, vector<2x16x16x4xf32>
    %23 = arith.truncf %22 : vector<2x16x16x4xf32> to vector<2x16x16x4xbf16>
    %24 = tpu.concatenate %7, %9, %11, %13, %15, %17, %19, %21, %23 in 3 : vector<2x16x16x4xbf16>, vector<2x16x16x4xbf16>, vector<2x16x16x4xbf16>, vector<2x16x16x4xbf16>, vector<2x16x16x4xbf16>, vector<2x16x16x4xbf16>, vector<2x16x16x4xbf16>, vector<2x16x16x4xbf16>, vector<2x16x16x4xbf16> -> vector<2x16x16x36xbf16>
    %25 = vector.shape_cast %24 : vector<2x16x16x36xbf16> to vector<512x36xbf16>
    %c0_50 = arith.constant 0 : index
    %c0_51 = arith.constant 0 : index
    %26 = vector.load %arg1[%c0_50, %c0_51] : memref<36x128xbf16, #tpu.memory_space<vmem>>, vector<36x128xbf16>
    %cst_52 = arith.constant dense<0.000000e+00> : vector<512x128xf32>
    %27 = tpu.matmul %25, %26, %cst_52 {dimension_numbers = #tpu.dot_dimension_numbers<[1], [0], [0], [1], [0, 0, 1, 1], [], []>} : vector<512x36xbf16>, vector<36x128xbf16>, vector<512x128xf32> -> vector<512x128xf32>
    %cst_53 = arith.constant dense<0.000000e+00> : vector<128xf32>
    %28 = vector.multi_reduction <add>, %27, %cst_53 [0] : vector<512x128xf32> to vector<128xf32>
    %29 = vector.shape_cast %28 : vector<128xf32> to vector<1x128xf32>
    %cst_54 = arith.constant 0.001953125 : f32
    %30 = vector.broadcast %cst_54 : f32 to vector<1x128xf32>
    %31 = arith.mulf %29, %30 : vector<1x128xf32>
    %32 = arith.mulf %27, %27 : vector<512x128xf32>
    %cst_55 = arith.constant dense<0.000000e+00> : vector<128xf32>
    %33 = vector.multi_reduction <add>, %32, %cst_55 [0] : vector<512x128xf32> to vector<128xf32>
    %34 = vector.shape_cast %33 : vector<128xf32> to vector<1x128xf32>
    %cst_56 = arith.constant 0.001953125 : f32
    %35 = vector.broadcast %cst_56 : f32 to vector<1x128xf32>
    %36 = arith.mulf %34, %35 : vector<1x128xf32>
    %37 = arith.mulf %31, %31 : vector<1x128xf32>
    %38 = arith.subf %36, %37 : vector<1x128xf32>
    %cst_57 = arith.constant 0.000000e+00 : f32
    %39 = vector.broadcast %cst_57 : f32 to vector<1x128xf32>
    %40 = arith.maximumf %38, %39 : vector<1x128xf32>
    %c0_58 = arith.constant 0 : index
    %c0_59 = arith.constant 0 : index
    %41 = vector.load %arg2[%c0_58, %c0_59] : memref<1x128xf32, #tpu.memory_space<vmem>>, vector<1x128xf32>
    %cst_60 = arith.constant 9.99999974E-6 : f32
    %42 = vector.broadcast %cst_60 : f32 to vector<1x128xf32>
    %43 = arith.addf %40, %42 : vector<1x128xf32>
    %44 = math.rsqrt %43 : vector<1x128xf32>
    %45 = arith.mulf %41, %44 : vector<1x128xf32>
    %c0_61 = arith.constant 0 : index
    %c0_62 = arith.constant 0 : index
    %46 = vector.load %arg3[%c0_61, %c0_62] : memref<1x128xf32, #tpu.memory_space<vmem>>, vector<1x128xf32>
    %47 = arith.mulf %31, %45 : vector<1x128xf32>
    %48 = arith.subf %46, %47 : vector<1x128xf32>
    %49 = vector.broadcast %45 : vector<1x128xf32> to vector<512x128xf32>
    %50 = arith.mulf %27, %49 : vector<512x128xf32>
    %51 = vector.broadcast %48 : vector<1x128xf32> to vector<512x128xf32>
    %52 = arith.addf %50, %51 : vector<512x128xf32>
    %cst_63 = arith.constant 0.000000e+00 : f32
    %53 = vector.broadcast %cst_63 : f32 to vector<512x128xf32>
    %54 = arith.maximumf %52, %53 : vector<512x128xf32>
    %55 = vector.shape_cast %54 : vector<512x128xf32> to vector<2x16x16x128xf32>
    %c0_64 = arith.constant 0 : index
    %c1_65 = arith.constant 1 : index
    %c1_66 = arith.constant 1 : index
    %c0_67 = arith.constant 0 : index
    %56 = vector.load %arg9[%c0_64, %c1_65, %c1_66, %c0_67] : memref<2x18x18x128xf32, #tpu.memory_space<vmem>>, vector<2x16x16x128xf32>
    tpu.vector_store %arg9[%c0_64, %c1_65, %c1_66, %c0_67], %55 {strides = array<i32>} : memref<2x18x18x128xf32, #tpu.memory_space<vmem>>, vector<2x16x16x128xf32>,
    %c0_68 = arith.constant 0 : index
    %c0_69 = arith.constant 0 : index
    %c0_70 = arith.constant 0 : index
    %c0_71 = arith.constant 0 : index
    %57 = vector.load %arg9[%c0_68, %c0_69, %c0_70, %c0_71] : memref<2x18x18x128xf32, #tpu.memory_space<vmem>>, vector<2x16x16x128xf32>
    %58 = arith.truncf %57 : vector<2x16x16x128xf32> to vector<2x16x16x128xbf16>
    %c0_72 = arith.constant 0 : index
    %c0_73 = arith.constant 0 : index
    %c1_74 = arith.constant 1 : index
    %c0_75 = arith.constant 0 : index
    %59 = vector.load %arg9[%c0_72, %c0_73, %c1_74, %c0_75] : memref<2x18x18x128xf32, #tpu.memory_space<vmem>>, vector<2x16x16x128xf32>
    %60 = arith.truncf %59 : vector<2x16x16x128xf32> to vector<2x16x16x128xbf16>
    %c0_76 = arith.constant 0 : index
    %c0_77 = arith.constant 0 : index
    %c2_78 = arith.constant 2 : index
    %c0_79 = arith.constant 0 : index
    %61 = vector.load %arg9[%c0_76, %c0_77, %c2_78, %c0_79] : memref<2x18x18x128xf32, #tpu.memory_space<vmem>>, vector<2x16x16x128xf32>
    %62 = arith.truncf %61 : vector<2x16x16x128xf32> to vector<2x16x16x128xbf16>
    %c0_80 = arith.constant 0 : index
    %c1_81 = arith.constant 1 : index
    %c0_82 = arith.constant 0 : index
    %c0_83 = arith.constant 0 : index
    %63 = vector.load %arg9[%c0_80, %c1_81, %c0_82, %c0_83] : memref<2x18x18x128xf32, #tpu.memory_space<vmem>>, vector<2x16x16x128xf32>
    %64 = arith.truncf %63 : vector<2x16x16x128xf32> to vector<2x16x16x128xbf16>
    %c0_84 = arith.constant 0 : index
    %c1_85 = arith.constant 1 : index
    %c1_86 = arith.constant 1 : index
    %c0_87 = arith.constant 0 : index
    %65 = vector.load %arg9[%c0_84, %c1_85, %c1_86, %c0_87] : memref<2x18x18x128xf32, #tpu.memory_space<vmem>>, vector<2x16x16x128xf32>
    %66 = arith.truncf %65 : vector<2x16x16x128xf32> to vector<2x16x16x128xbf16>
    %c0_88 = arith.constant 0 : index
    %c1_89 = arith.constant 1 : index
    %c2_90 = arith.constant 2 : index
    %c0_91 = arith.constant 0 : index
    %67 = vector.load %arg9[%c0_88, %c1_89, %c2_90, %c0_91] : memref<2x18x18x128xf32, #tpu.memory_space<vmem>>, vector<2x16x16x128xf32>
    %68 = arith.truncf %67 : vector<2x16x16x128xf32> to vector<2x16x16x128xbf16>
    %c0_92 = arith.constant 0 : index
    %c2_93 = arith.constant 2 : index
    %c0_94 = arith.constant 0 : index
    %c0_95 = arith.constant 0 : index
    %69 = vector.load %arg9[%c0_92, %c2_93, %c0_94, %c0_95] : memref<2x18x18x128xf32, #tpu.memory_space<vmem>>, vector<2x16x16x128xf32>
    %70 = arith.truncf %69 : vector<2x16x16x128xf32> to vector<2x16x16x128xbf16>
    %c0_96 = arith.constant 0 : index
    %c2_97 = arith.constant 2 : index
    %c1_98 = arith.constant 1 : index
    %c0_99 = arith.constant 0 : index
    %71 = vector.load %arg9[%c0_96, %c2_97, %c1_98, %c0_99] : memref<2x18x18x128xf32, #tpu.memory_space<vmem>>, vector<2x16x16x128xf32>
    %72 = arith.truncf %71 : vector<2x16x16x128xf32> to vector<2x16x16x128xbf16>
    %c0_100 = arith.constant 0 : index
    %c2_101 = arith.constant 2 : index
    %c2_102 = arith.constant 2 : index
    %c0_103 = arith.constant 0 : index
    %73 = vector.load %arg9[%c0_100, %c2_101, %c2_102, %c0_103] : memref<2x18x18x128xf32, #tpu.memory_space<vmem>>, vector<2x16x16x128xf32>
    %74 = arith.truncf %73 : vector<2x16x16x128xf32> to vector<2x16x16x128xbf16>
    %75 = tpu.concatenate %58, %60, %62, %64, %66, %68, %70, %72, %74 in 3 : vector<2x16x16x128xbf16>, vector<2x16x16x128xbf16>, vector<2x16x16x128xbf16>, vector<2x16x16x128xbf16>, vector<2x16x16x128xbf16>, vector<2x16x16x128xbf16>, vector<2x16x16x128xbf16>, vector<2x16x16x128xbf16>, vector<2x16x16x128xbf16> -> vector<2x16x16x1152xbf16>
    %76 = vector.shape_cast %75 : vector<2x16x16x1152xbf16> to vector<512x1152xbf16>
    %c0_104 = arith.constant 0 : index
    %c0_105 = arith.constant 0 : index
    %77 = vector.load %arg4[%c0_104, %c0_105] : memref<1152x128xbf16, #tpu.memory_space<vmem>>, vector<1152x128xbf16>
    %cst_106 = arith.constant dense<0.000000e+00> : vector<512x128xf32>
    %78 = tpu.matmul %76, %77, %cst_106 {dimension_numbers = #tpu.dot_dimension_numbers<[1], [0], [0], [1], [0, 0, 1, 1], [], []>} : vector<512x1152xbf16>, vector<1152x128xbf16>, vector<512x128xf32> -> vector<512x128xf32>
    %cst_107 = arith.constant dense<0.000000e+00> : vector<128xf32>
    %79 = vector.multi_reduction <add>, %78, %cst_107 [0] : vector<512x128xf32> to vector<128xf32>
    %80 = vector.shape_cast %79 : vector<128xf32> to vector<1x128xf32>
    %cst_108 = arith.constant 0.001953125 : f32
    %81 = vector.broadcast %cst_108 : f32 to vector<1x128xf32>
    %82 = arith.mulf %80, %81 : vector<1x128xf32>
    %83 = arith.mulf %78, %78 : vector<512x128xf32>
    %cst_109 = arith.constant dense<0.000000e+00> : vector<128xf32>
    %84 = vector.multi_reduction <add>, %83, %cst_109 [0] : vector<512x128xf32> to vector<128xf32>
    %85 = vector.shape_cast %84 : vector<128xf32> to vector<1x128xf32>
    %cst_110 = arith.constant 0.001953125 : f32
    %86 = vector.broadcast %cst_110 : f32 to vector<1x128xf32>
    %87 = arith.mulf %85, %86 : vector<1x128xf32>
    %88 = arith.mulf %82, %82 : vector<1x128xf32>
    %89 = arith.subf %87, %88 : vector<1x128xf32>
    %cst_111 = arith.constant 0.000000e+00 : f32
    %90 = vector.broadcast %cst_111 : f32 to vector<1x128xf32>
    %91 = arith.maximumf %89, %90 : vector<1x128xf32>
    %c0_112 = arith.constant 0 : index
    %c0_113 = arith.constant 0 : index
    %92 = vector.load %arg5[%c0_112, %c0_113] : memref<1x128xf32, #tpu.memory_space<vmem>>, vector<1x128xf32>
    %cst_114 = arith.constant 9.99999974E-6 : f32
    %93 = vector.broadcast %cst_114 : f32 to vector<1x128xf32>
    %94 = arith.addf %91, %93 : vector<1x128xf32>
    %95 = math.rsqrt %94 : vector<1x128xf32>
    %96 = arith.mulf %92, %95 : vector<1x128xf32>
    %c0_115 = arith.constant 0 : index
    %c0_116 = arith.constant 0 : index
    %97 = vector.load %arg6[%c0_115, %c0_116] : memref<1x128xf32, #tpu.memory_space<vmem>>, vector<1x128xf32>
    %98 = arith.mulf %82, %96 : vector<1x128xf32>
    %99 = arith.subf %97, %98 : vector<1x128xf32>
    %100 = vector.broadcast %96 : vector<1x128xf32> to vector<512x128xf32>
    %101 = arith.mulf %78, %100 : vector<512x128xf32>
    %102 = vector.broadcast %99 : vector<1x128xf32> to vector<512x128xf32>
    %103 = arith.addf %101, %102 : vector<512x128xf32>
    %cst_117 = arith.constant 0.000000e+00 : f32
    %104 = vector.broadcast %cst_117 : f32 to vector<512x128xf32>
    %105 = arith.maximumf %103, %104 : vector<512x128xf32>
    %c0_118 = arith.constant 0 : index
    %c0_119 = arith.constant 0 : index
    %106 = vector.load %arg7[%c0_118, %c0_119] : memref<512x128xf32, #tpu.memory_space<vmem>>, vector<512x128xf32>
    tpu.vector_store %arg7[%c0_118, %c0_119], %105 {strides = array<i32>} : memref<512x128xf32, #tpu.memory_space<vmem>>, vector<512x128xf32>,
    return
  }
}

</mosaic_0001>

<bundles_post_ra>
// kernel: conv_block.1
= control target key start
LH: loop header
LB: loop body
LE: loop exit
PB: predicated region body
PF: predicated region fallthrough
CT: control target
= control target key end

     0   :  { %vm27_vm0 = vcmask 31744   ;;  %vm30_vm1 = vcmask 25600   ;;  %v7567_v0 = vmov 0.0   ;;  %s7568_s14 = smov 8   ;;  %s7569_s15 = smov 4   ;;  %vm2643_vm2 = vcmask 1041408   ;;  %s12040_s0 = inlined_call_operand.vmem [shape: f32[2,16,16,4], index: 0, kind: input, shape index: {}]   ;;  %s12041_s1 = inlined_call_operand.vmem [shape: bf16[36,128], index: 1, kind: input, shape index: {}]   ;;  %s12042_s4 = inlined_call_operand.vmem [shape: bf16[1152,128], index: 4, kind: input, shape index: {}]   ;;  %s12043_s2 = inlined_call_operand.vmem [shape: f32[1,128], index: 2, kind: input, shape index: {}]   ;;  %s12044_s3 = inlined_call_operand.vmem [shape: f32[1,128], index: 3, kind: input, shape index: {}]   ;;  %s12045_s5 = inlined_call_operand.vmem [shape: f32[1,128], index: 5, kind: input, shape index: {}]   ;;  %s12046_s6 = inlined_call_operand.vmem [shape: f32[1,128], index: 6, kind: input, shape index: {}]   ;;  %s12047_s7 = inlined_call_operand.vmem [shape: f32[512,128], index: 7, kind: output, shape index: {}]  }
   0x1   :  { %28 = vst.msk [vmem:[#allocation2] sm:$0xff] %vm27_vm0, %v7567_v0  ;;  %29 = vst.msk [vmem:[#allocation2 + $0x8] sm:$0xff] %vm27_vm0, %v7567_v0  ;;  %v137_v1 = vld [vmem:[%s12040_s0] sm:$0xff]  ;;  %v138_v2 = vld [vmem:[%s12040_s0 + $0x8] sm:$0xff]  ;;  %s7570_s16 = smov 12   ;;  %s7571_s17 = smov 16  }
   0x2   :  { %31 = vst.msk [vmem:[#allocation2 + $0x10] sm:$0x3] %vm30_vm1, %v7567_v0  ;;  %34 = vst.msk [vmem:[#allocation2 + $0x28] sm:$0x3] %vm30_vm1, %v7567_v0  ;;  %v139_v3 = vld [vmem:[%s12040_s0 + $0x10] sm:$0xff]  ;;  %v140_v4 = vld [vmem:[%s12040_s0 + $0x18] sm:$0xff] }
   0x3   :  { %32 = vst.msk [vmem:[#allocation2 + $0x18] sm:$0xff] %vm27_vm0, %v7567_v0  ;;  %33 = vst.msk [vmem:[#allocation2 + $0x20] sm:$0xff] %vm27_vm0, %v7567_v0  ;;  %v141_v5 = vld [vmem:[%s12040_s0 + $0x20] sm:$0xff]  ;;  %v142_v6 = vld [vmem:[%s12040_s0 + $0x28] sm:$0xff]  ;;  %s7572_s18 = smov 20   ;;  %s7573_s27 = smov 24  }
   0x4   :  { %35 = vst.msk [vmem:[#allocation2 + $0x30] sm:$0xff] %vm27_vm0, %v7567_v0  ;;  %36 = vst.msk [vmem:[#allocation2 + $0x38] sm:$0xff] %vm27_vm0, %v7567_v0  ;;  %v143_v7 = vld [vmem:[%s12040_s0 + $0x30] sm:$0xff]  ;;  %v144_v8 = vld [vmem:[%s12040_s0 + $0x38] sm:$0xff]  ;;  %s7574_s11 = smov 28   ;;  %s7575_s12 = smov 32  }
   0x5   :  { %37 = vst.msk [vmem:[#allocation2 + $0x40] sm:$0x3] %vm30_vm1, %v7567_v0  ;;  %40 = vst.msk [vmem:[#allocation2 + $0x58] sm:$0x3] %vm30_vm1, %v7567_v0  ;;  %v145_v9 = vld [vmem:[%s12040_s0 + $0x40] sm:$0xff]  ;;  %v146_v10 = vld [vmem:[%s12040_s0 + $0x48] sm:$0xff] }
   0x6   :  { %38 = vst.msk [vmem:[#allocation2 + $0x48] sm:$0xff] %vm27_vm0, %v7567_v0  ;;  %39 = vst.msk [vmem:[#allocation2 + $0x50] sm:$0xff] %vm27_vm0, %v7567_v0  ;;  %v147_v11 = vld [vmem:[%s12040_s0 + $0x50] sm:$0xff]  ;;  %v148_v12 = vld [vmem:[%s12040_s0 + $0x58] sm:$0xff]  ;;  %vm2103_vm3 = vcmask 64512   ;;  %vm2168_vm4 = vcmask 97280  }
   0x7   :  { %41 = vst.msk [vmem:[#allocation2 + $0x60] sm:$0xff] %vm27_vm0, %v7567_v0  ;;  %42 = vst.msk [vmem:[#allocation2 + $0x68] sm:$0xff] %vm27_vm0, %v7567_v0  ;;  %v149_v13 = vld [vmem:[%s12040_s0 + $0x60] sm:$0xff]  ;;  %v150_v14 = vld [vmem:[%s12040_s0 + $0x68] sm:$0xff]  ;;  %vm2233_vm5 = vcmask 130048   ;;  %vm2298_vm6 = vcmask 162816  }
   0x8   :  { %43 = vst.msk [vmem:[#allocation2 + $0x70] sm:$0x3] %vm30_vm1, %v7567_v0  ;;  %46 = vst.msk [vmem:[#allocation2 + $0x88] sm:$0x3] %vm30_vm1, %v7567_v0  ;;  %v151_v15 = vld [vmem:[%s12040_s0 + $0x70] sm:$0xff]  ;;  %v152_v16 = vld [vmem:[%s12040_s0 + $0x78] sm:$0xff] }
   0x9   :  { %44 = vst.msk [vmem:[#allocation2 + $0x78] sm:$0xff] %vm27_vm0, %v7567_v0  ;;  %45 = vst.msk [vmem:[#allocation2 + $0x80] sm:$0xff] %vm27_vm0, %v7567_v0  ;;  %v153_v17 = vld [vmem:[%s12040_s0 + $0x80] sm:$0xff]  ;;  %v154_v18 = vld [vmem:[%s12040_s0 + $0x88] sm:$0xff]  ;;  %vm2363_vm7 = vcmask 195584   ;;  %vm2428_vm8 = vcmask 228352  }
   0xa   :  { %47 = vst.msk [vmem:[#allocation2 + $0x90] sm:$0xff] %vm27_vm0, %v7567_v0  ;;  %48 = vst.msk [vmem:[#allocation2 + $0x98] sm:$0xff] %vm27_vm0, %v7567_v0  ;;  %v566_v19 = vld [vmem:[#allocation2 + $0x2] sm:$0xff]  ;;  %v567_v20 = vld [vmem:[#allocation2 + $0xa] sm:$0xff]  ;;  %vm2493_vm9 = vcmask 261120   ;;  %vm2578_vm10 = vcmask 293888  }
   0xb   :  { %49 = vst.msk [vmem:[#allocation2 + $0xa0] sm:$0x3] %vm30_vm1, %v7567_v0  ;;  %52 = vst.msk [vmem:[#allocation2 + $0xb8] sm:$0x3] %vm30_vm1, %v7567_v0  ;;  %v470_v21 = vld [vmem:[#allocation2 + $0x1] sm:$0xff]  ;;  %v630_v22 = vpack.c.bf16 %v567_v20, %v566_v19  ;;  %v471_v23 = vld [vmem:[#allocation2 + $0x9] sm:$0xff] }
   0xc   :  { %50 = vst.msk [vmem:[#allocation2 + $0xa8] sm:$0xff] %vm27_vm0, %v7567_v0  ;;  %51 = vst.msk [vmem:[#allocation2 + $0xb0] sm:$0xff] %vm27_vm0, %v7567_v0  ;;  %v534_v26 = vpack.c.bf16 %v471_v23, %v470_v21  ;;  %v7486_v48 = vld [vmem:[%s12041_s1] sm:$0xff]   ;;  %v155_v49 = vld [vmem:[%s12040_s0 + $0x90] sm:$0xff] }
   0xd   :  { %53 = vst.msk [vmem:[#allocation2 + $0xc0] sm:$0xff] %vm27_vm0, %v7567_v0  ;;  %54 = vst.msk [vmem:[#allocation2 + $0xc8] sm:$0xff] %vm27_vm0, %v7567_v0  ;;  %1367 = vrot.lane.b32.xlu1 %v630_v22, %s7568_s14  ;;  %v156_v50 = vld [vmem:[%s12040_s0 + $0x98] sm:$0xff]  ;;  %6973 = vmatprep.subr.bf16.mxu0 %v7486_v48  ;;  %v7487_v51 = vld [vmem:[%s12041_s1 + $0x8] sm:$0xff]  }
   0xe   :  { %55 = vst.msk [vmem:[#allocation2 + $0xd0] sm:$0x3] %vm30_vm1, %v7567_v0  ;;  %58 = vst.msk [vmem:[#allocation2 + $0xe8] sm:$0x3] %vm30_vm1, %v7567_v0  ;;  %1271 = vrot.lane.b32.xlu0 %v534_v26, %s7569_s15  ;;  %6974 = vmatpush3.bf16.msra.mxu0 %v7486_v48  ;;  %v157_v53 = vld [vmem:[%s12040_s0 + $0xa0] sm:$0xff]  ;;  %v158_v54 = vld [vmem:[%s12040_s0 + $0xa8] sm:$0xff] }
   0xf   :  { %56 = vst.msk [vmem:[#allocation2 + $0xd8] sm:$0xff] %vm27_vm0, %v7567_v0  ;;  %57 = vst.msk [vmem:[#allocation2 + $0xe0] sm:$0xff] %vm27_vm0, %v7567_v0  ;;  %6975 = vmatprep.subr.bf16.mxu0 %v7487_v51  ;;  %v7488_v55 = vld [vmem:[%s12041_s1 + $0x10] ss:$0 sps:$4 sm:$0x33]   ;;  %v160_v61 = vld [vmem:[%s12040_s0 + $0xb8] sm:$0xff] }
  0x10   :  { %59 = vst.msk [vmem:[#allocation2 + $0xf0] sm:$0xff] %vm27_vm0, %v7567_v0  ;;  %60 = vst.msk [vmem:[#allocation2 + $0xf8] sm:$0xff] %vm27_vm0, %v7567_v0  ;;  %v2645_v56 = vsel %vm2643_vm2, %v7488_v55, 0  ;;  %v159_v60 = vld [vmem:[%s12040_s0 + $0xb0] sm:$0xff]  ;;  %v164_v19 = vld [vmem:[%s12040_s0 + $0xd8] sm:$0xff] }
  0x11   :  { %61 = vst.msk [vmem:[#allocation2 + $0x100] sm:$0x3] %vm30_vm1, %v7567_v0  ;;  %64 = vst.msk [vmem:[#allocation2 + $0x118] sm:$0x3] %vm30_vm1, %v7567_v0 }
  0x12   :  { %62 = vst.msk [vmem:[#allocation2 + $0x108] sm:$0xff] %vm27_vm0, %v7567_v0  ;;  %63 = vst.msk [vmem:[#allocation2 + $0x110] sm:$0xff] %vm27_vm0, %v7567_v0  ;;  %6976 = vmatpush3.bf16.msra.mxu0 %v7487_v51 }
  0x13   :  { %65 = vst.msk [vmem:[#allocation2 + $0x120] sm:$0xff] %vm27_vm0, %v7567_v0  ;;  %66 = vst.msk [vmem:[#allocation2 + $0x128] sm:$0xff] %vm27_vm0, %v7567_v0  ;;  %7475 = vmatprep.subr.msk.bf16.mxu0 %vm2643_vm2, %v7488_v55 }
  0x14   :  { %67 = vst.msk [vmem:[#allocation2 + $0x130] sm:$0x3] %vm30_vm1, %v7567_v0  ;;  %70 = vst.msk [vmem:[#allocation2 + $0x148] sm:$0x3] %vm30_vm1, %v7567_v0 }
  0x15   :  { %68 = vst.msk [vmem:[#allocation2 + $0x138] sm:$0xff] %vm27_vm0, %v7567_v0  ;;  %69 = vst.msk [vmem:[#allocation2 + $0x140] sm:$0xff] %vm27_vm0, %v7567_v0 }
  0x16   :  { %71 = vst.msk [vmem:[#allocation2 + $0x150] sm:$0xff] %vm27_vm0, %v7567_v0  ;;  %72 = vst.msk [vmem:[#allocation2 + $0x158] sm:$0xff] %vm27_vm0, %v7567_v0  ;;  %6978 = vmatpush3.bf16.msra.mxu0 %v2645_v56 }
  0x17   :  { %73 = vst.msk [vmem:[#allocation2 + $0x160] sm:$0x3] %vm30_vm1, %v7567_v0  ;;  %76 = vst.msk [vmem:[#allocation2 + $0x178] sm:$0x3] %vm30_vm1, %v7567_v0 }
  0x18   :  { %74 = vst.msk [vmem:[#allocation2 + $0x168] sm:$0xff] %vm27_vm0, %v7567_v0  ;;  %75 = vst.msk [vmem:[#allocation2 + $0x170] sm:$0xff] %vm27_vm0, %v7567_v0 }
  0x19   :  { %77 = vst.msk [vmem:[#allocation2 + $0x180] sm:$0xff] %vm27_vm0, %v7567_v0  ;;  %78 = vst.msk [vmem:[#allocation2 + $0x188] sm:$0xff] %vm27_vm0, %v7567_v0 }
  0x1a   :  { %79 = vst.msk [vmem:[#allocation2 + $0x190] sm:$0x3] %vm30_vm1, %v7567_v0  ;;  %82 = vst.msk [vmem:[#allocation2 + $0x1a8] sm:$0x3] %vm30_vm1, %v7567_v0 }
  0x1b   :  { %80 = vst.msk [vmem:[#allocation2 + $0x198] sm:$0xff] %vm27_vm0, %v7567_v0  ;;  %81 = vst.msk [vmem:[#allocation2 + $0x1a0] sm:$0xff] %vm27_vm0, %v7567_v0 }
  0x1c   :  { %83 = vst.msk [vmem:[#allocation2 + $0x1b0] sm:$0xff] %vm27_vm0, %v7567_v0  ;;  %84 = vst.msk [vmem:[#allocation2 + $0x1b8] sm:$0xff] %vm27_vm0, %v7567_v0 }
  0x1d   :  { %85 = vst.msk [vmem:[#allocation2 + $0x1c0] sm:$0x3] %vm30_vm1, %v7567_v0  ;;  %88 = vst.msk [vmem:[#allocation2 + $0x1d8] sm:$0x3] %vm30_vm1, %v7567_v0 }
  0x1e   :  { %86 = vst.msk [vmem:[#allocation2 + $0x1c8] sm:$0xff] %vm27_vm0, %v7567_v0  ;;  %87 = vst.msk [vmem:[#allocation2 + $0x1d0] sm:$0xff] %vm27_vm0, %v7567_v0 }
  0x1f   :  { %89 = vst.msk [vmem:[#allocation2 + $0x1e0] sm:$0xff] %vm27_vm0, %v7567_v0  ;;  %90 = vst.msk [vmem:[#allocation2 + $0x1e8] sm:$0xff] %vm27_vm0, %v7567_v0 }
  0x20   :  { %91 = vst.msk [vmem:[#allocation2 + $0x1f0] sm:$0x3] %vm30_vm1, %v7567_v0  ;;  %94 = vst.msk [vmem:[#allocation2 + $0x208] sm:$0x3] %vm30_vm1, %v7567_v0 }
  0x21   :  { %92 = vst.msk [vmem:[#allocation2 + $0x1f8] sm:$0xff] %vm27_vm0, %v7567_v0  ;;  %93 = vst.msk [vmem:[#allocation2 + $0x200] sm:$0xff] %vm27_vm0, %v7567_v0 }
  0x22   :  { %95 = vst.msk [vmem:[#allocation2 + $0x210] sm:$0xff] %vm27_vm0, %v7567_v0  ;;  %96 = vst.msk [vmem:[#allocation2 + $0x218] sm:$0xff] %vm27_vm0, %v7567_v0 }
  0x23   :  { %97 = vst.msk [vmem:[#allocation2 + $0x220] sm:$0x3] %vm30_vm1, %v7567_v0  ;;  %100 = vst.msk [vmem:[#allocation2 + $0x238] sm:$0x3] %vm30_vm1, %v7567_v0 }
  0x24   :  { %98 = vst.msk [vmem:[#allocation2 + $0x228] sm:$0xff] %vm27_vm0, %v7567_v0  ;;  %99 = vst.msk [vmem:[#allocation2 + $0x230] sm:$0xff] %vm27_vm0, %v7567_v0 }
  0x25   :  { %101 = vst.msk [vmem:[#allocation2 + $0x240] sm:$0xff] %vm27_vm0, %v7567_v0  ;;  %102 = vst.msk [vmem:[#allocation2 + $0x248] sm:$0xff] %vm27_vm0, %v7567_v0 }
  0x26   :  { %103 = vst.msk [vmem:[#allocation2 + $0x250] sm:$0x3] %vm30_vm1, %v7567_v0  ;;  %106 = vst.msk [vmem:[#allocation2 + $0x268] sm:$0x3] %vm30_vm1, %v7567_v0 }
  0x27   :  { %104 = vst.msk [vmem:[#allocation2 + $0x258] sm:$0xff] %vm27_vm0, %v7567_v0  ;;  %105 = vst.msk [vmem:[#allocation2 + $0x260] sm:$0xff] %vm27_vm0, %v7567_v0 }
  0x28   :  { %107 = vst.msk [vmem:[#allocation2 + $0x270] sm:$0xff] %vm27_vm0, %v7567_v0  ;;  %108 = vst.msk [vmem:[#allocation2 + $0x278] sm:$0xff] %vm27_vm0, %v7567_v0 }
  0x29   :  { %109 = vst.msk [vmem:[#allocation2 + $0x280] sm:$0x3] %vm30_vm1, %v7567_v0  ;;  %112 = vst.msk [vmem:[#allocation2 + $0x298] sm:$0x3] %vm30_vm1, %v7567_v0 }
  0x2a   :  { %110 = vst.msk [vmem:[#allocation2 + $0x288] sm:$0xff] %vm27_vm0, %v7567_v0  ;;  %111 = vst.msk [vmem:[#allocation2 + $0x290] sm:$0xff] %vm27_vm0, %v7567_v0 }
  0x2b   :  { %113 = vst.msk [vmem:[#allocation2 + $0x2a0] sm:$0xff] %vm27_vm0, %v7567_v0  ;;  %114 = vst.msk [vmem:[#allocation2 + $0x2a8] sm:$0xff] %vm27_vm0, %v7567_v0 }
  0x2c   :  { %115 = vst.msk [vmem:[#allocation2 + $0x2b0] sm:$0x3] %vm30_vm1, %v7567_v0  ;;  %118 = vst.msk [vmem:[#allocation2 + $0x2c8] sm:$0x3] %vm30_vm1, %v7567_v0 }
  0x2d   :  { %116 = vst.msk [vmem:[#allocation2 + $0x2b8] sm:$0xff] %vm27_vm0, %v7567_v0  ;;  %117 = vst.msk [vmem:[#allocation2 + $0x2c0] sm:$0xff] %vm27_vm0, %v7567_v0 }
  0x2e   :  { %119 = vst.msk [vmem:[#allocation2 + $0x2d0] sm:$0xff] %vm27_vm0, %v7567_v0  ;;  %120 = vst.msk [vmem:[#allocation2 + $0x2d8] sm:$0xff] %vm27_vm0, %v7567_v0 }
  0x2f   :  { %121 = vst.msk [vmem:[#allocation2 + $0x2e0] sm:$0x3] %vm30_vm1, %v7567_v0  ;;  %124 = vst.msk [vmem:[#allocation2 + $0x2f8] sm:$0x3] %vm30_vm1, %v7567_v0 }
  0x30   :  { %122 = vst.msk [vmem:[#allocation2 + $0x2e8] sm:$0xff] %vm27_vm0, %v7567_v0  ;;  %123 = vst.msk [vmem:[#allocation2 + $0x2f0] sm:$0xff] %vm27_vm0, %v7567_v0 }
  0x31   :  { %125 = vst.msk [vmem:[#allocation2 + $0x300] sm:$0xff] %vm27_vm0, %v7567_v0  ;;  %126 = vst.msk [vmem:[#allocation2 + $0x308] sm:$0xff] %vm27_vm0, %v7567_v0 }
  0x32   :  { %127 = vst.msk [vmem:[#allocation2 + $0x310] sm:$0x3] %vm30_vm1, %v7567_v0  ;;  %130 = vst.msk [vmem:[#allocation2 + $0x328] sm:$0x3] %vm30_vm1, %v7567_v0 }
  0x33   :  { %128 = vst.msk [vmem:[#allocation2 + $0x318] sm:$0xff] %vm27_vm0, %v7567_v0  ;;  %129 = vst.msk [vmem:[#allocation2 + $0x320] sm:$0xff] %vm27_vm0, %v7567_v0 }
  0x34   :  { %131 = vst.msk [vmem:[#allocation2 + $0x330] sm:$0xff] %vm27_vm0, %v7567_v0  ;;  %132 = vst.msk [vmem:[#allocation2 + $0x338] sm:$0xff] %vm27_vm0, %v7567_v0 }
  0x35   :  { %133 = vst.msk [vmem:[#allocation2 + $0x340] sm:$0x3] %vm30_vm1, %v7567_v0  ;;  %136 = vst.msk [vmem:[#allocation2 + $0x358] sm:$0x3] %vm30_vm1, %v7567_v0 }
  0x36   :  { %134 = vst.msk [vmem:[#allocation2 + $0x348] sm:$0xff] %vm27_vm0, %v7567_v0  ;;  %135 = vst.msk [vmem:[#allocation2 + $0x350] sm:$0xff] %vm27_vm0, %v7567_v0 }
  0x37   :  { %266 = vst [vmem:[#allocation3] sm:$0xff] %v7567_v0  ;;  %267 = vst [vmem:[#allocation3 + $0x8] sm:$0xff] %v7567_v0 }
  0x38   :  { %268 = vst [vmem:[#allocation3 + $0x10] sm:$0x3] %v7567_v0  ;;  %269 = vst [vmem:[#allocation3 + $0x18] sm:$0xff] %v7567_v0 }
  0x39   :  { %270 = vst [vmem:[#allocation3 + $0x20] sm:$0xff] %v7567_v0  ;;  %271 = vst [vmem:[#allocation3 + $0x28] sm:$0x3] %v7567_v0 }
  0x3a   :  { %272 = vst [vmem:[#allocation3 + $0x30] sm:$0xff] %v7567_v0  ;;  %273 = vst [vmem:[#allocation3 + $0x38] sm:$0xff] %v7567_v0 }
  0x3b   :  { %274 = vst [vmem:[#allocation3 + $0x40] sm:$0x3] %v7567_v0  ;;  %275 = vst [vmem:[#allocation3 + $0x48] sm:$0xff] %v7567_v0 }
  0x3c   :  { %276 = vst [vmem:[#allocation3 + $0x50] sm:$0xff] %v7567_v0  ;;  %277 = vst [vmem:[#allocation3 + $0x58] sm:$0x3] %v7567_v0 }
  0x3d   :  { %278 = vst [vmem:[#allocation3 + $0x60] sm:$0xff] %v7567_v0  ;;  %279 = vst [vmem:[#allocation3 + $0x68] sm:$0xff] %v7567_v0 }
  0x3e   :  { %280 = vst [vmem:[#allocation3 + $0x70] sm:$0x3] %v7567_v0  ;;  %281 = vst [vmem:[#allocation3 + $0x78] sm:$0xff] %v7567_v0 }
  0x3f   :  { %282 = vst [vmem:[#allocation3 + $0x80] sm:$0xff] %v7567_v0  ;;  %283 = vst [vmem:[#allocation3 + $0x88] sm:$0x3] %v7567_v0 }
  0x40   :  { %284 = vst [vmem:[#allocation3 + $0x90] sm:$0xff] %v7567_v0  ;;  %285 = vst [vmem:[#allocation3 + $0x98] sm:$0xff] %v7567_v0 }
  0x41   :  { %286 = vst [vmem:[#allocation3 + $0xa0] sm:$0x3] %v7567_v0  ;;  %287 = vst [vmem:[#allocation3 + $0xa8] sm:$0xff] %v7567_v0 }
  0x42   :  { %288 = vst [vmem:[#allocation3 + $0xb0] sm:$0xff] %v7567_v0  ;;  %289 = vst [vmem:[#allocation3 + $0xb8] sm:$0x3] %v7567_v0 }
  0x43   :  { %290 = vst [vmem:[#allocation3 + $0xc0] sm:$0xff] %v7567_v0  ;;  %291 = vst [vmem:[#allocation3 + $0xc8] sm:$0xff] %v7567_v0 }
  0x44   :  { %292 = vst [vmem:[#allocation3 + $0xd0] sm:$0x3] %v7567_v0  ;;  %293 = vst [vmem:[#allocation3 + $0xd8] sm:$0xff] %v7567_v0 }
  0x45   :  { %294 = vst [vmem:[#allocation3 + $0xe0] sm:$0xff] %v7567_v0  ;;  %295 = vst [vmem:[#allocation3 + $0xe8] sm:$0x3] %v7567_v0 }
  0x46   :  { %296 = vst [vmem:[#allocation3 + $0xf0] sm:$0xff] %v7567_v0  ;;  %297 = vst [vmem:[#allocation3 + $0xf8] sm:$0xff] %v7567_v0 }
  0x47   :  { %298 = vst [vmem:[#allocation3 + $0x100] sm:$0x3] %v7567_v0  ;;  %299 = vst [vmem:[#allocation3 + $0x108] sm:$0xff] %v7567_v0 }
  0x48   :  { %300 = vst [vmem:[#allocation3 + $0x110] sm:$0xff] %v7567_v0  ;;  %301 = vst [vmem:[#allocation3 + $0x118] sm:$0x3] %v7567_v0 }
  0x49   :  { %302 = vst [vmem:[#allocation3 + $0x120] sm:$0xff] %v7567_v0  ;;  %303 = vst [vmem:[#allocation3 + $0x128] sm:$0xff] %v7567_v0 }
  0x4a   :  { %304 = vst [vmem:[#allocation3 + $0x130] sm:$0x3] %v7567_v0  ;;  %305 = vst [vmem:[#allocation3 + $0x138] sm:$0xff] %v7567_v0 }
  0x4b   :  { %306 = vst [vmem:[#allocation3 + $0x140] sm:$0xff] %v7567_v0  ;;  %307 = vst [vmem:[#allocation3 + $0x148] sm:$0x3] %v7567_v0 }
  0x4c   :  { %308 = vst [vmem:[#allocation3 + $0x150] sm:$0xff] %v7567_v0  ;;  %309 = vst [vmem:[#allocation3 + $0x158] sm:$0xff] %v7567_v0 }
  0x4d   :  { %310 = vst [vmem:[#allocation3 + $0x160] sm:$0x3] %v7567_v0  ;;  %311 = vst [vmem:[#allocation3 + $0x168] sm:$0xff] %v7567_v0 }
  0x4e   :  { %312 = vst [vmem:[#allocation3 + $0x170] sm:$0xff] %v7567_v0  ;;  %313 = vst [vmem:[#allocation3 + $0x178] sm:$0x3] %v7567_v0 }
  0x4f   :  { %314 = vst [vmem:[#allocation3 + $0x180] sm:$0xff] %v7567_v0  ;;  %315 = vst [vmem:[#allocation3 + $0x188] sm:$0xff] %v7567_v0 }
  0x50   :  { %316 = vst [vmem:[#allocation3 + $0x190] sm:$0x3] %v7567_v0  ;;  %317 = vst [vmem:[#allocation3 + $0x198] sm:$0xff] %v7567_v0 }
  0x51   :  { %318 = vst [vmem:[#allocation3 + $0x1a0] sm:$0xff] %v7567_v0  ;;  %319 = vst [vmem:[#allocation3 + $0x1a8] sm:$0x3] %v7567_v0 }
  0x52   :  { %320 = vst [vmem:[#allocation3 + $0x1b0] sm:$0xff] %v7567_v0  ;;  %321 = vst [vmem:[#allocation3 + $0x1b8] sm:$0xff] %v7567_v0 }
  0x53   :  { %322 = vst [vmem:[#allocation3 + $0x1c0] sm:$0x3] %v7567_v0  ;;  %323 = vst [vmem:[#allocation3 + $0x1c8] sm:$0xff] %v7567_v0 }
  0x54   :  { %324 = vst [vmem:[#allocation3 + $0x1d0] sm:$0xff] %v7567_v0  ;;  %325 = vst [vmem:[#allocation3 + $0x1d8] sm:$0x3] %v7567_v0 }
  0x55   :  { %326 = vst [vmem:[#allocation3 + $0x1e0] sm:$0xff] %v7567_v0  ;;  %327 = vst [vmem:[#allocation3 + $0x1e8] sm:$0xff] %v7567_v0 }
  0x56   :  { %328 = vst [vmem:[#allocation3 + $0x1f0] sm:$0x3] %v7567_v0  ;;  %329 = vst [vmem:[#allocation3 + $0x1f8] sm:$0xff] %v7567_v0 }
  0x57   :  { %330 = vst [vmem:[#allocation3 + $0x200] sm:$0xff] %v7567_v0  ;;  %331 = vst [vmem:[#allocation3 + $0x208] sm:$0x3] %v7567_v0 }
  0x58   :  { %332 = vst [vmem:[#allocation3 + $0x210] sm:$0xff] %v7567_v0  ;;  %333 = vst [vmem:[#allocation3 + $0x218] sm:$0xff] %v7567_v0 }
  0x59   :  { %334 = vst [vmem:[#allocation3 + $0x220] sm:$0x3] %v7567_v0  ;;  %335 = vst [vmem:[#allocation3 + $0x228] sm:$0xff] %v7567_v0 }
  0x5a   :  { %336 = vst [vmem:[#allocation3 + $0x230] sm:$0xff] %v7567_v0  ;;  %337 = vst [vmem:[#allocation3 + $0x238] sm:$0x3] %v7567_v0 }
  0x5b   :  { %338 = vst [vmem:[#allocation3 + $0x240] sm:$0xff] %v7567_v0  ;;  %339 = vst [vmem:[#allocation3 + $0x248] sm:$0xff] %v7567_v0 }
  0x5c   :  { %340 = vst [vmem:[#allocation3 + $0x250] sm:$0x3] %v7567_v0  ;;  %341 = vst [vmem:[#allocation3 + $0x258] sm:$0xff] %v7567_v0 }
  0x5d   :  { %342 = vst [vmem:[#allocation3 + $0x260] sm:$0xff] %v7567_v0  ;;  %343 = vst [vmem:[#allocation3 + $0x268] sm:$0x3] %v7567_v0 }
  0x5e   :  { %344 = vst [vmem:[#allocation3 + $0x270] sm:$0xff] %v7567_v0  ;;  %345 = vst [vmem:[#allocation3 + $0x278] sm:$0xff] %v7567_v0 }
  0x5f   :  { %346 = vst [vmem:[#allocation3 + $0x280] sm:$0x3] %v7567_v0  ;;  %347 = vst [vmem:[#allocation3 + $0x288] sm:$0xff] %v7567_v0 }
  0x60   :  { %348 = vst [vmem:[#allocation3 + $0x290] sm:$0xff] %v7567_v0  ;;  %349 = vst [vmem:[#allocation3 + $0x298] sm:$0x3] %v7567_v0 }
  0x61   :  { %350 = vst [vmem:[#allocation3 + $0x2a0] sm:$0xff] %v7567_v0  ;;  %351 = vst [vmem:[#allocation3 + $0x2a8] sm:$0xff] %v7567_v0 }
  0x62   :  { %352 = vst [vmem:[#allocation3 + $0x2b0] sm:$0x3] %v7567_v0  ;;  %353 = vst [vmem:[#allocation3 + $0x2b8] sm:$0xff] %v7567_v0 }
  0x63   :  { %354 = vst [vmem:[#allocation3 + $0x2c0] sm:$0xff] %v7567_v0  ;;  %355 = vst [vmem:[#allocation3 + $0x2c8] sm:$0x3] %v7567_v0 }
  0x64   :  { %356 = vst [vmem:[#allocation3 + $0x2d0] sm:$0xff] %v7567_v0  ;;  %357 = vst [vmem:[#allocation3 + $0x2d8] sm:$0xff] %v7567_v0 }
  0x65   :  { %358 = vst [vmem:[#allocation3 + $0x2e0] sm:$0x3] %v7567_v0  ;;  %359 = vst [vmem:[#allocation3 + $0x2e8] sm:$0xff] %v7567_v0 }
  0x66   :  { %360 = vst [vmem:[#allocation3 + $0x2f0] sm:$0xff] %v7567_v0  ;;  %361 = vst [vmem:[#allocation3 + $0x2f8] sm:$0x3] %v7567_v0 }
  0x67   :  { %362 = vst [vmem:[#allocation3 + $0x300] sm:$0xff] %v7567_v0  ;;  %363 = vst [vmem:[#allocation3 + $0x308] sm:$0xff] %v7567_v0 }
  0x68   :  { %364 = vst [vmem:[#allocation3 + $0x310] sm:$0x3] %v7567_v0  ;;  %365 = vst [vmem:[#allocation3 + $0x318] sm:$0xff] %v7567_v0 }
  0x69   :  { %366 = vst [vmem:[#allocation3 + $0x320] sm:$0xff] %v7567_v0  ;;  %367 = vst [vmem:[#allocation3 + $0x328] sm:$0x3] %v7567_v0 }
  0x6a   :  { %368 = vst [vmem:[#allocation3 + $0x330] sm:$0xff] %v7567_v0  ;;  %369 = vst [vmem:[#allocation3 + $0x338] sm:$0xff] %v7567_v0 }
  0x6b   :  { %370 = vst [vmem:[#allocation3 + $0x340] sm:$0x3] %v7567_v0  ;;  %371 = vst [vmem:[#allocation3 + $0x348] sm:$0xff] %v7567_v0 }
  0x6c   :  { %372 = vst [vmem:[#allocation3 + $0x350] sm:$0xff] %v7567_v0  ;;  %373 = vst [vmem:[#allocation3 + $0x358] sm:$0x3] %v7567_v0 }
  0x6d   :  { %202 = vst.msk [vmem:[#allocation2 + $0x19] sm:$0xff] %vm27_vm0, %v137_v1  ;;  %203 = vst.msk [vmem:[#allocation2 + $0x21] sm:$0xff] %vm27_vm0, %v138_v2 }
  0x6e   :  { %204 = vst.msk [vmem:[#allocation2 + $0x31] sm:$0xff] %vm27_vm0, %v139_v3  ;;  %205 = vst.msk [vmem:[#allocation2 + $0x39] sm:$0xff] %vm27_vm0, %v140_v4 }
  0x6f   :  { %206 = vst.msk [vmem:[#allocation2 + $0x49] sm:$0xff] %vm27_vm0, %v141_v5  ;;  %207 = vst.msk [vmem:[#allocation2 + $0x51] sm:$0xff] %vm27_vm0, %v142_v6  ;;  %v161_v6 = vld [vmem:[%s12040_s0 + $0xc0] sm:$0xff] }
  0x70   :  { %208 = vst.msk [vmem:[#allocation2 + $0x61] sm:$0xff] %vm27_vm0, %v143_v7  ;;  %209 = vst.msk [vmem:[#allocation2 + $0x69] sm:$0xff] %vm27_vm0, %v144_v8  ;;  %v162_v7 = vld [vmem:[%s12040_s0 + $0xc8] sm:$0xff] }
  0x71   :  { %210 = vst.msk [vmem:[#allocation2 + $0x79] sm:$0xff] %vm27_vm0, %v145_v9  ;;  %211 = vst.msk [vmem:[#allocation2 + $0x81] sm:$0xff] %vm27_vm0, %v146_v10 }
  0x72   :  { %212 = vst.msk [vmem:[#allocation2 + $0x91] sm:$0xff] %vm27_vm0, %v147_v11  ;;  %213 = vst.msk [vmem:[#allocation2 + $0x99] sm:$0xff] %vm27_vm0, %v148_v12 }
  0x73   :  { %214 = vst.msk [vmem:[#allocation2 + $0xa9] sm:$0xff] %vm27_vm0, %v149_v13  ;;  %215 = vst.msk [vmem:[#allocation2 + $0xb1] sm:$0xff] %vm27_vm0, %v150_v14 }
  0x74   :  { %216 = vst.msk [vmem:[#allocation2 + $0xc1] sm:$0xff] %vm27_vm0, %v151_v15  ;;  %217 = vst.msk [vmem:[#allocation2 + $0xc9] sm:$0xff] %vm27_vm0, %v152_v16  ;;  %v568_v24 = vld [vmem:[#allocation2 + $0x1a] sm:$0xff]  ;;  %v569_v25 = vld [vmem:[#allocation2 + $0x22] sm:$0xff] }
  0x75   :  { %218 = vst.msk [vmem:[#allocation2 + $0xd9] sm:$0xff] %vm27_vm0, %v153_v17  ;;  %219 = vst.msk [vmem:[#allocation2 + $0xe1] sm:$0xff] %vm27_vm0, %v154_v18  ;;  %v472_v27 = vld [vmem:[#allocation2 + $0x19] sm:$0xff]  ;;  %v473_v28 = vld [vmem:[#allocation2 + $0x21] sm:$0xff]  ;;  %v631_v29 = vpack.c.bf16 %v569_v25, %v568_v24 }
  0x76   :  { %v535_v30 = vpack.c.bf16 %v473_v28, %v472_v27  ;;  %v664_v31 = vld [vmem:[#allocation2 + $0x30] sm:$0xff]  ;;  %v665_v32 = vld [vmem:[#allocation2 + $0x38] sm:$0xff]  ;;  %v663_v34 = vld [vmem:[#allocation2 + $0x20] sm:$0xff]  ;;  %220 = vst.msk [vmem:[#allocation2 + $0xf1] sm:$0xff] %vm27_vm0, %v155_v49 }
  0x77   :  { %v662_v33 = vld [vmem:[#allocation2 + $0x18] sm:$0xff]  ;;  %1369 = vrot.lane.b32.xlu1 %v631_v29, %s7568_s14  ;;  %v8016_v35 = vpack.c.bf16 %v665_v32, %v664_v31  ;;  %v953_v43 = vld [vmem:[#allocation2 + $0x48] sm:$0xff]  ;;  %v954_v44 = vld [vmem:[#allocation2 + $0x50] sm:$0xff]  ;;  %221 = vst.msk [vmem:[#allocation2 + $0xf9] sm:$0xff] %vm27_vm0, %v156_v50 }
  0x78   :  { %1273 = vrot.lane.b32.xlu0 %v535_v30, %s7569_s15  ;;  %v8019_v36 = vpack.c.bf16 %v663_v34, %v662_v33  ;;  %v760_v37 = vld [vmem:[#allocation2 + $0x31] sm:$0xff]  ;;  %v761_v38 = vld [vmem:[#allocation2 + $0x39] sm:$0xff]  ;;  %v8028_v45 = vpack.c.bf16 %v954_v44, %v953_v43  ;;  %v1049_v46 = vld [vmem:[#allocation2 + $0x49] sm:$0xff]  ;;  %222 = vst.msk [vmem:[#allocation2 + $0x109] sm:$0xff] %vm27_vm0, %v157_v53 }
  0x79   :  { %v823_v39 = vpack.c.bf16 %v761_v38, %v760_v37  ;;  %v856_v40 = vld [vmem:[#allocation2 + $0x32] sm:$0xff]  ;;  %v857_v41 = vld [vmem:[#allocation2 + $0x3a] sm:$0xff]  ;;  %223 = vst.msk [vmem:[#allocation2 + $0x111] sm:$0xff] %vm27_vm0, %v158_v54  ;;  %v1145_v57 = vld [vmem:[#allocation2 + $0x4a] sm:$0xff] }
  0x7a   :  { %v919_v42 = vpack.c.bf16 %v857_v41, %v856_v40  ;;  %v1050_v47 = vld [vmem:[#allocation2 + $0x51] sm:$0xff]  ;;  %224 = vst.msk [vmem:[#allocation2 + $0x121] sm:$0xff] %vm27_vm0, %v159_v60  ;;  %225 = vst.msk [vmem:[#allocation2 + $0x129] sm:$0xff] %vm27_vm0, %v160_v61  ;;  %v668_v62 = vld [vmem:[#allocation2 + $0x60] sm:$0xff] }
  0x7b   :  { %1465 = vrot.lane.b32.xlu1 %v8016_v35, %s7570_s16  ;;  %v1112_v52 = vpack.c.bf16 %v1050_v47, %v1049_v46  ;;  %v1146_v58 = vld [vmem:[#allocation2 + $0x52] sm:$0xff]  ;;  %v669_v63 = vld [vmem:[#allocation2 + $0x68] sm:$0xff]  ;;  %226 = vst.msk [vmem:[#allocation2 + $0x139] sm:$0xff] %vm27_vm0, %v161_v6  ;;  %227 = vst.msk [vmem:[#allocation2 + $0x141] sm:$0xff] %vm27_vm0, %v162_v7 }
  0x7c   :  { %1463 = vrot.lane.b32.xlu0 %v8019_v36, %s7570_s16  ;;  %v1208_v59 = vpack.c.bf16 %v1146_v58, %v1145_v57  ;;  %v8075_v0 = vpack.c.bf16 %v669_v63, %v668_v62  ;;  %v764_v1 = vld [vmem:[#allocation2 + $0x61] sm:$0xff]  ;;  %v765_v2 = vld [vmem:[#allocation2 + $0x69] sm:$0xff]  ;;  %v957_v9 = vld [vmem:[#allocation2 + $0x78] sm:$0xff]  ;;  %229 = vst.msk [vmem:[#allocation2 + $0x159] sm:$0xff] %vm27_vm0, %v164_v19 }
  0x7d   :  { %v825_v3 = vpack.c.bf16 %v765_v2, %v764_v1  ;;  %v860_v4 = vld [vmem:[#allocation2 + $0x62] sm:$0xff]  ;;  %v861_v5 = vld [vmem:[#allocation2 + $0x6a] sm:$0xff]  ;;  %v1053_v12 = vld [vmem:[#allocation2 + $0x79] sm:$0xff] }
  0x7e   :  { %v921_v8 = vpack.c.bf16 %v861_v5, %v860_v4  ;;  %v958_v10 = vld [vmem:[#allocation2 + $0x80] sm:$0xff]  ;;  %v163_v18 = vld [vmem:[%s12040_s0 + $0xd0] sm:$0xff]  ;;  %v673_v21 = vld [vmem:[#allocation2 + $0x98] sm:$0xff] }
  0x7f   :  { %1561 = vrot.lane.b32.xlu1 %v823_v39, %s7571_s17  ;;  %v8093_v11 = vpack.c.bf16 %v958_v10, %v957_v9  ;;  %v1054_v13 = vld [vmem:[#allocation2 + $0x81] sm:$0xff]  ;;  %228 = vst.msk [vmem:[#allocation2 + $0x151] sm:$0xff] %vm27_vm0, %v163_v18  ;;  %v672_v20 = vld [vmem:[#allocation2 + $0x90] sm:$0xff]  ;;  %v769_v24 = vld [vmem:[#allocation2 + $0x99] sm:$0xff] }
  0x80   :  { %1559 = vrot.lane.b32.xlu0 %v535_v30, %s7571_s17  ;;  %v1114_v14 = vpack.c.bf16 %v1054_v13, %v1053_v12  ;;  %v1149_v15 = vld [vmem:[#allocation2 + $0x7a] sm:$0xff]  ;;  %v1150_v16 = vld [vmem:[#allocation2 + $0x82] sm:$0xff]  ;;  %v8115_v22 = vpack.c.bf16 %v673_v21, %v672_v20  ;;  %v768_v23 = vld [vmem:[#allocation2 + $0x91] sm:$0xff]  ;;  %v1272_v60 = vpop.permute.xlu0 %1271 }
  0x81   :  { %v1210_v17 = vpack.c.bf16 %v1150_v16, %v1149_v15  ;;  %v827_v25 = vpack.c.bf16 %v769_v24, %v768_v23  ;;  %v864_v26 = vld [vmem:[#allocation2 + $0x92] sm:$0xff]  ;;  %v865_v27 = vld [vmem:[#allocation2 + $0x9a] sm:$0xff]  ;;  %v961_v31 = vld [vmem:[#allocation2 + $0xa8] sm:$0xff] }
  0x82   :  { %v165_v28 = vld [vmem:[%s12040_s0 + $0xe0] sm:$0xff]  ;;  %v923_v30 = vpack.c.bf16 %v865_v27, %v864_v26  ;;  %v962_v32 = vld [vmem:[#allocation2 + $0xb0] sm:$0xff]  ;;  %v168_v43 = vld [vmem:[%s12040_s0 + $0xf8] sm:$0xff] }
  0x83   :  { %1657 = vrot.lane.b32.xlu1 %v919_v42, %s7572_s18  ;;  %230 = vst.msk [vmem:[#allocation2 + $0x169] sm:$0xff] %vm27_vm0, %v165_v28  ;;  %v8133_v33 = vpack.c.bf16 %v962_v32, %v961_v31  ;;  %v1057_v34 = vld [vmem:[#allocation2 + $0xa9] sm:$0xff]  ;;  %v1058_v37 = vld [vmem:[#allocation2 + $0xb1] sm:$0xff]  ;;  %233 = vst.msk [vmem:[#allocation2 + $0x189] sm:$0xff] %vm27_vm0, %v168_v43 }
  0x84   :  { %1655 = vrot.lane.b32.xlu0 %v631_v29, %s7572_s18  ;;  %v166_v29 = vld [vmem:[%s12040_s0 + $0xe8] sm:$0xff]  ;;  %v1116_v38 = vpack.c.bf16 %v1058_v37, %v1057_v34  ;;  %v1154_v40 = vld [vmem:[#allocation2 + $0xb2] sm:$0xff]  ;;  %v676_v44 = vld [vmem:[#allocation2 + $0xc0] sm:$0xff] }
  0x85   :  { %231 = vst.msk [vmem:[#allocation2 + $0x171] sm:$0xff] %vm27_vm0, %v166_v29  ;;  %v677_v46 = vld [vmem:[#allocation2 + $0xc8] sm:$0xff]  ;;  %v965_v54 = vld [vmem:[#allocation2 + $0xd8] sm:$0xff]  ;;  %v966_v55 = vld [vmem:[#allocation2 + $0xe0] sm:$0xff] }
  0x86   :  { %v8155_v47 = vpack.c.bf16 %v677_v46, %v676_v44  ;;  %v772_v48 = vld [vmem:[#allocation2 + $0xc1] sm:$0xff]  ;;  %v773_v49 = vld [vmem:[#allocation2 + $0xc9] sm:$0xff]  ;;  %v8165_v56 = vpack.c.bf16 %v966_v55, %v965_v54  ;;  %v1061_v57 = vld [vmem:[#allocation2 + $0xd9] sm:$0xff] }
  0x87   :  { %1753 = vrot.lane.b32.xlu1 %v8028_v45, %s7573_s27  ;;  %v829_v50 = vpack.c.bf16 %v773_v49, %v772_v48  ;;  %v868_v51 = vld [vmem:[#allocation2 + $0xc2] sm:$0xff]  ;;  %v1157_v4 = vld [vmem:[#allocation2 + $0xda] sm:$0xff]  ;;  %v171_v10 = vld [vmem:[%s12040_s0 + $0x110] sm:$0xff] }
  0x88   :  { %1751 = vrot.lane.b32.xlu0 %v8016_v35, %s7573_s27  ;;  %v1062_v58 = vld [vmem:[#allocation2 + $0xe1] sm:$0xff]  ;;  %v172_v12 = vld [vmem:[%s12040_s0 + $0x118] sm:$0xff]  ;;  %236 = vst.msk [vmem:[#allocation2 + $0x1e1] sm:$0xff] %vm27_vm0, %v171_v10  ;;  %v680_v15 = vld [vmem:[#allocation2 + $0xf0] sm:$0xff] }
  0x89   :  { %v8170_v61 = vpack.c.bf16 %v1062_v58, %v1061_v57  ;;  %v169_v63 = vld [vmem:[%s12040_s0 + $0x100] sm:$0xff]  ;;  %v170_v2 = vld [vmem:[%s12040_s0 + $0x108] sm:$0xff]  ;;  %237 = vst.msk [vmem:[#allocation2 + $0x1e9] sm:$0xff] %vm27_vm0, %v172_v12  ;;  %v681_v16 = vld [vmem:[#allocation2 + $0xf8] sm:$0xff] }
  0x8a   :  { %234 = vst.msk [vmem:[#allocation2 + $0x1c9] sm:$0xff] %vm27_vm0, %v169_v63  ;;  %235 = vst.msk [vmem:[#allocation2 + $0x1d1] sm:$0xff] %vm27_vm0, %v170_v2  ;;  %v1158_v5 = vld [vmem:[#allocation2 + $0xe2] sm:$0xff]  ;;  %v8207_v20 = vpack.c.bf16 %v681_v16, %v680_v15  ;;  %v776_v21 = vld [vmem:[#allocation2 + $0xf1] sm:$0xff] }
  0x8b   :  { %1849 = vrot.lane.b32.xlu1 %v1112_v52, %s7574_s11  ;;  %v8191_v7 = vpack.c.bf16 %v1158_v5, %v1157_v4  ;;  %v375_v13 = vld [vmem:[#allocation2 + $0x8] sm:$0xff]  ;;  %v777_v23 = vld [vmem:[#allocation2 + $0xf9] sm:$0xff]  ;;  %v970_v43 = vld [vmem:[#allocation2 + $0x110] sm:$0xff] }
  0x8c   :  { %1847 = vrot.lane.b32.xlu0 %v823_v39, %s7574_s11  ;;  %v831_v27 = vpack.c.bf16 %v777_v23, %v776_v21  ;;  %v872_v28 = vld [vmem:[#allocation2 + $0xf2] sm:$0xff]  ;;  %v873_v29 = vld [vmem:[#allocation2 + $0xfa] sm:$0xff]  ;;  %v1065_v57 = vld [vmem:[#allocation2 + $0x109] sm:$0xff] }
  0x8d   :  { %v173_v32 = vld [vmem:[%s12040_s0 + $0x120] sm:$0xff]  ;;  %v1066_v58 = vld [vmem:[#allocation2 + $0x111] sm:$0xff]  ;;  %v685_v15 = vld [vmem:[#allocation2 + $0x128] sm:$0xff] }
  0x8e   :  { %238 = vst.msk [vmem:[#allocation2 + $0x1f9] sm:$0xff] %vm27_vm0, %v173_v32  ;;  %v1161_v5 = vld [vmem:[#allocation2 + $0x10a] sm:$0xff] }
  0x8f   :  { %1275 = vrot.lane.b32.xlu1 %v823_v39, %s7569_s15  ;;  %v1153_v39 = vld [vmem:[#allocation2 + $0xaa] sm:$0xff] }
  0x90   :  { %1943 = vrot.lane.b32.xlu0 %v919_v42, %s7575_s12  ;;  %v1212_v41 = vpack.c.bf16 %v1154_v40, %v1153_v39  ;;  %v174_v39 = vld [vmem:[%s12040_s0 + $0x128] sm:$0xff]  ;;  %v175_v10 = vld [vmem:[%s12040_s0 + $0x130] sm:$0xff] }
  0x91   :  { %239 = vst.msk [vmem:[#allocation2 + $0x201] sm:$0xff] %vm27_vm0, %v174_v39  ;;  %240 = vst.msk [vmem:[#allocation2 + $0x211] sm:$0xff] %vm27_vm0, %v175_v10  ;;  %v781_v21 = vld [vmem:[#allocation2 + $0x129] sm:$0xff]  ;;  %v180_v10 = vld [vmem:[%s12040_s0 + $0x158] sm:$0xff] }
  0x92   :  { %245 = vst.msk [vmem:[#allocation2 + $0x249] sm:$0xff] %vm27_vm0, %v180_v10 }
  0x93   :  { %1277 = vrot.lane.b32.xlu1 %v1112_v52, %s7569_s15 }
  0x94   :  { %1945 = vrot.lane.b32.xlu0 %v1208_v59, %s7575_s12 }
  0x97   :  { %1373 = vrot.lane.b32.xlu1 %v1208_v59, %s7568_s14 }
  0x98   :  { %1371 = vrot.lane.b32.xlu0 %v919_v42, %s7568_s14  ;;  %v167_v42 = vld [vmem:[%s12040_s0 + $0xf0] sm:$0xff] }
  0x99   :  { %232 = vst.msk [vmem:[#allocation2 + $0x181] sm:$0xff] %vm27_vm0, %v167_v42  ;;  %v969_v42 = vld [vmem:[#allocation2 + $0x108] sm:$0xff] }
  0x9a   :  { %v8241_v54 = vpack.c.bf16 %v970_v43, %v969_v42 }
  0x9b   :  { %1469 = vrot.lane.b32.xlu1 %v8075_v0, %s7570_s16 }
  0x9c   :  { %1467 = vrot.lane.b32.xlu0 %v8028_v45, %s7570_s16 }
  0x9f   :  { %1565 = vrot.lane.b32.xlu1 %v825_v3, %s7571_s17 }
  0xa0   :  { %1563 = vrot.lane.b32.xlu0 %v1112_v52, %s7571_s17  ;;  %v869_v52 = vld [vmem:[#allocation2 + $0xca] sm:$0xff] }
  0xa1   :  { %v925_v53 = vpack.c.bf16 %v869_v52, %v868_v51  ;;  %v693_v10 = vld [vmem:[#allocation2 + $0x188] sm:$0xff] }
  0xa3   :  { %1661 = vrot.lane.b32.xlu1 %v921_v8, %s7572_s18 }
  0xa4   :  { %1659 = vrot.lane.b32.xlu0 %v1208_v59, %s7572_s18  ;;  %v1368_v59 = vpop.permute.xlu1 %1367 }
  0xa7   :  { %1757 = vrot.lane.b32.xlu1 %v8093_v11, %s7573_s27 }
  0xa8   :  { %1755 = vrot.lane.b32.xlu0 %v8075_v0, %s7573_s27 }
  0xab   :  { %1853 = vrot.lane.b32.xlu1 %v1114_v14, %s7574_s11 }
  0xac   :  { %1851 = vrot.lane.b32.xlu0 %v825_v3, %s7574_s11 }
  0xaf   :  { %1279 = vrot.lane.b32.xlu1 %v825_v3, %s7569_s15 }
  0xb0   :  { %1947 = vrot.lane.b32.xlu0 %v921_v8, %s7575_s12 }
  0xb3   :  { %1281 = vrot.lane.b32.xlu1 %v1114_v14, %s7569_s15 }
  0xb4   :  { %1949 = vrot.lane.b32.xlu0 %v1210_v17, %s7575_s12 }
  0xb7   :  { %1377 = vrot.lane.b32.xlu1 %v1210_v17, %s7568_s14 }
  0xb8   :  { %1375 = vrot.lane.b32.xlu0 %v921_v8, %s7568_s14 }
  0xbb   :  { %1473 = vrot.lane.b32.xlu1 %v8115_v22, %s7570_s16 }
  0xbc   :  { %1471 = vrot.lane.b32.xlu0 %v8093_v11, %s7570_s16 }
  0xbf   :  { %1569 = vrot.lane.b32.xlu1 %v827_v25, %s7571_s17 }
  0xc0   :  { %1567 = vrot.lane.b32.xlu0 %v1114_v14, %s7571_s17  ;;  %v374_v14 = vld [vmem:[#allocation2] sm:$0xff] }
  0xc1   :  { %v438_v18 = vpack.c.bf16 %v375_v13, %v374_v14  ;;  %v176_v13 = vld [vmem:[%s12040_s0 + $0x138] sm:$0xff]  ;;  %v684_v14 = vld [vmem:[#allocation2 + $0x120] sm:$0xff] }
  0xc2   :  { %241 = vst.msk [vmem:[#allocation2 + $0x219] sm:$0xff] %vm27_vm0, %v176_v13  ;;  %v689_v13 = vld [vmem:[#allocation2 + $0x158] sm:$0xff] }
  0xc3   :  { %1665 = vrot.lane.b32.xlu1 %v923_v30, %s7572_s18 }
  0xc4   :  { %1663 = vrot.lane.b32.xlu0 %v1210_v17, %s7572_s18 }
  0xc7   :  { %1761 = vrot.lane.b32.xlu1 %v8133_v33, %s7573_s27 }
  0xc8   :  { %1759 = vrot.lane.b32.xlu0 %v8115_v22, %s7573_s27 }
  0xcb   :  { %1857 = vrot.lane.b32.xlu1 %v1116_v38, %s7574_s11 }
  0xcc   :  { %1855 = vrot.lane.b32.xlu0 %v827_v25, %s7574_s11 }
  0xcf   :  { %1283 = vrot.lane.b32.xlu1 %v827_v25, %s7569_s15  ;;  %v2009_v25 = vsel %vm27_vm0, %v438_v18, %v1272_v60  ;;  %v8270_v18 = vpack.c.bf16 %v685_v15, %v684_v14 }
  0xd0   :  { %1951 = vrot.lane.b32.xlu0 %v923_v30, %s7575_s12 }
  0xd3   :  { %1285 = vrot.lane.b32.xlu1 %v1116_v38, %s7569_s15 }
  0xd4   :  { %1953 = vrot.lane.b32.xlu0 %v1212_v41, %s7575_s12 }
  0xd7   :  { %1381 = vrot.lane.b32.xlu1 %v1212_v41, %s7568_s14 }
  0xd8   :  { %1379 = vrot.lane.b32.xlu0 %v923_v30, %s7568_s14  ;;  %v2105_v30 = vsel %vm2103_vm3, %v2009_v25, %v1368_v59 }
  0xdb   :  { %1477 = vrot.lane.b32.xlu1 %v8155_v47, %s7570_s16 }
  0xdc   :  { %1475 = vrot.lane.b32.xlu0 %v8133_v33, %s7570_s16 }
  0xdf   :  { %1573 = vrot.lane.b32.xlu1 %v829_v50, %s7571_s17 }
  0xe0   :  { %1571 = vrot.lane.b32.xlu0 %v1116_v38, %s7571_s17 }
  0xe3   :  { %1669 = vrot.lane.b32.xlu1 %v925_v53, %s7572_s18 }
  0xe4   :  { %1667 = vrot.lane.b32.xlu0 %v1212_v41, %s7572_s18  ;;  %v927_v41 = vpack.c.bf16 %v873_v29, %v872_v28  ;;  %v877_v28 = vld [vmem:[#allocation2 + $0x12a] sm:$0xff] }
  0xe7   :  { %1765 = vrot.lane.b32.xlu1 %v8165_v56, %s7573_s27 }
  0xe8   :  { %1763 = vrot.lane.b32.xlu0 %v8155_v47, %s7573_s27 }
  0xe9   :  { %v8174_v62 = vpop.permute.xlu1 %1369 }
  0xea   :  { %v1274_v1 = vpop.permute.xlu0 %1273 }
  0xeb   :  { %1861 = vrot.lane.b32.xlu1 %v8170_v61, %s7574_s11  ;;  %v2012_v34 = vsel %vm27_vm0, %v8019_v36, %v1274_v1  ;;  %v1120_v1 = vpack.c.bf16 %v1066_v58, %v1065_v57 }
  0xec   :  { %1859 = vrot.lane.b32.xlu0 %v829_v50, %s7574_s11  ;;  %v2107_v44 = vsel %vm2103_vm3, %v2012_v34, %v8174_v62 }
  0xed   :  { %v8187_v3 = vpop.permute.xlu1 %1465 }
  0xee   :  { %v1464_v6 = vpop.permute.xlu0 %1463  ;;  %v2172_v49 = vsel %vm2168_vm4, %v2107_v44, %v8187_v3 }
  0xef   :  { %1287 = vrot.lane.b32.xlu1 %v829_v50, %s7569_s15  ;;  %v2170_v37 = vsel %vm2168_vm4, %v2105_v30, %v1464_v6  ;;  %v1162_v6 = vld [vmem:[#allocation2 + $0x112] sm:$0xff] }
  0xf0   :  { %1955 = vrot.lane.b32.xlu0 %v925_v53, %s7575_s12 }
  0xf1   :  { %v1562_v8 = vpop.permute.xlu1 %1561 }
  0xf2   :  { %v1560_v9 = vpop.permute.xlu0 %1559  ;;  %v2237_v52 = vsel %vm2233_vm5, %v2172_v49, %v1562_v8  ;;  %v1216_v8 = vpack.c.bf16 %v1162_v6, %v1161_v5 }
  0xf3   :  { %1289 = vrot.lane.b32.xlu1 %v8170_v61, %s7569_s15  ;;  %v2235_v40 = vsel %vm2233_vm5, %v2170_v37, %v1560_v9  ;;  %v178_v37 = vld [vmem:[%s12040_s0 + $0x148] sm:$0xff] }
  0xf4   :  { %1957 = vrot.lane.b32.xlu0 %v8191_v7, %s7575_s12  ;;  %243 = vst.msk [vmem:[#allocation2 + $0x231] sm:$0xff] %vm27_vm0, %v178_v37 }
  0xf5   :  { %v1658_v17 = vpop.permute.xlu1 %1657 }
  0xf6   :  { %v1656_v19 = vpop.permute.xlu0 %1655  ;;  %v2302_v55 = vsel %vm2298_vm6, %v2237_v52, %v1658_v17 }
  0xf7   :  { %1385 = vrot.lane.b32.xlu1 %v8191_v7, %s7568_s14  ;;  %v2300_v36 = vsel %vm2298_vm6, %v2235_v40, %v1656_v19  ;;  %v780_v19 = vld [vmem:[#allocation2 + $0x121] sm:$0xff] }
  0xf8   :  { %1383 = vrot.lane.b32.xlu0 %v925_v53, %s7568_s14  ;;  %v833_v25 = vpack.c.bf16 %v781_v21, %v780_v19  ;;  %v785_v19 = vld [vmem:[#allocation2 + $0x159] sm:$0xff] }
  0xf9   :  { %v1754_v24 = vpop.permute.xlu1 %1753 }
  0xfa   :  { %v1752_v26 = vpop.permute.xlu0 %1751  ;;  %v2367_v59 = vsel %vm2363_vm7, %v2302_v55, %v1754_v24  ;;  %v1070_v55 = vld [vmem:[#allocation2 + $0x141] sm:$0xff] }
  0xfb   :  { %1481 = vrot.lane.b32.xlu1 %v8207_v20, %s7570_s16  ;;  %v2365_v46 = vsel %vm2363_vm7, %v2300_v36, %v1752_v26  ;;  %v974_v36 = vld [vmem:[#allocation2 + $0x140] sm:$0xff] }
  0xfc   :  { %1479 = vrot.lane.b32.xlu0 %v8165_v56, %s7570_s16 }
  0xfd   :  { %v1850_v31 = vpop.permute.xlu1 %1849 }
  0xfe   :  { %v1848_v38 = vpop.permute.xlu0 %1847 }
  0xff   :  { %1577 = vrot.lane.b32.xlu1 %v831_v27, %s7571_s17  ;;  %v2430_v50 = vsel %vm2428_vm8, %v2365_v46, %v1848_v38 }
 0x100   :  { %1575 = vrot.lane.b32.xlu0 %v8170_v61, %s7571_s17  ;;  %v2432_v61 = vsel %vm2428_vm8, %v2367_v59, %v1850_v31  ;;  %v177_v31 = vld [vmem:[%s12040_s0 + $0x140] sm:$0xff] }
 0x101   :  { %v1276_v48 = vpop.permute.xlu1 %1275  ;;  %242 = vst.msk [vmem:[#allocation2 + $0x229] sm:$0xff] %vm27_vm0, %v177_v31 }
 0x102   :  { %v1944_v51 = vpop.permute.xlu0 %1943  ;;  %v2015_v26 = vsel %vm27_vm0, %v8016_v35, %v1276_v48 }
 0x103   :  { %1673 = vrot.lane.b32.xlu1 %v927_v41, %s7572_s18  ;;  %v2495_v53 = vsel %vm2493_vm9, %v2430_v50, %v1944_v51 }
 0x104   :  { %1671 = vrot.lane.b32.xlu0 %v8191_v7, %s7572_s18  ;;  %6979 = vmatprep.mubr.msk.bf16.mxu0 %vm2578_vm10, %v2495_v53  ;;  %v1069_v53 = vld [vmem:[#allocation2 + $0x139] sm:$0xff] }
 0x105   :  { %v1278_v60 = vpop.permute.xlu1 %1277 }
 0x106   :  { %v1946_v62 = vpop.permute.xlu0 %1945  ;;  %v2018_v39 = vsel %vm27_vm0, %v8028_v45, %v1278_v60 }
 0x107   :  { %v2497_v63 = vsel %vm2493_vm9, %v2432_v61, %v1946_v62  ;;  %1769 = vrot.lane.b32.xlu1 %v8241_v54, %s7573_s27  ;;  %v1122_v62 = vpack.c.bf16 %v1070_v55, %v1069_v53 }
 0x108   :  { %1767 = vrot.lane.b32.xlu0 %v8207_v20, %s7573_s27  ;;  %6980 = vmatmul.mubr.msk.bf16.vlgmr.msra.gmra.mrb[0].mxu0 %vm2578_vm10, %v2497_v63 }
 0x109   :  { %v1374_v2 = vpop.permute.xlu1 %1373 }
 0x10a   :  { %v1372_v3 = vpop.permute.xlu0 %1371  ;;  %v2111_v42 = vsel %vm2103_vm3, %v2018_v39, %v1374_v2  ;;  %v977_v39 = vld [vmem:[#allocation2 + $0x168] sm:$0xff] }
 0x10b   :  { %1865 = vrot.lane.b32.xlu1 %v1120_v1, %s7574_s11  ;;  %v2109_v29 = vsel %vm2103_vm3, %v2015_v26, %v1372_v3  ;;  %v1165_v3 = vld [vmem:[#allocation2 + $0x13a] sm:$0xff]  ;;  %v880_v26 = vld [vmem:[#allocation2 + $0x152] sm:$0xff] }
 0x10c   :  { %1863 = vrot.lane.b32.xlu0 %v831_v27, %s7574_s11 }
 0x10d   :  { %v1470_v4 = vpop.permute.xlu1 %1469 }
 0x10e   :  { %v1468_v7 = vpop.permute.xlu0 %1467  ;;  %v2176_v46 = vsel %vm2168_vm4, %v2111_v42, %v1470_v4  ;;  %v1166_v4 = vld [vmem:[#allocation2 + $0x142] sm:$0xff] }
 0x10f   :  { %1291 = vrot.lane.b32.xlu1 %v831_v27, %s7569_s15  ;;  %v876_v27 = vld [vmem:[#allocation2 + $0x122] sm:$0xff]  ;;  %v2174_v32 = vsel %vm2168_vm4, %v2109_v29, %v1468_v7  ;;  %v1218_v6 = vpack.c.bf16 %v1166_v4, %v1165_v3 }
 0x110   :  { %1959 = vrot.lane.b32.xlu0 %v927_v41, %s7575_s12  ;;  %v929_v38 = vpack.c.bf16 %v877_v28, %v876_v27  ;;  %v881_v27 = vld [vmem:[#allocation2 + $0x15a] sm:$0xff] }
 0x111   :  { %v1566_v9 = vpop.permute.xlu1 %1565  ;;  %v931_v37 = vpack.c.bf16 %v881_v27, %v880_v26  ;;  %v885_v26 = vld [vmem:[#allocation2 + $0x18a] sm:$0xff] }
 0x112   :  { %v1564_v12 = vpop.permute.xlu0 %1563  ;;  %v2241_v50 = vsel %vm2233_vm5, %v2176_v46, %v1566_v9 }
 0x113   :  { %1293 = vrot.lane.b32.xlu1 %v1120_v1, %s7569_s15  ;;  %v2239_v35 = vsel %vm2233_vm5, %v2174_v32, %v1564_v12  ;;  %v688_v12 = vld [vmem:[#allocation2 + $0x150] sm:$0xff] }
 0x114   :  { %1961 = vrot.lane.b32.xlu0 %v1216_v8, %s7575_s12 }
 0x115   :  { %v1662_v16 = vpop.permute.xlu1 %1661 }
 0x116   :  { %v1660_v17 = vpop.permute.xlu0 %1659  ;;  %v2306_v52 = vsel %vm2298_vm6, %v2241_v50, %v1662_v16  ;;  %v8330_v16 = vpack.c.bf16 %v689_v13, %v688_v12 }
 0x117   :  { %1389 = vrot.lane.b32.xlu1 %v1216_v8, %s7568_s14  ;;  %v2304_v40 = vsel %vm2298_vm6, %v2239_v35, %v1660_v17  ;;  %v784_v17 = vld [vmem:[#allocation2 + $0x151] sm:$0xff] }
 0x118   :  { %1387 = vrot.lane.b32.xlu0 %v927_v41, %s7568_s14  ;;  %v973_v41 = vld [vmem:[#allocation2 + $0x138] sm:$0xff] }
 0x119   :  { %v1758_v23 = vpop.permute.xlu1 %1757  ;;  %v8302_v51 = vpack.c.bf16 %v974_v36, %v973_v41 }
 0x11a   :  { %v1756_v24 = vpop.permute.xlu0 %1755  ;;  %v2371_v57 = vsel %vm2363_vm7, %v2306_v52, %v1758_v23  ;;  %v1074_v52 = vld [vmem:[#allocation2 + $0x171] sm:$0xff] }
 0x11b   :  { %1485 = vrot.lane.b32.xlu1 %v8270_v18, %s7570_s16  ;;  %v2369_v43 = vsel %vm2363_vm7, %v2304_v40, %v1756_v24  ;;  %v835_v24 = vpack.c.bf16 %v785_v19, %v784_v17  ;;  %v978_v40 = vld [vmem:[#allocation2 + $0x170] sm:$0xff] }
 0x11c   :  { %1483 = vrot.lane.b32.xlu0 %v8241_v54, %s7570_s16  ;;  %v789_v17 = vld [vmem:[#allocation2 + $0x189] sm:$0xff] }
 0x11d   :  { %v1854_v30 = vpop.permute.xlu1 %1853 }
 0x11e   :  { %v1852_v34 = vpop.permute.xlu0 %1851  ;;  %v2436_v59 = vsel %vm2428_vm8, %v2371_v57, %v1854_v30  ;;  %v181_v30 = vld [vmem:[%s12040_s0 + $0x160] sm:$0xff] }
 0x11f   :  { %1581 = vrot.lane.b32.xlu1 %v833_v25, %s7571_s17  ;;  %v2434_v48 = vsel %vm2428_vm8, %v2369_v43, %v1852_v34  ;;  %v182_v34 = vld [vmem:[%s12040_s0 + $0x168] sm:$0xff]  ;;  %246 = vst.msk [vmem:[#allocation2 + $0x259] sm:$0xff] %vm27_vm0, %v181_v30 }
 0x120   :  { %1579 = vrot.lane.b32.xlu0 %v1120_v1, %s7571_s17  ;;  %247 = vst.msk [vmem:[#allocation2 + $0x261] sm:$0xff] %vm27_vm0, %v182_v34 }
 0x121   :  { %v1280_v44 = vpop.permute.xlu1 %1279 }
 0x122   :  { %v1948_v49 = vpop.permute.xlu0 %1947 }
 0x123   :  { %v2499_v45 = vsel %vm2493_vm9, %v2434_v48, %v1948_v49  ;;  %1677 = vrot.lane.b32.xlu1 %v929_v38, %s7572_s18  ;;  %v8362_v49 = vpack.c.bf16 %v978_v40, %v977_v39 }
 0x124   :  { %1675 = vrot.lane.b32.xlu0 %v1216_v8, %s7572_s18  ;;  %6983 = vmatprep.mubr.msk.bf16.mxu0 %vm2578_vm10, %v2499_v45  ;;  %v179_v8 = vld [vmem:[%s12040_s0 + $0x150] sm:$0xff] }
 0x125   :  { %v1282_v58 = vpop.permute.xlu1 %1281  ;;  %244 = vst.msk [vmem:[#allocation2 + $0x241] sm:$0xff] %vm27_vm0, %v179_v8  ;;  %v1073_v45 = vld [vmem:[#allocation2 + $0x169] sm:$0xff]  ;;  %v184_v8 = vld [vmem:[%s12040_s0 + $0x178] sm:$0xff] }
 0x126   :  { %v1950_v60 = vpop.permute.xlu0 %1949  ;;  %v2024_v35 = vsel %vm27_vm0, %v8093_v11, %v1282_v58  ;;  %249 = vst.msk [vmem:[#allocation2 + $0x279] sm:$0xff] %vm27_vm0, %v184_v8 }
 0x127   :  { %v2501_v61 = vsel %vm2493_vm9, %v2436_v59, %v1950_v60  ;;  %1773 = vrot.lane.b32.xlu1 %v8302_v51, %s7573_s27  ;;  %v1124_v60 = vpack.c.bf16 %v1074_v52, %v1073_v45 }
 0x128   :  { %1771 = vrot.lane.b32.xlu0 %v8270_v18, %s7573_s27  ;;  %6984 = vmatmul.mubr.msk.bf16.gmra.mrb[4].mxu0 %vm2578_vm10, %v2501_v61 }
 0x129   :  { %v1378_v63 = vpop.permute.xlu1 %1377 }
 0x12a   :  { %v1376_v1 = vpop.permute.xlu0 %1375  ;;  %v2115_v41 = vsel %vm2103_vm3, %v2024_v35, %v1378_v63  ;;  %v981_v35 = vld [vmem:[#allocation2 + $0x198] sm:$0xff] }
 0x12b   :  { %1869 = vrot.lane.b32.xlu1 %v1122_v62, %s7574_s11 }
 0x12c   :  { %1867 = vrot.lane.b32.xlu0 %v833_v25, %s7574_s11 }
 0x12d   :  { %v1474_v2 = vpop.permute.xlu1 %1473 }
 0x12e   :  { %v1472_v5 = vpop.permute.xlu0 %1471  ;;  %v2180_v43 = vsel %vm2168_vm4, %v2115_v41, %v1474_v2  ;;  %v1170_v2 = vld [vmem:[#allocation2 + $0x172] sm:$0xff] }
 0x12f   :  { %1295 = vrot.lane.b32.xlu1 %v833_v25, %s7569_s15  ;;  %v2021_v25 = vsel %vm27_vm0, %v8075_v0, %v1280_v44 }
 0x130   :  { %1963 = vrot.lane.b32.xlu0 %v929_v38, %s7575_s12  ;;  %v2113_v28 = vsel %vm2103_vm3, %v2021_v25, %v1376_v1  ;;  %v1169_v1 = vld [vmem:[#allocation2 + $0x16a] sm:$0xff]  ;;  %v884_v25 = vld [vmem:[#allocation2 + $0x182] sm:$0xff] }
 0x131   :  { %v1570_v7 = vpop.permute.xlu1 %1569  ;;  %v2178_v31 = vsel %vm2168_vm4, %v2113_v28, %v1472_v5  ;;  %v1220_v4 = vpack.c.bf16 %v1170_v2, %v1169_v1  ;;  %v933_v34 = vpack.c.bf16 %v885_v26, %v884_v25  ;;  %v504_v1 = vld [vmem:[#allocation2 + $0x1c9] sm:$0xff]  ;;  %v505_v2 = vld [vmem:[#allocation2 + $0x1d1] sm:$0xff] }
 0x132   :  { %v1568_v9 = vpop.permute.xlu0 %1567  ;;  %v2245_v48 = vsel %vm2233_vm5, %v2180_v43, %v1570_v7  ;;  %v697_v25 = vld [vmem:[#allocation2 + $0x1e8] sm:$0xff] }
 0x133   :  { %1297 = vrot.lane.b32.xlu1 %v1122_v62, %s7569_s15  ;;  %v2243_v0 = vsel %vm2233_vm5, %v2178_v31, %v1568_v9  ;;  %v692_v9 = vld [vmem:[#allocation2 + $0x180] sm:$0xff] }
 0x134   :  { %1965 = vrot.lane.b32.xlu0 %v1218_v6, %s7575_s12 }
 0x135   :  { %v1666_v14 = vpop.permute.xlu1 %1665 }
 0x136   :  { %v1664_v15 = vpop.permute.xlu0 %1663  ;;  %v2310_v50 = vsel %vm2298_vm6, %v2245_v48, %v1666_v14  ;;  %v741_v14 = vpack.c.bf16 %v693_v10, %v692_v9  ;;  %v600_v9 = vld [vmem:[#allocation2 + $0x1ca] sm:$0xff]  ;;  %v601_v10 = vld [vmem:[#allocation2 + $0x1d2] sm:$0xff] }
 0x137   :  { %1393 = vrot.lane.b32.xlu1 %v1218_v6, %s7568_s14 }
 0x138   :  { %1391 = vrot.lane.b32.xlu0 %v929_v38, %s7568_s14  ;;  %v2308_v38 = vsel %vm2298_vm6, %v2243_v0, %v1664_v15  ;;  %v788_v15 = vld [vmem:[#allocation2 + $0x181] sm:$0xff] }
 0x139   :  { %v1762_v21 = vpop.permute.xlu1 %1761 }
 0x13a   :  { %v1760_v23 = vpop.permute.xlu0 %1759  ;;  %v2375_v53 = vsel %vm2363_vm7, %v2310_v50, %v1762_v21  ;;  %v1078_v50 = vld [vmem:[#allocation2 + $0x1a1] sm:$0xff] }
 0x13b   :  { %1489 = vrot.lane.b32.xlu1 %v8330_v16, %s7570_s16  ;;  %v2373_v36 = vsel %vm2363_vm7, %v2308_v38, %v1760_v23  ;;  %v837_v23 = vpack.c.bf16 %v789_v17, %v788_v15  ;;  %v982_v38 = vld [vmem:[#allocation2 + $0x1a0] sm:$0xff]  ;;  %v187_v15 = vld [vmem:[%s12040_s0 + $0x190] sm:$0xff] }
 0x13c   :  { %1487 = vrot.lane.b32.xlu0 %v8302_v51, %s7570_s16  ;;  %252 = vst.msk [vmem:[#allocation2 + $0x2a1] sm:$0xff] %vm27_vm0, %v187_v15 }
 0x13d   :  { %v1858_v29 = vpop.permute.xlu1 %1857 }
 0x13e   :  { %v1856_v32 = vpop.permute.xlu0 %1855  ;;  %v2440_v57 = vsel %vm2428_vm8, %v2375_v53, %v1858_v29  ;;  %v185_v29 = vld [vmem:[%s12040_s0 + $0x180] sm:$0xff] }
 0x13f   :  { %1585 = vrot.lane.b32.xlu1 %v835_v24, %s7571_s17  ;;  %v2438_v44 = vsel %vm2428_vm8, %v2373_v36, %v1856_v32  ;;  %v186_v32 = vld [vmem:[%s12040_s0 + $0x188] sm:$0xff]  ;;  %250 = vst.msk [vmem:[#allocation2 + $0x289] sm:$0xff] %vm27_vm0, %v185_v29 }
 0x140   :  { %1583 = vrot.lane.b32.xlu0 %v1122_v62, %s7571_s17  ;;  %251 = vst.msk [vmem:[#allocation2 + $0x291] sm:$0xff] %vm27_vm0, %v186_v32  ;;  %v792_v32 = vld [vmem:[#allocation2 + $0x1e1] sm:$0xff] }
 0x141   :  { %v1284_v42 = vpop.permute.xlu1 %1283 }
 0x142   :  { %v1952_v46 = vpop.permute.xlu0 %1951 }
 0x143   :  { %v2503_v11 = vsel %vm2493_vm9, %v2438_v44, %v1952_v46  ;;  %1681 = vrot.lane.b32.xlu1 %v931_v37, %s7572_s18  ;;  %v1030_v46 = vpack.c.bf16 %v982_v38, %v981_v35  ;;  %v888_v38 = vld [vmem:[#allocation2 + $0x1e2] sm:$0xff] }
 0x144   :  { %1679 = vrot.lane.b32.xlu0 %v1218_v6, %s7572_s18  ;;  %6987 = vmatprep.mubr.msk.bf16.mxu0 %vm2578_vm10, %v2503_v11  ;;  %v183_v6 = vld [vmem:[%s12040_s0 + $0x170] sm:$0xff]  ;;  %v1077_v11 = vld [vmem:[#allocation2 + $0x199] sm:$0xff] }
 0x145   :  { %v1286_v55 = vpop.permute.xlu1 %1285  ;;  %248 = vst.msk [vmem:[#allocation2 + $0x271] sm:$0xff] %vm27_vm0, %v183_v6 }
 0x146   :  { %v1954_v58 = vpop.permute.xlu0 %1953  ;;  %v2030_v0 = vsel %vm27_vm0, %v8133_v33, %v1286_v55 }
 0x147   :  { %v2505_v59 = vsel %vm2493_vm9, %v2440_v57, %v1954_v58  ;;  %1777 = vrot.lane.b32.xlu1 %v8362_v49, %s7573_s27  ;;  %v1126_v58 = vpack.c.bf16 %v1078_v50, %v1077_v11  ;;  %v985_v11 = vld [vmem:[#allocation2 + $0x1f8] sm:$0xff]  ;;  %v986_v50 = vld [vmem:[#allocation2 + $0x200] sm:$0xff] }
 0x148   :  { %1775 = vrot.lane.b32.xlu0 %v8330_v16, %s7573_s27  ;;  %6988 = vmatmul.mubr.msk.bf16.gmra.mrb[8].mxu0 %vm2578_vm10, %v2505_v59  ;;  %v502_v59 = vld [vmem:[#allocation2 + $0x1b1] sm:$0xff] }
 0x149   :  { %v1382_v61 = vpop.permute.xlu1 %1381 }
 0x14a   :  { %v1380_v62 = vpop.permute.xlu0 %1379  ;;  %v2119_v39 = vsel %vm2103_vm3, %v2030_v0, %v1382_v61 }
 0x14b   :  { %1873 = vrot.lane.b32.xlu1 %v1124_v60, %s7574_s11 }
 0x14c   :  { %1871 = vrot.lane.b32.xlu0 %v835_v24, %s7574_s11 }
 0x14d   :  { %v1478_v63 = vpop.permute.xlu1 %1477 }
 0x14e   :  { %v1476_v3 = vpop.permute.xlu0 %1475  ;;  %v2184_v36 = vsel %vm2168_vm4, %v2119_v39, %v1478_v63  ;;  %v889_v39 = vld [vmem:[#allocation2 + $0x1ea] sm:$0xff] }
 0x14f   :  { %1299 = vrot.lane.b32.xlu1 %v835_v24, %s7569_s15  ;;  %v2027_v24 = vsel %vm27_vm0, %v8115_v22, %v1284_v42 }
 0x150   :  { %1967 = vrot.lane.b32.xlu0 %v931_v37, %s7575_s12  ;;  %v2117_v27 = vsel %vm2103_vm3, %v2027_v24, %v1380_v62  ;;  %v696_v24 = vld [vmem:[#allocation2 + $0x1e0] sm:$0xff] }
 0x151   :  { %v1574_v5 = vpop.permute.xlu1 %1573  ;;  %v2182_v30 = vsel %vm2168_vm4, %v2117_v27, %v1476_v3  ;;  %v694_v27 = vld [vmem:[#allocation2 + $0x1c8] sm:$0xff] }
 0x152   :  { %v1572_v7 = vpop.permute.xlu0 %1571  ;;  %v2249_v44 = vsel %vm2233_vm5, %v2184_v36, %v1574_v5  ;;  %v1174_v5 = vld [vmem:[#allocation2 + $0x1a2] sm:$0xff] }
 0x153   :  { %1301 = vrot.lane.b32.xlu1 %v1124_v60, %s7569_s15  ;;  %v2247_v22 = vsel %vm2233_vm5, %v2182_v30, %v1572_v7  ;;  %v551_v7 = vpack.c.bf16 %v505_v2, %v504_v1  ;;  %v8449_v30 = vpack.c.bf16 %v697_v25, %v696_v24  ;;  %v701_v24 = vld [vmem:[#allocation2 + $0x218] sm:$0xff] }
 0x154   :  { %1969 = vrot.lane.b32.xlu0 %v1220_v4, %s7575_s12 }
 0x155   :  { %v1670_v12 = vpop.permute.xlu1 %1669 }
 0x156   :  { %v1668_v13 = vpop.permute.xlu0 %1667  ;;  %v2314_v48 = vsel %vm2298_vm6, %v2249_v44, %v1670_v12 }
 0x157   :  { %1397 = vrot.lane.b32.xlu1 %v1220_v4, %s7568_s14 }
 0x158   :  { %1395 = vrot.lane.b32.xlu0 %v931_v37, %s7568_s14  ;;  %v2312_v37 = vsel %vm2298_vm6, %v2247_v22, %v1668_v13  ;;  %v598_v13 = vld [vmem:[#allocation2 + $0x1b2] sm:$0xff]  ;;  %v793_v22 = vld [vmem:[#allocation2 + $0x1e9] sm:$0xff] }
 0x159   :  { %v1766_v19 = vpop.permute.xlu1 %1765 }
 0x15a   :  { %v1764_v21 = vpop.permute.xlu0 %1763  ;;  %v2379_v45 = vsel %vm2363_vm7, %v2314_v48, %v1766_v19  ;;  %v188_v19 = vld [vmem:[%s12040_s0 + $0x198] sm:$0xff] }
 0x15b   :  { %1493 = vrot.lane.b32.xlu1 %v741_v14, %s7570_s16  ;;  %v2377_v40 = vsel %vm2363_vm7, %v2312_v37, %v1764_v21  ;;  %v647_v21 = vpack.c.bf16 %v601_v10, %v600_v9  ;;  %253 = vst.msk [vmem:[#allocation2 + $0x2a9] sm:$0xff] %vm27_vm0, %v188_v19  ;;  %v839_v37 = vpack.c.bf16 %v793_v22, %v792_v32  ;;  %v1177_v10 = vld [vmem:[#allocation2 + $0x1fa] sm:$0xff] }
 0x15c   :  { %1491 = vrot.lane.b32.xlu0 %v8362_v49, %s7570_s16 }
 0x15d   :  { %v1862_v28 = vpop.permute.xlu1 %1861 }
 0x15e   :  { %v1860_v31 = vpop.permute.xlu0 %1859  ;;  %v2444_v53 = vsel %vm2428_vm8, %v2379_v45, %v1862_v28  ;;  %v695_v28 = vld [vmem:[#allocation2 + $0x1d0] sm:$0xff] }
 0x15f   :  { %1589 = vrot.lane.b32.xlu1 %v837_v23, %s7571_s17  ;;  %v2442_v42 = vsel %vm2428_vm8, %v2377_v40, %v1860_v31  ;;  %v8452_v31 = vpack.c.bf16 %v695_v28, %v694_v27  ;;  %v796_v28 = vld [vmem:[#allocation2 + $0x211] sm:$0xff] }
 0x160   :  { %1587 = vrot.lane.b32.xlu0 %v1124_v60, %s7571_s17  ;;  %v503_v60 = vld [vmem:[#allocation2 + $0x1b9] sm:$0xff] }
 0x161   :  { %v8414_v41 = vpop.permute.xlu1 %1287  ;;  %v550_v63 = vpack.c.bf16 %v503_v60, %v502_v59 }
 0x162   :  { %v1956_v43 = vpop.permute.xlu0 %1955  ;;  %v2033_v35 = vsel %vm27_vm0, %v8155_v47, %v8414_v41  ;;  %v935_v41 = vpack.c.bf16 %v889_v39, %v888_v38 }
 0x163   :  { %v2507_v33 = vsel %vm2493_vm9, %v2442_v42, %v1956_v43  ;;  %1685 = vrot.lane.b32.xlu1 %v933_v34, %s7572_s18  ;;  %v189_v42 = vld [vmem:[%s12040_s0 + $0x1a0] sm:$0xff] }
 0x164   :  { %1683 = vrot.lane.b32.xlu0 %v1220_v4, %s7572_s18  ;;  %6991 = vmatprep.mubr.msk.bf16.mxu0 %vm2578_vm10, %v2507_v33  ;;  %v1173_v4 = vld [vmem:[#allocation2 + $0x19a] sm:$0xff]  ;;  %v190_v33 = vld [vmem:[%s12040_s0 + $0x1a8] sm:$0xff]  ;;  %254 = vst.msk [vmem:[#allocation2 + $0x2b9] sm:$0xff] %vm27_vm0, %v189_v42 }
 0x165   :  { %v8425_v52 = vpop.permute.xlu1 %1289  ;;  %v1222_v8 = vpack.c.bf16 %v1174_v5, %v1173_v4  ;;  %255 = vst.msk [vmem:[#allocation2 + $0x2c1] sm:$0xff] %vm27_vm0, %v190_v33 }
 0x166   :  { %v1958_v55 = vpop.permute.xlu0 %1957 }
 0x167   :  { %v2509_v57 = vsel %vm2493_vm9, %v2444_v53, %v1958_v55  ;;  %1781 = vrot.lane.b32.xlu1 %v1030_v46, %s7573_s27  ;;  %v2036_v46 = vsel %vm27_vm0, %v8165_v56, %v8425_v52  ;;  %v8486_v52 = vpack.c.bf16 %v986_v50, %v985_v11 }
 0x168   :  { %1779 = vrot.lane.b32.xlu0 %v741_v14, %s7573_s27  ;;  %6992 = vmatmul.mubr.msk.bf16.gmra.mrb[12].mxu0 %vm2578_vm10, %v2509_v57  ;;  %v599_v14 = vld [vmem:[#allocation2 + $0x1ba] sm:$0xff] }
 0x169   :  { %v8432_v61 = vpop.permute.xlu1 %1385 }
 0x16a   :  { %v1384_v62 = vpop.permute.xlu0 %1383  ;;  %v2123_v45 = vsel %vm2103_vm3, %v2036_v46, %v8432_v61  ;;  %v1081_v61 = vld [vmem:[#allocation2 + $0x1f9] sm:$0xff]  ;;  %v990_v46 = vld [vmem:[#allocation2 + $0x230] sm:$0xff] }
 0x16b   :  { %1877 = vrot.lane.b32.xlu1 %v1126_v58, %s7574_s11  ;;  %v2121_v40 = vsel %vm2103_vm3, %v2033_v35, %v1384_v62  ;;  %v893_v35 = vld [vmem:[#allocation2 + $0x21a] sm:$0xff] }
 0x16c   :  { %1875 = vrot.lane.b32.xlu0 %v837_v23, %s7574_s11  ;;  %v646_v23 = vpack.c.bf16 %v599_v14, %v598_v13 }
 0x16d   :  { %v1482_v3 = vpop.permute.xlu1 %1481 }
 0x16e   :  { %v1480_v6 = vpop.permute.xlu0 %1479  ;;  %v2188_v57 = vsel %vm2168_vm4, %v2123_v45, %v1482_v3 }
 0x16f   :  { %1303 = vrot.lane.b32.xlu1 %v550_v63, %s7569_s15  ;;  %v2186_v43 = vsel %vm2168_vm4, %v2121_v40, %v1480_v6  ;;  %v1082_v63 = vld [vmem:[#allocation2 + $0x201] sm:$0xff] }
 0x170   :  { %1971 = vrot.lane.b32.xlu0 %v933_v34, %s7575_s12  ;;  %v1128_v6 = vpack.c.bf16 %v1082_v63, %v1081_v61  ;;  %v193_v40 = vld [vmem:[%s12040_s0 + $0x1c0] sm:$0xff] }
 0x171   :  { %v1578_v12 = vpop.permute.xlu1 %1577  ;;  %258 = vst.msk [vmem:[#allocation2 + $0x2e9] sm:$0xff] %vm27_vm0, %v193_v40 }
 0x172   :  { %v1576_v17 = vpop.permute.xlu0 %1575  ;;  %v2253_v60 = vsel %vm2233_vm5, %v2188_v57, %v1578_v12  ;;  %v1178_v12 = vld [vmem:[#allocation2 + $0x202] sm:$0xff] }
 0x173   :  { %1305 = vrot.lane.b32.xlu1 %v551_v7, %s7569_s15  ;;  %v2251_v47 = vsel %vm2233_vm5, %v2186_v43, %v1576_v17  ;;  %v1224_v14 = vpack.c.bf16 %v1178_v12, %v1177_v10  ;;  %v191_v17 = vld [vmem:[%s12040_s0 + $0x1b0] sm:$0xff]  ;;  %v194_v43 = vld [vmem:[%s12040_s0 + $0x1c8] sm:$0xff] }
 0x174   :  { %1973 = vrot.lane.b32.xlu0 %v1222_v8, %s7575_s12  ;;  %256 = vst.msk [vmem:[#allocation2 + $0x2d1] sm:$0xff] %vm27_vm0, %v191_v17  ;;  %259 = vst.msk [vmem:[#allocation2 + $0x2f1] sm:$0xff] %vm27_vm0, %v194_v43  ;;  %v704_v17 = vld [vmem:[#allocation2 + $0x240] sm:$0xff] }
 0x175   :  { %v1674_v26 = vpop.permute.xlu1 %1673 }
 0x176   :  { %v1672_v29 = vpop.permute.xlu0 %1671  ;;  %v2318_v62 = vsel %vm2298_vm6, %v2253_v60, %v1674_v26  ;;  %v1085_v60 = vld [vmem:[#allocation2 + $0x229] sm:$0xff] }
 0x177   :  { %1401 = vrot.lane.b32.xlu1 %v647_v21, %s7568_s14  ;;  %v2316_v48 = vsel %vm2298_vm6, %v2251_v47, %v1672_v29  ;;  %v797_v29 = vld [vmem:[#allocation2 + $0x219] sm:$0xff] }
 0x178   :  { %1399 = vrot.lane.b32.xlu0 %v646_v23, %s7568_s14  ;;  %v700_v23 = vld [vmem:[#allocation2 + $0x210] sm:$0xff] }
 0x179   :  { %v1770_v34 = vpop.permute.xlu1 %1769  ;;  %v8514_v27 = vpack.c.bf16 %v701_v24, %v700_v23 }
 0x17a   :  { %v1768_v0 = vpop.permute.xlu0 %1767  ;;  %v2383_v1 = vsel %vm2363_vm7, %v2318_v62, %v1770_v34  ;;  %v841_v34 = vpack.c.bf16 %v797_v29, %v796_v28 }
 0x17b   :  { %1497 = vrot.lane.b32.xlu1 %v8449_v30, %s7570_s16  ;;  %v2381_v53 = vsel %vm2363_vm7, %v2316_v48, %v1768_v0 }
 0x17c   :  { %1495 = vrot.lane.b32.xlu0 %v8452_v31, %s7570_s16 }
 0x17d   :  { %v1866_v36 = vpop.permute.xlu1 %1865 }
 0x17e   :  { %v1864_v44 = vpop.permute.xlu0 %1863  ;;  %v2448_v3 = vsel %vm2428_vm8, %v2383_v1, %v1866_v36 }
 0x17f   :  { %1593 = vrot.lane.b32.xlu1 %v839_v37, %s7571_s17  ;;  %v2446_v58 = vsel %vm2428_vm8, %v2381_v53, %v1864_v44 }
 0x180   :  { %1591 = vrot.lane.b32.xlu0 %v551_v7, %s7571_s17 }
 0x181   :  { %v1292_v55 = vpop.permute.xlu1 %1291 }
 0x182   :  { %v1960_v59 = vpop.permute.xlu0 %1959  ;;  %v2039_v0 = vsel %vm27_vm0, %v8207_v20, %v1292_v55 }
 0x183   :  { %v2511_v56 = vsel %vm2493_vm9, %v2446_v58, %v1960_v59  ;;  %1689 = vrot.lane.b32.xlu1 %v935_v41, %s7572_s18 }
 0x184   :  { %1687 = vrot.lane.b32.xlu0 %v647_v21, %s7572_s18  ;;  %6995 = vmatprep.mubr.msk.bf16.mxu0 %vm2578_vm10, %v2511_v56  ;;  %v192_v21 = vld [vmem:[%s12040_s0 + $0x1b8] sm:$0xff] }
 0x185   :  { %v1294_v2 = vpop.permute.xlu1 %1293  ;;  %257 = vst.msk [vmem:[#allocation2 + $0x2d9] sm:$0xff] %vm27_vm0, %v192_v21  ;;  %v1086_v56 = vld [vmem:[#allocation2 + $0x231] sm:$0xff] }
 0x186   :  { %v1962_v4 = vpop.permute.xlu0 %1961  ;;  %v2042_v33 = vsel %vm27_vm0, %v8241_v54, %v1294_v2 }
 0x187   :  { %v2513_v5 = vsel %vm2493_vm9, %v2448_v3, %v1962_v4  ;;  %1785 = vrot.lane.b32.xlu1 %v8486_v52, %s7573_s27  ;;  %v1130_v3 = vpack.c.bf16 %v1086_v56, %v1085_v60 }
 0x188   :  { %1783 = vrot.lane.b32.xlu0 %v8449_v30, %s7573_s27  ;;  %6996 = vmatmul.mubr.msk.bf16.gmra.mrb[16].mxu0 %vm2578_vm10, %v2513_v5 }
 0x189   :  { %v1390_v7 = vpop.permute.xlu1 %1389 }
 0x18a   :  { %v1388_v8 = vpop.permute.xlu0 %1387  ;;  %v2127_v48 = vsel %vm2103_vm3, %v2042_v33, %v1390_v7  ;;  %v1181_v7 = vld [vmem:[#allocation2 + $0x22a] sm:$0xff]  ;;  %v994_v33 = vld [vmem:[#allocation2 + $0x260] sm:$0xff] }
 0x18b   :  { %1881 = vrot.lane.b32.xlu1 %v1128_v6, %s7574_s11  ;;  %v2125_v38 = vsel %vm2103_vm3, %v2039_v0, %v1388_v8  ;;  %v1182_v8 = vld [vmem:[#allocation2 + $0x232] sm:$0xff]  ;;  %v897_v0 = vld [vmem:[#allocation2 + $0x24a] sm:$0xff] }
 0x18c   :  { %1879 = vrot.lane.b32.xlu0 %v839_v37, %s7574_s11  ;;  %v1226_v10 = vpack.c.bf16 %v1182_v8, %v1181_v7 }
 0x18d   :  { %v1486_v9 = vpop.permute.xlu1 %1485 }
 0x18e   :  { %v1484_v13 = vpop.permute.xlu0 %1483  ;;  %v2192_v45 = vsel %vm2168_vm4, %v2127_v48, %v1486_v9 }
 0x18f   :  { %1307 = vrot.lane.b32.xlu1 %v839_v37, %s7569_s15  ;;  %v892_v37 = vld [vmem:[#allocation2 + $0x212] sm:$0xff]  ;;  %v2190_v36 = vsel %vm2168_vm4, %v2125_v38, %v1484_v13  ;;  %v197_v38 = vld [vmem:[%s12040_s0 + $0x1e0] sm:$0xff] }
 0x190   :  { %1975 = vrot.lane.b32.xlu0 %v935_v41, %s7575_s12  ;;  %v937_v44 = vpack.c.bf16 %v893_v35, %v892_v37  ;;  %v195_v13 = vld [vmem:[%s12040_s0 + $0x1d0] sm:$0xff]  ;;  %262 = vst.msk [vmem:[#allocation2 + $0x319] sm:$0xff] %vm27_vm0, %v197_v38 }
 0x191   :  { %v1582_v15 = vpop.permute.xlu1 %1581  ;;  %260 = vst.msk [vmem:[#allocation2 + $0x301] sm:$0xff] %vm27_vm0, %v195_v13  ;;  %v708_v13 = vld [vmem:[#allocation2 + $0x270] sm:$0xff] }
 0x192   :  { %v1580_v19 = vpop.permute.xlu0 %1579  ;;  %v2257_v57 = vsel %vm2233_vm5, %v2192_v45, %v1582_v15  ;;  %v196_v15 = vld [vmem:[%s12040_s0 + $0x1d8] sm:$0xff] }
 0x193   :  { %1309 = vrot.lane.b32.xlu1 %v1128_v6, %s7569_s15  ;;  %v2255_v20 = vsel %vm2233_vm5, %v2190_v36, %v1580_v19  ;;  %261 = vst.msk [vmem:[#allocation2 + $0x309] sm:$0xff] %vm27_vm0, %v196_v15  ;;  %v705_v19 = vld [vmem:[#allocation2 + $0x248] sm:$0xff] }
 0x194   :  { %1977 = vrot.lane.b32.xlu0 %v1224_v14, %s7575_s12  ;;  %v747_v24 = vpack.c.bf16 %v705_v19, %v704_v17  ;;  %v198_v36 = vld [vmem:[%s12040_s0 + $0x1e8] sm:$0xff] }
 0x195   :  { %v1678_v25 = vpop.permute.xlu1 %1677  ;;  %263 = vst.msk [vmem:[#allocation2 + $0x321] sm:$0xff] %vm27_vm0, %v198_v36 }
 0x196   :  { %v1676_v26 = vpop.permute.xlu0 %1675  ;;  %v2322_v59 = vsel %vm2298_vm6, %v2257_v57, %v1678_v25  ;;  %v800_v25 = vld [vmem:[#allocation2 + $0x241] sm:$0xff]  ;;  %v1089_v57 = vld [vmem:[#allocation2 + $0x259] sm:$0xff] }
 0x197   :  { %1405 = vrot.lane.b32.xlu1 %v1224_v14, %s7568_s14  ;;  %v2320_v47 = vsel %vm2298_vm6, %v2255_v20, %v1676_v26  ;;  %v801_v26 = vld [vmem:[#allocation2 + $0x249] sm:$0xff] }
 0x198   :  { %1403 = vrot.lane.b32.xlu0 %v935_v41, %s7568_s14  ;;  %v989_v41 = vld [vmem:[#allocation2 + $0x228] sm:$0xff] }
 0x199   :  { %v1774_v32 = vpop.permute.xlu1 %1773  ;;  %v8546_v58 = vpack.c.bf16 %v990_v46, %v989_v41 }
 0x19a   :  { %v1772_v22 = vpop.permute.xlu0 %1771  ;;  %v2387_v62 = vsel %vm2363_vm7, %v2322_v59, %v1774_v32  ;;  %v843_v32 = vpack.c.bf16 %v801_v26, %v800_v25 }
 0x19b   :  { %1501 = vrot.lane.b32.xlu1 %v8514_v27, %s7570_s16  ;;  %v2385_v11 = vsel %vm2363_vm7, %v2320_v47, %v1772_v22 }
 0x19c   :  { %1499 = vrot.lane.b32.xlu0 %v8486_v52, %s7570_s16 }
 0x19d   :  { %v1870_v39 = vpop.permute.xlu1 %1869 }
 0x19e   :  { %v1868_v42 = vpop.permute.xlu0 %1867  ;;  %v2452_v63 = vsel %vm2428_vm8, %v2387_v62, %v1870_v39 }
 0x19f   :  { %1597 = vrot.lane.b32.xlu1 %v841_v34, %s7571_s17  ;;  %v2450_v53 = vsel %vm2428_vm8, %v2385_v11, %v1868_v42 }
 0x1a0   :  { %1595 = vrot.lane.b32.xlu0 %v1128_v6, %s7571_s17 }
 0x1a1   :  { %v1296_v50 = vpop.permute.xlu1 %1295 }
 0x1a2   :  { %v1964_v55 = vpop.permute.xlu0 %1963  ;;  %v2045_v22 = vsel %vm27_vm0, %v8270_v18, %v1296_v50 }
 0x1a3   :  { %v2515_v54 = vsel %vm2493_vm9, %v2450_v53, %v1964_v55  ;;  %1693 = vrot.lane.b32.xlu1 %v937_v44, %s7572_s18 }
 0x1a4   :  { %1691 = vrot.lane.b32.xlu0 %v1224_v14, %s7572_s18  ;;  %6999 = vmatprep.mubr.msk.bf16.mxu0 %vm2578_vm10, %v2515_v54  ;;  %v1090_v54 = vld [vmem:[#allocation2 + $0x261] sm:$0xff] }
 0x1a5   :  { %v1298_v61 = vpop.permute.xlu1 %1297 }
 0x1a6   :  { %v1966_v1 = vpop.permute.xlu0 %1965  ;;  %v2048_v43 = vsel %vm27_vm0, %v8302_v51, %v1298_v61 }
 0x1a7   :  { %v2517_v2 = vsel %vm2493_vm9, %v2452_v63, %v1966_v1  ;;  %1789 = vrot.lane.b32.xlu1 %v8546_v58, %s7573_s27  ;;  %v1132_v63 = vpack.c.bf16 %v1090_v54, %v1089_v57 }
 0x1a8   :  { %1787 = vrot.lane.b32.xlu0 %v8514_v27, %s7573_s27  ;;  %7000 = vmatmul.mubr.msk.bf16.gmra.mrb[20].mxu0 %vm2578_vm10, %v2517_v2 }
 0x1a9   :  { %v1394_v4 = vpop.permute.xlu1 %1393 }
 0x1aa   :  { %v1392_v5 = vpop.permute.xlu0 %1391  ;;  %v2131_v47 = vsel %vm2103_vm3, %v2048_v43, %v1394_v4  ;;  %v1185_v4 = vld [vmem:[#allocation2 + $0x25a] sm:$0xff] }
 0x1ab   :  { %1885 = vrot.lane.b32.xlu1 %v1130_v3, %s7574_s11  ;;  %v2129_v37 = vsel %vm2103_vm3, %v2045_v22, %v1392_v5  ;;  %v1186_v5 = vld [vmem:[#allocation2 + $0x262] sm:$0xff] }
 0x1ac   :  { %1883 = vrot.lane.b32.xlu0 %v841_v34, %s7574_s11  ;;  %v8619_v7 = vpack.c.bf16 %v1186_v5, %v1185_v4 }
 0x1ad   :  { %v1490_v6 = vpop.permute.xlu1 %1489 }
 0x1ae   :  { %v1488_v9 = vpop.permute.xlu0 %1487  ;;  %v2196_v48 = vsel %vm2168_vm4, %v2131_v47, %v1490_v6 }
 0x1af   :  { %1311 = vrot.lane.b32.xlu1 %v841_v34, %s7569_s15  ;;  %v896_v34 = vld [vmem:[#allocation2 + $0x242] sm:$0xff]  ;;  %v2194_v39 = vsel %vm2168_vm4, %v2129_v37, %v1488_v9  ;;  %v199_v9 = vld [vmem:[%s12040_s0 + $0x1f0] sm:$0xff] }
 0x1b0   :  { %1979 = vrot.lane.b32.xlu0 %v937_v44, %s7575_s12  ;;  %v939_v42 = vpack.c.bf16 %v897_v0, %v896_v34  ;;  %264 = vst.msk [vmem:[#allocation2 + $0x331] sm:$0xff] %vm27_vm0, %v199_v9 }
 0x1b1   :  { %v1586_v12 = vpop.permute.xlu1 %1585 }
 0x1b2   :  { %v1584_v14 = vpop.permute.xlu0 %1583  ;;  %v2261_v45 = vsel %vm2233_vm5, %v2196_v48, %v1586_v12  ;;  %v200_v12 = vld [vmem:[%s12040_s0 + $0x1f8] sm:$0xff] }
 0x1b3   :  { %1313 = vrot.lane.b32.xlu1 %v1130_v3, %s7569_s15  ;;  %v2259_v18 = vsel %vm2233_vm5, %v2194_v39, %v1584_v14  ;;  %265 = vst.msk [vmem:[#allocation2 + $0x339] sm:$0xff] %vm27_vm0, %v200_v12  ;;  %v709_v14 = vld [vmem:[#allocation2 + $0x278] sm:$0xff] }
 0x1b4   :  { %1981 = vrot.lane.b32.xlu0 %v1226_v10, %s7575_s12  ;;  %v749_v19 = vpack.c.bf16 %v709_v14, %v708_v13  ;;  %v1189_v13 = vld [vmem:[#allocation2 + $0x28a] sm:$0xff]  ;;  %v1190_v14 = vld [vmem:[#allocation2 + $0x292] sm:$0xff] }
 0x1b5   :  { %v1682_v21 = vpop.permute.xlu1 %1681 }
 0x1b6   :  { %v1680_v23 = vpop.permute.xlu0 %1679  ;;  %v2326_v55 = vsel %vm2298_vm6, %v2261_v45, %v1682_v21  ;;  %v804_v21 = vld [vmem:[#allocation2 + $0x271] sm:$0xff] }
 0x1b7   :  { %1409 = vrot.lane.b32.xlu1 %v1226_v10, %s7568_s14  ;;  %v2324_v20 = vsel %vm2298_vm6, %v2259_v18, %v1680_v23  ;;  %v805_v23 = vld [vmem:[#allocation2 + $0x279] sm:$0xff] }
 0x1b8   :  { %1407 = vrot.lane.b32.xlu0 %v937_v44, %s7568_s14  ;;  %v993_v44 = vld [vmem:[#allocation2 + $0x258] sm:$0xff] }
 0x1b9   :  { %v1778_v28 = vpop.permute.xlu1 %1777  ;;  %v8603_v53 = vpack.c.bf16 %v994_v33, %v993_v44  ;;  %v997_v44 = vld [vmem:[#allocation2 + $0x288] sm:$0xff]  ;;  %v998_v33 = vld [vmem:[#allocation2 + $0x290] sm:$0xff] }
 0x1ba   :  { %v1776_v29 = vpop.permute.xlu0 %1775  ;;  %v2391_v59 = vsel %vm2363_vm7, %v2326_v55, %v1778_v28  ;;  %v845_v28 = vpack.c.bf16 %v805_v23, %v804_v21  ;;  %v8672_v54 = vpack.c.bf16 %v998_v33, %v997_v44  ;;  %v712_v23 = vld [vmem:[#allocation2 + $0x2a0] sm:$0xff] }
 0x1bb   :  { %1505 = vrot.lane.b32.xlu1 %v747_v24, %s7570_s16  ;;  %v2389_v41 = vsel %vm2363_vm7, %v2324_v20, %v1776_v29  ;;  %v900_v29 = vld [vmem:[#allocation2 + $0x272] sm:$0xff] }
 0x1bc   :  { %1503 = vrot.lane.b32.xlu0 %v8546_v58, %s7570_s16 }
 0x1bd   :  { %v1874_v35 = vpop.permute.xlu1 %1873 }
 0x1be   :  { %v1872_v40 = vpop.permute.xlu0 %1871  ;;  %v2456_v56 = vsel %vm2428_vm8, %v2391_v59, %v1874_v35 }
 0x1bf   :  { %1601 = vrot.lane.b32.xlu1 %v843_v32, %s7571_s17  ;;  %v2454_v11 = vsel %vm2428_vm8, %v2389_v41, %v1872_v40 }
 0x1c0   :  { %1599 = vrot.lane.b32.xlu0 %v1130_v3, %s7571_s17 }
 0x1c1   :  { %v1300_v46 = vpop.permute.xlu1 %1299 }
 0x1c2   :  { %v1968_v50 = vpop.permute.xlu0 %1967  ;;  %v2051_v22 = vsel %vm27_vm0, %v8330_v16, %v1300_v46 }
 0x1c3   :  { %v2519_v51 = vsel %vm2493_vm9, %v2454_v11, %v1968_v50  ;;  %1697 = vrot.lane.b32.xlu1 %v939_v42, %s7572_s18 }
 0x1c4   :  { %1695 = vrot.lane.b32.xlu0 %v1226_v10, %s7572_s18  ;;  %7003 = vmatprep.mubr.msk.bf16.mxu0 %vm2578_vm10, %v2519_v51 }
 0x1c5   :  { %v1302_v60 = vpop.permute.xlu1 %1301 }
 0x1c6   :  { %v1970_v62 = vpop.permute.xlu0 %1969  ;;  %v2054_v0 = vsel %vm27_vm0, %v8362_v49, %v1302_v60 }
 0x1c7   :  { %v2521_v61 = vsel %vm2493_vm9, %v2456_v56, %v1970_v62  ;;  %1793 = vrot.lane.b32.xlu1 %v8603_v53, %s7573_s27 }
 0x1c8   :  { %1791 = vrot.lane.b32.xlu0 %v747_v24, %s7573_s27  ;;  %7004 = vmatmul.mubr.msk.bf16.gmra.mrb[24].mxu0 %vm2578_vm10, %v2521_v61 }
 0x1c9   :  { %v1398_v1 = vpop.permute.xlu1 %1397 }
 0x1ca   :  { %v1396_v2 = vpop.permute.xlu0 %1395  ;;  %v2135_v39 = vsel %vm2103_vm3, %v2054_v0, %v1398_v1  ;;  %v1094_v1 = vld [vmem:[#allocation2 + $0x291] sm:$0xff] }
 0x1cb   :  { %1889 = vrot.lane.b32.xlu1 %v1132_v63, %s7574_s11  ;;  %v2133_v37 = vsel %vm2103_vm3, %v2051_v22, %v1396_v2 }
 0x1cc   :  { %1887 = vrot.lane.b32.xlu0 %v843_v32, %s7574_s11 }
 0x1cd   :  { %v1494_v3 = vpop.permute.xlu1 %1493 }
 0x1ce   :  { %v1492_v6 = vpop.permute.xlu0 %1491  ;;  %v2200_v47 = vsel %vm2168_vm4, %v2135_v39, %v1494_v3 }
 0x1cf   :  { %1315 = vrot.lane.b32.xlu1 %v843_v32, %s7569_s15  ;;  %v901_v32 = vld [vmem:[#allocation2 + $0x27a] sm:$0xff]  ;;  %v2198_v40 = vsel %vm2168_vm4, %v2133_v37, %v1492_v6 }
 0x1d0   :  { %1983 = vrot.lane.b32.xlu0 %v939_v42, %s7575_s12  ;;  %v8653_v16 = vpack.c.bf16 %v901_v32, %v900_v29  ;;  %v407_v29 = vld [vmem:[#allocation2 + $0x1b8] sm:$0xff]  ;;  %v808_v37 = vld [vmem:[#allocation2 + $0x2a1] sm:$0xff] }
 0x1d1   :  { %v1590_v8 = vpop.permute.xlu1 %1589 }
 0x1d2   :  { %v1588_v10 = vpop.permute.xlu0 %1587  ;;  %v2265_v51 = vsel %vm2233_vm5, %v2200_v47, %v1590_v8 }
 0x1d3   :  { %1317 = vrot.lane.b32.xlu1 %v1132_v63, %s7569_s15 }
 0x1d4   :  { %1985 = vrot.lane.b32.xlu0 %v8619_v7, %s7575_s12 }
 0x1d5   :  { %v1686_v15 = vpop.permute.xlu1 %1685 }
 0x1d6   :  { %v1684_v17 = vpop.permute.xlu0 %1683  ;;  %v2330_v61 = vsel %vm2298_vm6, %v2265_v51, %v1686_v15 }
 0x1d7   :  { %1413 = vrot.lane.b32.xlu1 %v8619_v7, %s7568_s14 }
 0x1d8   :  { %1411 = vrot.lane.b32.xlu0 %v939_v42, %s7568_s14  ;;  %v2263_v42 = vsel %vm2233_vm5, %v2198_v40, %v1588_v10 }
 0x1d9   :  { %v1782_v24 = vpop.permute.xlu1 %1781  ;;  %v2328_v41 = vsel %vm2298_vm6, %v2263_v42, %v1684_v17  ;;  %v8696_v17 = vpack.c.bf16 %v1190_v14, %v1189_v13 }
 0x1da   :  { %v1780_v25 = vpop.permute.xlu0 %1779  ;;  %v2395_v2 = vsel %vm2363_vm7, %v2330_v61, %v1782_v24  ;;  %v713_v24 = vld [vmem:[#allocation2 + $0x2a8] sm:$0xff] }
 0x1db   :  { %v8635_v26 = vpop.f32.mrb[0].mxu0  ;;  %1509 = vrot.lane.b32.xlu1 %v749_v19, %s7570_s16  ;;  %v2393_v46 = vsel %vm2363_vm7, %v2328_v41, %v1780_v25  ;;  %v406_v25 = vld [vmem:[#allocation2 + $0x1b0] sm:$0xff] }
 0x1dc   :  { %1507 = vrot.lane.b32.xlu0 %v8603_v53, %s7570_s16  ;;  %v8642_v34 = vpop.f32.mrb[1].mxu0  ;;  %v3008_v48 = vmul.f32 %v8635_v26, %v8635_v26  ;;  %v454_v0 = vpack.c.bf16 %v407_v29, %v406_v25 }
 0x1dd   :  { %v8647_v35 = vpop.f32.mrb[2].mxu0  ;;  %v1878_v38 = vpop.permute.xlu1 %1877  ;;  %v3006_v43 = vmul.f32 %v8642_v34, %v8642_v34 }
 0x1de   :  { %v1876_v36 = vpop.permute.xlu0 %1875  ;;  %v8651_v18 = vpop.f32.mrb[3].mxu0  ;;  %v3009_v59 = vmul.f32 %v8647_v35, %v8647_v35  ;;  %v2460_v5 = vsel %vm2428_vm8, %v2395_v2, %v1878_v38  ;;  %v809_v38 = vld [vmem:[#allocation2 + $0x2a9] sm:$0xff] }
 0x1df   :  { %v2936_v49 = vadd.f32 %v8651_v18, %v8642_v34  ;;  %v3007_v20 = vmul.f32 %v8651_v18, %v8651_v18  ;;  %1605 = vrot.lane.b32.xlu1 %v845_v28, %s7571_s17  ;;  %v2458_v55 = vsel %vm2428_vm8, %v2393_v46, %v1876_v36  ;;  %v8711_v42 = vpack.c.bf16 %v809_v38, %v808_v37 }
 0x1e0   :  { %1603 = vrot.lane.b32.xlu0 %v1132_v63, %s7571_s17  ;;  %v1093_v63 = vld [vmem:[#allocation2 + $0x289] sm:$0xff] }
 0x1e1   :  { %v2937_v11 = vadd.f32 %v8635_v26, %v2936_v49  ;;  %v3070_v50 = vadd.f32 %v3007_v20, %v3006_v43  ;;  %v1304_v45 = vpop.permute.xlu1 %1303  ;;  %v1134_v9 = vpack.c.bf16 %v1094_v1, %v1093_v63  ;;  %v904_v43 = vld [vmem:[#allocation2 + $0x2a2] sm:$0xff]  ;;  %v905_v49 = vld [vmem:[#allocation2 + $0x2aa] sm:$0xff] }
 0x1e2   :  { %v1972_v57 = vpop.permute.xlu0 %1971  ;;  %v2057_v20 = vsel %vm27_vm0, %v454_v0, %v1304_v45 }
 0x1e3   :  { %v3071_v60 = vadd.f32 %v3070_v50, %v3008_v48  ;;  %v2523_v56 = vsel %vm2493_vm9, %v2458_v55, %v1972_v57  ;;  %1701 = vrot.lane.b32.xlu1 %v8653_v16, %s7572_s18  ;;  %v2938_v62 = vadd.f32 %v8647_v35, %v2937_v11  ;;  %v943_v55 = vpack.c.bf16 %v905_v49, %v904_v43 }
 0x1e4   :  { %1699 = vrot.lane.b32.xlu0 %v8619_v7, %s7572_s18  ;;  %7007 = vmatprep.mubr.msk.bf16.mxu0 %vm2578_vm10, %v2523_v56  ;;  %v1001_v56 = vld [vmem:[#allocation2 + $0x2b8] sm:$0xff] }
 0x1e5   :  { %v1306_v3 = vpop.permute.xlu1 %1305  ;;  %v3072_v4 = vadd.f32 %v3071_v60, %v3009_v59 }
 0x1e6   :  { %v1974_v6 = vpop.permute.xlu0 %1973 }
 0x1e7   :  { %v2525_v8 = vsel %vm2493_vm9, %v2460_v5, %v1974_v6  ;;  %1797 = vrot.lane.b32.xlu1 %v8672_v54, %s7573_s27 }
 0x1e8   :  { %1795 = vrot.lane.b32.xlu0 %v749_v19, %s7573_s27  ;;  %7008 = vmatmul.mubr.msk.bf16.gmra.mrb[28].mxu0 %vm2578_vm10, %v2525_v8 }
 0x1e9   :  { %v1402_v7 = vpop.permute.xlu1 %1401 }
 0x1ea   :  { %v1400_v10 = vpop.permute.xlu0 %1399 }
 0x1eb   :  { %1893 = vrot.lane.b32.xlu1 %v1134_v9, %s7574_s11  ;;  %v2137_v33 = vsel %vm2103_vm3, %v2057_v20, %v1400_v10 }
 0x1ec   :  { %1891 = vrot.lane.b32.xlu0 %v845_v28, %s7574_s11 }
 0x1ed   :  { %v1498_v12 = vpop.permute.xlu1 %1497 }
 0x1ee   :  { %v1496_v15 = vpop.permute.xlu0 %1495 }
 0x1ef   :  { %1319 = vrot.lane.b32.xlu1 %v845_v28, %s7569_s15  ;;  %v8703_v28 = vpack.c.bf16 %v713_v24, %v712_v23  ;;  %v2202_v50 = vsel %vm2168_vm4, %v2137_v33, %v1496_v15  ;;  %v716_v33 = vld [vmem:[#allocation2 + $0x2d0] sm:$0xff] }
 0x1f0   :  { %1987 = vrot.lane.b32.xlu0 %v8653_v16, %s7575_s12 }
 0x1f1   :  { %v1594_v19 = vpop.permute.xlu1 %1593 }
 0x1f2   :  { %v1592_v21 = vpop.permute.xlu0 %1591 }
 0x1f3   :  { %1321 = vrot.lane.b32.xlu1 %v1134_v9, %s7569_s15 }
 0x1f4   :  { %1989 = vrot.lane.b32.xlu0 %v8696_v17, %s7575_s12 }
 0x1f5   :  { %v1690_v32 = vpop.permute.xlu1 %1689 }
 0x1f6   :  { %v1688_v22 = vpop.permute.xlu0 %1687 }
 0x1f7   :  { %1417 = vrot.lane.b32.xlu1 %v8696_v17, %s7568_s14 }
 0x1f8   :  { %1415 = vrot.lane.b32.xlu0 %v8653_v16, %s7568_s14  ;;  %v2060_v16 = vsel %vm27_vm0, %v8452_v31, %v1306_v3  ;;  %v2267_v31 = vsel %vm2233_vm5, %v2202_v50, %v1592_v21  ;;  %v1098_v21 = vld [vmem:[#allocation2 + $0x2c1] sm:$0xff]  ;;  %v813_v50 = vld [vmem:[#allocation2 + $0x2d9] sm:$0xff] }
 0x1f9   :  { %v1786_v39 = vpop.permute.xlu1 %1785  ;;  %v2139_v11 = vsel %vm2103_vm3, %v2060_v16, %v1402_v7  ;;  %v2332_v63 = vsel %vm2298_vm6, %v2267_v31, %v1688_v22 }
 0x1fa   :  { %v1784_v40 = vpop.permute.xlu0 %1783  ;;  %v2204_v61 = vsel %vm2168_vm4, %v2139_v11, %v1498_v12 }
 0x1fb   :  { %v8707_v36 = vpop.f32.mrb[4].mxu0  ;;  %1513 = vrot.lane.b32.xlu1 %v8703_v28, %s7570_s16  ;;  %v2397_v1 = vsel %vm2363_vm7, %v2332_v63, %v1784_v40  ;;  %v2269_v6 = vsel %vm2233_vm5, %v2204_v61, %v1594_v19  ;;  %v1097_v19 = vld [vmem:[#allocation2 + $0x2b9] sm:$0xff]  ;;  %v1194_v40 = vld [vmem:[#allocation2 + $0x2c2] sm:$0xff] }
 0x1fc   :  { %1511 = vrot.lane.b32.xlu0 %v8672_v54, %s7570_s16  ;;  %v8716_v44 = vpop.f32.mrb[5].mxu0  ;;  %v3012_v2 = vmul.f32 %v8707_v36, %v8707_v36  ;;  %v2334_v15 = vsel %vm2298_vm6, %v2269_v6, %v1690_v32  ;;  %v1136_v32 = vpack.c.bf16 %v1098_v21, %v1097_v19 }
 0x1fd   :  { %v2939_v47 = vadd.f32 %v2938_v62, %v8716_v44  ;;  %v3010_v41 = vmul.f32 %v8716_v44, %v8716_v44  ;;  %v8724_v46 = vpop.f32.mrb[6].mxu0  ;;  %v1882_v48 = vpop.permute.xlu1 %1881  ;;  %v1002_v62 = vld [vmem:[#allocation2 + $0x2c0] sm:$0xff]  ;;  %v2399_v23 = vsel %vm2363_vm7, %v2334_v15, %v1786_v39  ;;  %v1006_v15 = vld [vmem:[#allocation2 + $0x2f0] sm:$0xff] }
 0x1fe   :  { %v1880_v45 = vpop.permute.xlu0 %1879  ;;  %v8728_v51 = vpop.f32.mrb[7].mxu0  ;;  %v8745_v10 = vpack.c.bf16 %v1002_v62, %v1001_v56  ;;  %v3013_v12 = vmul.f32 %v8724_v46, %v8724_v46  ;;  %v2464_v29 = vsel %vm2428_vm8, %v2399_v23, %v1882_v48  ;;  %v1193_v39 = vld [vmem:[#allocation2 + $0x2ba] sm:$0xff] }
 0x1ff   :  { %v3073_v57 = vadd.f32 %v3072_v4, %v3010_v41  ;;  %v2940_v59 = vadd.f32 %v2939_v47, %v8728_v51  ;;  %v3011_v60 = vmul.f32 %v8728_v51, %v8728_v51  ;;  %1609 = vrot.lane.b32.xlu1 %v8711_v42, %s7571_s17  ;;  %v2462_v8 = vsel %vm2428_vm8, %v2397_v1, %v1880_v45  ;;  %v717_v47 = vld [vmem:[#allocation2 + $0x2d8] sm:$0xff] }
 0x200   :  { %1607 = vrot.lane.b32.xlu0 %v1134_v9, %s7571_s17  ;;  %v1232_v49 = vpack.c.bf16 %v1194_v40, %v1193_v39  ;;  %v8773_v11 = vpack.c.bf16 %v717_v47, %v716_v33  ;;  %v909_v56 = vld [vmem:[#allocation2 + $0x2da] sm:$0xff]  ;;  %v1102_v33 = vld [vmem:[#allocation2 + $0x2f1] sm:$0xff] }
 0x201   :  { %v2941_v3 = vadd.f32 %v8707_v36, %v2940_v59  ;;  %v3074_v4 = vadd.f32 %v3073_v57, %v3011_v60  ;;  %v1308_v5 = vpop.permute.xlu1 %1307  ;;  %v908_v60 = vld [vmem:[#allocation2 + $0x2d2] sm:$0xff] }
 0x202   :  { %v1976_v7 = vpop.permute.xlu0 %1975  ;;  %v2063_v62 = vsel %vm27_vm0, %v8449_v30, %v1308_v5 }
 0x203   :  { %v3075_v9 = vadd.f32 %v3074_v4, %v3012_v2  ;;  %v2527_v13 = vsel %vm2493_vm9, %v2462_v8, %v1976_v7  ;;  %1705 = vrot.lane.b32.xlu1 %v943_v55, %s7572_s18  ;;  %v2942_v14 = vadd.f32 %v8724_v46, %v2941_v3  ;;  %v945_v7 = vpack.c.bf16 %v909_v56, %v908_v60 }
 0x204   :  { %1703 = vrot.lane.b32.xlu0 %v8696_v17, %s7572_s18  ;;  %7011 = vmatprep.mubr.msk.bf16.mxu0 %vm2578_vm10, %v2527_v13 }
 0x205   :  { %v1310_v24 = vpop.permute.xlu1 %1309  ;;  %v3076_v25 = vadd.f32 %v3075_v9, %v3013_v12 }
 0x206   :  { %v1978_v22 = vpop.permute.xlu0 %1977  ;;  %v2066_v61 = vsel %vm27_vm0, %v8486_v52, %v1310_v24 }
 0x207   :  { %v2529_v0 = vsel %vm2493_vm9, %v2464_v29, %v1978_v22  ;;  %1801 = vrot.lane.b32.xlu1 %v8745_v10, %s7573_s27 }
 0x208   :  { %1799 = vrot.lane.b32.xlu0 %v8703_v28, %s7573_s27  ;;  %7012 = vmatmul.mubr.msk.bf16.gmra.mrb[32].mxu0 %vm2578_vm10, %v2529_v0 }
 0x209   :  { %v1406_v17 = vpop.permute.xlu1 %1405 }
 0x20a   :  { %v1404_v37 = vpop.permute.xlu0 %1403  ;;  %v2143_v30 = vsel %vm2103_vm3, %v2066_v61, %v1406_v17  ;;  %v1198_v61 = vld [vmem:[#allocation2 + $0x2f2] sm:$0xff] }
 0x20b   :  { %1897 = vrot.lane.b32.xlu1 %v1136_v32, %s7574_s11  ;;  %v2141_v63 = vsel %vm2103_vm3, %v2063_v62, %v1404_v37  ;;  %v1197_v62 = vld [vmem:[#allocation2 + $0x2ea] sm:$0xff] }
 0x20c   :  { %1895 = vrot.lane.b32.xlu0 %v8711_v42, %s7574_s11 }
 0x20d   :  { %v1502_v38 = vpop.permute.xlu1 %1501 }
 0x20e   :  { %v1500_v43 = vpop.permute.xlu0 %1499  ;;  %v2208_v19 = vsel %vm2168_vm4, %v2143_v30, %v1502_v38  ;;  %v720_v30 = vld [vmem:[#allocation2 + $0x300] sm:$0xff] }
 0x20f   :  { %1323 = vrot.lane.b32.xlu1 %v8711_v42, %s7569_s15  ;;  %v812_v42 = vld [vmem:[#allocation2 + $0x2d1] sm:$0xff]  ;;  %v2206_v5 = vsel %vm2168_vm4, %v2141_v63, %v1500_v43 }
 0x210   :  { %1991 = vrot.lane.b32.xlu0 %v943_v55, %s7575_s12  ;;  %v8780_v59 = vpack.c.bf16 %v813_v50, %v812_v42 }
 0x211   :  { %v1598_v20 = vpop.permute.xlu1 %1597 }
 0x212   :  { %v1596_v16 = vpop.permute.xlu0 %1595  ;;  %v2273_v0 = vsel %vm2233_vm5, %v2208_v19, %v1598_v20  ;;  %v1101_v20 = vld [vmem:[#allocation2 + $0x2e9] sm:$0xff] }
 0x213   :  { %1325 = vrot.lane.b32.xlu1 %v1136_v32, %s7569_s15  ;;  %v2271_v52 = vsel %vm2233_vm5, %v2206_v5, %v1596_v16  ;;  %v1138_v56 = vpack.c.bf16 %v1102_v33, %v1101_v20  ;;  %v721_v5 = vld [vmem:[#allocation2 + $0x308] sm:$0xff] }
 0x214   :  { %1993 = vrot.lane.b32.xlu0 %v1232_v49, %s7575_s12 }
 0x215   :  { %v1694_v41 = vpop.permute.xlu1 %1693 }
 0x216   :  { %v1692_v48 = vpop.permute.xlu0 %1691  ;;  %v2338_v16 = vsel %vm2298_vm6, %v2273_v0, %v1694_v41 }
 0x217   :  { %1421 = vrot.lane.b32.xlu1 %v1232_v49, %s7568_s14  ;;  %v2336_v21 = vsel %vm2298_vm6, %v2271_v52, %v1692_v48 }
 0x218   :  { %1419 = vrot.lane.b32.xlu0 %v943_v55, %s7568_s14 }
 0x219   :  { %v1790_v45 = vpop.permute.xlu1 %1789 }
 0x21a   :  { %v1788_v31 = vpop.permute.xlu0 %1787  ;;  %v2403_v47 = vsel %vm2363_vm7, %v2338_v16, %v1790_v45 }
 0x21b   :  { %v8776_v57 = vpop.f32.mrb[8].mxu0  ;;  %1517 = vrot.lane.b32.xlu1 %v8773_v11, %s7570_s16  ;;  %v2401_v23 = vsel %vm2363_vm7, %v2336_v21, %v1788_v31  ;;  %v912_v21 = vld [vmem:[#allocation2 + $0x302] sm:$0xff] }
 0x21c   :  { %1515 = vrot.lane.b32.xlu0 %v8745_v10, %s7570_s16  ;;  %v8786_v55 = vpop.f32.mrb[9].mxu0  ;;  %v3016_v24 = vmul.f32 %v8776_v57, %v8776_v57 }
 0x21d   :  { %v2943_v1 = vadd.f32 %v2942_v14, %v8786_v55  ;;  %v3014_v2 = vmul.f32 %v8786_v55, %v8786_v55  ;;  %v8794_v3 = vpop.f32.mrb[10].mxu0  ;;  %v1886_v4 = vpop.permute.xlu1 %1885  ;;  %v1005_v14 = vld [vmem:[#allocation2 + $0x2e8] sm:$0xff] }
 0x21e   :  { %v1884_v6 = vpop.permute.xlu0 %1883  ;;  %v8798_v8 = vpop.f32.mrb[11].mxu0  ;;  %v8815_v39 = vpack.c.bf16 %v1006_v15, %v1005_v14  ;;  %v3017_v38 = vmul.f32 %v8794_v3, %v8794_v3  ;;  %v2468_v50 = vsel %vm2428_vm8, %v2403_v47, %v1886_v4  ;;  %v1009_v47 = vld [vmem:[#allocation2 + $0x318] sm:$0xff] }
 0x21f   :  { %v3077_v12 = vadd.f32 %v3076_v25, %v3014_v2  ;;  %v2944_v9 = vadd.f32 %v2943_v1, %v8798_v8  ;;  %v3015_v13 = vmul.f32 %v8798_v8, %v8798_v8  ;;  %1613 = vrot.lane.b32.xlu1 %v8780_v59, %s7571_s17  ;;  %v2466_v17 = vsel %vm2428_vm8, %v2401_v23, %v1884_v6  ;;  %v913_v23 = vld [vmem:[#allocation2 + $0x30a] sm:$0xff] }
 0x220   :  { %1611 = vrot.lane.b32.xlu0 %v1136_v32, %s7571_s17  ;;  %v1234_v1 = vpack.c.bf16 %v1198_v61, %v1197_v62  ;;  %v8869_v16 = vpack.c.bf16 %v913_v23, %v912_v21 }
 0x221   :  { %v2945_v25 = vadd.f32 %v8776_v57, %v2944_v9  ;;  %v3078_v29 = vadd.f32 %v3077_v12, %v3015_v13  ;;  %v1312_v22 = vpop.permute.xlu1 %1311  ;;  %v8842_v12 = vpack.c.bf16 %v721_v5, %v720_v30  ;;  %v817_v9 = vld [vmem:[#allocation2 + $0x309] sm:$0xff] }
 0x222   :  { %v1980_v37 = vpop.permute.xlu0 %1979 }
 0x223   :  { %v3079_v32 = vadd.f32 %v3078_v29, %v3016_v24  ;;  %v2531_v40 = vsel %vm2493_vm9, %v2466_v17, %v1980_v37  ;;  %1709 = vrot.lane.b32.xlu1 %v945_v7, %s7572_s18  ;;  %v2946_v43 = vadd.f32 %v8794_v3, %v2945_v25  ;;  %v2069_v24 = vsel %vm27_vm0, %v8514_v27, %v1312_v22 }
 0x224   :  { %1707 = vrot.lane.b32.xlu0 %v1232_v49, %s7572_s18  ;;  %7015 = vmatprep.mubr.msk.bf16.mxu0 %vm2578_vm10, %v2531_v40 }
 0x225   :  { %v1314_v48 = vpop.permute.xlu1 %1313  ;;  %v3080_v42 = vadd.f32 %v3079_v32, %v3017_v38 }
 0x226   :  { %v1982_v31 = vpop.permute.xlu0 %1981  ;;  %v2072_v25 = vsel %vm27_vm0, %v8546_v58, %v1314_v48  ;;  %v1010_v48 = vld [vmem:[#allocation2 + $0x320] sm:$0xff] }
 0x227   :  { %v2533_v60 = vsel %vm2493_vm9, %v2468_v50, %v1982_v31  ;;  %1805 = vrot.lane.b32.xlu1 %v8815_v39, %s7573_s27  ;;  %v8886_v30 = vpack.c.bf16 %v1010_v48, %v1009_v47  ;;  %v419_v47 = vld [vmem:[#allocation2 + $0x248] sm:$0xff] }
 0x228   :  { %1803 = vrot.lane.b32.xlu0 %v8773_v11, %s7573_s27  ;;  %7016 = vmatmul.mubr.msk.bf16.gmra.mrb[36].mxu0 %vm2578_vm10, %v2533_v60 }
 0x229   :  { %v1410_v49 = vpop.permute.xlu1 %1409 }
 0x22a   :  { %v1408_v41 = vpop.permute.xlu0 %1407  ;;  %v2147_v27 = vsel %vm2103_vm3, %v2072_v25, %v1410_v49 }
 0x22b   :  { %1901 = vrot.lane.b32.xlu1 %v1138_v56, %s7574_s11  ;;  %v2145_v29 = vsel %vm2103_vm3, %v2069_v24, %v1408_v41 }
 0x22c   :  { %1899 = vrot.lane.b32.xlu0 %v8780_v59, %s7574_s11 }
 0x22d   :  { %v1506_v45 = vpop.permute.xlu1 %1505 }
 0x22e   :  { %v1504_v63 = vpop.permute.xlu0 %1503  ;;  %v2212_v50 = vsel %vm2168_vm4, %v2147_v27, %v1506_v45 }
 0x22f   :  { %1327 = vrot.lane.b32.xlu1 %v8780_v59, %s7569_s15  ;;  %v816_v59 = vld [vmem:[#allocation2 + $0x301] sm:$0xff]  ;;  %v2210_v22 = vsel %vm2168_vm4, %v2145_v29, %v1504_v63 }
 0x230   :  { %1995 = vrot.lane.b32.xlu0 %v945_v7, %s7575_s12  ;;  %v8849_v19 = vpack.c.bf16 %v817_v9, %v816_v59  ;;  %v1106_v9 = vld [vmem:[#allocation2 + $0x321] sm:$0xff] }
 0x231   :  { %v1602_v2 = vpop.permute.xlu1 %1601 }
 0x232   :  { %v1600_v4 = vpop.permute.xlu0 %1599  ;;  %v2277_v61 = vsel %vm2233_vm5, %v2212_v50, %v1602_v2  ;;  %v1105_v2 = vld [vmem:[#allocation2 + $0x319] sm:$0xff] }
 0x233   :  { %1329 = vrot.lane.b32.xlu1 %v1138_v56, %s7569_s15  ;;  %v2275_v58 = vsel %vm2233_vm5, %v2210_v22, %v1600_v4 }
 0x234   :  { %1997 = vrot.lane.b32.xlu0 %v1234_v1, %s7575_s12 }
 0x235   :  { %v1698_v6 = vpop.permute.xlu1 %1697 }
 0x236   :  { %v1696_v52 = vpop.permute.xlu0 %1695  ;;  %v2342_v59 = vsel %vm2298_vm6, %v2277_v61, %v1698_v6 }
 0x237   :  { %1425 = vrot.lane.b32.xlu1 %v1234_v1, %s7568_s14  ;;  %v2340_v31 = vsel %vm2298_vm6, %v2275_v58, %v1696_v52 }
 0x238   :  { %1423 = vrot.lane.b32.xlu0 %v945_v7, %s7568_s14 }
 0x239   :  { %v1794_v13 = vpop.permute.xlu1 %1793 }
 0x23a   :  { %v1792_v14 = vpop.permute.xlu0 %1791 }
 0x23b   :  { %v8845_v15 = vpop.f32.mrb[12].mxu0  ;;  %1521 = vrot.lane.b32.xlu1 %v8842_v12, %s7570_s16  ;;  %v2405_v60 = vsel %vm2363_vm7, %v2340_v31, %v1792_v14  ;;  %v2407_v14 = vsel %vm2363_vm7, %v2342_v59, %v1794_v13 }
 0x23c   :  { %1519 = vrot.lane.b32.xlu0 %v8815_v39, %s7570_s16  ;;  %v8855_v7 = vpop.f32.mrb[13].mxu0 }
 0x23d   :  { %v2947_v0 = vadd.f32 %v2946_v43, %v8855_v7  ;;  %v3018_v17 = vmul.f32 %v8855_v7, %v8855_v7  ;;  %v8863_v37 = vpop.f32.mrb[14].mxu0  ;;  %v1890_v38 = vpop.permute.xlu1 %1889 }
 0x23e   :  { %v1888_v32 = vpop.permute.xlu0 %1887  ;;  %v8867_v40 = vpop.f32.mrb[15].mxu0  ;;  %v3021_v45 = vmul.f32 %v8863_v37, %v8863_v37  ;;  %v2472_v24 = vsel %vm2428_vm8, %v2407_v14, %v1890_v38  ;;  %v1202_v38 = vld [vmem:[#allocation2 + $0x322] sm:$0xff] }
 0x23f   :  { %v3081_v20 = vadd.f32 %v3080_v42, %v3018_v17  ;;  %v2948_v43 = vadd.f32 %v2947_v0, %v8867_v40  ;;  %v3019_v33 = vmul.f32 %v8867_v40, %v8867_v40  ;;  %1617 = vrot.lane.b32.xlu1 %v8849_v19, %s7571_s17  ;;  %v3020_v42 = vmul.f32 %v8845_v15, %v8845_v15  ;;  %v1201_v17 = vld [vmem:[#allocation2 + $0x31a] sm:$0xff] }
 0x240   :  { %1615 = vrot.lane.b32.xlu0 %v1138_v56, %s7571_s17  ;;  %v2470_v63 = vsel %vm2428_vm8, %v2405_v60, %v1888_v32  ;;  %v1140_v0 = vpack.c.bf16 %v1106_v9, %v1105_v2  ;;  %v8912_v22 = vpack.c.bf16 %v1202_v38, %v1201_v17  ;;  %v820_v60 = vld [vmem:[#allocation2 + $0x331] sm:$0xff] }
 0x241   :  { %v2949_v49 = vadd.f32 %v8845_v15, %v2948_v43  ;;  %v3082_v41 = vadd.f32 %v3081_v20, %v3019_v33  ;;  %v1316_v62 = vpop.permute.xlu1 %1315  ;;  %v724_v20 = vld [vmem:[#allocation2 + $0x330] sm:$0xff]  ;;  %v725_v43 = vld [vmem:[#allocation2 + $0x338] sm:$0xff]  ;;  %v418_v33 = vld [vmem:[#allocation2 + $0x240] sm:$0xff] }
 0x242   :  { %v1984_v4 = vpop.permute.xlu0 %1983  ;;  %v460_v31 = vpack.c.bf16 %v419_v47, %v418_v33 }
 0x243   :  { %v3083_v56 = vadd.f32 %v3082_v41, %v3020_v42  ;;  %v2535_v5 = vsel %vm2493_vm9, %v2470_v63, %v1984_v4  ;;  %1713 = vrot.lane.b32.xlu1 %v8869_v16, %s7572_s18  ;;  %v2950_v52 = vadd.f32 %v8863_v37, %v2949_v49  ;;  %v821_v42 = vld [vmem:[#allocation2 + $0x339] sm:$0xff] }
 0x244   :  { %1711 = vrot.lane.b32.xlu0 %v1234_v1, %s7572_s18  ;;  %7019 = vmatprep.mubr.msk.bf16.mxu0 %vm2578_vm10, %v2535_v5  ;;  %v853_v63 = vpack.c.bf16 %v821_v42, %v820_v60  ;;  %v916_v4 = vld [vmem:[#allocation2 + $0x332] sm:$0xff] }
 0x245   :  { %v1318_v21 = vpop.permute.xlu1 %1317  ;;  %v3084_v23 = vadd.f32 %v3083_v56, %v3021_v45  ;;  %v917_v45 = vld [vmem:[#allocation2 + $0x33a] sm:$0xff]  ;;  %v2075_v56 = vsel %vm27_vm0, %v460_v31, %v1316_v62 }
 0x246   :  { %v1986_v25 = vpop.permute.xlu0 %1985  ;;  %v949_v38 = vpack.c.bf16 %v917_v45, %v916_v4 }
 0x247   :  { %v2537_v29 = vsel %vm2493_vm9, %v2472_v24, %v1986_v25  ;;  %1809 = vrot.lane.b32.xlu1 %v8886_v30, %s7573_s27 }
 0x248   :  { %1807 = vrot.lane.b32.xlu0 %v8842_v12, %s7573_s27  ;;  %7020 = vmatmul.mubr.msk.bf16.gmra.mrb[40].mxu0 %vm2578_vm10, %v2537_v29 }
 0x249   :  { %v1414_v1 = vpop.permute.xlu1 %1413 }
 0x24a   :  { %v1412_v6 = vpop.permute.xlu0 %1411 }
 0x24b   :  { %1905 = vrot.lane.b32.xlu1 %v1140_v0, %s7574_s11  ;;  %v2149_v59 = vsel %vm2103_vm3, %v2075_v56, %v1412_v6 }
 0x24c   :  { %1903 = vrot.lane.b32.xlu0 %v8849_v19, %s7574_s11 }
 0x24d   :  { %v1510_v13 = vpop.permute.xlu1 %1509 }
 0x24e   :  { %v1508_v27 = vpop.permute.xlu0 %1507 }
 0x24f   :  { %1331 = vrot.lane.b32.xlu1 %v8849_v19, %s7569_s15  ;;  %v8919_v19 = vpack.c.bf16 %v725_v43, %v724_v20  ;;  %v2214_v25 = vsel %vm2168_vm4, %v2149_v59, %v1508_v27  ;;  %v1013_v20 = vld [vmem:[#allocation2 + $0x348] sm:$0xff]  ;;  %v1014_v43 = vld [vmem:[#allocation2 + $0x350] sm:$0xff] }
 0x250   :  { %1999 = vrot.lane.b32.xlu0 %v8869_v16, %s7575_s12  ;;  %v1046_v45 = vpack.c.bf16 %v1014_v43, %v1013_v20 }
 0x251   :  { %v1606_v32 = vpop.permute.xlu1 %1605 }
 0x252   :  { %v1604_v58 = vpop.permute.xlu0 %1603 }
 0x253   :  { %1333 = vrot.lane.b32.xlu1 %v1140_v0, %s7569_s15 }
 0x254   :  { %2001 = vrot.lane.b32.xlu0 %v8912_v22, %s7575_s12 }
 0x255   :  { %v1702_v48 = vpop.permute.xlu1 %1701 }
 0x256   :  { %v1700_v50 = vpop.permute.xlu0 %1699 }
 0x257   :  { %1429 = vrot.lane.b32.xlu1 %v8912_v22, %s7568_s14 }
 0x258   :  { %1427 = vrot.lane.b32.xlu0 %v8869_v16, %s7568_s14  ;;  %v2078_v16 = vsel %vm27_vm0, %v8603_v53, %v1318_v21  ;;  %v2279_v53 = vsel %vm2233_vm5, %v2214_v25, %v1604_v58 }
 0x259   :  { %v1798_v49 = vpop.permute.xlu1 %1797  ;;  %v2151_v62 = vsel %vm2103_vm3, %v2078_v16, %v1414_v1  ;;  %v2344_v27 = vsel %vm2298_vm6, %v2279_v53, %v1700_v50  ;;  %v1110_v16 = vld [vmem:[#allocation2 + $0x351] sm:$0xff] }
 0x25a   :  { %v1796_v41 = vpop.permute.xlu0 %1795  ;;  %v2216_v1 = vsel %vm2168_vm4, %v2151_v62, %v1510_v13 }
 0x25b   :  { %v8923_v61 = vpop.f32.mrb[16].mxu0  ;;  %1525 = vrot.lane.b32.xlu1 %v8919_v19, %s7570_s16  ;;  %v2409_v33 = vsel %vm2363_vm7, %v2344_v27, %v1796_v41  ;;  %v2281_v60 = vsel %vm2233_vm5, %v2216_v1, %v1606_v32  ;;  %v1109_v32 = vld [vmem:[#allocation2 + $0x349] sm:$0xff]  ;;  %v423_v1 = vld [vmem:[#allocation2 + $0x278] sm:$0xff] }
 0x25c   :  { %1523 = vrot.lane.b32.xlu0 %v8886_v30, %s7570_s16  ;;  %v8930_v5 = vpop.f32.mrb[17].mxu0  ;;  %v2346_v56 = vsel %vm2298_vm6, %v2281_v60, %v1702_v48  ;;  %v1142_v53 = vpack.c.bf16 %v1110_v16, %v1109_v32  ;;  %v1206_v48 = vld [vmem:[#allocation2 + $0x352] sm:$0xff] }
 0x25d   :  { %v2951_v2 = vadd.f32 %v2950_v52, %v8930_v5  ;;  %v3022_v9 = vmul.f32 %v8930_v5, %v8930_v5  ;;  %v8938_v14 = vpop.f32.mrb[18].mxu0  ;;  %v1894_v24 = vpop.permute.xlu1 %1893  ;;  %v2411_v59 = vsel %vm2363_vm7, %v2346_v56, %v1798_v49 }
 0x25e   :  { %v1892_v29 = vpop.permute.xlu0 %1891  ;;  %v8942_v17 = vpop.f32.mrb[19].mxu0  ;;  %v3025_v13 = vmul.f32 %v8938_v14, %v8938_v14  ;;  %v2476_v62 = vsel %vm2428_vm8, %v2411_v59, %v1894_v24 }
 0x25f   :  { %v3085_v21 = vadd.f32 %v3084_v23, %v3022_v9  ;;  %v2952_v6 = vadd.f32 %v2951_v2, %v8942_v17  ;;  %v3023_v52 = vmul.f32 %v8942_v17, %v8942_v17  ;;  %1621 = vrot.lane.b32.xlu1 %v853_v63, %s7571_s17  ;;  %v3024_v23 = vmul.f32 %v8923_v61, %v8923_v61 }
 0x260   :  { %1619 = vrot.lane.b32.xlu0 %v1140_v0, %s7571_s17  ;;  %v2474_v42 = vsel %vm2428_vm8, %v2409_v33, %v1892_v29 }
 0x261   :  { %v2953_v58 = vadd.f32 %v8923_v61, %v2952_v6  ;;  %v3086_v47 = vadd.f32 %v3085_v21, %v3023_v52  ;;  %v1320_v31 = vpop.permute.xlu1 %1319 }
 0x262   :  { %v1988_v4 = vpop.permute.xlu0 %1987 }
 0x263   :  { %v3087_v50 = vadd.f32 %v3086_v47, %v3024_v23  ;;  %v2539_v0 = vsel %vm2493_vm9, %v2474_v42, %v1988_v4  ;;  %1717 = vrot.lane.b32.xlu1 %v949_v38, %s7572_s18  ;;  %v2954_v41 = vadd.f32 %v8938_v14, %v2953_v58 }
 0x264   :  { %1715 = vrot.lane.b32.xlu0 %v8912_v22, %s7572_s18  ;;  %7023 = vmatprep.mubr.msk.bf16.mxu0 %vm2578_vm10, %v2539_v0  ;;  %v1205_v22 = vld [vmem:[#allocation2 + $0x34a] sm:$0xff] }
 0x265   :  { %v1322_v2 = vpop.permute.xlu1 %1321  ;;  %v3088_v9 = vadd.f32 %v3087_v50, %v3025_v13  ;;  %v1238_v49 = vpack.c.bf16 %v1206_v48, %v1205_v22 }
 0x266   :  { %v1990_v25 = vpop.permute.xlu0 %1989  ;;  %v2084_v4 = vsel %vm27_vm0, %v8672_v54, %v1322_v2 }
 0x267   :  { %v2541_v29 = vsel %vm2493_vm9, %v2476_v62, %v1990_v25  ;;  %1813 = vrot.lane.b32.xlu1 %v1046_v45, %s7573_s27 }
 0x268   :  { %1811 = vrot.lane.b32.xlu0 %v8919_v19, %s7573_s27  ;;  %7024 = vmatmul.mubr.msk.bf16.gmra.mrb[44].mxu0 %vm2578_vm10, %v2541_v29  ;;  %v422_v19 = vld [vmem:[#allocation2 + $0x270] sm:$0xff] }
 0x269   :  { %v1418_v21 = vpop.permute.xlu1 %1417  ;;  %v462_v23 = vpack.c.bf16 %v423_v1, %v422_v19 }
 0x26a   :  { %v1416_v6 = vpop.permute.xlu0 %1415  ;;  %v2155_v56 = vsel %vm2103_vm3, %v2084_v4, %v1418_v21 }
 0x26b   :  { %1909 = vrot.lane.b32.xlu1 %v1142_v53, %s7574_s11  ;;  %v2081_v42 = vsel %vm27_vm0, %v462_v23, %v1320_v31 }
 0x26c   :  { %1907 = vrot.lane.b32.xlu0 %v853_v63, %s7574_s11 }
 0x26d   :  { %v1514_v24 = vpop.permute.xlu1 %1513 }
 0x26e   :  { %v1512_v52 = vpop.permute.xlu0 %1511  ;;  %v2220_v62 = vsel %vm2168_vm4, %v2155_v56, %v1514_v24 }
 0x26f   :  { %2005 = vrot.lane.b32.xlu1 %v1238_v49, %s7575_s12 }
 0x270   :  { %2003 = vrot.lane.b32.xlu0 %v949_v38, %s7575_s12  ;;  %v2153_v38 = vsel %vm2103_vm3, %v2081_v42, %v1416_v6 }
 0x271   :  { %v1610_v20 = vpop.permute.xlu1 %1609  ;;  %v2218_v32 = vsel %vm2168_vm4, %v2153_v38, %v1512_v52 }
 0x272   :  { %v1608_v43 = vpop.permute.xlu0 %1607 }
 0x273   :  { %v2283_v59 = vsel %vm2233_vm5, %v2218_v32, %v1608_v43 }
 0x275   :  { %v1706_v27 = vpop.permute.xlu1 %1705 }
 0x276   :  { %v1704_v33 = vpop.permute.xlu0 %1703 }
 0x277   :  { %v2348_v25 = vsel %vm2298_vm6, %v2283_v59, %v1704_v33 }
 0x279   :  { %v1802_v58 = vpop.permute.xlu1 %1801 }
 0x27a   :  { %v1800_v47 = vpop.permute.xlu0 %1799 }
 0x27b   :  { %v8978_v60 = vpop.f32.mrb[20].mxu0  ;;  %v2413_v29 = vsel %vm2363_vm7, %v2348_v25, %v1800_v47 }
 0x27c   :  { %v8981_v63 = vpop.f32.mrb[21].mxu0  ;;  %v3028_v53 = vmul.f32 %v8978_v60, %v8978_v60 }
 0x27d   :  { %v2955_v45 = vadd.f32 %v2954_v41, %v8981_v63  ;;  %v3026_v13 = vmul.f32 %v8981_v63, %v8981_v63  ;;  %v8989_v50 = vpop.f32.mrb[22].mxu0  ;;  %v1898_v0 = vpop.permute.xlu1 %1897 }
 0x27e   :  { %v1896_v31 = vpop.permute.xlu0 %1895  ;;  %v8993_v16 = vpop.f32.mrb[23].mxu0  ;;  %v3029_v52 = vmul.f32 %v8989_v50, %v8989_v50 }
 0x27f   :  { %v3089_v54 = vadd.f32 %v3088_v9, %v3026_v13  ;;  %v2956_v2 = vadd.f32 %v2955_v45, %v8993_v16  ;;  %v3027_v41 = vmul.f32 %v8993_v16, %v8993_v16  ;;  %v2285_v9 = vsel %vm2233_vm5, %v2220_v62, %v1610_v20 }
 0x280   :  { %v2478_v6 = vsel %vm2428_vm8, %v2413_v29, %v1896_v31  ;;  %v2350_v1 = vsel %vm2298_vm6, %v2285_v9, %v1706_v27 }
 0x281   :  { %v2957_v22 = vadd.f32 %v8978_v60, %v2956_v2  ;;  %v3090_v48 = vadd.f32 %v3089_v54, %v3027_v41  ;;  %v1324_v21 = vpop.permute.xlu1 %1323  ;;  %v2415_v33 = vsel %vm2363_vm7, %v2350_v1, %v1802_v58 }
 0x282   :  { %v1992_v49 = vpop.permute.xlu0 %1991  ;;  %v2480_v20 = vsel %vm2428_vm8, %v2415_v33, %v1898_v0  ;;  %v2087_v0 = vsel %vm27_vm0, %v8703_v28, %v1324_v21 }
 0x283   :  { %v3091_v24 = vadd.f32 %v3090_v48, %v3028_v53  ;;  %v2543_v43 = vsel %vm2493_vm9, %v2478_v6, %v1992_v49  ;;  %v2958_v19 = vadd.f32 %v8989_v50, %v2957_v22 }
 0x284   :  { %7027 = vmatprep.mubr.msk.bf16.mxu0 %vm2578_vm10, %v2543_v43 }
 0x285   :  { %v1326_v23 = vpop.permute.xlu1 %1325  ;;  %v3092_v47 = vadd.f32 %v3091_v24, %v3029_v52 }
 0x286   :  { %v1994_v42 = vpop.permute.xlu0 %1993  ;;  %v2090_v62 = vsel %vm27_vm0, %v8745_v10, %v1326_v23 }
 0x287   :  { %v2545_v4 = vsel %vm2493_vm9, %v2480_v20, %v1994_v42 }
 0x288   :  { %7028 = vmatmul.mubr.msk.bf16.gmra.mrb[48].mxu0 %vm2578_vm10, %v2545_v4 }
 0x289   :  { %v1422_v38 = vpop.permute.xlu1 %1421 }
 0x28a   :  { %v1420_v45 = vpop.permute.xlu0 %1419  ;;  %v2159_v9 = vsel %vm2103_vm3, %v2090_v62, %v1422_v38 }
 0x28b   :  { %v2157_v25 = vsel %vm2103_vm3, %v2087_v0, %v1420_v45 }
 0x28d   :  { %v1518_v13 = vpop.permute.xlu1 %1517 }
 0x28e   :  { %v1516_v56 = vpop.permute.xlu0 %1515  ;;  %v2224_v43 = vsel %vm2168_vm4, %v2159_v9, %v1518_v13 }
 0x28f   :  { %v2222_v6 = vsel %vm2168_vm4, %v2157_v25, %v1516_v56 }
 0x291   :  { %v1614_v32 = vpop.permute.xlu1 %1613 }
 0x292   :  { %v1612_v31 = vpop.permute.xlu0 %1611 }
 0x293   :  { %v2287_v49 = vsel %vm2233_vm5, %v2222_v6, %v1612_v31 }
 0x295   :  { %v1710_v27 = vpop.permute.xlu1 %1709 }
 0x296   :  { %v1708_v59 = vpop.permute.xlu0 %1707 }
 0x299   :  { %v1806_v54 = vpop.permute.xlu1 %1805 }
 0x29a   :  { %v1804_v2 = vpop.permute.xlu0 %1803 }
 0x29b   :  { %v9017_v58 = vpop.f32.mrb[24].mxu0 }
 0x29c   :  { %v9021_v41 = vpop.f32.mrb[25].mxu0  ;;  %v3032_v33 = vmul.f32 %v9017_v58, %v9017_v58 }
 0x29d   :  { %v2959_v29 = vadd.f32 %v2958_v19, %v9021_v41  ;;  %v3030_v53 = vmul.f32 %v9021_v41, %v9021_v41  ;;  %v9029_v22 = vpop.f32.mrb[26].mxu0  ;;  %v1902_v48 = vpop.permute.xlu1 %1901  ;;  %v2352_v19 = vsel %vm2298_vm6, %v2287_v49, %v1708_v59 }
 0x29e   :  { %v1900_v28 = vpop.permute.xlu0 %1899  ;;  %v9033_v21 = vpop.f32.mrb[27].mxu0  ;;  %v2417_v1 = vsel %vm2363_vm7, %v2352_v19, %v1804_v2  ;;  %v3033_v45 = vmul.f32 %v9029_v22, %v9029_v22 }
 0x29f   :  { %v3093_v10 = vadd.f32 %v3092_v47, %v3030_v53  ;;  %v2960_v52 = vadd.f32 %v2959_v29, %v9033_v21  ;;  %v3031_v24 = vmul.f32 %v9033_v21, %v9033_v21  ;;  %v2289_v47 = vsel %vm2233_vm5, %v2224_v43, %v1614_v32 }
 0x2a0   :  { %v2482_v4 = vsel %vm2428_vm8, %v2417_v1, %v1900_v28  ;;  %v2354_v59 = vsel %vm2298_vm6, %v2289_v47, %v1710_v27 }
 0x2a1   :  { %v2961_v23 = vadd.f32 %v9017_v58, %v2960_v52  ;;  %v3094_v20 = vadd.f32 %v3093_v10, %v3031_v24  ;;  %v1328_v42 = vpop.permute.xlu1 %1327  ;;  %v2419_v2 = vsel %vm2363_vm7, %v2354_v59, %v1806_v54 }
 0x2a2   :  { %v1996_v38 = vpop.permute.xlu0 %1995  ;;  %v2484_v32 = vsel %vm2428_vm8, %v2419_v2, %v1902_v48  ;;  %v2093_v48 = vsel %vm27_vm0, %v8773_v11, %v1328_v42 }
 0x2a3   :  { %v3095_v13 = vadd.f32 %v3094_v20, %v3032_v33  ;;  %v2547_v56 = vsel %vm2493_vm9, %v2482_v4, %v1996_v38  ;;  %v2962_v31 = vadd.f32 %v9029_v22, %v2961_v23 }
 0x2a4   :  { %7031 = vmatprep.mubr.msk.bf16.mxu0 %vm2578_vm10, %v2547_v56 }
 0x2a5   :  { %v1330_v0 = vpop.permute.xlu1 %1329  ;;  %v3096_v62 = vadd.f32 %v3095_v13, %v3033_v45 }
 0x2a6   :  { %v1998_v25 = vpop.permute.xlu0 %1997  ;;  %v2096_v1 = vsel %vm27_vm0, %v8815_v39, %v1330_v0 }
 0x2a7   :  { %v2549_v29 = vsel %vm2493_vm9, %v2484_v32, %v1998_v25 }
 0x2a8   :  { %7032 = vmatmul.mubr.msk.bf16.gmra.mrb[52].mxu0 %vm2578_vm10, %v2549_v29 }
 0x2a9   :  { %v1426_v53 = vpop.permute.xlu1 %1425 }
 0x2aa   :  { %v1424_v9 = vpop.permute.xlu0 %1423  ;;  %v2163_v38 = vsel %vm2103_vm3, %v2096_v1, %v1426_v53 }
 0x2ab   :  { %v2161_v33 = vsel %vm2103_vm3, %v2093_v48, %v1424_v9 }
 0x2ad   :  { %v1522_v6 = vpop.permute.xlu1 %1521 }
 0x2ae   :  { %v1520_v28 = vpop.permute.xlu0 %1519  ;;  %v2228_v59 = vsel %vm2168_vm4, %v2163_v38, %v1522_v6 }
 0x2af   :  { %v2226_v45 = vsel %vm2168_vm4, %v2161_v33, %v1520_v28 }
 0x2b1   :  { %v1618_v49 = vpop.permute.xlu1 %1617 }
 0x2b2   :  { %v1616_v10 = vpop.permute.xlu0 %1615 }
 0x2b3   :  { %v2291_v13 = vsel %vm2233_vm5, %v2226_v45, %v1616_v10 }
 0x2b5   :  { %v1714_v27 = vpop.permute.xlu1 %1713 }
 0x2b6   :  { %v1712_v52 = vpop.permute.xlu0 %1711 }
 0x2b7   :  { %v2356_v2 = vsel %vm2298_vm6, %v2291_v13, %v1712_v52 }
 0x2b9   :  { %v1810_v24 = vpop.permute.xlu1 %1809 }
 0x2ba   :  { %v1808_v43 = vpop.permute.xlu0 %1807 }
 0x2bb   :  { %v9057_v54 = vpop.f32.mrb[28].mxu0  ;;  %v2421_v0 = vsel %vm2363_vm7, %v2356_v2, %v1808_v43 }
 0x2bc   :  { %v9061_v19 = vpop.f32.mrb[29].mxu0  ;;  %v3036_v32 = vmul.f32 %v9057_v54, %v9057_v54 }
 0x2bd   :  { %v2963_v23 = vadd.f32 %v2962_v31, %v9061_v19  ;;  %v3034_v20 = vmul.f32 %v9061_v19, %v9061_v19  ;;  %v9069_v47 = vpop.f32.mrb[30].mxu0  ;;  %v1906_v4 = vpop.permute.xlu1 %1905 }
 0x2be   :  { %v1904_v11 = vpop.permute.xlu0 %1903  ;;  %v9073_v42 = vpop.f32.mrb[31].mxu0  ;;  %v3037_v10 = vmul.f32 %v9069_v47, %v9069_v47 }
 0x2bf   :  { %v3097_v39 = vadd.f32 %v3096_v62, %v3034_v20  ;;  %v2964_v56 = vadd.f32 %v2963_v23, %v9073_v42  ;;  %v3035_v31 = vmul.f32 %v9073_v42, %v9073_v42  ;;  %v2293_v62 = vsel %vm2233_vm5, %v2228_v59, %v1618_v49 }
 0x2c0   :  { %v2486_v9 = vsel %vm2428_vm8, %v2421_v0, %v1904_v11  ;;  %v2358_v48 = vsel %vm2298_vm6, %v2293_v62, %v1714_v27 }
 0x2c1   :  { %v2965_v25 = vadd.f32 %v9057_v54, %v2964_v56  ;;  %v3098_v29 = vadd.f32 %v3097_v39, %v3035_v31  ;;  %v1332_v53 = vpop.permute.xlu1 %1331  ;;  %v2423_v1 = vsel %vm2363_vm7, %v2358_v48, %v1810_v24 }
 0x2c2   :  { %v2000_v28 = vpop.permute.xlu0 %1999  ;;  %v2488_v49 = vsel %vm2428_vm8, %v2423_v1, %v1906_v4  ;;  %v2099_v4 = vsel %vm27_vm0, %v8842_v12, %v1332_v53 }
 0x2c3   :  { %v3099_v6 = vadd.f32 %v3098_v29, %v3036_v32  ;;  %v2551_v52 = vsel %vm2493_vm9, %v2486_v9, %v2000_v28  ;;  %v2966_v43 = vadd.f32 %v9069_v47, %v2965_v25 }
 0x2c4   :  { %7035 = vmatprep.mubr.msk.bf16.mxu0 %vm2578_vm10, %v2551_v52 }
 0x2c5   :  { %v1334_v33 = vpop.permute.xlu1 %1333  ;;  %v3100_v23 = vadd.f32 %v3099_v6, %v3037_v10 }
 0x2c6   :  { %v2002_v20 = vpop.permute.xlu0 %2001  ;;  %v2102_v24 = vsel %vm27_vm0, %v8886_v30, %v1334_v33 }
 0x2c7   :  { %v2553_v38 = vsel %vm2493_vm9, %v2488_v49, %v2002_v20 }
 0x2c8   :  { %7036 = vmatmul.mubr.msk.bf16.gmra.mrb[56].mxu0 %vm2578_vm10, %v2553_v38 }
 0x2c9   :  { %v1430_v45 = vpop.permute.xlu1 %1429 }
 0x2ca   :  { %v1428_v11 = vpop.permute.xlu0 %1427  ;;  %v2167_v32 = vsel %vm2103_vm3, %v2102_v24, %v1430_v45 }
 0x2cb   :  { %v2165_v29 = vsel %vm2103_vm3, %v2099_v4, %v1428_v11 }
 0x2cd   :  { %v1526_v13 = vpop.permute.xlu1 %1525 }
 0x2ce   :  { %v1524_v39 = vpop.permute.xlu0 %1523  ;;  %v2232_v62 = vsel %vm2168_vm4, %v2167_v32, %v1526_v13 }
 0x2cf   :  { %v2230_v28 = vsel %vm2168_vm4, %v2165_v29, %v1524_v39 }
 0x2d1   :  { %v1622_v56 = vpop.permute.xlu1 %1621 }
 0x2d2   :  { %v1620_v31 = vpop.permute.xlu0 %1619  ;;  %v2297_v10 = vsel %vm2233_vm5, %v2232_v62, %v1622_v56 }
 0x2d3   :  { %v2295_v52 = vsel %vm2233_vm5, %v2230_v28, %v1620_v31 }
 0x2d5   :  { %v1718_v27 = vpop.permute.xlu1 %1717 }
 0x2d6   :  { %v1716_v59 = vpop.permute.xlu0 %1715  ;;  %v2362_v48 = vsel %vm2298_vm6, %v2297_v10, %v1718_v27 }
 0x2d7   :  { %v2360_v49 = vsel %vm2298_vm6, %v2295_v52, %v1716_v59 }
 0x2d9   :  { %v1814_v2 = vpop.permute.xlu1 %1813 }
 0x2da   :  { %v1812_v0 = vpop.permute.xlu0 %1811  ;;  %v2427_v45 = vsel %vm2363_vm7, %v2362_v48, %v1814_v2 }
 0x2db   :  { %v9102_v25 = vpop.f32.mrb[32].mxu0  ;;  %v2425_v11 = vsel %vm2363_vm7, %v2360_v49, %v1812_v0 }
 0x2dc   :  { %v9106_v9 = vpop.f32.mrb[33].mxu0  ;;  %v3040_v13 = vmul.f32 %v9102_v25, %v9102_v25 }
 0x2dd   :  { %v2967_v30 = vadd.f32 %v2966_v43, %v9106_v9  ;;  %v3038_v6 = vmul.f32 %v9106_v9, %v9106_v9  ;;  %v9113_v12 = vpop.f32.mrb[34].mxu0  ;;  %v1910_v53 = vpop.permute.xlu1 %1909 }
 0x2de   :  { %v1908_v1 = vpop.permute.xlu0 %1907  ;;  %v9117_v33 = vpop.f32.mrb[35].mxu0  ;;  %v2492_v39 = vsel %vm2428_vm8, %v2427_v45, %v1910_v53  ;;  %v3041_v4 = vmul.f32 %v9113_v12, %v9113_v12 }
 0x2df   :  { %v3101_v20 = vadd.f32 %v3100_v23, %v3038_v6  ;;  %v2968_v38 = vadd.f32 %v2967_v30, %v9117_v33  ;;  %v3039_v43 = vmul.f32 %v9117_v33, %v9117_v33  ;;  %v2490_v23 = vsel %vm2428_vm8, %v2425_v11, %v1908_v1 }
 0x2e1   :  { %v2969_v56 = vadd.f32 %v9102_v25, %v2968_v38  ;;  %v3102_v31 = vadd.f32 %v3101_v20, %v3039_v43  ;;  %v2006_v27 = vpop.permute.xlu1 %2005 }
 0x2e2   :  { %v2557_v59 = vsel %vm2493_vm9, %v2492_v39, %v2006_v27  ;;  %v2004_v24 = vpop.permute.xlu0 %2003 }
 0x2e3   :  { %v3103_v2 = vadd.f32 %v3102_v31, %v3040_v13  ;;  %v2555_v0 = vsel %vm2493_vm9, %v2490_v23, %v2004_v24  ;;  %v2970_v32 = vadd.f32 %v9113_v12, %v2969_v56 }
 0x2e4   :  { %7039 = vmatprep.mubr.msk.bf16.mxu0 %vm2578_vm10, %v2555_v0 }
 0x2e5   :  { %7040 = vmatmul.mubr.msk.bf16.gmra.mrb[60].mxu0 %vm2578_vm10, %v2557_v59  ;;  %v3104_v29 = vadd.f32 %v3103_v2, %v3041_v4 }
 0x2fb   :  { %v9137_v62 = vpop.f32.mrb[36].mxu0 }
 0x2fc   :  { %12111 = vst [vmem:[#allocation4_spill] sm:$0xff] %v9137_v62  ;;  %v9139_v28 = vpop.f32.mrb[37].mxu0  ;;  %v3044_v49 = vmul.f32 %v9137_v62, %v9137_v62 }
 0x2fd   :  { %12112 = vst [vmem:[#allocation5_spill] sm:$0xff] %v9139_v28  ;;  %v2971_v10 = vadd.f32 %v2970_v32, %v9139_v28  ;;  %v3042_v30 = vmul.f32 %v9139_v28, %v9139_v28  ;;  %v9144_v6 = vpop.f32.mrb[38].mxu0 }
 0x2fe   :  { %12113 = vst [vmem:[#allocation6_spill] sm:$0xff] %v9144_v6  ;;  %v9146_v53 = vpop.f32.mrb[39].mxu0  ;;  %v3045_v43 = vmul.f32 %v9144_v6, %v9144_v6 }
 0x2ff   :  { %12114 = vst [vmem:[#allocation7_spill] sm:$0xff] %v9146_v53  ;;  %v3105_v52 = vadd.f32 %v3104_v29, %v3042_v30  ;;  %v2972_v48 = vadd.f32 %v2971_v10, %v9146_v53  ;;  %v3043_v1 = vmul.f32 %v9146_v53, %v9146_v53 }
 0x301   :  { %v2973_v20 = vadd.f32 %v9137_v62, %v2972_v48  ;;  %v3106_v38 = vadd.f32 %v3105_v52, %v3043_v1  ;;  %v12048_v48 = vmov 0   ;;  %v7489_v1 = vld [vmem:[%s12042_s4] sm:$0xff]  }
 0x302   :  { %4860 = vmatprep.subr.bf16.mxu0 %v12048_v48  ;;  %7123 = vmatprep.subr.bf16.mxu1 %v12048_v48 }
 0x303   :  { %v3107_v45 = vadd.f32 %v3106_v38, %v3044_v49  ;;  %v2974_v11 = vadd.f32 %v9144_v6, %v2973_v20  ;;  %v7490_v20 = vld [vmem:[%s12042_s4 + $0x8] sm:$0xff]   ;;  %4861 = vmatpush1.bf16.msra.mxu0 %v7489_v1  ;;  %v9190_v38 = vld [vmem:[%s12042_s4 + $0x80] sm:$0xff]  }
 0x304   :  { %4862 = vmatprep.subr.bf16.mxu0 %v12048_v48  ;;  %7139 = vmatpush1.bf16.msra.mxu1 %v9190_v38 }
 0x305   :  { %v3108_v13 = vadd.f32 %v3107_v45, %v3045_v43  ;;  %7124 = vmatprep.subr.bf16.mxu1 %v12048_v48 }
 0x307   :  { %4863 = vmatpush1.bf16.msra.mxu0 %v7490_v20 }
 0x308   :  { %4864 = vmatprep.subr.bf16.mxu0 %v12048_v48 }
 0x31b   :  { %v9157_v39 = vpop.f32.mrb[40].mxu0 }
 0x31c   :  { %12115 = vst [vmem:[#allocation8_spill] sm:$0xff] %v9157_v39  ;;  %v9159_v56 = vpop.f32.mrb[41].mxu0  ;;  %v3048_v0 = vmul.f32 %v9157_v39, %v9157_v39 }
 0x31d   :  { %12116 = vst [vmem:[#allocation9_spill] sm:$0xff] %v9159_v56  ;;  %v2975_v31 = vadd.f32 %v2974_v11, %v9159_v56  ;;  %v3046_v27 = vmul.f32 %v9159_v56, %v9159_v56  ;;  %v9164_v23 = vpop.f32.mrb[42].mxu0  ;;  %v9405_v56 = vld [vmem:[%s12042_s4 + $0xf0] sm:$0xff]  }
 0x31e   :  { %12117 = vst [vmem:[#allocation10_spill] sm:$0xff] %v9164_v23  ;;  %v9166_v59 = vpop.f32.mrb[43].mxu0  ;;  %v3049_v10 = vmul.f32 %v9164_v23, %v9164_v23 }
 0x31f   :  { %12118 = vst [vmem:[#allocation11_spill] sm:$0xff] %v9166_v59  ;;  %v3109_v24 = vadd.f32 %v3108_v13, %v3046_v27  ;;  %v2976_v4 = vadd.f32 %v2975_v31, %v9166_v59  ;;  %v3047_v2 = vmul.f32 %v9166_v59, %v9166_v59 }
 0x321   :  { %v2977_v32 = vadd.f32 %v9157_v39, %v2976_v4  ;;  %v3110_v29 = vadd.f32 %v3109_v24, %v3047_v2 }
 0x323   :  { %v3111_v30 = vadd.f32 %v3110_v29, %v3048_v0  ;;  %v2978_v52 = vadd.f32 %v9164_v23, %v2977_v32 }
 0x325   :  { %v3112_v49 = vadd.f32 %v3111_v30, %v3049_v10 }
 0x33b   :  { %v9192_v43 = vpop.f32.mrb[44].mxu0 }
 0x33c   :  { %12119 = vst [vmem:[#allocation12_spill] sm:$0xff] %v9192_v43  ;;  %v9195_v45 = vpop.f32.mrb[45].mxu0  ;;  %v3052_v0 = vmul.f32 %v9192_v43, %v9192_v43 }
 0x33d   :  { %12120 = vst [vmem:[#allocation13_spill] sm:$0xff] %v9195_v45  ;;  %v2979_v11 = vadd.f32 %v2978_v52, %v9195_v45  ;;  %v3050_v13 = vmul.f32 %v9195_v45, %v9195_v45  ;;  %v9201_v31 = vpop.f32.mrb[46].mxu0 }
 0x33e   :  { %12121 = vst [vmem:[#allocation14_spill] sm:$0xff] %v9201_v31  ;;  %v9203_v27 = vpop.f32.mrb[47].mxu0  ;;  %v3053_v10 = vmul.f32 %v9201_v31, %v9201_v31 }
 0x33f   :  { %12122 = vst [vmem:[#allocation15_spill] sm:$0xff] %v9203_v27  ;;  %v3113_v24 = vadd.f32 %v3112_v49, %v3050_v13  ;;  %v2980_v4 = vadd.f32 %v2979_v11, %v9203_v27  ;;  %v3051_v2 = vmul.f32 %v9203_v27, %v9203_v27 }
 0x341   :  { %v2981_v32 = vadd.f32 %v9192_v43, %v2980_v4  ;;  %v3114_v29 = vadd.f32 %v3113_v24, %v3051_v2 }
 0x343   :  { %v3115_v30 = vadd.f32 %v3114_v29, %v3052_v0  ;;  %v2982_v52 = vadd.f32 %v9201_v31, %v2981_v32  ;;  %v7506_v31 = vld [vmem:[%s12042_s4 + $0x48] sm:$0xff]  }
 0x345   :  { %v3116_v1 = vadd.f32 %v3115_v30, %v3053_v10  ;;  %v7492_v30 = vld [vmem:[%s12042_s4 + $0x10] sm:$0xff]  }
 0x346   :  { %4865 = vmatpush1.bf16.msra.mxu0 %v7492_v30  ;;  %v9288_v30 = vld [vmem:[%s12042_s4 + $0xa8] sm:$0xff]  }
 0x35b   :  { %v9214_v20 = vpop.f32.mrb[48].mxu0 }
 0x35c   :  { %12123 = vst [vmem:[#allocation16_spill] sm:$0xff] %v9214_v20  ;;  %v9216_v49 = vpop.f32.mrb[49].mxu0  ;;  %v3056_v32 = vmul.f32 %v9214_v20, %v9214_v20 }
 0x35d   :  { %12124 = vst [vmem:[#allocation17_spill] sm:$0xff] %v9216_v49  ;;  %v2983_v11 = vadd.f32 %v2982_v52, %v9216_v49  ;;  %v3054_v13 = vmul.f32 %v9216_v49, %v9216_v49  ;;  %v9221_v48 = vpop.f32.mrb[50].mxu0 }
 0x35e   :  { %12125 = vst [vmem:[#allocation18_spill] sm:$0xff] %v9221_v48  ;;  %v9223_v4 = vpop.f32.mrb[51].mxu0  ;;  %v3057_v52 = vmul.f32 %v9221_v48, %v9221_v48 }
 0x35f   :  { %12126 = vst [vmem:[#allocation19_spill] sm:$0xff] %v9223_v4  ;;  %v3117_v24 = vadd.f32 %v3116_v1, %v3054_v13  ;;  %v2984_v2 = vadd.f32 %v2983_v11, %v9223_v4  ;;  %v3055_v0 = vmul.f32 %v9223_v4, %v9223_v4  ;;  %v12127_v11 = vmov 0   ;;  %v7494_v4 = vld [vmem:[%s12042_s4 + $0x18] sm:$0xff]  }
 0x360   :  { %4866 = vmatprep.subr.bf16.mxu0 %v12127_v11 }
 0x361   :  { %v2985_v29 = vadd.f32 %v9214_v20, %v2984_v2  ;;  %v3118_v10 = vadd.f32 %v3117_v24, %v3055_v0  ;;  %v9244_v24 = vld [vmem:[%s12042_s4 + $0x88] sm:$0xff]   ;;  %4867 = vmatpush1.bf16.msra.mxu0 %v7494_v4  ;;  %v7496_v2 = vld [vmem:[%s12042_s4 + $0x20] sm:$0xff]   ;;  %v9266_v0 = vld [vmem:[%s12042_s4 + $0x98] sm:$0xff]  }
 0x362   :  { %4868 = vmatprep.subr.bf16.mxu0 %v12127_v11  ;;  %7140 = vmatpush1.bf16.msra.mxu1 %v9244_v24  ;;  %v7498_v4 = vld [vmem:[%s12042_s4 + $0x28] sm:$0xff]  }
 0x363   :  { %v3119_v49 = vadd.f32 %v3118_v10, %v3056_v32  ;;  %v2986_v1 = vadd.f32 %v9221_v48, %v2985_v29  ;;  %7125 = vmatprep.subr.bf16.mxu1 %v12127_v11  ;;  %v7500_v32 = vld [vmem:[%s12042_s4 + $0x30] sm:$0xff]   ;;  %v9277_v29 = vld [vmem:[%s12042_s4 + $0xa0] sm:$0xff]   ;;  %v7502_v10 = vld [vmem:[%s12042_s4 + $0x38] sm:$0xff]  }
 0x365   :  { %v3120_v13 = vadd.f32 %v3119_v49, %v3057_v52  ;;  %v9255_v49 = vld [vmem:[%s12042_s4 + $0x90] sm:$0xff]   ;;  %4869 = vmatpush1.bf16.msra.mxu0 %v7496_v2  ;;  %v7504_v52 = vld [vmem:[%s12042_s4 + $0x40] sm:$0xff]  }
 0x366   :  { %4870 = vmatprep.subr.bf16.mxu0 %v12127_v11  ;;  %7141 = vmatpush1.bf16.msra.mxu1 %v9255_v49 }
 0x367   :  { %7126 = vmatprep.subr.bf16.mxu1 %v12127_v11 }
 0x369   :  { %4871 = vmatpush1.bf16.msra.mxu0 %v7498_v4  ;;  %v9301_v4 = vld [vmem:[%s12042_s4 + $0xb0] sm:$0xff]  }
 0x36a   :  { %4872 = vmatprep.subr.bf16.mxu0 %v12127_v11  ;;  %7142 = vmatpush1.bf16.msra.mxu1 %v9266_v0 }
 0x36b   :  { %7127 = vmatprep.subr.bf16.mxu1 %v12127_v11 }
 0x36d   :  { %4873 = vmatpush1.bf16.msra.mxu0 %v7500_v32 }
 0x36e   :  { %4874 = vmatprep.subr.bf16.mxu0 %v12127_v11  ;;  %7143 = vmatpush1.bf16.msra.mxu1 %v9277_v29 }
 0x36f   :  { %7128 = vmatprep.subr.bf16.mxu1 %v12127_v11 }
 0x371   :  { %4875 = vmatpush1.bf16.msra.mxu0 %v7502_v10 }
 0x372   :  { %4876 = vmatprep.subr.bf16.mxu0 %v12127_v11  ;;  %7144 = vmatpush1.bf16.msra.mxu1 %v9288_v30 }
 0x373   :  { %7129 = vmatprep.subr.bf16.mxu1 %v12127_v11 }
 0x375   :  { %4877 = vmatpush1.bf16.msra.mxu0 %v7504_v52 }
 0x376   :  { %4878 = vmatprep.subr.bf16.mxu0 %v12127_v11  ;;  %7145 = vmatpush1.bf16.msra.mxu1 %v9301_v4 }
 0x377   :  { %7130 = vmatprep.subr.bf16.mxu1 %v12127_v11 }
 0x379   :  { %4879 = vmatpush1.bf16.msra.mxu0 %v7506_v31 }
 0x37a   :  { %4880 = vmatprep.subr.bf16.mxu0 %v12127_v11 }
 0x37b   :  { %v9296_v2 = vpop.f32.mrb[52].mxu0 }
 0x37c   :  { %12128 = vst [vmem:[#allocation20_spill] sm:$0xff] %v9296_v2  ;;  %v9303_v32 = vpop.f32.mrb[53].mxu0  ;;  %v3060_v45 = vmul.f32 %v9296_v2, %v9296_v2 }
 0x37d   :  { %12129 = vst [vmem:[#allocation21_spill] sm:$0xff] %v9303_v32  ;;  %v2987_v10 = vadd.f32 %v2986_v1, %v9303_v32  ;;  %v3058_v48 = vmul.f32 %v9303_v32, %v9303_v32  ;;  %v9309_v20 = vpop.f32.mrb[54].mxu0  ;;  %v9324_v32 = vld [vmem:[%s12042_s4 + $0xb8] sm:$0xff]  }
 0x37e   :  { %12130 = vst [vmem:[#allocation22_spill] sm:$0xff] %v9309_v20  ;;  %v9315_v43 = vpop.f32.mrb[55].mxu0  ;;  %7146 = vmatpush1.bf16.msra.mxu1 %v9324_v32 }
 0x37f   :  { %12131 = vst [vmem:[#allocation23_spill] sm:$0xff] %v9315_v43  ;;  %v3121_v52 = vadd.f32 %v3120_v13, %v3058_v48  ;;  %v2988_v27 = vadd.f32 %v2987_v10, %v9315_v43  ;;  %v3059_v1 = vmul.f32 %v9315_v43, %v9315_v43  ;;  %v7508_v48 = vld [vmem:[%s12042_s4 + $0x50] sm:$0xff]   ;;  %7131 = vmatprep.subr.bf16.mxu1 %v12127_v11  ;;  %v9341_v43 = vld [vmem:[%s12042_s4 + $0xc0] sm:$0xff]  }
 0x380   :  { %v3061_v13 = vmul.f32 %v9309_v20, %v9309_v20  ;;  %4881 = vmatpush1.bf16.msra.mxu0 %v7508_v48  ;;  %v9374_v48 = vld [vmem:[%s12042_s4 + $0xd8] sm:$0xff]  }
 0x381   :  { %v2989_v23 = vadd.f32 %v9296_v2, %v2988_v27  ;;  %v3122_v39 = vadd.f32 %v3121_v52, %v3059_v1  ;;  %4882 = vmatprep.subr.bf16.mxu0 %v12127_v11  ;;  %v7510_v52 = vld [vmem:[%s12042_s4 + $0x58] sm:$0xff]   ;;  %v7514_v1 = vld [vmem:[%s12042_s4 + $0x68] sm:$0xff]  }
 0x382   :  { %7147 = vmatpush1.bf16.msra.mxu1 %v9341_v43 }
 0x383   :  { %v3123_v31 = vadd.f32 %v3122_v39, %v3060_v45  ;;  %v2990_v10 = vadd.f32 %v9309_v20, %v2989_v23  ;;  %7132 = vmatprep.subr.bf16.mxu1 %v12127_v11  ;;  %v9352_v39 = vld [vmem:[%s12042_s4 + $0xc8] sm:$0xff]   ;;  %v7512_v23 = vld [vmem:[%s12042_s4 + $0x60] sm:$0xff]   ;;  %v9363_v45 = vld [vmem:[%s12042_s4 + $0xd0] sm:$0xff]  }
 0x384   :  { %4883 = vmatpush1.bf16.msra.mxu0 %v7510_v52  ;;  %v7518_v52 = vld [vmem:[%s12042_s4 + $0x78] sm:$0xff]   ;;  %v9396_v20 = vld [vmem:[%s12042_s4 + $0xe8] sm:$0xff]  }
 0x385   :  { %v3124_v27 = vadd.f32 %v3123_v31, %v3061_v13  ;;  %4884 = vmatprep.subr.bf16.mxu0 %v12127_v11  ;;  %v7516_v13 = vld [vmem:[%s12042_s4 + $0x70] sm:$0xff]   ;;  %v9385_v31 = vld [vmem:[%s12042_s4 + $0xe0] sm:$0xff]  }
 0x386   :  { %7148 = vmatpush1.bf16.msra.mxu1 %v9352_v39 }
 0x387   :  { %7133 = vmatprep.subr.bf16.mxu1 %v12127_v11 }
 0x388   :  { %4885 = vmatpush1.bf16.msra.mxu0 %v7512_v23  ;;  %v3515_v23 = vld [vmem:[#allocation3 + $0x1] sm:$0xff] }
 0x389   :  { %4886 = vmatprep.subr.bf16.mxu0 %v12127_v11 }
 0x38a   :  { %7149 = vmatpush1.bf16.msra.mxu1 %v9363_v45 }
 0x38b   :  { %7134 = vmatprep.subr.bf16.mxu1 %v12127_v11 }
 0x38c   :  { %4887 = vmatpush1.bf16.msra.mxu0 %v7514_v1  ;;  %v3516_v1 = vld [vmem:[#allocation3 + $0x9] sm:$0xff] }
 0x38d   :  { %4888 = vmatprep.subr.bf16.mxu0 %v12127_v11  ;;  %v3579_v2 = vpack.c.bf16 %v3516_v1, %v3515_v23 }
 0x38e   :  { %7150 = vmatpush1.bf16.msra.mxu1 %v9374_v48 }
 0x38f   :  { %7135 = vmatprep.subr.bf16.mxu1 %v12127_v11  ;;  %4892 = vmatprep.mubr.bf16.mxu0 %v3579_v2 }
 0x390   :  { %4889 = vmatpush1.bf16.msra.mxu0 %v7516_v13  ;;  %v7565_v13 = vld [vmem:[#allocation3] sm:$0xff] }
 0x391   :  { %4890 = vmatprep.subr.bf16.mxu0 %v12127_v11  ;;  %v9398_v59 = vpack.c.bf16 %v7565_v13, %v7565_v13  ;;  %v9424_v13 = vld [vmem:[%s12042_s4 + $0xf8] sm:$0xff]  }
 0x392   :  { %7151 = vmatpush1.bf16.msra.mxu1 %v9385_v31 }
 0x393   :  { %7136 = vmatprep.subr.bf16.mxu1 %v12127_v11  ;;  %12132 = vst [vmem:[#allocation24_spill] sm:$0xff] %v9398_v59 }
 0x394   :  { %4891 = vmatpush1.bf16.msra.mxu0 %v7518_v52 }
 0x395   :  { %5149 = vmatprep.subr.bf16.mxu0 %v12127_v11 }
 0x396   :  { %7152 = vmatpush1.bf16.msra.mxu1 %v9396_v20 }
 0x397   :  { %7137 = vmatprep.subr.bf16.mxu1 %v12127_v11  ;;  %4893 = vmatmul.mubr.bf16.vlgmr.msra.gmra.mrb[64].mxu0 %v9398_v59 }
 0x398   :  { %5150 = vmatpush1.bf16.msra.mxu0 %v9190_v38 }
 0x399   :  { %5151 = vmatprep.subr.bf16.mxu0 %v12127_v11 }
 0x39a   :  { %7153 = vmatpush1.bf16.msra.mxu1 %v9405_v56 }
 0x39b   :  { %v9409_v6 = vpop.f32.mrb[56].mxu0  ;;  %7138 = vmatprep.subr.bf16.mxu1 %v12127_v11 }
 0x39c   :  { %v9412_v52 = vpop.f32.mrb[57].mxu0  ;;  %5152 = vmatpush1.bf16.msra.mxu0 %v9244_v24 }
 0x39d   :  { %12133 = vst [vmem:[#allocation25_spill] sm:$0xff] %v9412_v52  ;;  %v2991_v23 = vadd.f32 %v2990_v10, %v9412_v52  ;;  %v3062_v2 = vmul.f32 %v9412_v52, %v9412_v52  ;;  %v9418_v1 = vpop.f32.mrb[58].mxu0  ;;  %5153 = vmatprep.subr.bf16.mxu0 %v12127_v11  ;;  %v3064_v52 = vmul.f32 %v9409_v6, %v9409_v6 }
 0x39e   :  { %v9426_v59 = vpop.f32.mrb[59].mxu0  ;;  %7154 = vmatpush1.bf16.msra.mxu1 %v9424_v13 }
 0x39f   :  { %v3125_v38 = vadd.f32 %v3124_v27, %v3062_v2  ;;  %v2992_v62 = vadd.f32 %v2991_v23, %v9426_v59  ;;  %v3063_v10 = vmul.f32 %v9426_v59, %v9426_v59  ;;  %5438 = vmatprep.subr.bf16.mxu1 %v12127_v11  ;;  %v3065_v27 = vmul.f32 %v9418_v1, %v9418_v1 }
 0x3a0   :  { %5154 = vmatpush1.bf16.msra.mxu0 %v9255_v49 }
 0x3a1   :  { %v2993_v53 = vadd.f32 %v9409_v6, %v2992_v62  ;;  %v3126_v28 = vadd.f32 %v3125_v38, %v3063_v10  ;;  %5155 = vmatprep.subr.bf16.mxu0 %v12127_v11 }
 0x3a3   :  { %v3127_v23 = vadd.f32 %v3126_v28, %v3064_v52  ;;  %v2994_v2 = vadd.f32 %v9418_v1, %v2993_v53 }
 0x3a4   :  { %5156 = vmatpush1.bf16.msra.mxu0 %v9266_v0 }
 0x3a5   :  { %v3128_v24 = vadd.f32 %v3127_v23, %v3065_v27  ;;  %5157 = vmatprep.subr.bf16.mxu0 %v12127_v11 }
 0x3a8   :  { %5158 = vmatpush1.bf16.msra.mxu0 %v9277_v29 }
 0x3a9   :  { %5159 = vmatprep.subr.bf16.mxu0 %v12127_v11 }
 0x3ac   :  { %5160 = vmatpush1.bf16.msra.mxu0 %v9288_v30 }
 0x3ad   :  { %5161 = vmatprep.subr.bf16.mxu0 %v12127_v11 }
 0x3b0   :  { %5162 = vmatpush1.bf16.msra.mxu0 %v9301_v4 }
 0x3b1   :  { %5163 = vmatprep.subr.bf16.mxu0 %v12127_v11 }
 0x3b4   :  { %5164 = vmatpush1.bf16.msra.mxu0 %v9324_v32 }
 0x3b5   :  { %5165 = vmatprep.subr.bf16.mxu0 %v12127_v11 }
 0x3b8   :  { %v9453_v62 = vpop.f32.mrb[60].mxu0  ;;  %5166 = vmatpush1.bf16.msra.mxu0 %v9341_v43 }
 0x3b9   :  { %v9456_v28 = vpop.f32.mrb[61].mxu0  ;;  %5167 = vmatprep.subr.bf16.mxu0 %v12127_v11  ;;  %v3068_v32 = vmul.f32 %v9453_v62, %v9453_v62 }
 0x3ba   :  { %v2995_v53 = vadd.f32 %v2994_v2, %v9456_v28  ;;  %v3066_v49 = vmul.f32 %v9456_v28, %v9456_v28  ;;  %v9461_v0 = vpop.f32.mrb[62].mxu0 }
 0x3bb   :  { %v2924_v29 = vpop.f32.mrb[63].mxu0  ;;  %v3069_v27 = vmul.f32 %v9461_v0, %v9461_v0 }
 0x3bc   :  { %v3129_v30 = vadd.f32 %v3128_v24, %v3066_v49  ;;  %v2996_v4 = vadd.f32 %v2995_v53, %v2924_v29  ;;  %v3067_v52 = vmul.f32 %v2924_v29, %v2924_v29  ;;  %5168 = vmatpush1.bf16.msra.mxu0 %v9352_v39 }
 0x3bd   :  { %5169 = vmatprep.subr.bf16.mxu0 %v12127_v11 }
 0x3be   :  { %v2997_v38 = vadd.f32 %v9453_v62, %v2996_v4  ;;  %v3130_v10 = vadd.f32 %v3129_v30, %v3067_v52 }
 0x3c0   :  { %v2998_v23 = vadd.f32 %v9461_v0, %v2997_v38  ;;  %v3131_v2 = vadd.f32 %v3130_v10, %v3068_v32  ;;  %5170 = vmatpush1.bf16.msra.mxu0 %v9363_v45 }
 0x3c1   :  { %5171 = vmatprep.subr.bf16.mxu0 %v12127_v11 }
 0x3c2   :  { %v2999_v43 = vrot.slane %v2998_v23, 4  ;;  %v3132_v24 = vadd.f32 %v3131_v2, %v3069_v27 }
 0x3c4   :  { %v3000_v53 = vadd.f32 %v2999_v43, %v2998_v23  ;;  %v3133_v49 = vrot.slane %v3132_v24, 4  ;;  %5172 = vmatpush1.bf16.msra.mxu0 %v9374_v48 }
 0x3c5   :  { %5173 = vmatprep.subr.bf16.mxu0 %v12127_v11 }
 0x3c6   :  { %v3001_v4 = vrot.slane %v3000_v53, 2  ;;  %v3134_v30 = vadd.f32 %v3133_v49, %v3132_v24 }
 0x3c8   :  { %v3002_v39 = vadd.f32 %v3001_v4, %v3000_v53  ;;  %v3135_v52 = vrot.slane %v3134_v30, 2  ;;  %5174 = vmatpush1.bf16.msra.mxu0 %v9385_v31  ;;  %v3151_v31 = vlaneseq }
 0x3c9   :  { %5175 = vmatprep.subr.bf16.mxu0 %v12127_v11 }
 0x3ca   :  { %v3003_v38 = vrot.slane %v3002_v39, 1  ;;  %v3136_v32 = vadd.f32 %v3135_v52, %v3134_v30  ;;  %v3152_v49 = vshrl.u32 %v3151_v31, 7  ;;  %v12137_v31 = vld [vmem:[#allocation4_spill] sm:$0xff] }
 0x3cc   :  { %v3004_v10 = vadd.f32 %v3003_v38, %v3002_v39  ;;  %v3137_v27 = vrot.slane %v3136_v32, 1  ;;  %5176 = vmatpush1.bf16.msra.mxu0 %v9396_v20  ;;  %v3143_v20 = vld [vmem:[%s12043_s2] sm:$0x1]  ;;  %v9487_v4 = vsub.s32 0, %v3152_v49  ;;  %v12138_v49 = vld [vmem:[#allocation6_spill] sm:$0xff] }
 0x3cd   :  { %5177 = vmatprep.subr.bf16.mxu0 %v12127_v11 }
 0x3ce   :  { %v3005_v45 = vmul.f32 0.001953125, %v3004_v10  ;;  %v3138_v23 = vadd.f32 %v3137_v27, %v3136_v32  ;;  %12134 = vst [vmem:[#allocation26_spill] sm:$0xff] %v9487_v4 }
 0x3d0   :  { %v3139_v2 = vmul.f32 0.001953125, %v3138_v23  ;;  %v3140_v43 = vmul.f32 %v3005_v45, %v3005_v45  ;;  %5178 = vmatpush1.bf16.msra.mxu0 %v9405_v56  ;;  %v3147_v56 = vld [vmem:[%s12044_s3] sm:$0x1] }
 0x3d1   :  { %5179 = vmatprep.subr.bf16.mxu0 %v12127_v11  ;;  %v12154_v11 = vld [vmem:[#allocation16_spill] sm:$0xff] }
 0x3d2   :  { %v3141_v48 = vsub.f32 %v3139_v2, %v3140_v43 }
 0x3d4   :  { %v3142_v24 = vmax.f32 %v3141_v48, 0.0  ;;  %5180 = vmatpush1.bf16.msra.mxu0 %v9424_v13 }
 0x3d6   :  { %v3144_v53 = vadd.f32 1e-05, %v3142_v24  ;;  %v12135_v24 = vld [vmem:[#allocation5_spill] sm:$0xff] }
 0x3d8   :  { %7561 = vrsqrt.f32 %v3144_v53  ;;  %v12136_v53 = vld [vmem:[#allocation7_spill] sm:$0xff] }
 0x3e2   :  { %v7562_v30 = vpop.eup %7561 }
 0x3e3   :  { %v3146_v39 = vmul.f32 %v7562_v30, %v3143_v20  ;;  %v12139_v20 = vld [vmem:[#allocation9_spill] sm:$0xff]  ;;  %v12140_v30 = vld [vmem:[#allocation11_spill] sm:$0xff] }
 0x3e5   :  { %v3148_v52 = vmul.f32 %v3146_v39, %v3005_v45  ;;  %v9493_v38 = vrot.slane %v3146_v39, %v9487_v4 }
 0x3e7   :  { %v3149_v13 = vsub.f32 %v3147_v56, %v3148_v52  ;;  %v3217_v32 = vmul.f32 %v9493_v38, %v2924_v29  ;;  %v9498_v10 = vmul.f32 %v9493_v38, %v8642_v34  ;;  %v9502_v27 = vmul.f32 %v9493_v38, %v8651_v18  ;;  %v12141_v56 = vld [vmem:[#allocation8_spill] sm:$0xff] }
 0x3e8   :  { %v9506_v23 = vmul.f32 %v8635_v26, %v9493_v38  ;;  %v9510_v45 = vmul.f32 %v8647_v35, %v9493_v38  ;;  %v9514_v2 = vmul.f32 %v9493_v38, %v8716_v44  ;;  %v9518_v34 = vmul.f32 %v9493_v38, %v8728_v51 }
 0x3e9   :  { %v9521_v29 = vrot.slane %v3149_v13, %v9487_v4  ;;  %v9525_v18 = vmul.f32 %v8707_v36, %v9493_v38  ;;  %v9529_v26 = vmul.f32 %v8724_v46, %v9493_v38  ;;  %v9533_v35 = vmul.f32 %v9493_v38, %v8786_v55  ;;  %v12142_v13 = vld [vmem:[#allocation10_spill] sm:$0xff]  ;;  %v12152_v4 = vld [vmem:[#allocation19_spill] sm:$0xff] }
 0x3ea   :  { %v9537_v44 = vmul.f32 %v9493_v38, %v8798_v8  ;;  %v9541_v51 = vmul.f32 %v8776_v57, %v9493_v38  ;;  %v9545_v36 = vmul.f32 %v8794_v3, %v9493_v38  ;;  %v9549_v46 = vmul.f32 %v9493_v38, %v8855_v7 }
 0x3eb   :  { %v3287_v43 = vadd.f32 %v9521_v29, %v3217_v32  ;;  %v9554_v55 = vmul.f32 %v9493_v38, %v8867_v40  ;;  %v9558_v8 = vmul.f32 %v8845_v15, %v9493_v38  ;;  %v9562_v57 = vmul.f32 %v8863_v37, %v9493_v38 }
 0x3ec   :  { %v9566_v3 = vmul.f32 %v9493_v38, %v8930_v5  ;;  %v9570_v7 = vmul.f32 %v9493_v38, %v8942_v17  ;;  %v9574_v40 = vmul.f32 %v8923_v61, %v9493_v38  ;;  %v9578_v15 = vmul.f32 %v8938_v14, %v9493_v38 }
 0x3ed   :  { %v3351_v48 = vmax.f32 %v3287_v43, 0.0  ;;  %v9582_v37 = vmul.f32 %v9493_v38, %v8981_v63  ;;  %v9586_v5 = vmul.f32 %v9493_v38, %v8993_v16  ;;  %v9590_v17 = vmul.f32 %v8978_v60, %v9493_v38  ;;  %v12143_v43 = vld [vmem:[#allocation13_spill] sm:$0xff] }
 0x3ee   :  { %v9594_v61 = vmul.f32 %v8989_v50, %v9493_v38  ;;  %v9598_v14 = vmul.f32 %v9493_v38, %v9021_v41  ;;  %v9602_v63 = vmul.f32 %v9493_v38, %v9033_v21  ;;  %v9606_v16 = vmul.f32 %v9017_v58, %v9493_v38 }
 0x3ef   :  { %3416 = vst [vmem:[#allocation3 + $0x321] sm:$0xff] %v3351_v48  ;;  %v9610_v60 = vmul.f32 %v9029_v22, %v9493_v38  ;;  %v9614_v50 = vmul.f32 %v9493_v38, %v9061_v19  ;;  %v9618_v41 = vmul.f32 %v9493_v38, %v9073_v42  ;;  %v9622_v21 = vmul.f32 %v9057_v54, %v9493_v38 }
 0x3f0   :  { %v9626_v58 = vmul.f32 %v9069_v47, %v9493_v38  ;;  %v9630_v22 = vmul.f32 %v9493_v38, %v9106_v9  ;;  %v9634_v19 = vmul.f32 %v9493_v38, %v9117_v33  ;;  %v9638_v42 = vmul.f32 %v9102_v25, %v9493_v38 }
 0x3f1   :  { %v9642_v54 = vmul.f32 %v9113_v12, %v9493_v38  ;;  %v9646_v47 = vmul.f32 %v9493_v38, %v12135_v24  ;;  %v9650_v9 = vmul.f32 %v9493_v38, %v12136_v53  ;;  %v9654_v33 = vmul.f32 %v12137_v31, %v9493_v38  ;;  %v12144_v24 = vld [vmem:[#allocation15_spill] sm:$0xff]  ;;  %v12146_v31 = vld [vmem:[#allocation12_spill] sm:$0xff] }
 0x3f2   :  { %v9658_v25 = vmul.f32 %v12138_v49, %v9493_v38  ;;  %v9662_v12 = vmul.f32 %v9493_v38, %v12139_v20  ;;  %v9666_v39 = vmul.f32 %v9493_v38, %v12140_v30  ;;  %v9670_v52 = vmul.f32 %v12141_v56, %v9493_v38  ;;  %v12148_v20 = vld [vmem:[#allocation14_spill] sm:$0xff]  ;;  %v12150_v56 = vld [vmem:[#allocation17_spill] sm:$0xff] }
 0x3f3   :  { %v9674_v32 = vmul.f32 %v12142_v13, %v9493_v38  ;;  %v9678_v48 = vmul.f32 %v9493_v38, %v12143_v43  ;;  %v9682_v53 = vmul.f32 %v9493_v38, %v12144_v24  ;;  %v9686_v49 = vmul.f32 %v12146_v31, %v9493_v38 }
 0x3f4   :  { %v9690_v30 = vmul.f32 %v12148_v20, %v9493_v38  ;;  %v9694_v13 = vmul.f32 %v9493_v38, %v12150_v56  ;;  %v9698_v43 = vmul.f32 %v9493_v38, %v12152_v4  ;;  %v9702_v24 = vmul.f32 %v12154_v11, %v9493_v38 }
 0x3f5   :  { %12145 = vst [vmem:[#allocation5_spill] sm:$0xff] %v9682_v53  ;;  %12147 = vst [vmem:[#allocation7_spill] sm:$0xff] %v9686_v49  ;;  %v12156_v53 = vld [vmem:[#allocation18_spill] sm:$0xff]  ;;  %v12157_v49 = vld [vmem:[#allocation21_spill] sm:$0xff] }
 0x3f6   :  { %12149 = vst [vmem:[#allocation4_spill] sm:$0xff] %v9690_v30  ;;  %12151 = vst [vmem:[#allocation6_spill] sm:$0xff] %v9694_v13  ;;  %v9706_v31 = vmul.f32 %v12156_v53, %v9493_v38  ;;  %v9710_v20 = vmul.f32 %v9493_v38, %v12157_v49  ;;  %v12158_v30 = vld [vmem:[#allocation23_spill] sm:$0xff]  ;;  %v12159_v13 = vld [vmem:[#allocation20_spill] sm:$0xff]  ;;  %v9730_v49 = vmul.f32 %v9493_v38, %v9426_v59 }
 0x3f7   :  { %12153 = vst [vmem:[#allocation9_spill] sm:$0xff] %v9698_v43  ;;  %12155 = vst [vmem:[#allocation11_spill] sm:$0xff] %v9702_v24  ;;  %v9714_v56 = vmul.f32 %v9493_v38, %v12158_v30  ;;  %v9718_v4 = vmul.f32 %v12159_v13, %v9493_v38  ;;  %v12160_v43 = vld [vmem:[#allocation22_spill] sm:$0xff]  ;;  %v12161_v24 = vld [vmem:[#allocation25_spill] sm:$0xff]  ;;  %v9734_v30 = vmul.f32 %v9409_v6, %v9493_v38 }
 0x3f8   :  { %v9722_v11 = vmul.f32 %v12160_v43, %v9493_v38  ;;  %v9726_v53 = vmul.f32 %v9493_v38, %v12161_v24  ;;  %v9738_v13 = vmul.f32 %v9418_v1, %v9493_v38  ;;  %v9742_v43 = vmul.f32 %v9493_v38, %v9456_v28 }
 0x3f9   :  { %v9746_v24 = vmul.f32 %v9453_v62, %v9493_v38  ;;  %v9750_v59 = vmul.f32 %v9461_v0, %v9493_v38  ;;  %v9754_v6 = vadd.f32 %v9521_v29, %v9498_v10  ;;  %v9758_v1 = vadd.f32 %v9521_v29, %v9502_v27 }
 0x3fa   :  { %v9762_v28 = vadd.f32 %v9521_v29, %v9506_v23  ;;  %v9766_v62 = vadd.f32 %v9521_v29, %v9510_v45  ;;  %v9770_v0 = vadd.f32 %v9521_v29, %v9514_v2  ;;  %v9774_v38 = vadd.f32 %v9521_v29, %v9518_v34 }
 0x3fb   :  { %v9778_v10 = vadd.f32 %v9521_v29, %v9525_v18  ;;  %v9782_v27 = vadd.f32 %v9521_v29, %v9529_v26  ;;  %v9786_v23 = vadd.f32 %v9521_v29, %v9533_v35  ;;  %v9790_v45 = vadd.f32 %v9521_v29, %v9537_v44 }
 0x3fc   :  { %v9794_v2 = vadd.f32 %v9521_v29, %v9541_v51  ;;  %v9798_v34 = vadd.f32 %v9521_v29, %v9545_v36  ;;  %v9802_v18 = vadd.f32 %v9521_v29, %v9549_v46  ;;  %v9806_v26 = vadd.f32 %v9521_v29, %v9554_v55 }
 0x3fd   :  { %v9810_v35 = vadd.f32 %v9521_v29, %v9558_v8  ;;  %v9814_v44 = vadd.f32 %v9521_v29, %v9562_v57  ;;  %v9818_v51 = vadd.f32 %v9521_v29, %v9566_v3  ;;  %v9822_v36 = vadd.f32 %v9521_v29, %v9570_v7 }
 0x3fe   :  { %v9826_v46 = vadd.f32 %v9521_v29, %v9574_v40  ;;  %v9830_v55 = vadd.f32 %v9521_v29, %v9578_v15  ;;  %v9834_v8 = vadd.f32 %v9521_v29, %v9582_v37  ;;  %v9838_v57 = vadd.f32 %v9521_v29, %v9586_v5 }
 0x3ff   :  { %v9842_v3 = vadd.f32 %v9521_v29, %v9590_v17  ;;  %v9846_v7 = vadd.f32 %v9521_v29, %v9594_v61  ;;  %v9850_v40 = vadd.f32 %v9521_v29, %v9598_v14  ;;  %v9854_v15 = vadd.f32 %v9521_v29, %v9602_v63 }
 0x400   :  { %v9858_v37 = vadd.f32 %v9521_v29, %v9606_v16  ;;  %v9862_v5 = vadd.f32 %v9521_v29, %v9610_v60  ;;  %v9866_v17 = vadd.f32 %v9521_v29, %v9614_v50  ;;  %v9870_v61 = vadd.f32 %v9521_v29, %v9618_v41 }
 0x401   :  { %v9874_v14 = vadd.f32 %v9521_v29, %v9622_v21  ;;  %v9878_v63 = vadd.f32 %v9521_v29, %v9626_v58  ;;  %v9882_v16 = vadd.f32 %v9521_v29, %v9630_v22  ;;  %v9886_v60 = vadd.f32 %v9521_v29, %v9634_v19 }
 0x402   :  { %12162 = vst [vmem:[#allocation8_spill] sm:$0xff] %v9862_v5  ;;  %12163 = vst [vmem:[#allocation10_spill] sm:$0xff] %v9866_v17  ;;  %v9890_v50 = vadd.f32 %v9521_v29, %v9638_v42  ;;  %v9894_v41 = vadd.f32 %v9521_v29, %v9642_v54  ;;  %v9898_v21 = vadd.f32 %v9521_v29, %v9646_v47 }
 0x403   :  { %v9902_v58 = vadd.f32 %v9521_v29, %v9650_v9  ;;  %v9906_v22 = vadd.f32 %v9521_v29, %v9654_v33  ;;  %v9910_v19 = vadd.f32 %v9521_v29, %v9658_v25  ;;  %v9914_v42 = vadd.f32 %v9521_v29, %v9662_v12  ;;  %v12169_v25 = vld [vmem:[#allocation5_spill] sm:$0xff] }
 0x404   :  { %v9918_v54 = vadd.f32 %v9521_v29, %v9666_v39  ;;  %v9922_v47 = vadd.f32 %v9521_v29, %v9670_v52  ;;  %v9926_v9 = vadd.f32 %v9521_v29, %v9674_v32  ;;  %v9930_v33 = vadd.f32 %v9521_v29, %v9678_v48 }
 0x405   :  { %12164 = vst [vmem:[#allocation13_spill] sm:$0xff] %v9914_v42  ;;  %v9934_v12 = vadd.f32 %v9521_v29, %v12169_v25  ;;  %v12170_v42 = vld [vmem:[#allocation7_spill] sm:$0xff] }
 0x406   :  { %12165 = vst [vmem:[#allocation15_spill] sm:$0xff] %v9918_v54  ;;  %12166 = vst [vmem:[#allocation12_spill] sm:$0xff] %v9922_v47  ;;  %v9938_v39 = vadd.f32 %v9521_v29, %v12170_v42  ;;  %v12171_v54 = vld [vmem:[#allocation4_spill] sm:$0xff]  ;;  %v12172_v47 = vld [vmem:[#allocation6_spill] sm:$0xff]  ;;  %v9958_v42 = vadd.f32 %v9521_v29, %v9706_v31  ;;  %v9978_v31 = vadd.f32 %v9521_v29, %v9726_v53 }
 0x407   :  { %12167 = vst [vmem:[#allocation14_spill] sm:$0xff] %v9926_v9  ;;  %12168 = vst [vmem:[#allocation17_spill] sm:$0xff] %v9930_v33  ;;  %v9942_v52 = vadd.f32 %v9521_v29, %v12171_v54  ;;  %v9946_v32 = vadd.f32 %v9521_v29, %v12172_v47  ;;  %v12173_v9 = vld [vmem:[#allocation9_spill] sm:$0xff]  ;;  %v12174_v33 = vld [vmem:[#allocation11_spill] sm:$0xff]  ;;  %v9962_v54 = vadd.f32 %v9521_v29, %v9710_v20 }
 0x408   :  { %v9950_v48 = vadd.f32 %v9521_v29, %v12173_v9  ;;  %v9954_v25 = vadd.f32 %v9521_v29, %v12174_v33  ;;  %v9966_v47 = vadd.f32 %v9521_v29, %v9714_v56  ;;  %v9970_v9 = vadd.f32 %v9521_v29, %v9718_v4 }
 0x409   :  { %v9974_v33 = vadd.f32 %v9521_v29, %v9722_v11  ;;  %v9982_v20 = vadd.f32 %v9521_v29, %v9730_v49  ;;  %v9986_v56 = vadd.f32 %v9521_v29, %v9734_v30  ;;  %v9990_v4 = vadd.f32 %v9521_v29, %v9738_v13 }
 0x40a   :  { %v9994_v11 = vadd.f32 %v9521_v29, %v9742_v43  ;;  %v9998_v53 = vadd.f32 %v9521_v29, %v9746_v24  ;;  %v10002_v49 = vadd.f32 %v9521_v29, %v9750_v59  ;;  %v12076_v30 = vmax.f32 %v9758_v1, 0.0 }
 0x40b   :  { %12175 = vst [vmem:[#allocation19_spill] sm:$0xff] %v9982_v20  ;;  %12176 = vst [vmem:[#allocation16_spill] sm:$0xff] %v9986_v56  ;;  %v12075_v20 = vmax.f32 %v9754_v6, 0.0  ;;  %v12078_v43 = vmax.f32 %v9774_v38, 0.0  ;;  %v12080_v29 = vmax.f32 %v9790_v45, 0.0  ;;  %v12181_v24 = vmax.f32 %v9766_v62, 0.0 }
 0x40c   :  { %12177 = vst [vmem:[#allocation18_spill] sm:$0xff] %v9990_v4  ;;  %12178 = vst [vmem:[#allocation21_spill] sm:$0xff] %v9994_v11  ;;  %v12077_v4 = vmax.f32 %v9770_v0, 0.0  ;;  %v12180_v11 = vmax.f32 %v9762_v28, 0.0  ;;  %v12082_v59 = vmax.f32 %v9810_v35, 0.0  ;;  %v3321_v56 = vmax.f32 %v9878_v63, 0.0 }
 0x40d   :  { %12179 = vst [vmem:[#allocation23_spill] sm:$0xff] %v9998_v53  ;;  %v12079_v53 = vmax.f32 %v9786_v23, 0.0  ;;  %3355 = vst [vmem:[#allocation3 + $0x19] sm:$0xff] %v12075_v20  ;;  %v12081_v20 = vmax.f32 %v9806_v26, 0.0  ;;  %v3322_v13 = vmax.f32 %v9882_v16, 0.0  ;;  %v3325_v63 = vmax.f32 %v9894_v41, 0.0 }
 0x40e   :  { %3356 = vst [vmem:[#allocation3 + $0x21] sm:$0xff] %v12076_v30  ;;  %3357 = vst [vmem:[#allocation3 + $0x31] sm:$0xff] %v12180_v11  ;;  %v12182_v30 = vmax.f32 %v9778_v10, 0.0  ;;  %v12183_v11 = vmax.f32 %v9782_v27, 0.0  ;;  %v3326_v16 = vmax.f32 %v9898_v21, 0.0  ;;  %v3329_v41 = vmax.f32 %v9910_v19, 0.0 }
 0x40f   :  { %3358 = vst [vmem:[#allocation3 + $0x39] sm:$0xff] %v12181_v24  ;;  %3359 = vst [vmem:[#allocation3 + $0x49] sm:$0xff] %v12077_v4  ;;  %v12086_v24 = vmax.f32 %v9822_v36, 0.0  ;;  %v12084_v4 = vmax.f32 %v9842_v3, 0.0  ;;  %v3336_v19 = vmax.f32 %v9938_v39, 0.0 }
 0x410   :  { %3360 = vst [vmem:[#allocation3 + $0x51] sm:$0xff] %v12078_v43  ;;  %3361 = vst [vmem:[#allocation3 + $0x61] sm:$0xff] %v12182_v30  ;;  %v12184_v43 = vmax.f32 %v9794_v2, 0.0  ;;  %v12185_v30 = vmax.f32 %v9798_v34, 0.0 }
 0x411   :  { %3362 = vst [vmem:[#allocation3 + $0x69] sm:$0xff] %v12183_v11  ;;  %3363 = vst [vmem:[#allocation3 + $0x79] sm:$0xff] %v12079_v53  ;;  %v12186_v11 = vmax.f32 %v9802_v18, 0.0  ;;  %v12083_v53 = vmax.f32 %v9838_v57, 0.0 }
 0x412   :  { %3364 = vst [vmem:[#allocation3 + $0x81] sm:$0xff] %v12080_v29  ;;  %3365 = vst [vmem:[#allocation3 + $0x91] sm:$0xff] %v12184_v43  ;;  %v12187_v43 = vmax.f32 %v9814_v44, 0.0  ;;  %v3320_v29 = vmax.f32 %v9874_v14, 0.0  ;;  %v3324_v14 = vmax.f32 %v9890_v50, 0.0  ;;  %v3328_v50 = vmax.f32 %v9906_v22, 0.0 }
 0x413   :  { %3366 = vst [vmem:[#allocation3 + $0x99] sm:$0xff] %v12185_v30  ;;  %3367 = vst [vmem:[#allocation3 + $0xa9] sm:$0xff] %v12186_v11  ;;  %v12188_v30 = vmax.f32 %v9818_v51, 0.0  ;;  %v12085_v11 = vmax.f32 %v9854_v15, 0.0  ;;  %v3335_v22 = vmax.f32 %v9934_v12, 0.0 }
 0x414   :  { %3368 = vst [vmem:[#allocation3 + $0xb1] sm:$0xff] %v12081_v20  ;;  %3369 = vst [vmem:[#allocation3 + $0xc1] sm:$0xff] %v12082_v59  ;;  %v12189_v20 = vmax.f32 %v9826_v46, 0.0  ;;  %v12190_v59 = vmax.f32 %v9830_v55, 0.0  ;;  %v3421_v12 = vld [vmem:[#allocation3 + $0x18] sm:$0xff] }
 0x415   :  { %3370 = vst [vmem:[#allocation3 + $0xc9] sm:$0xff] %v12187_v43  ;;  %3371 = vst [vmem:[#allocation3 + $0xd9] sm:$0xff] %v12188_v30  ;;  %v12191_v43 = vmax.f32 %v9834_v8, 0.0  ;;  %v3319_v30 = vmax.f32 %v9870_v61, 0.0  ;;  %v3422_v39 = vld [vmem:[#allocation3 + $0x20] sm:$0xff] }
 0x416   :  { %3372 = vst [vmem:[#allocation3 + $0xe1] sm:$0xff] %v12086_v24  ;;  %3373 = vst [vmem:[#allocation3 + $0xf1] sm:$0xff] %v12189_v20  ;;  %v12192_v20 = vmax.f32 %v9846_v7, 0.0 }
 0x417   :  { %3374 = vst [vmem:[#allocation3 + $0xf9] sm:$0xff] %v12190_v59  ;;  %3375 = vst [vmem:[#allocation3 + $0x109] sm:$0xff] %v12191_v43  ;;  %v12193_v59 = vmax.f32 %v9850_v40, 0.0  ;;  %v3323_v43 = vmax.f32 %v9886_v60, 0.0  ;;  %v3327_v60 = vmax.f32 %v9902_v58, 0.0 }
 0x418   :  { %3376 = vst [vmem:[#allocation3 + $0x111] sm:$0xff] %v12083_v53  ;;  %3377 = vst [vmem:[#allocation3 + $0x121] sm:$0xff] %v12084_v4  ;;  %v12194_v53 = vmax.f32 %v9858_v37, 0.0  ;;  %v12195_v4 = vmax.f32 %v9862_v5, 0.0  ;;  %v12201_v5 = vld [vmem:[#allocation17_spill] sm:$0xff] }
 0x419   :  { %3378 = vst [vmem:[#allocation3 + $0x129] sm:$0xff] %v12192_v20  ;;  %3379 = vst [vmem:[#allocation3 + $0x139] sm:$0xff] %v12193_v59  ;;  %v12196_v20 = vmax.f32 %v9866_v17, 0.0  ;;  %v12197_v59 = vld [vmem:[#allocation13_spill] sm:$0xff]  ;;  %v12200_v17 = vld [vmem:[#allocation14_spill] sm:$0xff]  ;;  %v3334_v58 = vmax.f32 %v12201_v5, 0.0 }
 0x41a   :  { %3380 = vst [vmem:[#allocation3 + $0x141] sm:$0xff] %v12085_v11  ;;  %3381 = vst [vmem:[#allocation3 + $0x151] sm:$0xff] %v12194_v53  ;;  %v3330_v21 = vmax.f32 %v12197_v59, 0.0  ;;  %v12198_v53 = vld [vmem:[#allocation15_spill] sm:$0xff]  ;;  %v3340_v5 = vmax.f32 %v9954_v25, 0.0  ;;  %v3484_v59 = vpack.c.bf16 %v3422_v39, %v3421_v12 }
 0x41b   :  { %3382 = vst [vmem:[#allocation3 + $0x159] sm:$0xff] %v12195_v4  ;;  %3383 = vst [vmem:[#allocation3 + $0x169] sm:$0xff] %v12196_v20  ;;  %v3331_v11 = vmax.f32 %v12198_v53, 0.0  ;;  %v12199_v4 = vld [vmem:[#allocation12_spill] sm:$0xff]  ;;  %v3333_v20 = vmax.f32 %v12200_v17, 0.0  ;;  %v3339_v17 = vmax.f32 %v9950_v48, 0.0 }
 0x41c   :  { %3384 = vst [vmem:[#allocation3 + $0x171] sm:$0xff] %v3319_v30  ;;  %3385 = vst [vmem:[#allocation3 + $0x181] sm:$0xff] %v3320_v29  ;;  %v3332_v24 = vmax.f32 %v12199_v4, 0.0  ;;  %v3337_v29 = vmax.f32 %v9942_v52, 0.0  ;;  %v3343_v52 = vmax.f32 %v9966_v47, 0.0  ;;  %v3346_v48 = vmax.f32 %v9978_v31, 0.0 }
 0x41d   :  { %3386 = vst [vmem:[#allocation3 + $0x189] sm:$0xff] %v3321_v56  ;;  %3387 = vst [vmem:[#allocation3 + $0x1c9] sm:$0xff] %v3322_v13  ;;  %v3338_v56 = vmax.f32 %v9946_v32, 0.0  ;;  %v3341_v13 = vmax.f32 %v9958_v42, 0.0  ;;  %v3344_v32 = vmax.f32 %v9970_v9, 0.0  ;;  %v12202_v25 = vld [vmem:[#allocation19_spill] sm:$0xff] }
 0x41e   :  { %3388 = vst [vmem:[#allocation3 + $0x1d1] sm:$0xff] %v3323_v43  ;;  %3389 = vst [vmem:[#allocation3 + $0x1e1] sm:$0xff] %v3324_v14  ;;  %v3342_v43 = vmax.f32 %v9962_v54, 0.0  ;;  %v3345_v14 = vmax.f32 %v9974_v33, 0.0  ;;  %v3347_v42 = vmax.f32 %v12202_v25, 0.0  ;;  %v12203_v54 = vld [vmem:[#allocation16_spill] sm:$0xff] }
 0x41f   :  { %3390 = vst [vmem:[#allocation3 + $0x1e9] sm:$0xff] %v3325_v63  ;;  %3391 = vst [vmem:[#allocation3 + $0x1f9] sm:$0xff] %v3326_v16  ;;  %v12205_v16 = vld [vmem:[#allocation21_spill] sm:$0xff]  ;;  %v12206_v47 = vld [vmem:[#allocation23_spill] sm:$0xff]  ;;  %v3353_v33 = vmax.f32 %v10002_v49, 0.0  ;;  %v12207_v31 = vmax.f32 %v9754_v6, 0.0 }
 0x420   :  { %3392 = vst [vmem:[#allocation3 + $0x201] sm:$0xff] %v3327_v60  ;;  %3393 = vst [vmem:[#allocation3 + $0x211] sm:$0xff] %v3328_v50  ;;  %v3350_v60 = vmax.f32 %v12205_v16, 0.0  ;;  %v3352_v9 = vmax.f32 %v12206_v47, 0.0  ;;  %v12208_v50 = vmax.f32 %v9758_v1, 0.0  ;;  %v12210_v53 = vmax.f32 %v9766_v62, 0.0 }
 0x421   :  { %3394 = vst [vmem:[#allocation3 + $0x219] sm:$0xff] %v3329_v41  ;;  %3395 = vst [vmem:[#allocation3 + $0x229] sm:$0xff] %v3330_v21  ;;  %v12209_v21 = vmax.f32 %v9762_v28, 0.0  ;;  %v12211_v49 = vmax.f32 %v9770_v0, 0.0  ;;  %v7521_v6 = vld [vmem:[%s12042_s4 + $0x100] sm:$0xff]   ;;  %v12213_v1 = vmax.f32 %v9778_v10, 0.0 }
 0x422   :  { %3396 = vst [vmem:[#allocation3 + $0x231] sm:$0xff] %v3331_v11  ;;  %3397 = vst [vmem:[#allocation3 + $0x241] sm:$0xff] %v3332_v24  ;;  %v3348_v24 = vmax.f32 %v12203_v54, 0.0  ;;  %v12204_v11 = vld [vmem:[#allocation18_spill] sm:$0xff]  ;;  %v3580_v41 = vpack.c.bf16 %v12208_v50, %v12207_v31  ;;  %v12215_v62 = vmax.f32 %v9786_v23, 0.0  ;;  %v12219_v10 = vmax.f32 %v9802_v18, 0.0 }
 0x423   :  { %3398 = vst [vmem:[#allocation3 + $0x249] sm:$0xff] %v3333_v20  ;;  %3399 = vst [vmem:[#allocation3 + $0x259] sm:$0xff] %v3334_v58  ;;  %v3349_v63 = vmax.f32 %v12204_v11, 0.0  ;;  %v3581_v4 = vpack.c.bf16 %v12210_v53, %v12209_v21  ;;  %v12212_v20 = vmax.f32 %v9774_v38, 0.0  ;;  %v12224_v18 = vmax.f32 %v9822_v36, 0.0  ;;  %v3424_v54 = vld [vmem:[#allocation3 + $0x38] sm:$0xff] }
 0x424   :  { %3400 = vst [vmem:[#allocation3 + $0x261] sm:$0xff] %v3335_v22  ;;  %3401 = vst [vmem:[#allocation3 + $0x271] sm:$0xff] %v3336_v19  ;;  %4900 = vmatprep.mubr.bf16.mxu0 %v3580_v41  ;;  %v12214_v22 = vmax.f32 %v9782_v27, 0.0  ;;  %v12216_v19 = vmax.f32 %v9790_v45, 0.0  ;;  %v12220_v27 = vmax.f32 %v9806_v26, 0.0  ;;  %v12226_v25 = vmax.f32 %v9830_v55, 0.0 }
 0x425   :  { %3402 = vst [vmem:[#allocation3 + $0x279] sm:$0xff] %v3337_v29  ;;  %3403 = vst [vmem:[#allocation3 + $0x289] sm:$0xff] %v3338_v56  ;;  %v3582_v58 = vpack.c.bf16 %v12212_v20, %v12211_v49  ;;  %4901 = vmatmul.mubr.bf16.gmra.mrb[68].mxu0 %v3484_v59  ;;  %v12229_v11 = vmax.f32 %v9842_v3, 0.0  ;;  %v12232_v16 = vmax.f32 %v9854_v15, 0.0  ;;  %v12234_v3 = vld [vmem:[#allocation8_spill] sm:$0xff]  ;;  %v12238_v15 = vmov 0  }
 0x426   :  { %3404 = vst [vmem:[#allocation3 + $0x291] sm:$0xff] %v3339_v17  ;;  %3405 = vst [vmem:[#allocation3 + $0x2a1] sm:$0xff] %v3340_v5  ;;  %v3583_v28 = vpack.c.bf16 %v12214_v22, %v12213_v1  ;;  %v10150_v0 = vpack.c.bf16 %v12216_v19, %v12215_v62  ;;  %v12217_v17 = vmax.f32 %v9794_v2, 0.0  ;;  %v12218_v5 = vmax.f32 %v9798_v34, 0.0  ;;  %4908 = vmatprep.mubr.bf16.mxu0 %v3581_v4  ;;  %v3426_v4 = vld [vmem:[#allocation3 + $0x50] sm:$0xff]  ;;  %v7524_v49 = vld [vmem:[%s12042_s4 + $0x118] sm:$0xff]  }
 0x427   :  { %3406 = vst [vmem:[#allocation3 + $0x2a9] sm:$0xff] %v3341_v13  ;;  %3407 = vst [vmem:[#allocation3 + $0x2b9] sm:$0xff] %v3342_v43  ;;  %v3745_v38 = vld [vmem:[#allocation3 + $0x210] sm:$0xff]  ;;  %v3649_v56 = vld [vmem:[#allocation3 + $0x1fa] sm:$0xff]  ;;  %v10162_v43 = vpack.c.bf16 %v12220_v27, %v12219_v10  ;;  %v12222_v2 = vmax.f32 %v9814_v44, 0.0  ;;  %v12223_v34 = vmax.f32 %v9818_v51, 0.0 }
 0x428   :  { %3408 = vst [vmem:[#allocation3 + $0x2c1] sm:$0xff] %v3343_v52  ;;  %3409 = vst [vmem:[#allocation3 + $0x2d1] sm:$0xff] %v3344_v32  ;;  %v3746_v29 = vld [vmem:[#allocation3 + $0x218] sm:$0xff]  ;;  %v10156_v13 = vpack.c.bf16 %v12218_v5, %v12217_v17  ;;  %v3650_v45 = vld [vmem:[#allocation3 + $0x202] sm:$0xff]  ;;  %v12221_v52 = vmax.f32 %v9810_v35, 0.0  ;;  %v12228_v51 = vmax.f32 %v9838_v57, 0.0 }
 0x429   :  { %3410 = vst [vmem:[#allocation3 + $0x2d9] sm:$0xff] %v3345_v14  ;;  %3411 = vst [vmem:[#allocation3 + $0x2e9] sm:$0xff] %v3346_v48  ;;  %v10164_v23 = vpack.c.bf16 %v3746_v29, %v3745_v38  ;;  %v3747_v12 = vld [vmem:[#allocation3 + $0x228] sm:$0xff]  ;;  %v3748_v39 = vld [vmem:[#allocation3 + $0x230] sm:$0xff]  ;;  %v10176_v14 = vpack.c.bf16 %v12224_v18, %v12223_v34  ;;  %v3694_v26 = vpack.c.bf16 %v3650_v45, %v3649_v56  ;;  %v12225_v48 = vmax.f32 %v9826_v46, 0.0 }
 0x42a   :  { %3412 = vst [vmem:[#allocation3 + $0x2f1] sm:$0xff] %v3347_v42  ;;  %3413 = vst [vmem:[#allocation3 + $0x301] sm:$0xff] %v3348_v24  ;;  %v10170_v32 = vpack.c.bf16 %v12222_v2, %v12221_v52  ;;  %v10185_v35 = vpack.c.bf16 %v3748_v39, %v3747_v12  ;;  %v3423_v44 = vld [vmem:[#allocation3 + $0x30] sm:$0xff]  ;;  %v12227_v24 = vmax.f32 %v9834_v8, 0.0  ;;  %v12230_v46 = vmax.f32 %v9846_v7, 0.0  ;;  %v7522_v8 = vld [vmem:[%s12042_s4 + $0x108] sm:$0xff]  }
 0x42b   :  { %3414 = vst [vmem:[#allocation3 + $0x309] sm:$0xff] %v3349_v63  ;;  %3415 = vst [vmem:[#allocation3 + $0x319] sm:$0xff] %v3350_v60  ;;  %v10182_v42 = vpack.c.bf16 %v12226_v25, %v12225_v48  ;;  %5333 = vmatprep.mubr.bf16.mxu1 %v10164_v23  ;;  %v12231_v63 = vmax.f32 %v9850_v40, 0.0  ;;  %v12233_v57 = vmax.f32 %v9858_v37, 0.0  ;;  %v12235_v47 = vmax.f32 %v12234_v3, 0.0  ;;  %v3651_v50 = vld [vmem:[#allocation3 + $0x212] sm:$0xff] }
 0x42c   :  { %3417 = vst [vmem:[#allocation3 + $0x331] sm:$0xff] %v3352_v9  ;;  %3418 = vst [vmem:[#allocation3 + $0x339] sm:$0xff] %v3353_v33  ;;  %v10191_v36 = vpack.c.bf16 %v12228_v51, %v12227_v24  ;;  %5334 = vmatmul.mubr.bf16.vlgmr.msra.gmra.mrb[0].mxu1 %v3694_v26  ;;  %v10197_v55 = vpack.c.bf16 %v12230_v46, %v12229_v11  ;;  %v12236_v9 = vld [vmem:[#allocation10_spill] sm:$0xff]  ;;  %v3485_v31 = vpack.c.bf16 %v3424_v54, %v3423_v44  ;;  %v3652_v41 = vld [vmem:[#allocation3 + $0x21a] sm:$0xff] }
 0x42d   :  { %v10203_v60 = vpack.c.bf16 %v12232_v16, %v12231_v63  ;;  %5439 = vmatpush1.bf16.msra.mxu1 %v7521_v6  ;;  %5341 = vmatprep.mubr.bf16.mxu1 %v10185_v35  ;;  %v10213_v7 = vpack.c.bf16 %v12235_v47, %v12233_v57  ;;  %v12237_v33 = vmax.f32 %v12236_v9, 0.0  ;;  %v3749_v59 = vld [vmem:[#allocation3 + $0x240] sm:$0xff]  ;;  %v3750_v21 = vld [vmem:[#allocation3 + $0x248] sm:$0xff]  ;;  %v7523_v37 = vld [vmem:[%s12042_s4 + $0x110] sm:$0xff]   ;;  %v3695_v53 = vpack.c.bf16 %v3652_v41, %v3651_v50 }
 0x42e   :  { %5440 = vmatprep.subr.bf16.mxu1 %v12238_v15  ;;  %4909 = vmatmul.mubr.bf16.gmra.mrb[72].mxu0 %v3485_v31  ;;  %v10226_v61 = vpack.c.bf16 %v3750_v21, %v3749_v59  ;;  %v3654_v6 = vld [vmem:[#allocation3 + $0x232] sm:$0xff]  ;;  %v3752_v22 = vld [vmem:[#allocation3 + $0x260] sm:$0xff]  ;;  %v3428_v56 = vld [vmem:[#allocation3 + $0x68] sm:$0xff] }
 0x42f   :  { %v10219_v40 = vpack.c.bf16 %v3319_v30, %v12237_v33  ;;  %4916 = vmatprep.mubr.bf16.mxu0 %v3582_v58  ;;  %v3425_v30 = vld [vmem:[#allocation3 + $0x48] sm:$0xff]  ;;  %v3751_v1 = vld [vmem:[#allocation3 + $0x258] sm:$0xff]  ;;  %v7525_v62 = vld [vmem:[%s12042_s4 + $0x120] sm:$0xff]  }
 0x430   :  { %v3486_v20 = vpack.c.bf16 %v3426_v4, %v3425_v30  ;;  %v3653_v58 = vld [vmem:[#allocation3 + $0x22a] sm:$0xff]  ;;  %v10237_v38 = vpack.c.bf16 %v3752_v22, %v3751_v1  ;;  %v3427_v29 = vld [vmem:[#allocation3 + $0x60] sm:$0xff]  ;;  %v3754_v45 = vld [vmem:[#allocation3 + $0x278] sm:$0xff] }
 0x431   :  { %5441 = vmatpush1.bf16.msra.mxu1 %v7522_v8  ;;  %v3696_v19 = vpack.c.bf16 %v3654_v6, %v3653_v58  ;;  %v3487_v17 = vpack.c.bf16 %v3428_v56, %v3427_v29  ;;  %v3655_v5 = vld [vmem:[#allocation3 + $0x242] sm:$0xff]  ;;  %v3656_v10 = vld [vmem:[#allocation3 + $0x24a] sm:$0xff]  ;;  %v3429_v2 = vld [vmem:[#allocation3 + $0x78] sm:$0xff] }
 0x432   :  { %5442 = vmatprep.subr.bf16.mxu1 %v12238_v15  ;;  %v3753_v27 = vld [vmem:[#allocation3 + $0x270] sm:$0xff]  ;;  %v3697_v39 = vpack.c.bf16 %v3656_v10, %v3655_v5  ;;  %v3430_v34 = vld [vmem:[#allocation3 + $0x80] sm:$0xff]  ;;  %v3755_v25 = vld [vmem:[#allocation3 + $0x288] sm:$0xff] }
 0x433   :  { %v7527_v12 = vld [vmem:[%s12042_s4 + $0x130] sm:$0xff]   ;;  %v10249_v52 = vpack.c.bf16 %v3754_v45, %v3753_v27  ;;  %v3488_v18 = vpack.c.bf16 %v3430_v34, %v3429_v2  ;;  %v3657_v26 = vld [vmem:[#allocation3 + $0x25a] sm:$0xff]  ;;  %v3658_v48 = vld [vmem:[#allocation3 + $0x262] sm:$0xff] }
 0x434   :  { %5342 = vmatmul.mubr.bf16.gmra.mrb[4].mxu1 %v3695_v53  ;;  %v3756_v44 = vld [vmem:[#allocation3 + $0x290] sm:$0xff]  ;;  %v7529_v54 = vld [vmem:[%s12042_s4 + $0x140] sm:$0xff]   ;;  %v3698_v24 = vpack.c.bf16 %v3658_v48, %v3657_v26  ;;  %v3432_v46 = vld [vmem:[#allocation3 + $0x98] sm:$0xff] }
 0x435   :  { %5349 = vmatprep.mubr.bf16.mxu1 %v10226_v61  ;;  %5443 = vmatpush1.bf16.msra.mxu1 %v7523_v37  ;;  %v10261_v51 = vpack.c.bf16 %v3756_v44, %v3755_v25  ;;  %v3431_v11 = vld [vmem:[#allocation3 + $0x90] sm:$0xff]  ;;  %v3660_v8 = vld [vmem:[#allocation3 + $0x27a] sm:$0xff]  ;;  %v3758_v3 = vld [vmem:[#allocation3 + $0x2a8] sm:$0xff] }
 0x436   :  { %5444 = vmatprep.subr.bf16.mxu1 %v12238_v15  ;;  %4917 = vmatmul.mubr.bf16.gmra.mrb[76].mxu0 %v3486_v20  ;;  %v3489_v63 = vpack.c.bf16 %v3432_v46, %v3431_v11  ;;  %v3659_v16 = vld [vmem:[#allocation3 + $0x272] sm:$0xff]  ;;  %v3757_v57 = vld [vmem:[#allocation3 + $0x2a0] sm:$0xff]  ;;  %v3433_v31 = vld [vmem:[#allocation3 + $0xa8] sm:$0xff] }
 0x437   :  { %4924 = vmatprep.mubr.bf16.mxu0 %v3583_v28  ;;  %v7526_v28 = vld [vmem:[%s12042_s4 + $0x128] sm:$0xff]   ;;  %v7531_v47 = vld [vmem:[%s12042_s4 + $0x150] sm:$0xff]   ;;  %v3699_v9 = vpack.c.bf16 %v3660_v8, %v3659_v16  ;;  %v10273_v33 = vpack.c.bf16 %v3758_v3, %v3757_v57  ;;  %v3759_v37 = vld [vmem:[#allocation3 + $0x2b8] sm:$0xff] }
 0x438   :  { %v3434_v50 = vld [vmem:[#allocation3 + $0xb0] sm:$0xff]  ;;  %v3760_v53 = vld [vmem:[#allocation3 + $0x2c0] sm:$0xff]  ;;  %v3436_v58 = vld [vmem:[#allocation3 + $0xc8] sm:$0xff] }
 0x439   :  { %5445 = vmatpush1.bf16.msra.mxu1 %v7524_v49  ;;  %v3490_v41 = vpack.c.bf16 %v3434_v50, %v3433_v31  ;;  %v3661_v59 = vld [vmem:[#allocation3 + $0x28a] sm:$0xff]  ;;  %v3662_v21 = vld [vmem:[#allocation3 + $0x292] sm:$0xff]  ;;  %v7533_v30 = vld [vmem:[%s12042_s4 + $0x160] sm:$0xff]   ;;  %v10285_v49 = vpack.c.bf16 %v3760_v53, %v3759_v37 }
 0x43a   :  { %5446 = vmatprep.subr.bf16.mxu1 %v12238_v15  ;;  %v3700_v4 = vpack.c.bf16 %v3662_v21, %v3661_v59  ;;  %v3435_v20 = vld [vmem:[#allocation3 + $0xc0] sm:$0xff]  ;;  %v3664_v22 = vld [vmem:[#allocation3 + $0x2aa] sm:$0xff]  ;;  %v3667_v48 = vld [vmem:[#allocation3 + $0x2d2] sm:$0xff] }
 0x43b   :  { %v3491_v6 = vpack.c.bf16 %v3436_v58, %v3435_v20  ;;  %v3663_v1 = vld [vmem:[#allocation3 + $0x2a2] sm:$0xff]  ;;  %v7535_v29 = vld [vmem:[%s12042_s4 + $0x170] sm:$0xff]   ;;  %v3665_v27 = vld [vmem:[#allocation3 + $0x2ba] sm:$0xff] }
 0x43c   :  { %5350 = vmatmul.mubr.bf16.gmra.mrb[8].mxu1 %v3696_v19  ;;  %v3762_v19 = vld [vmem:[#allocation3 + $0x2d8] sm:$0xff]  ;;  %v3701_v56 = vpack.c.bf16 %v3664_v22, %v3663_v1  ;;  %v3438_v5 = vld [vmem:[#allocation3 + $0xe0] sm:$0xff]  ;;  %v3441_v11 = vld [vmem:[#allocation3 + $0x108] sm:$0xff] }
 0x43d   :  { %5357 = vmatprep.mubr.bf16.mxu1 %v10237_v38  ;;  %5447 = vmatpush1.bf16.msra.mxu1 %v7525_v62  ;;  %v3761_v62 = vld [vmem:[#allocation3 + $0x2d0] sm:$0xff]  ;;  %v3666_v45 = vld [vmem:[#allocation3 + $0x2c2] sm:$0xff]  ;;  %v3668_v25 = vld [vmem:[#allocation3 + $0x2da] sm:$0xff] }
 0x43e   :  { %5448 = vmatprep.subr.bf16.mxu1 %v12238_v15  ;;  %4925 = vmatmul.mubr.bf16.gmra.mrb[80].mxu0 %v3487_v17  ;;  %v3437_v17 = vld [vmem:[#allocation3 + $0xd8] sm:$0xff]  ;;  %v3702_v2 = vpack.c.bf16 %v3666_v45, %v3665_v27  ;;  %v3765_v44 = vld [vmem:[#allocation3 + $0x300] sm:$0xff]  ;;  %v3442_v46 = vld [vmem:[#allocation3 + $0x110] sm:$0xff] }
 0x43f   :  { %4932 = vmatprep.mubr.bf16.mxu0 %v10150_v0  ;;  %v7528_v0 = vld [vmem:[%s12042_s4 + $0x138] sm:$0xff]   ;;  %v3492_v10 = vpack.c.bf16 %v3438_v5, %v3437_v17  ;;  %v3768_v57 = vld [vmem:[#allocation3 + $0x320] sm:$0xff]  ;;  %v3447_v22 = vld [vmem:[#allocation3 + $0x150] sm:$0xff] }
 0x440   :  { %v3670_v16 = vld [vmem:[#allocation3 + $0x2f2] sm:$0xff]  ;;  %v3671_v50 = vld [vmem:[#allocation3 + $0x302] sm:$0xff]  ;;  %v3899_v58 = vld [vmem:[#allocation3 + $0x1a] sm:$0xff] }
 0x441   :  { %5449 = vmatpush1.bf16.msra.mxu1 %v7526_v28  ;;  %v10297_v28 = vpack.c.bf16 %v3762_v19, %v3761_v62  ;;  %v3767_v8 = vld [vmem:[#allocation3 + $0x318] sm:$0xff]  ;;  %v3674_v20 = vld [vmem:[#allocation3 + $0x322] sm:$0xff] }
 0x442   :  { %5450 = vmatprep.subr.bf16.mxu1 %v12238_v15  ;;  %v3770_v59 = vld [vmem:[#allocation3 + $0x338] sm:$0xff]  ;;  %v7537_v5 = vld [vmem:[%s12042_s4 + $0x180] sm:$0xff]   ;;  %v3449_v45 = vld [vmem:[#allocation3 + $0x168] sm:$0xff] }
 0x443   :  { %v3445_v53 = vld [vmem:[#allocation3 + $0x138] sm:$0xff] }
 0x444   :  { %5358 = vmatmul.mubr.bf16.gmra.mrb[12].mxu1 %v3697_v39  ;;  %v3764_v39 = vld [vmem:[#allocation3 + $0x2f0] sm:$0xff]  ;;  %v3448_v62 = vld [vmem:[#allocation3 + $0x158] sm:$0xff] }
 0x445   :  { %5365 = vmatprep.mubr.bf16.mxu1 %v10249_v52  ;;  %5451 = vmatpush1.bf16.msra.mxu1 %v7527_v12  ;;  %v3763_v12 = vld [vmem:[#allocation3 + $0x2e8] sm:$0xff]  ;;  %v3803_v19 = vld [vmem:[#allocation3 + $0x19] sm:$0xff] }
 0x446   :  { %5452 = vmatprep.subr.bf16.mxu1 %v12238_v15  ;;  %4933 = vmatmul.mubr.bf16.gmra.mrb[84].mxu0 %v3488_v18  ;;  %v10306_v34 = vpack.c.bf16 %v3764_v39, %v3763_v12  ;;  %v3440_v18 = vld [vmem:[#allocation3 + $0xf8] sm:$0xff]  ;;  %v3450_v12 = vld [vmem:[#allocation3 + $0x170] sm:$0xff] }
 0x447   :  { %4940 = vmatprep.mubr.bf16.mxu0 %v10156_v13  ;;  %v7530_v13 = vld [vmem:[%s12042_s4 + $0x148] sm:$0xff]   ;;  %v3902_v17 = vld [vmem:[#allocation3 + $0x3a] sm:$0xff] }
 0x449   :  { %5453 = vmatpush1.bf16.msra.mxu1 %v7528_v0  ;;  %v3439_v0 = vld [vmem:[#allocation3 + $0xf0] sm:$0xff] }
 0x44a   :  { %5454 = vmatprep.subr.bf16.mxu1 %v12238_v15  ;;  %v3493_v26 = vpack.c.bf16 %v3440_v18, %v3439_v0  ;;  %v3498_v0 = vpack.c.bf16 %v3450_v12, %v3449_v45  ;;  %v3806_v18 = vld [vmem:[#allocation3 + $0x39] sm:$0xff] }
 0x44b   :  { %v7545_v45 = vld [vmem:[%s12042_s4 + $0x1c0] sm:$0xff]  }
 0x44c   :  { %5366 = vmatmul.mubr.bf16.gmra.mrb[16].mxu1 %v3698_v24 }
 0x44d   :  { %5373 = vmatprep.mubr.bf16.mxu1 %v10261_v51  ;;  %5455 = vmatpush1.bf16.msra.mxu1 %v7529_v54  ;;  %v3766_v54 = vld [vmem:[#allocation3 + $0x308] sm:$0xff] }
 0x44e   :  { %5456 = vmatprep.subr.bf16.mxu1 %v12238_v15  ;;  %4941 = vmatmul.mubr.bf16.gmra.mrb[88].mxu0 %v3489_v63  ;;  %v10310_v24 = vpack.c.bf16 %v3766_v54, %v3765_v44  ;;  %v3669_v63 = vld [vmem:[#allocation3 + $0x2ea] sm:$0xff] }
 0x44f   :  { %4948 = vmatprep.mubr.bf16.mxu0 %v10162_v43  ;;  %v7532_v43 = vld [vmem:[%s12042_s4 + $0x158] sm:$0xff]   ;;  %v3704_v3 = vpack.c.bf16 %v3670_v16, %v3669_v63 }
 0x450   :  { %v3808_v63 = vld [vmem:[#allocation3 + $0x51] sm:$0xff] }
 0x451   :  { %5457 = vmatpush1.bf16.msra.mxu1 %v7530_v13  ;;  %v3494_v13 = vpack.c.bf16 %v3442_v46, %v3441_v11  ;;  %v3550_v11 = vld [vmem:[#allocation3 + $0x1d1] sm:$0xff] }
 0x452   :  { %5458 = vmatprep.subr.bf16.mxu1 %v12238_v15  ;;  %v7540_v46 = vld [vmem:[%s12042_s4 + $0x198] sm:$0xff]  }
 0x454   :  { %5374 = vmatmul.mubr.bf16.gmra.mrb[20].mxu1 %v3699_v9  ;;  %v3444_v9 = vld [vmem:[#allocation3 + $0x128] sm:$0xff] }
 0x455   :  { %5381 = vmatprep.mubr.bf16.mxu1 %v10273_v33  ;;  %5459 = vmatpush1.bf16.msra.mxu1 %v7531_v47  ;;  %v10314_v47 = vpack.c.bf16 %v3768_v57, %v3767_v8  ;;  %v12239_v8 = vld [vmem:[#allocation24_spill] sm:$0xff] }
 0x456   :  { %5460 = vmatprep.subr.bf16.mxu1 %v12238_v15  ;;  %4949 = vmatmul.mubr.bf16.gmra.mrb[92].mxu0 %v3490_v41  ;;  %v3769_v41 = vld [vmem:[#allocation3 + $0x330] sm:$0xff]  ;;  %v3905_v57 = vld [vmem:[#allocation3 + $0x62] sm:$0xff] }
 0x457   :  { %4956 = vmatprep.mubr.bf16.mxu0 %v10170_v32  ;;  %v7534_v32 = vld [vmem:[%s12042_s4 + $0x168] sm:$0xff]   ;;  %v3802_v37 = vpack.c.bf16 %v3770_v59, %v3769_v41 }
 0x458   :  { %v3551_v41 = vld [vmem:[#allocation3 + $0x1e1] sm:$0xff]  ;;  %v3552_v59 = vld [vmem:[#allocation3 + $0x1e9] sm:$0xff] }
 0x459   :  { %5461 = vmatpush1.bf16.msra.mxu1 %v7532_v43  ;;  %v3672_v43 = vld [vmem:[#allocation3 + $0x30a] sm:$0xff] }
 0x45a   :  { %5462 = vmatprep.subr.bf16.mxu1 %v12238_v15  ;;  %v3705_v21 = vpack.c.bf16 %v3672_v43, %v3671_v50  ;;  %v3453_v50 = vld [vmem:[#allocation3 + $0x1c8] sm:$0xff]  ;;  %v3454_v43 = vld [vmem:[#allocation3 + $0x1d0] sm:$0xff] }
 0x45c   :  { %5382 = vmatmul.mubr.bf16.gmra.mrb[24].mxu1 %v3700_v4  ;;  %v3673_v4 = vld [vmem:[#allocation3 + $0x31a] sm:$0xff] }
 0x45d   :  { %5389 = vmatprep.mubr.bf16.mxu1 %v10285_v49  ;;  %5463 = vmatpush1.bf16.msra.mxu1 %v7533_v30 }
 0x45e   :  { %5464 = vmatprep.subr.bf16.mxu1 %v12238_v15  ;;  %4957 = vmatmul.mubr.bf16.gmra.mrb[96].mxu0 %v3491_v6  ;;  %v3706_v6 = vpack.c.bf16 %v3674_v20, %v3673_v4  ;;  %v3907_v4 = vld [vmem:[#allocation3 + $0x7a] sm:$0xff]  ;;  %v3908_v20 = vld [vmem:[#allocation3 + $0x82] sm:$0xff] }
 0x45f   :  { %4964 = vmatprep.mubr.bf16.mxu0 %v10176_v14  ;;  %v7536_v14 = vld [vmem:[%s12042_s4 + $0x178] sm:$0xff]  }
 0x461   :  { %5465 = vmatpush1.bf16.msra.mxu1 %v7534_v32  ;;  %v3900_v32 = vld [vmem:[#allocation3 + $0x22] sm:$0xff] }
 0x462   :  { %5466 = vmatprep.subr.bf16.mxu1 %v12238_v15  ;;  %v10319_v1 = vpack.c.bf16 %v3900_v32, %v3899_v58  ;;  %v7543_v58 = vld [vmem:[%s12042_s4 + $0x1b0] sm:$0xff]  }
 0x464   :  { %5390 = vmatmul.mubr.bf16.gmra.mrb[28].mxu1 %v3701_v56  ;;  %v3901_v56 = vld [vmem:[#allocation3 + $0x32] sm:$0xff] }
 0x465   :  { %5397 = vmatprep.mubr.bf16.mxu1 %v10297_v28  ;;  %5467 = vmatpush1.bf16.msra.mxu1 %v7535_v29  ;;  %v3804_v29 = vld [vmem:[#allocation3 + $0x21] sm:$0xff]  ;;  %v10326_v27 = vpack.c.bf16 %v3902_v17, %v3901_v56  ;;  %v3811_v17 = vld [vmem:[#allocation3 + $0x79] sm:$0xff] }
 0x466   :  { %5468 = vmatprep.subr.bf16.mxu1 %v12238_v15  ;;  %4965 = vmatmul.mubr.bf16.gmra.mrb[100].mxu0 %v3492_v10  ;;  %v3548_v10 = vld [vmem:[#allocation3 + $0x1b9] sm:$0xff] }
 0x467   :  { %4972 = vmatprep.mubr.bf16.mxu0 %v10182_v42  ;;  %v3703_v42 = vpack.c.bf16 %v3668_v25, %v3667_v48  ;;  %v3904_v48 = vld [vmem:[#allocation3 + $0x52] sm:$0xff] }
 0x468   :  { %v7539_v25 = vld [vmem:[%s12042_s4 + $0x190] sm:$0xff]  }
 0x469   :  { %5469 = vmatpush1.bf16.msra.mxu1 %v7536_v14  ;;  %v3547_v14 = vld [vmem:[#allocation3 + $0x1b1] sm:$0xff] }
 0x46a   :  { %5727 = vmatprep.subr.bf16.mxu1 %v12238_v15  ;;  %v3595_v39 = vpack.c.bf16 %v3548_v10, %v3547_v14  ;;  %v3909_v14 = vld [vmem:[#allocation3 + $0x92] sm:$0xff]  ;;  %v3910_v10 = vld [vmem:[#allocation3 + $0x9a] sm:$0xff] }
 0x46c   :  { %5398 = vmatmul.mubr.bf16.gmra.mrb[32].mxu1 %v3702_v2  ;;  %v7538_v2 = vld [vmem:[%s12042_s4 + $0x188] sm:$0xff]  }
 0x46d   :  { %5405 = vmatprep.mubr.bf16.mxu1 %v10306_v34 }
 0x46e   :  { %4973 = vmatmul.mubr.bf16.gmra.mrb[104].mxu0 %v3493_v26  ;;  %v3903_v26 = vld [vmem:[#allocation3 + $0x4a] sm:$0xff] }
 0x46f   :  { %4980 = vmatprep.mubr.bf16.mxu0 %v10191_v36  ;;  %v3443_v36 = vld [vmem:[#allocation3 + $0x120] sm:$0xff]  ;;  %v10337_v54 = vpack.c.bf16 %v3904_v48, %v3903_v26  ;;  %v7546_v26 = vld [vmem:[%s12042_s4 + $0x1c8] sm:$0xff]  }
 0x470   :  { %v3495_v31 = vpack.c.bf16 %v3444_v9, %v3443_v36  ;;  %v7541_v36 = vld [vmem:[%s12042_s4 + $0x1a0] sm:$0xff]  }
 0x474   :  { %5406 = vmatmul.mubr.bf16.gmra.mrb[36].mxu1 %v3703_v42  ;;  %v3549_v42 = vld [vmem:[#allocation3 + $0x1c9] sm:$0xff] }
 0x475   :  { %5413 = vmatprep.mubr.bf16.mxu1 %v10310_v24  ;;  %v10344_v16 = vpack.c.bf16 %v3550_v11, %v3549_v42  ;;  %v3911_v11 = vld [vmem:[#allocation3 + $0xaa] sm:$0xff] }
 0x476   :  { %4981 = vmatmul.mubr.bf16.gmra.mrb[108].mxu0 %v3494_v13  ;;  %v3807_v13 = vld [vmem:[#allocation3 + $0x49] sm:$0xff] }
 0x477   :  { %4988 = vmatprep.mubr.bf16.mxu0 %v10197_v55  ;;  %v3446_v55 = vld [vmem:[#allocation3 + $0x140] sm:$0xff]  ;;  %v3869_v9 = vpack.c.bf16 %v3808_v63, %v3807_v13  ;;  %v7547_v13 = vld [vmem:[%s12042_s4 + $0x1d0] sm:$0xff]  }
 0x478   :  { %v3496_v30 = vpack.c.bf16 %v3446_v55, %v3445_v53  ;;  %v3809_v53 = vld [vmem:[#allocation3 + $0x61] sm:$0xff]  ;;  %v3810_v55 = vld [vmem:[#allocation3 + $0x69] sm:$0xff] }
 0x479   :  { %v3870_v32 = vpack.c.bf16 %v3810_v55, %v3809_v53  ;;  %v3560_v53 = vld [vmem:[#allocation3 + $0x249] sm:$0xff]  ;;  %v7548_v55 = vld [vmem:[%s12042_s4 + $0x1d8] sm:$0xff]  }
 0x47c   :  { %5414 = vmatmul.mubr.bf16.gmra.mrb[40].mxu1 %v3704_v3  ;;  %v3906_v3 = vld [vmem:[#allocation3 + $0x6a] sm:$0xff] }
 0x47d   :  { %5421 = vmatprep.mubr.bf16.mxu1 %v10314_v47 }
 0x47e   :  { %4989 = vmatmul.mubr.bf16.gmra.mrb[112].mxu0 %v3495_v31  ;;  %v10352_v31 = vpack.c.bf16 %v3906_v3, %v3905_v57  ;;  %v3557_v57 = vld [vmem:[#allocation3 + $0x229] sm:$0xff]  ;;  %v3558_v3 = vld [vmem:[#allocation3 + $0x231] sm:$0xff] }
 0x47f   :  { %4996 = vmatprep.mubr.bf16.mxu0 %v10203_v60  ;;  %v3497_v60 = vpack.c.bf16 %v3448_v62, %v3447_v22  ;;  %v3455_v22 = vld [vmem:[#allocation3 + $0x1e0] sm:$0xff]  ;;  %v3456_v62 = vld [vmem:[#allocation3 + $0x1e8] sm:$0xff] }
 0x480   :  { %v3501_v56 = vpack.c.bf16 %v3456_v62, %v3455_v22 }
 0x484   :  { %5422 = vmatmul.mubr.bf16.gmra.mrb[44].mxu1 %v3705_v21  ;;  %v7542_v21 = vld [vmem:[%s12042_s4 + $0x1a8] sm:$0xff]  }
 0x485   :  { %5429 = vmatprep.mubr.bf16.mxu1 %v3802_v37  ;;  %v3500_v37 = vpack.c.bf16 %v3454_v43, %v3453_v50  ;;  %v10398_v50 = vpack.c.bf16 %v3558_v3, %v3557_v57  ;;  %v3913_v43 = vld [vmem:[#allocation3 + $0xc2] sm:$0xff] }
 0x486   :  { %4997 = vmatmul.mubr.bf16.gmra.mrb[116].mxu0 %v3496_v30  ;;  %v10359_v30 = vpack.c.bf16 %v3552_v59, %v3551_v41  ;;  %v3914_v41 = vld [vmem:[#allocation3 + $0xca] sm:$0xff]  ;;  %v3921_v57 = vld [vmem:[#allocation3 + $0x122] sm:$0xff] }
 0x487   :  { %5004 = vmatprep.mubr.bf16.mxu0 %v10213_v7  ;;  %v3867_v7 = vpack.c.bf16 %v3804_v29, %v3803_v19  ;;  %v3554_v19 = vld [vmem:[#allocation3 + $0x201] sm:$0xff]  ;;  %v7544_v29 = vld [vmem:[%s12042_s4 + $0x1b8] sm:$0xff]  }
 0x48c   :  { %5430 = vmatmul.mubr.bf16.gmra.mrb[48].mxu1 %v3706_v6  ;;  %v10366_v6 = vpack.c.bf16 %v3908_v20, %v3907_v4  ;;  %v3817_v4 = vld [vmem:[#allocation3 + $0xc1] sm:$0xff]  ;;  %v3818_v20 = vld [vmem:[#allocation3 + $0xc9] sm:$0xff] }
 0x48d   :  { %5470 = vmatprep.mubr.bf16.mxu1 %v10319_v1  ;;  %v3874_v22 = vpack.c.bf16 %v3818_v20, %v3817_v4 }
 0x48e   :  { %5005 = vmatmul.mubr.bf16.gmra.mrb[120].mxu0 %v3497_v60  ;;  %v3553_v60 = vld [vmem:[#allocation3 + $0x1f9] sm:$0xff] }
 0x48f   :  { %5012 = vmatprep.mubr.bf16.mxu0 %v10219_v40  ;;  %v3805_v40 = vld [vmem:[#allocation3 + $0x31] sm:$0xff] }
 0x490   :  { %v3868_v44 = vpack.c.bf16 %v3806_v18, %v3805_v40  ;;  %v3555_v40 = vld [vmem:[#allocation3 + $0x211] sm:$0xff]  ;;  %v3556_v18 = vld [vmem:[#allocation3 + $0x219] sm:$0xff] }
 0x491   :  { %v10387_v42 = vpack.c.bf16 %v3556_v18, %v3555_v40  ;;  %v3822_v40 = vld [vmem:[#allocation3 + $0xf9] sm:$0xff]  ;;  %v3919_v18 = vld [vmem:[#allocation3 + $0x10a] sm:$0xff] }
 0x494   :  { %5471 = vmatmul.mubr.bf16.vlgmr.msra.gmra.mrb[52].mxu1 %v3867_v7  ;;  %v10373_v7 = vpack.c.bf16 %v3554_v19, %v3553_v60  ;;  %v3561_v60 = vld [vmem:[#allocation3 + $0x259] sm:$0xff]  ;;  %v3562_v19 = vld [vmem:[#allocation3 + $0x261] sm:$0xff] }
 0x495   :  { %5728 = vmatpush1.bf16.msra.mxu1 %v7537_v5  ;;  %5478 = vmatprep.mubr.bf16.mxu1 %v10326_v27  ;;  %v3812_v5 = vld [vmem:[#allocation3 + $0x81] sm:$0xff] }
 0x496   :  { %5729 = vmatprep.subr.bf16.mxu1 %v12238_v15  ;;  %5013 = vmatmul.mubr.bf16.gmra.mrb[124].mxu0 %v3498_v0  ;;  %v3871_v12 = vpack.c.bf16 %v3812_v5, %v3811_v17  ;;  %v3458_v0 = vld [vmem:[#allocation3 + $0x200] sm:$0xff]  ;;  %v10416_v17 = vpack.c.bf16 %v3562_v19, %v3561_v60  ;;  %v3917_v5 = vld [vmem:[#allocation3 + $0xf2] sm:$0xff] }
 0x497   :  { %5020 = vmatprep.mubr.bf16.mxu0 %v3595_v39  ;;  %v10380_v39 = vpack.c.bf16 %v3910_v10, %v3909_v14  ;;  %v3828_v60 = vld [vmem:[#allocation3 + $0x141] sm:$0xff] }
 0x499   :  { %5730 = vmatpush1.bf16.msra.mxu1 %v7538_v2  ;;  %v3457_v2 = vld [vmem:[#allocation3 + $0x1f8] sm:$0xff] }
 0x49a   :  { %5731 = vmatprep.subr.bf16.mxu1 %v12238_v15  ;;  %v3502_v48 = vpack.c.bf16 %v3458_v0, %v3457_v2  ;;  %v7549_v2 = vld [vmem:[%s12042_s4 + $0x1e0] sm:$0xff]   ;;  %v3821_v0 = vld [vmem:[#allocation3 + $0xf1] sm:$0xff] }
 0x49c   :  { %5479 = vmatmul.mubr.bf16.gmra.mrb[56].mxu1 %v3868_v44  ;;  %v3814_v44 = vld [vmem:[#allocation3 + $0x99] sm:$0xff] }
 0x49d   :  { %5486 = vmatprep.mubr.bf16.mxu1 %v10337_v54  ;;  %5732 = vmatpush1.bf16.msra.mxu1 %v7539_v25  ;;  %v3813_v25 = vld [vmem:[#allocation3 + $0x91] sm:$0xff] }
 0x49e   :  { %5733 = vmatprep.subr.bf16.mxu1 %v12238_v15  ;;  %5021 = vmatmul.mubr.bf16.gmra.mrb[128].mxu0 %v12239_v8  ;;  %v3872_v63 = vpack.c.bf16 %v3814_v44, %v3813_v25  ;;  %v3565_v44 = vld [vmem:[#allocation3 + $0x289] sm:$0xff] }
 0x49f   :  { %5028 = vmatprep.mubr.bf16.mxu0 %v10344_v16 }
 0x4a1   :  { %5734 = vmatpush1.bf16.msra.mxu1 %v7540_v46  ;;  %v3912_v46 = vld [vmem:[#allocation3 + $0xb2] sm:$0xff] }
 0x4a2   :  { %5735 = vmatprep.subr.bf16.mxu1 %v12238_v15  ;;  %v10394_v8 = vpack.c.bf16 %v3912_v46, %v3911_v11  ;;  %v3566_v11 = vld [vmem:[#allocation3 + $0x291] sm:$0xff]  ;;  %v3823_v46 = vld [vmem:[#allocation3 + $0x109] sm:$0xff] }
 0x4a4   :  { %5487 = vmatmul.mubr.bf16.gmra.mrb[60].mxu1 %v3869_v9  ;;  %v3816_v9 = vld [vmem:[#allocation3 + $0xb1] sm:$0xff] }
 0x4a5   :  { %5494 = vmatprep.mubr.bf16.mxu1 %v10352_v31  ;;  %5736 = vmatpush1.bf16.msra.mxu1 %v7541_v36  ;;  %v3815_v36 = vld [vmem:[#allocation3 + $0xa9] sm:$0xff] }
 0x4a6   :  { %5737 = vmatprep.subr.bf16.mxu1 %v12238_v15  ;;  %5029 = vmatmul.mubr.bf16.gmra.mrb[132].mxu0 %v3500_v37  ;;  %v3873_v59 = vpack.c.bf16 %v3816_v9, %v3815_v36  ;;  %v3559_v37 = vld [vmem:[#allocation3 + $0x241] sm:$0xff] }
 0x4a7   :  { %5036 = vmatprep.mubr.bf16.mxu0 %v10359_v30  ;;  %v3567_v9 = vld [vmem:[#allocation3 + $0x2a1] sm:$0xff] }
 0x4a9   :  { %5738 = vmatpush1.bf16.msra.mxu1 %v7542_v21  ;;  %v10402_v21 = vpack.c.bf16 %v3914_v41, %v3913_v43  ;;  %v3568_v43 = vld [vmem:[#allocation3 + $0x2a9] sm:$0xff] }
 0x4aa   :  { %5739 = vmatprep.subr.bf16.mxu1 %v12238_v15  ;;  %v7550_v41 = vld [vmem:[%s12042_s4 + $0x1e8] sm:$0xff]  }
 0x4ac   :  { %5495 = vmatmul.mubr.bf16.gmra.mrb[64].mxu1 %v3870_v32  ;;  %v3916_v32 = vld [vmem:[#allocation3 + $0xe2] sm:$0xff] }
 0x4ad   :  { %5502 = vmatprep.mubr.bf16.mxu1 %v10366_v6  ;;  %5740 = vmatpush1.bf16.msra.mxu1 %v7543_v58  ;;  %v3915_v58 = vld [vmem:[#allocation3 + $0xda] sm:$0xff] }
 0x4ae   :  { %5741 = vmatprep.subr.bf16.mxu1 %v12238_v15  ;;  %5037 = vmatmul.mubr.bf16.gmra.mrb[136].mxu0 %v3501_v56  ;;  %v10413_v62 = vpack.c.bf16 %v3916_v32, %v3915_v58  ;;  %v3820_v56 = vld [vmem:[#allocation3 + $0xe1] sm:$0xff]  ;;  %v3569_v58 = vld [vmem:[#allocation3 + $0x2b9] sm:$0xff] }
 0x4af   :  { %5044 = vmatprep.mubr.bf16.mxu0 %v10373_v7  ;;  %v3570_v32 = vld [vmem:[#allocation3 + $0x2c1] sm:$0xff] }
 0x4b0   :  { %v10452_v19 = vpack.c.bf16 %v3570_v32, %v3569_v58  ;;  %v3577_v32 = vld [vmem:[#allocation3 + $0x319] sm:$0xff] }
 0x4b1   :  { %5742 = vmatpush1.bf16.msra.mxu1 %v7544_v29  ;;  %v3819_v29 = vld [vmem:[#allocation3 + $0xd9] sm:$0xff] }
 0x4b2   :  { %5743 = vmatprep.subr.bf16.mxu1 %v12238_v15  ;;  %v3875_v14 = vpack.c.bf16 %v3820_v56, %v3819_v29  ;;  %v3925_v29 = vld [vmem:[#allocation3 + $0x152] sm:$0xff] }
 0x4b4   :  { %5503 = vmatmul.mubr.bf16.gmra.mrb[68].mxu1 %v3871_v12  ;;  %v3564_v12 = vld [vmem:[#allocation3 + $0x279] sm:$0xff] }
 0x4b5   :  { %5510 = vmatprep.mubr.bf16.mxu1 %v10380_v39  ;;  %5744 = vmatpush1.bf16.msra.mxu1 %v7545_v45  ;;  %v3563_v45 = vld [vmem:[#allocation3 + $0x271] sm:$0xff] }
 0x4b6   :  { %5745 = vmatprep.subr.bf16.mxu1 %v12238_v15  ;;  %5045 = vmatmul.mubr.bf16.gmra.mrb[140].mxu0 %v3502_v48  ;;  %v3876_v48 = vpack.c.bf16 %v3822_v40, %v3821_v0  ;;  %v3927_v40 = vld [vmem:[#allocation3 + $0x16a] sm:$0xff] }
 0x4b7   :  { %5052 = vmatprep.mubr.bf16.mxu0 %v10387_v42 }
 0x4b9   :  { %5746 = vmatpush1.bf16.msra.mxu1 %v7546_v26  ;;  %v3920_v26 = vld [vmem:[#allocation3 + $0x112] sm:$0xff] }
 0x4ba   :  { %5747 = vmatprep.subr.bf16.mxu1 %v12238_v15  ;;  %v10431_v25 = vpack.c.bf16 %v3920_v26, %v3919_v18  ;;  %v3928_v18 = vld [vmem:[#allocation3 + $0x172] sm:$0xff] }
 0x4bc   :  { %5511 = vmatmul.mubr.bf16.gmra.mrb[72].mxu1 %v3872_v63  ;;  %v10434_v63 = vpack.c.bf16 %v3566_v11, %v3565_v44  ;;  %v3573_v44 = vld [vmem:[#allocation3 + $0x2e9] sm:$0xff]  ;;  %v3574_v11 = vld [vmem:[#allocation3 + $0x2f1] sm:$0xff] }
 0x4bd   :  { %5518 = vmatprep.mubr.bf16.mxu1 %v10394_v8  ;;  %5748 = vmatpush1.bf16.msra.mxu1 %v7547_v13  ;;  %v3824_v13 = vld [vmem:[#allocation3 + $0x111] sm:$0xff] }
 0x4be   :  { %5749 = vmatprep.subr.bf16.mxu1 %v12238_v15  ;;  %5053 = vmatmul.mubr.bf16.gmra.mrb[144].mxu0 %v10164_v23  ;;  %v10408_v23 = vpack.c.bf16 %v3560_v53, %v3559_v37  ;;  %v3877_v3 = vpack.c.bf16 %v3824_v13, %v3823_v46  ;;  %v3826_v37 = vld [vmem:[#allocation3 + $0x129] sm:$0xff]  ;;  %v3923_v53 = vld [vmem:[#allocation3 + $0x13a] sm:$0xff]  ;;  %v3832_v13 = vld [vmem:[#allocation3 + $0x171] sm:$0xff] }
 0x4bf   :  { %5060 = vmatprep.mubr.bf16.mxu0 %v10398_v50  ;;  %v3831_v46 = vld [vmem:[#allocation3 + $0x169] sm:$0xff] }
 0x4c1   :  { %5750 = vmatpush1.bf16.msra.mxu1 %v7548_v55  ;;  %v3924_v55 = vld [vmem:[#allocation3 + $0x142] sm:$0xff] }
 0x4c2   :  { %5751 = vmatprep.subr.bf16.mxu1 %v12238_v15  ;;  %v10449_v20 = vpack.c.bf16 %v3924_v55, %v3923_v53  ;;  %v3932_v55 = vld [vmem:[#allocation3 + $0x1d2] sm:$0xff] }
 0x4c4   :  { %5519 = vmatmul.mubr.bf16.gmra.mrb[76].mxu1 %v3873_v59  ;;  %v3825_v59 = vld [vmem:[#allocation3 + $0x121] sm:$0xff] }
 0x4c5   :  { %5526 = vmatprep.mubr.bf16.mxu1 %v10402_v21  ;;  %5752 = vmatpush1.bf16.msra.mxu1 %v7549_v2  ;;  %v3878_v4 = vpack.c.bf16 %v3826_v37, %v3825_v59  ;;  %v3830_v2 = vld [vmem:[#allocation3 + $0x159] sm:$0xff]  ;;  %v3833_v59 = vld [vmem:[#allocation3 + $0x181] sm:$0xff]  ;;  %v3834_v37 = vld [vmem:[#allocation3 + $0x189] sm:$0xff] }
 0x4c6   :  { %5061 = vmatmul.mubr.bf16.gmra.mrb[148].mxu0 %v10185_v35  ;;  %v3918_v35 = vld [vmem:[#allocation3 + $0xfa] sm:$0xff]  ;;  %5753 = vmatprep.subr.bf16.mxu1 %v12238_v15 }
 0x4c7   :  { %5068 = vmatprep.mubr.bf16.mxu0 %v10408_v23  ;;  %v10420_v10 = vpack.c.bf16 %v3918_v35, %v3917_v5  ;;  %v3571_v35 = vld [vmem:[#allocation3 + $0x2d1] sm:$0xff] }
 0x4c9   :  { %5754 = vmatpush1.bf16.msra.mxu1 %v7550_v41  ;;  %v7553_v41 = vld [vmem:[%s12042_s4 + $0x1f8] sm:$0xff]  }
 0x4ca   :  { %5755 = vmatprep.subr.bf16.mxu1 %v12238_v15 }
 0x4cc   :  { %5527 = vmatmul.mubr.bf16.gmra.mrb[80].mxu1 %v3874_v22  ;;  %v3827_v22 = vld [vmem:[#allocation3 + $0x139] sm:$0xff] }
 0x4cd   :  { %5534 = vmatprep.mubr.bf16.mxu1 %v10413_v62  ;;  %v3879_v56 = vpack.c.bf16 %v3828_v60, %v3827_v22  ;;  %v3578_v22 = vld [vmem:[#allocation3 + $0x321] sm:$0xff] }
 0x4ce   :  { %5069 = vmatmul.mubr.bf16.gmra.mrb[152].mxu0 %v10226_v61  ;;  %v10426_v61 = vpack.c.bf16 %v3564_v12, %v3563_v45  ;;  %v7551_v45 = vld [vmem:[%s12042_s4 + $0x1f0] sm:$0xff]   ;;  %v10490_v60 = vpack.c.bf16 %v3578_v22, %v3577_v32  ;;  %v3716_v32 = vld [vmem:[#allocation3 + $0x80] sm:$0xff] }
 0x4cf   :  { %5076 = vmatprep.mubr.bf16.mxu0 %v10416_v17  ;;  %5756 = vmatpush1.bf16.msra.mxu1 %v7551_v45  ;;  %v3829_v12 = vld [vmem:[#allocation3 + $0x151] sm:$0xff]  ;;  %v3935_v45 = vld [vmem:[#allocation3 + $0x1fa] sm:$0xff] }
 0x4d0   :  { %5757 = vmatprep.subr.bf16.mxu1 %v12238_v15  ;;  %v3880_v26 = vpack.c.bf16 %v3830_v2, %v3829_v12  ;;  %v3929_v15 = vld [vmem:[#allocation3 + $0x182] sm:$0xff]  ;;  %v7559_v22 = vld [vmem:[%s12042_s4 + $0x230] sm:$0xff]  }
 0x4d1   :  { %v3936_v12 = vld [vmem:[#allocation3 + $0x202] sm:$0xff] }
 0x4d2   :  { %v3611_v2 = vld [vmem:[#allocation3 + $0x2] sm:$0xff] }
 0x4d3   :  { %5758 = vmatpush1.bf16.msra.mxu1 %v7553_v41  ;;  %v3714_v41 = vld [vmem:[#allocation3 + $0x68] sm:$0xff] }
 0x4d4   :  { %5535 = vmatmul.mubr.bf16.gmra.mrb[84].mxu1 %v3875_v14  ;;  %v3572_v14 = vld [vmem:[#allocation3 + $0x2d9] sm:$0xff] }
 0x4d5   :  { %5542 = vmatprep.mubr.bf16.mxu1 %v10420_v10  ;;  %v10467_v0 = vpack.c.bf16 %v3572_v14, %v3571_v35  ;;  %v3708_v35 = vld [vmem:[#allocation3 + $0x20] sm:$0xff] }
 0x4d6   :  { %5077 = vmatmul.mubr.bf16.gmra.mrb[156].mxu0 %v10237_v38  ;;  %v3922_v38 = vld [vmem:[#allocation3 + $0x12a] sm:$0xff] }
 0x4d7   :  { %5084 = vmatprep.mubr.bf16.mxu0 %v10426_v61  ;;  %v10438_v36 = vpack.c.bf16 %v3922_v38, %v3921_v57  ;;  %v10476_v57 = vpack.c.bf16 %v3574_v11, %v3573_v44  ;;  %v3881_v38 = vpack.c.bf16 %v3832_v13, %v3831_v46  ;;  %v3710_v44 = vld [vmem:[#allocation3 + $0x38] sm:$0xff] }
 0x4d8   :  { %v3938_v46 = vld [vmem:[#allocation3 + $0x21a] sm:$0xff] }
 0x4dc   :  { %5543 = vmatmul.mubr.bf16.gmra.mrb[88].mxu1 %v3876_v48  ;;  %v10473_v48 = vpack.c.bf16 %v3928_v18, %v3927_v40  ;;  %v3981_v40 = vpack.c.bf16 %v3936_v12, %v3935_v45  ;;  %v3945_v12 = vld [vmem:[#allocation3 + $0x272] sm:$0xff] }
 0x4dd   :  { %5550 = vmatprep.mubr.bf16.mxu1 %v10431_v25 }
 0x4de   :  { %5085 = vmatmul.mubr.bf16.gmra.mrb[160].mxu0 %v10249_v52  ;;  %v10444_v52 = vpack.c.bf16 %v3568_v43, %v3567_v9  ;;  %v3575_v9 = vld [vmem:[#allocation3 + $0x301] sm:$0xff]  ;;  %v3576_v43 = vld [vmem:[#allocation3 + $0x309] sm:$0xff] }
 0x4df   :  { %5092 = vmatprep.mubr.bf16.mxu0 %v10434_v63  ;;  %v10483_v53 = vpack.c.bf16 %v3576_v43, %v3575_v9  ;;  %v3940_v9 = vld [vmem:[#allocation3 + $0x232] sm:$0xff]  ;;  %v3713_v43 = vld [vmem:[#allocation3 + $0x60] sm:$0xff] }
 0x4e4   :  { %5551 = vmatmul.mubr.bf16.gmra.mrb[92].mxu1 %v3877_v3 }
 0x4e5   :  { %5558 = vmatprep.mubr.bf16.mxu1 %v10438_v36 }
 0x4e6   :  { %5093 = vmatmul.mubr.bf16.gmra.mrb[164].mxu0 %v10261_v51  ;;  %v3926_v51 = vld [vmem:[#allocation3 + $0x15a] sm:$0xff] }
 0x4e7   :  { %5100 = vmatprep.mubr.bf16.mxu0 %v10444_v52  ;;  %v10456_v5 = vpack.c.bf16 %v3926_v51, %v3925_v29  ;;  %v3933_v29 = vld [vmem:[#allocation3 + $0x1e2] sm:$0xff]  ;;  %v3934_v51 = vld [vmem:[#allocation3 + $0x1ea] sm:$0xff] }
 0x4ec   :  { %5559 = vmatmul.mubr.bf16.gmra.mrb[96].mxu1 %v3878_v4  ;;  %v3882_v4 = vpack.c.bf16 %v3834_v37, %v3833_v59  ;;  %v7557_v59 = vld [vmem:[%s12042_s4 + $0x220] sm:$0xff]   ;;  %v10525_v37 = vpack.c.bf16 %v3714_v41, %v3713_v43  ;;  %v3727_v43 = vld [vmem:[#allocation3 + $0x108] sm:$0xff]  ;;  %v3728_v41 = vld [vmem:[#allocation3 + $0x110] sm:$0xff] }
 0x4ed   :  { %5566 = vmatprep.mubr.bf16.mxu1 %v10449_v20 }
 0x4ee   :  { %5101 = vmatmul.mubr.bf16.gmra.mrb[168].mxu0 %v10273_v33  ;;  %v10465_v33 = vld [vmem:[%s12042_s4 + $0x200] sm:$0xff]  }
 0x4ef   :  { %5108 = vmatprep.mubr.bf16.mxu0 %v10452_v19  ;;  %7043 = vmatprep.subr.bf16.mxu0 %v10465_v33 }
 0x4f4   :  { %5567 = vmatmul.mubr.bf16.gmra.mrb[100].mxu1 %v3879_v56  ;;  %v3707_v56 = vld [vmem:[#allocation3 + $0x18] sm:$0xff] }
 0x4f5   :  { %5574 = vmatprep.mubr.bf16.mxu1 %v10456_v5  ;;  %v3771_v14 = vpack.c.bf16 %v3708_v35, %v3707_v56  ;;  %v3944_v56 = vld [vmem:[#allocation3 + $0x262] sm:$0xff]  ;;  %v3717_v35 = vld [vmem:[#allocation3 + $0x90] sm:$0xff] }
 0x4f6   :  { %5109 = vmatmul.mubr.bf16.gmra.mrb[172].mxu0 %v10285_v49  ;;  %v3930_v49 = vld [vmem:[#allocation3 + $0x18a] sm:$0xff] }
 0x4f7   :  { %5116 = vmatprep.mubr.bf16.mxu0 %v10467_v0  ;;  %v3978_v3 = vpack.c.bf16 %v3930_v49, %v3929_v15  ;;  %v3711_v15 = vld [vmem:[#allocation3 + $0x48] sm:$0xff]  ;;  %v3712_v49 = vld [vmem:[#allocation3 + $0x50] sm:$0xff] }
 0x4fc   :  { %5575 = vmatmul.mubr.bf16.gmra.mrb[104].mxu1 %v3880_v26  ;;  %v3709_v26 = vld [vmem:[#allocation3 + $0x30] sm:$0xff] }
 0x4fd   :  { %5582 = vmatprep.mubr.bf16.mxu1 %v10473_v48  ;;  %v10503_v11 = vpack.c.bf16 %v3710_v44, %v3709_v26  ;;  %v3948_v26 = vld [vmem:[#allocation3 + $0x292] sm:$0xff] }
 0x4fe   :  { %5117 = vmatmul.mubr.bf16.gmra.mrb[176].mxu0 %v10297_v28  ;;  %v3931_v28 = vld [vmem:[#allocation3 + $0x1ca] sm:$0xff] }
 0x4ff   :  { %5124 = vmatprep.mubr.bf16.mxu0 %v10476_v57  ;;  %v10487_v58 = vpack.c.bf16 %v3932_v55, %v3931_v28  ;;  %v3941_v28 = vld [vmem:[#allocation3 + $0x242] sm:$0xff]  ;;  %v3942_v55 = vld [vmem:[#allocation3 + $0x24a] sm:$0xff] }
 0x504   :  { %5583 = vmatmul.mubr.bf16.gmra.mrb[108].mxu1 %v3881_v38  ;;  %v7556_v38 = vld [vmem:[%s12042_s4 + $0x218] sm:$0xff]  }
 0x505   :  { %5590 = vmatprep.mubr.bf16.mxu1 %v3978_v3  ;;  %v10514_v3 = vpack.c.bf16 %v3712_v49, %v3711_v15  ;;  %v3951_v15 = vld [vmem:[#allocation3 + $0x2ba] sm:$0xff]  ;;  %v3952_v49 = vld [vmem:[#allocation3 + $0x2c2] sm:$0xff] }
 0x506   :  { %5125 = vmatmul.mubr.bf16.gmra.mrb[180].mxu0 %v10306_v34  ;;  %v10494_v34 = vpack.c.bf16 %v3934_v51, %v3933_v29  ;;  %v3943_v51 = vld [vmem:[#allocation3 + $0x25a] sm:$0xff] }
 0x507   :  { %5132 = vmatprep.mubr.bf16.mxu0 %v10483_v53 }
 0x50c   :  { %5591 = vmatmul.mubr.bf16.gmra.mrb[112].mxu1 %v3882_v4  ;;  %v3715_v4 = vld [vmem:[#allocation3 + $0x78] sm:$0xff] }
 0x50d   :  { %5598 = vmatprep.mubr.bf16.mxu1 %v10487_v58  ;;  %v10536_v29 = vpack.c.bf16 %v3716_v32, %v3715_v4  ;;  %v3958_v4 = vld [vmem:[#allocation3 + $0x30a] sm:$0xff]  ;;  %v3731_v32 = vld [vmem:[#allocation3 + $0x138] sm:$0xff] }
 0x50e   :  { %5133 = vmatmul.mubr.bf16.gmra.mrb[184].mxu0 %v10310_v24  ;;  %v3612_v24 = vld [vmem:[#allocation3 + $0xa] sm:$0xff] }
 0x50f   :  { %5140 = vmatprep.mubr.bf16.mxu0 %v10490_v60  ;;  %v3675_v18 = vpack.c.bf16 %v3612_v24, %v3611_v2  ;;  %v3946_v2 = vld [vmem:[#allocation3 + $0x27a] sm:$0xff]  ;;  %v3719_v24 = vld [vmem:[#allocation3 + $0xa8] sm:$0xff] }
 0x514   :  { %5599 = vmatmul.mubr.bf16.gmra.mrb[116].mxu1 %v10344_v16  ;;  %v7554_v16 = vld [vmem:[%s12042_s4 + $0x208] sm:$0xff]  }
 0x515   :  { %5606 = vmatprep.mubr.bf16.mxu1 %v10494_v34 }
 0x516   :  { %5141 = vmatmul.mubr.bf16.gmra.mrb[188].mxu0 %v10314_v47  ;;  %v3937_v47 = vld [vmem:[#allocation3 + $0x212] sm:$0xff] }
 0x517   :  { %5181 = vmatprep.mubr.bf16.mxu0 %v3771_v14  ;;  %v3982_v13 = vpack.c.bf16 %v3938_v46, %v3937_v47  ;;  %v3718_v14 = vld [vmem:[#allocation3 + $0x98] sm:$0xff]  ;;  %v3950_v46 = vld [vmem:[#allocation3 + $0x2aa] sm:$0xff] }
 0x518   :  { %v10541_v45 = vpack.c.bf16 %v3718_v14, %v3717_v35  ;;  %v3961_v35 = vld [vmem:[#allocation3 + $0x332] sm:$0xff]  ;;  %v3962_v14 = vld [vmem:[#allocation3 + $0x33a] sm:$0xff] }
 0x51c   :  { %5607 = vmatmul.mubr.bf16.gmra.mrb[120].mxu1 %v10359_v30  ;;  %v7555_v30 = vld [vmem:[%s12042_s4 + $0x210] sm:$0xff]  }
 0x51d   :  { %5614 = vmatprep.mubr.bf16.mxu1 %v3981_v40  ;;  %v3720_v40 = vld [vmem:[#allocation3 + $0xb0] sm:$0xff] }
 0x51e   :  { %5182 = vmatmul.mubr.bf16.vlgmr.msra.gmra.mrb[64].mxu0 %v3675_v18  ;;  %v10546_v18 = vpack.c.bf16 %v3720_v40, %v3719_v24  ;;  %v4092_v40 = vld [vmem:[#allocation3 + $0x31] sm:$0xff] }
 0x51f   :  { %5189 = vmatprep.mubr.bf16.mxu0 %v10503_v11  ;;  %7044 = vmatpush3.bf16.msra.mxu0 %v10465_v33  ;;  %v3939_v33 = vld [vmem:[#allocation3 + $0x22a] sm:$0xff] }
 0x520   :  { %7045 = vmatprep.subr.bf16.mxu0 %v7554_v16 }
 0x523   :  { %7046 = vmatpush3.bf16.msra.mxu0 %v7554_v16  ;;  %v3722_v16 = vld [vmem:[#allocation3 + $0xc8] sm:$0xff] }
 0x524   :  { %5615 = vmatmul.mubr.bf16.gmra.mrb[124].mxu1 %v10373_v7  ;;  %7047 = vmatprep.subr.bf16.mxu0 %v7555_v30  ;;  %v3983_v7 = vpack.c.bf16 %v3940_v9, %v3939_v33  ;;  %v3726_v33 = vld [vmem:[#allocation3 + $0xf8] sm:$0xff] }
 0x525   :  { %5622 = vmatprep.mubr.bf16.mxu1 %v3982_v13  ;;  %v3724_v13 = vld [vmem:[#allocation3 + $0xe0] sm:$0xff]  ;;  %v3953_v9 = vld [vmem:[#allocation3 + $0x2d2] sm:$0xff] }
 0x526   :  { %5190 = vmatmul.mubr.bf16.gmra.mrb[68].mxu0 %v10319_v1  ;;  %v7558_v1 = vld [vmem:[%s12042_s4 + $0x228] sm:$0xff]  }
 0x527   :  { %5197 = vmatprep.mubr.bf16.mxu0 %v10514_v3  ;;  %7048 = vmatpush3.bf16.msra.mxu0 %v7555_v30 }
 0x528   :  { %7049 = vmatprep.subr.bf16.mxu0 %v7556_v38 }
 0x52b   :  { %7050 = vmatpush3.bf16.msra.mxu0 %v7556_v38  ;;  %v3725_v38 = vld [vmem:[#allocation3 + $0xf0] sm:$0xff] }
 0x52c   :  { %5623 = vmatmul.mubr.bf16.gmra.mrb[0].mxu1 %v10387_v42  ;;  %7051 = vmatprep.subr.bf16.mxu0 %v7557_v59  ;;  %v3984_v42 = vpack.c.bf16 %v3942_v55, %v3941_v28  ;;  %v3729_v28 = vld [vmem:[#allocation3 + $0x120] sm:$0xff]  ;;  %v3730_v55 = vld [vmem:[#allocation3 + $0x128] sm:$0xff] }
 0x52d   :  { %5630 = vmatprep.mubr.bf16.mxu1 %v3983_v7  ;;  %v3954_v7 = vld [vmem:[#allocation3 + $0x2da] sm:$0xff] }
 0x52e   :  { %5198 = vmatmul.mubr.bf16.gmra.mrb[72].mxu0 %v10326_v27  ;;  %v7560_v27 = vld [vmem:[%s12042_s4 + $0x238] sm:$0xff]  }
 0x52f   :  { %5205 = vmatprep.mubr.bf16.mxu0 %v10525_v37  ;;  %7052 = vmatpush3.bf16.msra.mxu0 %v7557_v59  ;;  %v3955_v59 = vld [vmem:[#allocation3 + $0x2ea] sm:$0xff] }
 0x530   :  { %7053 = vmatprep.subr.bf16.mxu0 %v7558_v1 }
 0x533   :  { %7054 = vmatpush3.bf16.msra.mxu0 %v7558_v1  ;;  %v3956_v1 = vld [vmem:[#allocation3 + $0x2f2] sm:$0xff] }
 0x534   :  { %5631 = vmatmul.mubr.bf16.gmra.mrb[4].mxu1 %v10398_v50  ;;  %7055 = vmatprep.subr.bf16.mxu0 %v7559_v22  ;;  %v3985_v50 = vpack.c.bf16 %v3944_v56, %v3943_v51  ;;  %v3960_v51 = vld [vmem:[#allocation3 + $0x322] sm:$0xff]  ;;  %v3733_v56 = vld [vmem:[#allocation3 + $0x150] sm:$0xff] }
 0x535   :  { %5638 = vmatprep.mubr.bf16.mxu1 %v3984_v42  ;;  %v3957_v42 = vld [vmem:[#allocation3 + $0x302] sm:$0xff] }
 0x536   :  { %5206 = vmatmul.mubr.bf16.gmra.mrb[76].mxu0 %v10337_v54  ;;  %v3986_v54 = vpack.c.bf16 %v3946_v2, %v3945_v12  ;;  %v3735_v12 = vld [vmem:[#allocation3 + $0x168] sm:$0xff]  ;;  %v3736_v2 = vld [vmem:[#allocation3 + $0x170] sm:$0xff] }
 0x537   :  { %5213 = vmatprep.mubr.bf16.mxu0 %v10536_v29  ;;  %7056 = vmatpush3.bf16.msra.mxu0 %v7559_v22  ;;  %v3732_v22 = vld [vmem:[#allocation3 + $0x140] sm:$0xff]  ;;  %v10607_v24 = vpack.c.bf16 %v3736_v2, %v3735_v12  ;;  %v3743_v12 = vld [vmem:[#allocation3 + $0x1f8] sm:$0xff] }
 0x538   :  { %7057 = vmatprep.subr.bf16.mxu0 %v7560_v27  ;;  %v3744_v2 = vld [vmem:[#allocation3 + $0x200] sm:$0xff] }
 0x53b   :  { %7058 = vmatpush3.bf16.msra.mxu0 %v7560_v27  ;;  %v3959_v27 = vld [vmem:[#allocation3 + $0x31a] sm:$0xff] }
 0x53c   :  { %5639 = vmatmul.mubr.bf16.gmra.mrb[8].mxu1 %v10408_v23  ;;  %v3947_v23 = vld [vmem:[#allocation3 + $0x28a] sm:$0xff] }
 0x53d   :  { %5646 = vmatprep.mubr.bf16.mxu1 %v3985_v50  ;;  %v3987_v44 = vpack.c.bf16 %v3948_v26, %v3947_v23  ;;  %v3734_v50 = vld [vmem:[#allocation3 + $0x158] sm:$0xff] }
 0x53e   :  { %5214 = vmatmul.mubr.bf16.gmra.mrb[80].mxu0 %v10352_v31  ;;  %v3721_v31 = vld [vmem:[#allocation3 + $0xc0] sm:$0xff] }
 0x53f   :  { %5221 = vmatprep.mubr.bf16.mxu0 %v10541_v45  ;;  %v10551_v47 = vpack.c.bf16 %v3722_v16, %v3721_v31  ;;  %v3737_v31 = vld [vmem:[#allocation3 + $0x180] sm:$0xff]  ;;  %v3738_v16 = vld [vmem:[#allocation3 + $0x188] sm:$0xff] }
 0x544   :  { %5647 = vmatmul.mubr.bf16.gmra.mrb[12].mxu1 %v10416_v17  ;;  %v3949_v17 = vld [vmem:[#allocation3 + $0x2a2] sm:$0xff] }
 0x545   :  { %5654 = vmatprep.mubr.bf16.mxu1 %v3986_v54  ;;  %v10555_v30 = vpack.c.bf16 %v3950_v46, %v3949_v17  ;;  %v3866_v54 = vld [vmem:[#allocation3 + $0x339] sm:$0xff] }
 0x546   :  { %5222 = vmatmul.mubr.bf16.gmra.mrb[84].mxu0 %v10366_v6  ;;  %v3723_v6 = vld [vmem:[#allocation3 + $0xd8] sm:$0xff] }
 0x547   :  { %5229 = vmatprep.mubr.bf16.mxu0 %v10546_v18 }
 0x54c   :  { %5655 = vmatmul.mubr.bf16.gmra.mrb[16].mxu1 %v10426_v61  ;;  %v10559_v61 = vpack.c.bf16 %v3724_v13, %v3723_v6  ;;  %v10615_v6 = vpack.c.bf16 %v3738_v16, %v3737_v31  ;;  %v4095_v13 = vld [vmem:[#allocation3 + $0x51] sm:$0xff]  ;;  %v4189_v16 = vld [vmem:[#allocation3 + $0x3a] sm:$0xff] }
 0x54d   :  { %5662 = vmatprep.mubr.bf16.mxu1 %v3987_v44  ;;  %v4188_v31 = vld [vmem:[#allocation3 + $0x32] sm:$0xff] }
 0x54e   :  { %5230 = vmatmul.mubr.bf16.gmra.mrb[88].mxu0 %v10380_v39  ;;  %v10563_v39 = vpack.c.bf16 %v3952_v49, %v3951_v15 }
 0x54f   :  { %5237 = vmatprep.mubr.bf16.mxu0 %v10551_v47 }
 0x554   :  { %5663 = vmatmul.mubr.bf16.gmra.mrb[20].mxu1 %v10434_v63  ;;  %v10567_v63 = vpack.c.bf16 %v3726_v33, %v3725_v38  ;;  %v3739_v33 = vld [vmem:[#allocation3 + $0x1c8] sm:$0xff] }
 0x555   :  { %5670 = vmatprep.mubr.bf16.mxu1 %v10555_v30 }
 0x556   :  { %5238 = vmatmul.mubr.bf16.gmra.mrb[92].mxu0 %v10394_v8  ;;  %v10571_v8 = vpack.c.bf16 %v3954_v7, %v3953_v9  ;;  %v3740_v9 = vld [vmem:[#allocation3 + $0x1d0] sm:$0xff] }
 0x557   :  { %5245 = vmatprep.mubr.bf16.mxu0 %v10559_v61 }
 0x55c   :  { %5671 = vmatmul.mubr.bf16.gmra.mrb[24].mxu1 %v10444_v52  ;;  %v10575_v52 = vpack.c.bf16 %v3728_v41, %v3727_v43  ;;  %v3787_v41 = vpack.c.bf16 %v3740_v9, %v3739_v33  ;;  %v4190_v9 = vld [vmem:[#allocation3 + $0x4a] sm:$0xff] }
 0x55d   :  { %5678 = vmatprep.mubr.bf16.mxu1 %v10563_v39 }
 0x55e   :  { %5246 = vmatmul.mubr.bf16.gmra.mrb[96].mxu0 %v10402_v21  ;;  %v10579_v21 = vpack.c.bf16 %v3956_v1, %v3955_v59  ;;  %v4097_v59 = vld [vmem:[#allocation3 + $0x69] sm:$0xff]  ;;  %v3643_v1 = vld [vmem:[#allocation3 + $0x1b2] sm:$0xff] }
 0x55f   :  { %5253 = vmatprep.mubr.bf16.mxu0 %v10567_v63 }
 0x564   :  { %5679 = vmatmul.mubr.bf16.gmra.mrb[28].mxu1 %v10452_v19  ;;  %v10583_v19 = vpack.c.bf16 %v3730_v55, %v3729_v28  ;;  %v3644_v28 = vld [vmem:[#allocation3 + $0x1ba] sm:$0xff] }
 0x565   :  { %5686 = vmatprep.mubr.bf16.mxu1 %v10571_v8 }
 0x566   :  { %5254 = vmatmul.mubr.bf16.gmra.mrb[100].mxu0 %v10413_v62  ;;  %v10587_v62 = vpack.c.bf16 %v3958_v4, %v3957_v42  ;;  %v3691_v4 = vpack.c.bf16 %v3644_v28, %v3643_v1 }
 0x567   :  { %5261 = vmatprep.mubr.bf16.mxu0 %v10575_v52 }
 0x56c   :  { %5687 = vmatmul.mubr.bf16.gmra.mrb[32].mxu1 %v10467_v0  ;;  %v10591_v0 = vpack.c.bf16 %v3732_v22, %v3731_v32  ;;  %v3741_v32 = vld [vmem:[#allocation3 + $0x1e0] sm:$0xff]  ;;  %v3742_v22 = vld [vmem:[#allocation3 + $0x1e8] sm:$0xff] }
 0x56d   :  { %5694 = vmatprep.mubr.bf16.mxu1 %v10579_v21 }
 0x56e   :  { %5262 = vmatmul.mubr.bf16.gmra.mrb[104].mxu0 %v10420_v10  ;;  %v10595_v10 = vpack.c.bf16 %v3960_v51, %v3959_v27 }
 0x56f   :  { %5269 = vmatprep.mubr.bf16.mxu0 %v10583_v19 }
 0x574   :  { %5695 = vmatmul.mubr.bf16.gmra.mrb[36].mxu1 %v10476_v57  ;;  %v10599_v57 = vpack.c.bf16 %v3734_v50, %v3733_v56  ;;  %v10630_v56 = vpack.c.bf16 %v3742_v22, %v3741_v32  ;;  %v4099_v50 = vld [vmem:[#allocation3 + $0x81] sm:$0xff] }
 0x575   :  { %5702 = vmatprep.mubr.bf16.mxu1 %v10587_v62  ;;  %v4194_v22 = vld [vmem:[#allocation3 + $0x7a] sm:$0xff] }
 0x576   :  { %5270 = vmatmul.mubr.bf16.gmra.mrb[108].mxu0 %v10431_v25  ;;  %v10603_v25 = vpack.c.bf16 %v3962_v14, %v3961_v35 }
 0x577   :  { %5277 = vmatprep.mubr.bf16.mxu0 %v10591_v0 }
 0x57c   :  { %5703 = vmatmul.mubr.bf16.gmra.mrb[40].mxu1 %v10483_v53  ;;  %v3865_v53 = vld [vmem:[#allocation3 + $0x331] sm:$0xff] }
 0x57d   :  { %5710 = vmatprep.mubr.bf16.mxu1 %v10595_v10  ;;  %v3898_v23 = vpack.c.bf16 %v3866_v54, %v3865_v53 }
 0x57e   :  { %5278 = vmatmul.mubr.bf16.gmra.mrb[112].mxu0 %v10438_v36  ;;  %v4093_v36 = vld [vmem:[#allocation3 + $0x39] sm:$0xff] }
 0x57f   :  { %5285 = vmatprep.mubr.bf16.mxu0 %v10599_v57  ;;  %v4156_v26 = vpack.c.bf16 %v4093_v36, %v4092_v40  ;;  %v10638_v40 = vpack.c.bf16 %v3744_v2, %v3743_v12  ;;  %v4100_v36 = vld [vmem:[#allocation3 + $0x91] sm:$0xff] }
 0x584   :  { %5711 = vmatmul.mubr.bf16.gmra.mrb[44].mxu1 %v10490_v60 }
 0x585   :  { %5718 = vmatprep.mubr.bf16.mxu1 %v10603_v25 }
 0x586   :  { %5286 = vmatmul.mubr.bf16.gmra.mrb[116].mxu0 %v10449_v20  ;;  %v4094_v20 = vld [vmem:[#allocation3 + $0x49] sm:$0xff] }
 0x587   :  { %5293 = vmatprep.mubr.bf16.mxu0 %v10607_v24  ;;  %v4157_v15 = vpack.c.bf16 %v4095_v13, %v4094_v20  ;;  %v4252_v13 = vpack.c.bf16 %v4189_v16, %v4188_v31  ;;  %v4199_v31 = vld [vmem:[#allocation3 + $0xb2] sm:$0xff]  ;;  %v4200_v16 = vld [vmem:[#allocation3 + $0xc2] sm:$0xff] }
 0x589   :  { %v10611_v44 = vpop.f32.mrb[140].mxu0 }
 0x58a   :  { %v5048_v60 = vpop.f32.mrb[141].mxu0 }
 0x58b   :  { %v10613_v17 = vpop.f32.mrb[142].mxu0 }
 0x58c   :  { %5719 = vmatmul.mubr.bf16.gmra.mrb[48].mxu1 %v3898_v23  ;;  %v5051_v46 = vpop.f32.mrb[143].mxu0  ;;  %v4101_v23 = vld [vmem:[#allocation3 + $0x99] sm:$0xff] }
 0x58d   :  { %5759 = vmatprep.mubr.bf16.mxu1 %v4156_v26  ;;  %v4160_v26 = vpack.c.bf16 %v4101_v23, %v4100_v36  ;;  %v4107_v36 = vld [vmem:[#allocation3 + $0xe1] sm:$0xff] }
 0x58e   :  { %5294 = vmatmul.mubr.bf16.gmra.mrb[120].mxu0 %v10456_v5  ;;  %v4096_v5 = vld [vmem:[#allocation3 + $0x61] sm:$0xff] }
 0x58f   :  { %5301 = vmatprep.mubr.bf16.mxu0 %v10615_v6  ;;  %v4158_v55 = vpack.c.bf16 %v4097_v59, %v4096_v5  ;;  %v4193_v5 = vld [vmem:[#allocation3 + $0x6a] sm:$0xff] }
 0x591   :  { %v10619_v49 = vpop.f32.mrb[144].mxu0 }
 0x592   :  { %v5056_v38 = vpop.f32.mrb[145].mxu0 }
 0x593   :  { %v10622_v7 = vpop.f32.mrb[146].mxu0 }
 0x594   :  { %5760 = vmatmul.mubr.bf16.vlgmr.msra.gmra.mrb[52].mxu1 %v10503_v11  ;;  %v5059_v43 = vpop.f32.mrb[147].mxu0 }
 0x595   :  { %5767 = vmatprep.mubr.bf16.mxu1 %v4157_v15  ;;  %v4103_v15 = vld [vmem:[#allocation3 + $0xb1] sm:$0xff] }
 0x596   :  { %5302 = vmatmul.mubr.bf16.gmra.mrb[124].mxu0 %v10473_v48  ;;  %v4098_v48 = vld [vmem:[#allocation3 + $0x79] sm:$0xff] }
 0x597   :  { %5309 = vmatprep.mubr.bf16.mxu0 %v3787_v41  ;;  %v4159_v35 = vpack.c.bf16 %v4099_v50, %v4098_v48  ;;  %v4191_v43 = vld [vmem:[#allocation3 + $0x52] sm:$0xff]  ;;  %v4192_v41 = vld [vmem:[#allocation3 + $0x62] sm:$0xff]  ;;  %v4197_v50 = vld [vmem:[#allocation3 + $0x9a] sm:$0xff] }
 0x598   :  { %v4253_v28 = vpack.c.bf16 %v4191_v43, %v4190_v9  ;;  %v4196_v48 = vld [vmem:[#allocation3 + $0x92] sm:$0xff] }
 0x599   :  { %v10625_v42 = vpop.f32.mrb[148].mxu0  ;;  %v4256_v2 = vpack.c.bf16 %v4197_v50, %v4196_v48  ;;  %v4108_v9 = vld [vmem:[#allocation3 + $0xf1] sm:$0xff]  ;;  %v4109_v43 = vld [vmem:[#allocation3 + $0xf9] sm:$0xff] }
 0x59a   :  { %v5064_v11 = vpop.f32.mrb[149].mxu0 }
 0x59b   :  { %v10628_v27 = vpop.f32.mrb[150].mxu0  ;;  %v4105_v11 = vld [vmem:[#allocation3 + $0xc9] sm:$0xff] }
 0x59c   :  { %5768 = vmatmul.mubr.bf16.gmra.mrb[56].mxu1 %v10514_v3  ;;  %v5067_v51 = vpop.f32.mrb[151].mxu0 }
 0x59d   :  { %5775 = vmatprep.mubr.bf16.mxu1 %v4158_v55  ;;  %v4254_v55 = vpack.c.bf16 %v4193_v5, %v4192_v41  ;;  %v4195_v51 = vld [vmem:[#allocation3 + $0x82] sm:$0xff]  ;;  %v4202_v5 = vld [vmem:[#allocation3 + $0xda] sm:$0xff] }
 0x59e   :  { %5310 = vmatmul.mubr.bf16.gmra.mrb[128].mxu0 %v3691_v4  ;;  %v4255_v12 = vpack.c.bf16 %v4195_v51, %v4194_v22  ;;  %v4110_v51 = vld [vmem:[#allocation3 + $0x109] sm:$0xff] }
 0x59f   :  { %5317 = vmatprep.mubr.bf16.mxu0 %v10630_v56 }
 0x5a1   :  { %v10633_v14 = vpop.f32.mrb[152].mxu0 }
 0x5a2   :  { %v5072_v3 = vpop.f32.mrb[153].mxu0 }
 0x5a3   :  { %v10636_v53 = vpop.f32.mrb[154].mxu0 }
 0x5a4   :  { %5776 = vmatmul.mubr.bf16.gmra.mrb[60].mxu1 %v10525_v37  ;;  %v5075_v54 = vpop.f32.mrb[155].mxu0 }
 0x5a5   :  { %5783 = vmatprep.mubr.bf16.mxu1 %v4159_v35  ;;  %v4106_v54 = vld [vmem:[#allocation3 + $0xd9] sm:$0xff] }
 0x5a6   :  { %5318 = vmatmul.mubr.bf16.gmra.mrb[132].mxu0 %v10487_v58  ;;  %v4102_v58 = vld [vmem:[#allocation3 + $0xa9] sm:$0xff]  ;;  %v4163_v23 = vpack.c.bf16 %v4107_v36, %v4106_v54 }
 0x5a7   :  { %5325 = vmatprep.mubr.bf16.mxu0 %v10638_v40  ;;  %v4161_v38 = vpack.c.bf16 %v4103_v15, %v4102_v58  ;;  %v4209_v54 = vld [vmem:[#allocation3 + $0x12a] sm:$0xff] }
 0x5a9   :  { %v10642_v60 = vpop.f32.mrb[156].mxu0 }
 0x5aa   :  { %12240 = vst [vmem:[#allocation20_spill] sm:$0xff] %v10642_v60  ;;  %v5080_v37 = vpop.f32.mrb[157].mxu0 }
 0x5ab   :  { %v10645_v46 = vpop.f32.mrb[158].mxu0  ;;  %v4198_v37 = vld [vmem:[#allocation3 + $0xaa] sm:$0xff] }
 0x5ac   :  { %5784 = vmatmul.mubr.bf16.gmra.mrb[64].mxu1 %v10536_v29  ;;  %12241 = vst [vmem:[#allocation22_spill] sm:$0xff] %v10645_v46  ;;  %v5083_v20 = vpop.f32.mrb[159].mxu0  ;;  %v4257_v15 = vpack.c.bf16 %v4199_v31, %v4198_v37 }
 0x5ad   :  { %5791 = vmatprep.mubr.bf16.mxu1 %v4160_v26  ;;  %v4201_v20 = vld [vmem:[#allocation3 + $0xca] sm:$0xff] }
 0x5ae   :  { %5326 = vmatmul.mubr.bf16.gmra.mrb[136].mxu0 %v10494_v34  ;;  %v4104_v34 = vld [vmem:[#allocation3 + $0xc1] sm:$0xff] }
 0x5af   :  { %7059 = vmatprep.mubr.bf16.mxu0 %v4252_v13  ;;  %v4162_v4 = vpack.c.bf16 %v4105_v11, %v4104_v34 }
 0x5b1   :  { %v10648_v33 = vpop.f32.mrb[160].mxu0 }
 0x5b2   :  { %12242 = vst [vmem:[#allocation25_spill] sm:$0xff] %v10648_v33  ;;  %v5088_v29 = vpop.f32.mrb[161].mxu0 }
 0x5b3   :  { %v10651_v59 = vpop.f32.mrb[162].mxu0  ;;  %v4164_v29 = vpack.c.bf16 %v4109_v43, %v4108_v9  ;;  %v4212_v9 = vld [vmem:[#allocation3 + $0x152] sm:$0xff]  ;;  %v4213_v43 = vld [vmem:[#allocation3 + $0x15a] sm:$0xff] }
 0x5b4   :  { %5792 = vmatmul.mubr.bf16.gmra.mrb[68].mxu1 %v10541_v45  ;;  %12243 = vst [vmem:[#allocation5_spill] sm:$0xff] %v10651_v59  ;;  %v5091_v1 = vpop.f32.mrb[163].mxu0  ;;  %v4153_v59 = vld [vmem:[#allocation3 + $0x339] sm:$0xff] }
 0x5b5   :  { %5799 = vmatprep.mubr.bf16.mxu1 %v4161_v38  ;;  %v4258_v38 = vpack.c.bf16 %v4201_v20, %v4200_v16  ;;  %v4203_v1 = vld [vmem:[#allocation3 + $0xe2] sm:$0xff] }
 0x5b6   :  { %7060 = vmatmul.mubr.bf16.vlgmr.msra.gmra.mrb[192].mxu0 %v4253_v28  ;;  %v4204_v28 = vld [vmem:[#allocation3 + $0xf2] sm:$0xff]  ;;  %v4113_v16 = vld [vmem:[#allocation3 + $0x129] sm:$0xff] }
 0x5b7   :  { %7063 = vmatprep.mubr.bf16.mxu0 %v4254_v55  ;;  %v4205_v55 = vld [vmem:[#allocation3 + $0xfa] sm:$0xff] }
 0x5b8   :  { %v4260_v22 = vpack.c.bf16 %v4205_v55, %v4204_v28  ;;  %v4114_v28 = vld [vmem:[#allocation3 + $0x139] sm:$0xff]  ;;  %v4115_v55 = vld [vmem:[#allocation3 + $0x141] sm:$0xff] }
 0x5b9   :  { %v10653_v32 = vpop.f32.mrb[164].mxu0 }
 0x5ba   :  { %12244 = vst [vmem:[#allocation7_spill] sm:$0xff] %v10653_v32  ;;  %v5096_v45 = vpop.f32.mrb[165].mxu0  ;;  %v4152_v32 = vld [vmem:[#allocation3 + $0x331] sm:$0xff] }
 0x5bb   :  { %v10656_v35 = vpop.f32.mrb[166].mxu0  ;;  %v4111_v45 = vld [vmem:[#allocation3 + $0x111] sm:$0xff] }
 0x5bc   :  { %5800 = vmatmul.mubr.bf16.gmra.mrb[72].mxu1 %v10546_v18  ;;  %12245 = vst [vmem:[#allocation4_spill] sm:$0xff] %v10656_v35  ;;  %v5099_v3 = vpop.f32.mrb[167].mxu0  ;;  %v4165_v48 = vpack.c.bf16 %v4111_v45, %v4110_v51  ;;  %v4215_v51 = vld [vmem:[#allocation3 + $0x172] sm:$0xff]  ;;  %v4216_v45 = vld [vmem:[#allocation3 + $0x182] sm:$0xff] }
 0x5bd   :  { %5807 = vmatprep.mubr.bf16.mxu1 %v4162_v4  ;;  %v4259_v4 = vpack.c.bf16 %v4203_v1, %v4202_v5  ;;  %v4206_v3 = vld [vmem:[#allocation3 + $0x10a] sm:$0xff]  ;;  %v4054_v35 = vld [vmem:[#allocation3 + $0x318] sm:$0xff] }
 0x5be   :  { %7064 = vmatmul.mubr.bf16.gmra.mrb[196].mxu0 %v4255_v12  ;;  %v4207_v12 = vld [vmem:[#allocation3 + $0x112] sm:$0xff] }
 0x5bf   :  { %7067 = vmatprep.mubr.bf16.mxu0 %v4256_v2  ;;  %v4208_v2 = vld [vmem:[#allocation3 + $0x122] sm:$0xff]  ;;  %v4261_v37 = vpack.c.bf16 %v4207_v12, %v4206_v3 }
 0x5c0   :  { %v4262_v31 = vpack.c.bf16 %v4209_v54, %v4208_v2  ;;  %v4116_v54 = vld [vmem:[#allocation3 + $0x151] sm:$0xff] }
 0x5c1   :  { %v10658_v26 = vpop.f32.mrb[168].mxu0 }
 0x5c2   :  { %12246 = vst [vmem:[#allocation6_spill] sm:$0xff] %v10658_v26  ;;  %v5104_v18 = vpop.f32.mrb[169].mxu0  ;;  %v4150_v26 = vld [vmem:[#allocation3 + $0x319] sm:$0xff] }
 0x5c3   :  { %v10661_v13 = vpop.f32.mrb[170].mxu0  ;;  %v4112_v18 = vld [vmem:[#allocation3 + $0x121] sm:$0xff] }
 0x5c4   :  { %5808 = vmatmul.mubr.bf16.gmra.mrb[76].mxu1 %v10551_v47  ;;  %12247 = vst [vmem:[#allocation9_spill] sm:$0xff] %v10661_v13  ;;  %v5107_v58 = vpop.f32.mrb[171].mxu0  ;;  %v4166_v20 = vpack.c.bf16 %v4113_v16, %v4112_v18 }
 0x5c5   :  { %5815 = vmatprep.mubr.bf16.mxu1 %v4163_v23 }
 0x5c6   :  { %7068 = vmatmul.mubr.bf16.gmra.mrb[200].mxu0 %v4257_v15  ;;  %v4210_v15 = vld [vmem:[#allocation3 + $0x13a] sm:$0xff] }
 0x5c7   :  { %7071 = vmatprep.mubr.bf16.mxu0 %v4258_v38  ;;  %v4211_v38 = vld [vmem:[#allocation3 + $0x142] sm:$0xff] }
 0x5c8   :  { %v4263_v1 = vpack.c.bf16 %v4211_v38, %v4210_v15  ;;  %v4220_v15 = vld [vmem:[#allocation3 + $0x1e2] sm:$0xff]  ;;  %v4221_v38 = vld [vmem:[#allocation3 + $0x1ea] sm:$0xff] }
 0x5c9   :  { %v10663_v41 = vpop.f32.mrb[172].mxu0 }
 0x5ca   :  { %12248 = vst [vmem:[#allocation11_spill] sm:$0xff] %v10663_v41  ;;  %v5112_v47 = vpop.f32.mrb[173].mxu0 }
 0x5cb   :  { %v10666_v34 = vpop.f32.mrb[174].mxu0  ;;  %v4264_v47 = vpack.c.bf16 %v4213_v43, %v4212_v9  ;;  %v4268_v43 = vpack.c.bf16 %v4221_v38, %v4220_v15 }
 0x5cc   :  { %5816 = vmatmul.mubr.bf16.gmra.mrb[80].mxu1 %v10559_v61  ;;  %12249 = vst [vmem:[#allocation13_spill] sm:$0xff] %v10666_v34  ;;  %v5115_v11 = vpop.f32.mrb[175].mxu0 }
 0x5cd   :  { %5823 = vmatprep.mubr.bf16.mxu1 %v4164_v29  ;;  %v4167_v11 = vpack.c.bf16 %v4115_v55, %v4114_v28  ;;  %v4222_v55 = vld [vmem:[#allocation3 + $0x1fa] sm:$0xff] }
 0x5ce   :  { %7072 = vmatmul.mubr.bf16.gmra.mrb[204].mxu0 %v4259_v4 }
 0x5cf   :  { %7075 = vmatprep.mubr.bf16.mxu0 %v4260_v22  ;;  %v4214_v22 = vld [vmem:[#allocation3 + $0x16a] sm:$0xff] }
 0x5d1   :  { %v10668_v50 = vpop.f32.mrb[176].mxu0 }
 0x5d2   :  { %12250 = vst [vmem:[#allocation15_spill] sm:$0xff] %v10668_v50  ;;  %v5120_v61 = vpop.f32.mrb[177].mxu0  ;;  %v4149_v50 = vld [vmem:[#allocation3 + $0x309] sm:$0xff] }
 0x5d3   :  { %v10671_v36 = vpop.f32.mrb[178].mxu0  ;;  %v4265_v61 = vpack.c.bf16 %v4215_v51, %v4214_v22  ;;  %v4224_v22 = vld [vmem:[#allocation3 + $0x212] sm:$0xff]  ;;  %v4225_v51 = vld [vmem:[#allocation3 + $0x21a] sm:$0xff] }
 0x5d4   :  { %5824 = vmatmul.mubr.bf16.gmra.mrb[84].mxu1 %v10567_v63  ;;  %12251 = vst [vmem:[#allocation12_spill] sm:$0xff] %v10671_v36  ;;  %v5123_v23 = vpop.f32.mrb[179].mxu0 }
 0x5d5   :  { %5831 = vmatprep.mubr.bf16.mxu1 %v4165_v48  ;;  %v4217_v48 = vld [vmem:[#allocation3 + $0x18a] sm:$0xff]  ;;  %v4117_v23 = vld [vmem:[#allocation3 + $0x159] sm:$0xff] }
 0x5d6   :  { %7076 = vmatmul.mubr.bf16.gmra.mrb[208].mxu0 %v4261_v37  ;;  %v4266_v2 = vpack.c.bf16 %v4217_v48, %v4216_v45  ;;  %v4218_v37 = vld [vmem:[#allocation3 + $0x19a] sm:$0xff]  ;;  %v4168_v18 = vpack.c.bf16 %v4117_v23, %v4116_v54 }
 0x5d7   :  { %7079 = vmatprep.mubr.bf16.mxu0 %v4262_v31  ;;  %v4219_v31 = vld [vmem:[#allocation3 + $0x1a2] sm:$0xff] }
 0x5d9   :  { %v10673_v58 = vpop.f32.mrb[180].mxu0 }
 0x5da   :  { %12252 = vst [vmem:[#allocation14_spill] sm:$0xff] %v10673_v58  ;;  %v5128_v63 = vpop.f32.mrb[181].mxu0 }
 0x5db   :  { %v10676_v29 = vpop.f32.mrb[182].mxu0 }
 0x5dc   :  { %5832 = vmatmul.mubr.bf16.gmra.mrb[88].mxu1 %v10575_v52  ;;  %12253 = vst [vmem:[#allocation17_spill] sm:$0xff] %v10676_v29  ;;  %v5131_v5 = vpop.f32.mrb[183].mxu0 }
 0x5dd   :  { %5839 = vmatprep.mubr.bf16.mxu1 %v4166_v20  ;;  %v4267_v20 = vpack.c.bf16 %v4219_v31, %v4218_v37  ;;  %v4118_v5 = vld [vmem:[#allocation3 + $0x169] sm:$0xff]  ;;  %v4227_v31 = vld [vmem:[#allocation3 + $0x232] sm:$0xff] }
 0x5de   :  { %7080 = vmatmul.mubr.bf16.gmra.mrb[212].mxu0 %v4263_v1  ;;  %v4119_v1 = vld [vmem:[#allocation3 + $0x171] sm:$0xff] }
 0x5df   :  { %7083 = vmatprep.mubr.bf16.mxu0 %v4264_v47  ;;  %v4169_v47 = vpack.c.bf16 %v4119_v1, %v4118_v5  ;;  %v4226_v37 = vld [vmem:[#allocation3 + $0x22a] sm:$0xff] }
 0x5e0   :  { %v4271_v38 = vpack.c.bf16 %v4227_v31, %v4226_v37  ;;  %v4125_v37 = vld [vmem:[#allocation3 + $0x1e9] sm:$0xff] }
 0x5e1   :  { %v10678_v4 = vpop.f32.mrb[184].mxu0 }
 0x5e2   :  { %12254 = vst [vmem:[#allocation19_spill] sm:$0xff] %v10678_v4  ;;  %v5136_v52 = vpop.f32.mrb[185].mxu0 }
 0x5e3   :  { %v10681_v3 = vpop.f32.mrb[186].mxu0 }
 0x5e4   :  { %5840 = vmatmul.mubr.bf16.gmra.mrb[92].mxu1 %v10583_v19  ;;  %12255 = vst [vmem:[#allocation16_spill] sm:$0xff] %v10681_v3  ;;  %v5139_v12 = vpop.f32.mrb[187].mxu0 }
 0x5e5   :  { %5847 = vmatprep.mubr.bf16.mxu1 %v4167_v11  ;;  %v4223_v11 = vld [vmem:[#allocation3 + $0x202] sm:$0xff]  ;;  %v4270_v12 = vpack.c.bf16 %v4225_v51, %v4224_v22  ;;  %v4233_v22 = vld [vmem:[#allocation3 + $0x27a] sm:$0xff] }
 0x5e6   :  { %7084 = vmatmul.mubr.bf16.gmra.mrb[216].mxu0 %v4265_v61  ;;  %v4269_v48 = vpack.c.bf16 %v4223_v11, %v4222_v55  ;;  %v4120_v61 = vld [vmem:[#allocation3 + $0x181] sm:$0xff] }
 0x5e7   :  { %7087 = vmatprep.mubr.bf16.mxu0 %v4266_v2  ;;  %v4121_v2 = vld [vmem:[#allocation3 + $0x189] sm:$0xff]  ;;  %v4230_v55 = vld [vmem:[#allocation3 + $0x25a] sm:$0xff] }
 0x5e8   :  { %v4170_v54 = vpack.c.bf16 %v4121_v2, %v4120_v61  ;;  %v4231_v11 = vld [vmem:[#allocation3 + $0x262] sm:$0xff] }
 0x5e9   :  { %v10683_v16 = vpop.f32.mrb[188].mxu0  ;;  %v7566_v61 = vld [vmem:[#allocation3] sm:$0xff] }
 0x5ea   :  { %12256 = vst [vmem:[#allocation18_spill] sm:$0xff] %v10683_v16  ;;  %v5144_v19 = vpop.f32.mrb[189].mxu0  ;;  %v10703_v2 = vpack.c.bf16 %v7566_v61, %v7566_v61 }
 0x5eb   :  { %v10686_v63 = vpop.f32.mrb[190].mxu0  ;;  %v4229_v19 = vld [vmem:[#allocation3 + $0x24a] sm:$0xff] }
 0x5ec   :  { %5848 = vmatmul.mubr.bf16.gmra.mrb[96].mxu1 %v10591_v0  ;;  %12257 = vst [vmem:[#allocation21_spill] sm:$0xff] %v10686_v63  ;;  %v5147_v9 = vpop.f32.mrb[191].mxu0 }
 0x5ed   :  { %5855 = vmatprep.mubr.bf16.mxu1 %v4168_v18  ;;  %v4228_v18 = vld [vmem:[#allocation3 + $0x242] sm:$0xff]  ;;  %v4122_v9 = vld [vmem:[#allocation3 + $0x199] sm:$0xff] }
 0x5ee   :  { %7088 = vmatmul.mubr.bf16.gmra.mrb[220].mxu0 %v4267_v20  ;;  %v4272_v5 = vpack.c.bf16 %v4229_v19, %v4228_v18  ;;  %v4235_v18 = vld [vmem:[#allocation3 + $0x292] sm:$0xff] }
 0x5ef   :  { %7091 = vmatprep.mubr.bf16.mxu0 %v4268_v43  ;;  %v4123_v43 = vld [vmem:[#allocation3 + $0x1a1] sm:$0xff] }
 0x5f0   :  { %v4171_v1 = vpack.c.bf16 %v4123_v43, %v4122_v9  ;;  %v4126_v43 = vld [vmem:[#allocation3 + $0x1f9] sm:$0xff] }
 0x5f1   :  { %v10688_v28 = vpop.f32.mrb[64].mxu0 }
 0x5f2   :  { %v5185_v0 = vpop.f32.mrb[65].mxu0 }
 0x5f3   :  { %v10691_v52 = vpop.f32.mrb[66].mxu0  ;;  %v4232_v0 = vld [vmem:[#allocation3 + $0x272] sm:$0xff] }
 0x5f4   :  { %5856 = vmatmul.mubr.bf16.gmra.mrb[100].mxu1 %v10599_v57  ;;  %v5188_v45 = vpop.f32.mrb[67].mxu0 }
 0x5f5   :  { %5863 = vmatprep.mubr.bf16.mxu1 %v4169_v47 }
 0x5f6   :  { %7092 = vmatmul.mubr.bf16.gmra.mrb[224].mxu0 %v4269_v48  ;;  %v4273_v48 = vpack.c.bf16 %v4231_v11, %v4230_v55 }
 0x5f7   :  { %7095 = vmatprep.mubr.bf16.mxu0 %v4270_v12  ;;  %v4274_v12 = vpack.c.bf16 %v4233_v22, %v4232_v0  ;;  %v4128_v22 = vld [vmem:[#allocation3 + $0x211] sm:$0xff] }
 0x5f9   :  { %v10693_v23 = vpop.f32.mrb[68].mxu0 }
 0x5fa   :  { %v5193_v57 = vpop.f32.mrb[69].mxu0 }
 0x5fb   :  { %v10696_v20 = vpop.f32.mrb[70].mxu0 }
 0x5fc   :  { %5864 = vmatmul.mubr.bf16.gmra.mrb[104].mxu1 %v10607_v24  ;;  %v5196_v15 = vpop.f32.mrb[71].mxu0 }
 0x5fd   :  { %5871 = vmatprep.mubr.bf16.mxu1 %v4170_v54  ;;  %v4124_v54 = vld [vmem:[#allocation3 + $0x1e1] sm:$0xff] }
 0x5fe   :  { %7096 = vmatmul.mubr.bf16.gmra.mrb[228].mxu0 %v4271_v38  ;;  %v4172_v31 = vpack.c.bf16 %v4125_v37, %v4124_v54  ;;  %v4032_v54 = vld [vmem:[#allocation3 + $0x210] sm:$0xff]  ;;  %v4033_v37 = vld [vmem:[#allocation3 + $0x218] sm:$0xff] }
 0x5ff   :  { %7099 = vmatprep.mubr.bf16.mxu0 %v4272_v5  ;;  %v4127_v5 = vld [vmem:[#allocation3 + $0x201] sm:$0xff] }
 0x601   :  { %v10698_v47 = vpop.f32.mrb[72].mxu0 }
 0x602   :  { %v5201_v24 = vpop.f32.mrb[73].mxu0 }
 0x603   :  { %v10701_v51 = vpop.f32.mrb[74].mxu0 }
 0x604   :  { %5872 = vmatmul.mubr.bf16.gmra.mrb[108].mxu1 %v10615_v6  ;;  %v5204_v45 = vpop.f32.mrb[75].mxu0  ;;  %v4234_v6 = vld [vmem:[#allocation3 + $0x28a] sm:$0xff] }
 0x605   :  { %5879 = vmatprep.mubr.bf16.mxu1 %v4171_v1  ;;  %v4275_v9 = vpack.c.bf16 %v4235_v18, %v4234_v6  ;;  %v4173_v1 = vpack.c.bf16 %v4127_v5, %v4126_v43  ;;  %v4129_v45 = vld [vmem:[#allocation3 + $0x219] sm:$0xff]  ;;  %v4078_v6 = vpack.c.bf16 %v4033_v37, %v4032_v54  ;;  %v4035_v43 = vld [vmem:[#allocation3 + $0x230] sm:$0xff]  ;;  %v4132_v5 = vld [vmem:[#allocation3 + $0x241] sm:$0xff] }
 0x606   :  { %7100 = vmatmul.mubr.bf16.gmra.mrb[232].mxu0 %v4273_v48  ;;  %v4174_v48 = vpack.c.bf16 %v4129_v45, %v4128_v22  ;;  %v4036_v54 = vld [vmem:[#allocation3 + $0x240] sm:$0xff]  ;;  %v4037_v37 = vld [vmem:[#allocation3 + $0x248] sm:$0xff] }
 0x607   :  { %7103 = vmatprep.mubr.bf16.mxu0 %v4274_v12 }
 0x609   :  { %v10705_v57 = vpop.f32.mrb[76].mxu0 }
 0x60a   :  { %v5209_v19 = vpop.f32.mrb[77].mxu0 }
 0x60b   :  { %v10708_v15 = vpop.f32.mrb[78].mxu0 }
 0x60c   :  { %5880 = vmatmul.mubr.bf16.gmra.mrb[112].mxu1 %v10703_v2  ;;  %v5212_v38 = vpop.f32.mrb[79].mxu0 }
 0x60d   :  { %5887 = vmatprep.mubr.bf16.mxu1 %v4172_v31  ;;  %v4130_v31 = vld [vmem:[#allocation3 + $0x229] sm:$0xff] }
 0x60e   :  { %7104 = vmatmul.mubr.bf16.gmra.mrb[236].mxu0 %v4275_v9  ;;  %v4034_v9 = vld [vmem:[#allocation3 + $0x228] sm:$0xff] }
 0x60f   :  { %7107 = vmatprep.mubr.bf16.mxu0 %v10555_v30 }
 0x611   :  { %v10711_v55 = vpop.f32.mrb[80].mxu0 }
 0x612   :  { %v5217_v11 = vpop.f32.mrb[81].mxu0 }
 0x613   :  { %v10714_v24 = vpop.f32.mrb[82].mxu0  ;;  %v4079_v11 = vpack.c.bf16 %v4035_v43, %v4034_v9  ;;  %v4038_v9 = vld [vmem:[#allocation3 + $0x258] sm:$0xff]  ;;  %v4039_v43 = vld [vmem:[#allocation3 + $0x260] sm:$0xff] }
 0x614   :  { %5888 = vmatmul.mubr.bf16.gmra.mrb[116].mxu1 %v10630_v56  ;;  %v5220_v0 = vpop.f32.mrb[83].mxu0 }
 0x615   :  { %5895 = vmatprep.mubr.bf16.mxu1 %v4173_v1  ;;  %v4250_v1 = vld [vmem:[#allocation3 + $0x34a] sm:$0xff] }
 0x616   :  { %7108 = vmatmul.mubr.bf16.gmra.mrb[240].mxu0 %v10563_v39  ;;  %v4131_v39 = vld [vmem:[#allocation3 + $0x231] sm:$0xff] }
 0x617   :  { %7111 = vmatprep.mubr.bf16.mxu0 %v10571_v8  ;;  %v4175_v8 = vpack.c.bf16 %v4131_v39, %v4130_v31  ;;  %v4135_v31 = vld [vmem:[#allocation3 + $0x261] sm:$0xff]  ;;  %v4080_v39 = vpack.c.bf16 %v4037_v37, %v4036_v54  ;;  %v4041_v54 = vld [vmem:[#allocation3 + $0x278] sm:$0xff]  ;;  %v4138_v37 = vld [vmem:[#allocation3 + $0x289] sm:$0xff] }
 0x619   :  { %v10718_v12 = vpop.f32.mrb[84].mxu0 }
 0x61a   :  { %v5225_v30 = vpop.f32.mrb[85].mxu0 }
 0x61b   :  { %v10721_v61 = vpop.f32.mrb[86].mxu0 }
 0x61c   :  { %5896 = vmatmul.mubr.bf16.gmra.mrb[120].mxu1 %v10638_v40  ;;  %v5228_v56 = vpop.f32.mrb[87].mxu0 }
 0x61d   :  { %5903 = vmatprep.mubr.bf16.mxu1 %v4174_v48 }
 0x61e   :  { %7112 = vmatmul.mubr.bf16.gmra.mrb[244].mxu0 %v10579_v21  ;;  %v4133_v21 = vld [vmem:[#allocation3 + $0x249] sm:$0xff] }
 0x61f   :  { %7115 = vmatprep.mubr.bf16.mxu0 %v10587_v62  ;;  %v4251_v62 = vld [vmem:[#allocation3 + $0x352] sm:$0xff]  ;;  %v4176_v0 = vpack.c.bf16 %v4133_v21, %v4132_v5 }
 0x620   :  { %v4283_v48 = vpack.c.bf16 %v4251_v62, %v4250_v1  ;;  %v4136_v5 = vld [vmem:[#allocation3 + $0x271] sm:$0xff]  ;;  %v4137_v21 = vld [vmem:[#allocation3 + $0x279] sm:$0xff]  ;;  %v4081_v1 = vpack.c.bf16 %v4039_v43, %v4038_v9  ;;  %v4042_v43 = vld [vmem:[#allocation3 + $0x288] sm:$0xff] }
 0x621   :  { %v10725_v18 = vpop.f32.mrb[88].mxu0  ;;  %v4178_v62 = vpack.c.bf16 %v4137_v21, %v4136_v5  ;;  %v4043_v5 = vld [vmem:[#allocation3 + $0x290] sm:$0xff]  ;;  %v4140_v21 = vld [vmem:[#allocation3 + $0x2a1] sm:$0xff] }
 0x622   :  { %v5233_v19 = vpop.f32.mrb[89].mxu0 }
 0x623   :  { %v10727_v40 = vpop.f32.mrb[90].mxu0 }
 0x624   :  { %5904 = vmatmul.mubr.bf16.gmra.mrb[124].mxu1 %v4078_v6  ;;  %v5236_v38 = vpop.f32.mrb[91].mxu0 }
 0x625   :  { %5911 = vmatprep.mubr.bf16.mxu1 %v4175_v8 }
 0x626   :  { %7116 = vmatmul.mubr.bf16.gmra.mrb[248].mxu0 %v10595_v10  ;;  %v4134_v10 = vld [vmem:[#allocation3 + $0x259] sm:$0xff] }
 0x627   :  { %7119 = vmatprep.mubr.bf16.mxu0 %v10603_v25  ;;  %v4177_v25 = vpack.c.bf16 %v4135_v31, %v4134_v10  ;;  %v4139_v10 = vld [vmem:[#allocation3 + $0x291] sm:$0xff] }
 0x629   :  { %v10731_v22 = vpop.f32.mrb[92].mxu0 }
 0x62a   :  { %v5241_v45 = vpop.f32.mrb[93].mxu0 }
 0x62b   :  { %v10733_v30 = vpop.f32.mrb[94].mxu0 }
 0x62c   :  { %5912 = vmatmul.mubr.bf16.gmra.mrb[0].mxu1 %v4079_v11  ;;  %v5244_v56 = vpop.f32.mrb[95].mxu0 }
 0x62d   :  { %5919 = vmatprep.mubr.bf16.mxu1 %v4176_v0  ;;  %v4040_v56 = vld [vmem:[#allocation3 + $0x270] sm:$0xff] }
 0x62e   :  { %7120 = vmatmul.mubr.bf16.gmra.mrb[252].mxu0 %v4283_v48  ;;  %v4082_v31 = vpack.c.bf16 %v4041_v54, %v4040_v56 }
 0x631   :  { %v10735_v6 = vpop.f32.mrb[96].mxu0 }
 0x632   :  { %v5249_v8 = vpop.f32.mrb[97].mxu0 }
 0x633   :  { %v10737_v19 = vpop.f32.mrb[98].mxu0 }
 0x634   :  { %5920 = vmatmul.mubr.bf16.gmra.mrb[4].mxu1 %v4080_v39  ;;  %v5252_v38 = vpop.f32.mrb[99].mxu0  ;;  %v4179_v39 = vpack.c.bf16 %v4139_v10, %v4138_v37  ;;  %v4044_v37 = vld [vmem:[#allocation3 + $0x2a0] sm:$0xff]  ;;  %v4045_v10 = vld [vmem:[#allocation3 + $0x2a8] sm:$0xff] }
 0x635   :  { %5927 = vmatprep.mubr.bf16.mxu1 %v4177_v25 }
 0x639   :  { %v10739_v11 = vpop.f32.mrb[100].mxu0 }
 0x63a   :  { %v5257_v0 = vpop.f32.mrb[101].mxu0 }
 0x63b   :  { %v10741_v45 = vpop.f32.mrb[102].mxu0 }
 0x63c   :  { %5928 = vmatmul.mubr.bf16.gmra.mrb[8].mxu1 %v4081_v1  ;;  %v5260_v48 = vpop.f32.mrb[103].mxu0  ;;  %v4141_v1 = vld [vmem:[#allocation3 + $0x2a9] sm:$0xff] }
 0x63d   :  { %5935 = vmatprep.mubr.bf16.mxu1 %v4178_v62  ;;  %v4083_v62 = vpack.c.bf16 %v4043_v5, %v4042_v43  ;;  %v4180_v0 = vpack.c.bf16 %v4141_v1, %v4140_v21  ;;  %v4046_v21 = vld [vmem:[#allocation3 + $0x2b8] sm:$0xff] }
 0x63e   :  { %v4144_v1 = vld [vmem:[#allocation3 + $0x2d1] sm:$0xff] }
 0x641   :  { %v10743_v25 = vpop.f32.mrb[104].mxu0 }
 0x642   :  { %v5265_v8 = vpop.f32.mrb[105].mxu0 }
 0x643   :  { %v10745_v38 = vpop.f32.mrb[106].mxu0  ;;  %v4084_v8 = vpack.c.bf16 %v4045_v10, %v4044_v37 }
 0x644   :  { %5936 = vmatmul.mubr.bf16.gmra.mrb[12].mxu1 %v4082_v31  ;;  %v5268_v9 = vpop.f32.mrb[107].mxu0  ;;  %v4142_v31 = vld [vmem:[#allocation3 + $0x2b9] sm:$0xff] }
 0x645   :  { %5943 = vmatprep.mubr.bf16.mxu1 %v4179_v39  ;;  %v4143_v39 = vld [vmem:[#allocation3 + $0x2c1] sm:$0xff] }
 0x646   :  { %v4181_v9 = vpack.c.bf16 %v4143_v39, %v4142_v31  ;;  %v4048_v31 = vld [vmem:[#allocation3 + $0x2d0] sm:$0xff] }
 0x647   :  { %v4146_v39 = vld [vmem:[#allocation3 + $0x2e9] sm:$0xff] }
 0x649   :  { %v10747_v48 = vpop.f32.mrb[108].mxu0 }
 0x64a   :  { %v5273_v63 = vpop.f32.mrb[109].mxu0 }
 0x64b   :  { %v10749_v56 = vpop.f32.mrb[110].mxu0  ;;  %v4047_v63 = vld [vmem:[#allocation3 + $0x2c0] sm:$0xff] }
 0x64c   :  { %5944 = vmatmul.mubr.bf16.gmra.mrb[16].mxu1 %v4083_v62  ;;  %v5276_v54 = vpop.f32.mrb[111].mxu0  ;;  %v4145_v62 = vld [vmem:[#allocation3 + $0x2d9] sm:$0xff] }
 0x64d   :  { %5951 = vmatprep.mubr.bf16.mxu1 %v4180_v0  ;;  %v4085_v0 = vpack.c.bf16 %v4047_v63, %v4046_v21  ;;  %v4182_v54 = vpack.c.bf16 %v4145_v62, %v4144_v1  ;;  %v4051_v62 = vld [vmem:[#allocation3 + $0x2f0] sm:$0xff] }
 0x651   :  { %v10751_v16 = vpop.f32.mrb[112].mxu0 }
 0x652   :  { %v5281_v3 = vpop.f32.mrb[113].mxu0 }
 0x653   :  { %v10753_v43 = vpop.f32.mrb[114].mxu0  ;;  %v4049_v3 = vld [vmem:[#allocation3 + $0x2d8] sm:$0xff] }
 0x654   :  { %5952 = vmatmul.mubr.bf16.gmra.mrb[20].mxu1 %v4084_v8  ;;  %v5284_v5 = vpop.f32.mrb[115].mxu0  ;;  %v4147_v8 = vld [vmem:[#allocation3 + $0x2f1] sm:$0xff] }
 0x655   :  { %5959 = vmatprep.mubr.bf16.mxu1 %v4181_v9  ;;  %v4086_v9 = vpack.c.bf16 %v4049_v3, %v4048_v31  ;;  %v4183_v5 = vpack.c.bf16 %v4147_v8, %v4146_v39 }
 0x659   :  { %v10755_v4 = vpop.f32.mrb[116].mxu0 }
 0x65a   :  { %v5289_v29 = vpop.f32.mrb[117].mxu0 }
 0x65b   :  { %v10757_v37 = vpop.f32.mrb[118].mxu0  ;;  %v4050_v29 = vld [vmem:[#allocation3 + $0x2e8] sm:$0xff] }
 0x65c   :  { %5960 = vmatmul.mubr.bf16.gmra.mrb[24].mxu1 %v4085_v0  ;;  %v5292_v10 = vpop.f32.mrb[119].mxu0  ;;  %v4087_v39 = vpack.c.bf16 %v4051_v62, %v4050_v29 }
 0x65d   :  { %5967 = vmatprep.mubr.bf16.mxu1 %v4182_v54  ;;  %v4148_v10 = vld [vmem:[#allocation3 + $0x301] sm:$0xff] }
 0x661   :  { %v10759_v58 = vpop.f32.mrb[120].mxu0 }
 0x662   :  { %v5297_v36 = vpop.f32.mrb[121].mxu0 }
 0x663   :  { %v10761_v21 = vpop.f32.mrb[122].mxu0  ;;  %v4184_v36 = vpack.c.bf16 %v4149_v50, %v4148_v10 }
 0x664   :  { %5968 = vmatmul.mubr.bf16.gmra.mrb[28].mxu1 %v4086_v9  ;;  %v5300_v63 = vpop.f32.mrb[123].mxu0 }
 0x665   :  { %5975 = vmatprep.mubr.bf16.mxu1 %v4183_v5 }
 0x667   :  { %v5761_v1 = vpop.f32.mrb[52].mxu1 }
 0x668   :  { %v10764_v0 = vadd.f32 %v5761_v1, %v10688_v28  ;;  %v5763_v54 = vpop.f32.mrb[53].mxu1  ;;  %v4052_v1 = vld [vmem:[#allocation3 + $0x300] sm:$0xff] }
 0x669   :  { %v5764_v34 = vpop.f32.mrb[54].mxu1  ;;  %v10769_v8 = vpop.f32.mrb[124].mxu0  ;;  %v4053_v54 = vld [vmem:[#allocation3 + $0x308] sm:$0xff] }
 0x66a   :  { %v10767_v31 = vadd.f32 %v5764_v34, %v10691_v52  ;;  %v5766_v3 = vpop.f32.mrb[55].mxu1  ;;  %v5305_v9 = vpop.f32.mrb[125].mxu0  ;;  %v4151_v34 = vld [vmem:[#allocation3 + $0x321] sm:$0xff]  ;;  %v4088_v62 = vpack.c.bf16 %v4053_v54, %v4052_v1 }
 0x66b   :  { %v10771_v5 = vpop.f32.mrb[126].mxu0  ;;  %v4185_v10 = vpack.c.bf16 %v4151_v34, %v4150_v26  ;;  %v4186_v34 = vpack.c.bf16 %v4153_v59, %v4152_v32 }
 0x66c   :  { %5976 = vmatmul.mubr.bf16.gmra.mrb[32].mxu1 %v4087_v39  ;;  %v5308_v63 = vpop.f32.mrb[127].mxu0 }
 0x66d   :  { %5983 = vmatprep.mubr.bf16.mxu1 %v4184_v36 }
 0x66f   :  { %v5769_v28 = vpop.f32.mrb[56].mxu1 }
 0x670   :  { %v7157_v41 = vadd.f32 %v5769_v28, %v10693_v23  ;;  %v5771_v13 = vpop.f32.mrb[57].mxu1  ;;  %v4055_v23 = vld [vmem:[#allocation3 + $0x320] sm:$0xff] }
 0x671   :  { %v5772_v52 = vpop.f32.mrb[58].mxu1  ;;  %v10775_v3 = vpop.f32.mrb[128].mxu0  ;;  %v4089_v54 = vpack.c.bf16 %v4055_v23, %v4054_v35 }
 0x672   :  { %v7158_v29 = vadd.f32 %v5772_v52, %v10696_v20  ;;  %v5774_v50 = vpop.f32.mrb[59].mxu1  ;;  %v5313_v39 = vpop.f32.mrb[129].mxu0 }
 0x673   :  { %v10777_v36 = vpop.f32.mrb[130].mxu0  ;;  %v4154_v39 = vld [vmem:[#allocation3 + $0x349] sm:$0xff] }
 0x674   :  { %5984 = vmatmul.mubr.bf16.gmra.mrb[36].mxu1 %v4088_v62  ;;  %v5316_v9 = vpop.f32.mrb[131].mxu0 }
 0x675   :  { %5991 = vmatprep.mubr.bf16.mxu1 %v4185_v10  ;;  %v4155_v9 = vld [vmem:[#allocation3 + $0x351] sm:$0xff] }
 0x677   :  { %v5777_v63 = vpop.f32.mrb[60].mxu1 }
 0x678   :  { %v7159_v13 = vadd.f32 %v5777_v63, %v10698_v47  ;;  %v5779_v28 = vpop.f32.mrb[61].mxu1  ;;  %v4056_v63 = vld [vmem:[#allocation3 + $0x330] sm:$0xff] }
 0x679   :  { %v5780_v20 = vpop.f32.mrb[62].mxu1  ;;  %v10781_v52 = vpop.f32.mrb[132].mxu0  ;;  %v4057_v28 = vld [vmem:[#allocation3 + $0x338] sm:$0xff] }
 0x67a   :  { %v7160_v1 = vadd.f32 %v5780_v20, %v10701_v51  ;;  %v5782_v26 = vpop.f32.mrb[63].mxu1  ;;  %v5321_v50 = vpop.f32.mrb[133].mxu0  ;;  %v4187_v20 = vpack.c.bf16 %v4155_v9, %v4154_v39  ;;  %v4090_v35 = vpack.c.bf16 %v4057_v28, %v4056_v63 }
 0x67b   :  { %v10783_v62 = vpop.f32.mrb[134].mxu0 }
 0x67c   :  { %5992 = vmatmul.mubr.bf16.gmra.mrb[40].mxu1 %v4089_v54  ;;  %v5324_v10 = vpop.f32.mrb[135].mxu0 }
 0x67d   :  { %5999 = vmatprep.mubr.bf16.mxu1 %v4186_v34 }
 0x67f   :  { %v5785_v47 = vpop.f32.mrb[64].mxu1 }
 0x680   :  { %v7161_v33 = vadd.f32 %v5785_v47, %v10705_v57  ;;  %v5787_v46 = vpop.f32.mrb[65].mxu1 }
 0x681   :  { %v5788_v51 = vpop.f32.mrb[66].mxu1  ;;  %v10787_v23 = vpop.f32.mrb[136].mxu0 }
 0x682   :  { %v7162_v59 = vadd.f32 %v5788_v51, %v10708_v15  ;;  %v5790_v32 = vpop.f32.mrb[67].mxu1  ;;  %v5329_v26 = vpop.f32.mrb[137].mxu0 }
 0x683   :  { %v10789_v54 = vpop.f32.mrb[138].mxu0 }
 0x684   :  { %6000 = vmatmul.mubr.bf16.gmra.mrb[44].mxu1 %v4090_v35  ;;  %v5332_v34 = vpop.f32.mrb[139].mxu0 }
 0x685   :  { %6007 = vmatprep.mubr.bf16.mxu1 %v4187_v20 }
 0x687   :  { %v5793_v50 = vpop.f32.mrb[68].mxu1 }
 0x688   :  { %v7163_v10 = vadd.f32 %v5793_v50, %v10711_v55  ;;  %v5795_v60 = vpop.f32.mrb[69].mxu1 }
 0x689   :  { %v5796_v57 = vpop.f32.mrb[70].mxu1  ;;  %v7061_v9 = vpop.f32.mrb[192].mxu0 }
 0x68a   :  { %v7164_v46 = vadd.f32 %v5796_v57, %v10714_v24  ;;  %v5798_v39 = vpop.f32.mrb[71].mxu1  ;;  %v10794_v15 = vadd.f32 %v7157_v41, %v7061_v9  ;;  %v6050_v47 = vpop.f32.mrb[193].mxu0 }
 0x68b   :  { %v10797_v63 = vadd.f32 %v10764_v0, %v6050_v47  ;;  %v7062_v28 = vpop.f32.mrb[194].mxu0 }
 0x68c   :  { %6008 = vmatmul.mubr.bf16.gmra.mrb[48].mxu1 %v10703_v2  ;;  %v10799_v51 = vadd.f32 %v7158_v29, %v7062_v28  ;;  %v6053_v20 = vpop.f32.mrb[195].mxu0 }
 0x68d   :  { %v10802_v60 = vadd.f32 %v10767_v31, %v6053_v20 }
 0x68f   :  { %v5801_v32 = vpop.f32.mrb[72].mxu1 }
 0x690   :  { %v7165_v55 = vadd.f32 %v5801_v32, %v10718_v12  ;;  %v5803_v24 = vpop.f32.mrb[73].mxu1  ;;  %v6376_v12 = vmul.f32 %v10802_v60, %v10802_v60 }
 0x691   :  { %v5804_v35 = vpop.f32.mrb[74].mxu1  ;;  %v7065_v26 = vpop.f32.mrb[196].mxu0 }
 0x692   :  { %v7166_v2 = vadd.f32 %v5804_v35, %v10721_v61  ;;  %v5806_v41 = vpop.f32.mrb[75].mxu1  ;;  %v10806_v34 = vadd.f32 %v7161_v33, %v7065_v26  ;;  %v6066_v0 = vpop.f32.mrb[197].mxu0  ;;  %v6375_v33 = vmul.f32 %v10797_v63, %v10797_v63 }
 0x693   :  { %v10808_v50 = vadd.f32 %v7159_v13, %v6066_v0  ;;  %v7066_v29 = vpop.f32.mrb[198].mxu0  ;;  %v6305_v13 = vadd.f32 %v10802_v60, %v10797_v63 }
 0x694   :  { %12258 = vst [vmem:[#allocation23_spill] sm:$0xff] %v10806_v34  ;;  %v10810_v57 = vadd.f32 %v7162_v59, %v7066_v29  ;;  %v6069_v39 = vpop.f32.mrb[199].mxu0  ;;  %v6439_v24 = vadd.f32 %v6376_v12, %v6375_v33 }
 0x695   :  { %v10812_v31 = vadd.f32 %v7160_v1, %v6069_v39  ;;  %v6306_v0 = vadd.f32 %v6305_v13, %v10794_v15 }
 0x696   :  { %12259 = vst [vmem:[#allocation8_spill] sm:$0xff] %v10810_v57 }
 0x697   :  { %v5809_v9 = vpop.f32.mrb[76].mxu1  ;;  %12260 = vst [vmem:[#allocation10_spill] sm:$0xff] %v10812_v31  ;;  %v6307_v33 = vadd.f32 %v6306_v0, %v10799_v51 }
 0x698   :  { %v7167_v47 = vadd.f32 %v5809_v9, %v10725_v18  ;;  %v5811_v61 = vpop.f32.mrb[77].mxu1  ;;  %v6377_v18 = vmul.f32 %v10794_v15, %v10794_v15 }
 0x699   :  { %v5812_v28 = vpop.f32.mrb[78].mxu1  ;;  %v7069_v32 = vpop.f32.mrb[200].mxu0 }
 0x69a   :  { %v7168_v59 = vadd.f32 %v5812_v28, %v10727_v40  ;;  %v5814_v20 = vpop.f32.mrb[79].mxu1  ;;  %v10822_v1 = vadd.f32 %v7165_v55, %v7069_v32  ;;  %v6082_v35 = vpop.f32.mrb[201].mxu0  ;;  %v6440_v40 = vadd.f32 %v6439_v24, %v6377_v18  ;;  %v6308_v18 = vadd.f32 %v6307_v33, %v10808_v50 }
 0x69b   :  { %v10824_v41 = vadd.f32 %v7163_v10, %v6082_v35  ;;  %v7070_v26 = vpop.f32.mrb[202].mxu0  ;;  %v6378_v10 = vmul.f32 %v10799_v51, %v10799_v51 }
 0x69c   :  { %v10829_v29 = vadd.f32 %v7166_v2, %v7070_v26  ;;  %v6085_v39 = vpop.f32.mrb[203].mxu0  ;;  %v6379_v2 = vmul.f32 %v10808_v50, %v10808_v50 }
 0x69d   :  { %12261 = vst [vmem:[#allocation24_spill] sm:$0xff] %v10824_v41  ;;  %v10831_v61 = vadd.f32 %v7164_v46, %v6085_v39  ;;  %v6441_v35 = vadd.f32 %v6440_v40, %v6378_v10 }
 0x69e   :  { %12262 = vst [vmem:[#allocation27_spill] sm:$0xff] %v10829_v29 }
 0x69f   :  { %v5817_v9 = vpop.f32.mrb[80].mxu1 }
 0x6a0   :  { %v7169_v12 = vadd.f32 %v5817_v9, %v10731_v22  ;;  %v5819_v55 = vpop.f32.mrb[81].mxu1 }
 0x6a1   :  { %v5820_v28 = vpop.f32.mrb[82].mxu1  ;;  %v7073_v13 = vpop.f32.mrb[204].mxu0 }
 0x6a2   :  { %v7170_v20 = vadd.f32 %v5820_v28, %v10733_v30  ;;  %v5822_v32 = vpop.f32.mrb[83].mxu1  ;;  %v10840_v46 = vadd.f32 %v7169_v12, %v7073_v13  ;;  %v6098_v24 = vpop.f32.mrb[205].mxu0  ;;  %v6442_v30 = vadd.f32 %v6441_v35, %v6379_v2  ;;  %v6380_v28 = vmul.f32 %v10812_v31, %v10812_v31 }
 0x6a3   :  { %v10842_v26 = vadd.f32 %v7167_v47, %v6098_v24  ;;  %v7074_v22 = vpop.f32.mrb[206].mxu0  ;;  %v6309_v47 = vadd.f32 %v6308_v18, %v10812_v31  ;;  %v6381_v2 = vmul.f32 %v10806_v34, %v10806_v34 }
 0x6a4   :  { %12263 = vst [vmem:[#allocation28_spill] sm:$0xff] %v10840_v46  ;;  %v10845_v39 = vadd.f32 %v7170_v20, %v7074_v22  ;;  %v6101_v9 = vpop.f32.mrb[207].mxu0  ;;  %v6443_v20 = vadd.f32 %v6442_v30, %v6380_v28  ;;  %v6382_v30 = vmul.f32 %v10810_v57, %v10810_v57 }
 0x6a5   :  { %12264 = vst [vmem:[#allocation29_spill] sm:$0xff] %v10842_v26  ;;  %v10847_v55 = vadd.f32 %v7168_v59, %v6101_v9  ;;  %v6310_v35 = vadd.f32 %v6309_v47, %v10806_v34 }
 0x6a6   :  { %12265 = vst [vmem:[#allocation30_spill] sm:$0xff] %v10845_v39 }
 0x6a7   :  { %v5825_v0 = vpop.f32.mrb[84].mxu1  ;;  %12266 = vst [vmem:[#allocation31_spill] sm:$0xff] %v10847_v55  ;;  %v6311_v28 = vadd.f32 %v6310_v35, %v10810_v57 }
 0x6a8   :  { %v7171_v40 = vadd.f32 %v5825_v0, %v10735_v6  ;;  %v5827_v12 = vpop.f32.mrb[85].mxu1 }
 0x6a9   :  { %v5828_v10 = vpop.f32.mrb[86].mxu1  ;;  %v7077_v33 = vpop.f32.mrb[208].mxu0  ;;  %v6444_v12 = vadd.f32 %v6443_v20, %v6381_v2 }
 0x6aa   :  { %v7172_v32 = vadd.f32 %v5828_v10, %v10737_v19  ;;  %v5830_v13 = vpop.f32.mrb[87].mxu1  ;;  %v6114_v24 = vpop.f32.mrb[209].mxu0 }
 0x6ab   :  { %v10854_v22 = vadd.f32 %v7171_v40, %v6114_v24  ;;  %v7078_v59 = vpop.f32.mrb[210].mxu0 }
 0x6ac   :  { %v6117_v9 = vpop.f32.mrb[211].mxu0 }
 0x6ad   :  { %12267 = vst [vmem:[#allocation32_spill] sm:$0xff] %v10854_v22  ;;  %v10859_v0 = vadd.f32 %v7172_v32, %v6117_v9  ;;  %v6383_v32 = vmul.f32 %v10824_v41, %v10824_v41  ;;  %v6445_v9 = vadd.f32 %v6444_v12, %v6382_v30 }
 0x6af   :  { %v5833_v6 = vpop.f32.mrb[88].mxu1  ;;  %12268 = vst [vmem:[#allocation33_spill] sm:$0xff] %v10859_v0  ;;  %v6446_v31 = vadd.f32 %v6445_v9, %v6383_v32  ;;  %v6385_v9 = vmul.f32 %v10822_v1, %v10822_v1 }
 0x6b0   :  { %v7173_v18 = vadd.f32 %v5833_v6, %v10739_v11  ;;  %v5835_v19 = vpop.f32.mrb[89].mxu1  ;;  %v6312_v6 = vadd.f32 %v6311_v28, %v10824_v41 }
 0x6b1   :  { %v5836_v10 = vpop.f32.mrb[90].mxu1  ;;  %v7081_v47 = vpop.f32.mrb[212].mxu0 }
 0x6b2   :  { %v10865_v40 = vadd.f32 %v7173_v18, %v7077_v33  ;;  %v7174_v13 = vadd.f32 %v5836_v10, %v10741_v45  ;;  %v5838_v24 = vpop.f32.mrb[91].mxu1  ;;  %v6130_v11 = vpop.f32.mrb[213].mxu0  ;;  %v6384_v33 = vmul.f32 %v10831_v61, %v10831_v61  ;;  %v6313_v10 = vadd.f32 %v6312_v6, %v10831_v61 }
 0x6b3   :  { %v7082_v2 = vpop.f32.mrb[214].mxu0 }
 0x6b4   :  { %12269 = vst [vmem:[#allocation34_spill] sm:$0xff] %v10865_v40  ;;  %v10870_v20 = vadd.f32 %v7174_v13, %v7078_v59  ;;  %v6133_v19 = vpop.f32.mrb[215].mxu0  ;;  %v6447_v13 = vadd.f32 %v6446_v31, %v6384_v33 }
 0x6b6   :  { %12270 = vst [vmem:[#allocation35_spill] sm:$0xff] %v10870_v20  ;;  %v6448_v57 = vadd.f32 %v6447_v13, %v6385_v9 }
 0x6b7   :  { %v5841_v34 = vpop.f32.mrb[92].mxu1 }
 0x6b8   :  { %v7175_v45 = vadd.f32 %v5841_v34, %v10743_v25  ;;  %v5843_v35 = vpop.f32.mrb[93].mxu1  ;;  %v6314_v25 = vadd.f32 %v6313_v10, %v10822_v1  ;;  %v6387_v10 = vmul.f32 %v10842_v26, %v10842_v26 }
 0x6b9   :  { %v5844_v18 = vpop.f32.mrb[94].mxu1  ;;  %v7085_v30 = vpop.f32.mrb[216].mxu0 }
 0x6ba   :  { %v10877_v24 = vadd.f32 %v7175_v45, %v6130_v11  ;;  %v7176_v59 = vadd.f32 %v5844_v18, %v10745_v38  ;;  %v5846_v12 = vpop.f32.mrb[95].mxu1  ;;  %v6146_v41 = vpop.f32.mrb[217].mxu0  ;;  %v6386_v38 = vmul.f32 %v10829_v29, %v10829_v29  ;;  %v6315_v31 = vadd.f32 %v6314_v25, %v10829_v29 }
 0x6bb   :  { %v7086_v32 = vpop.f32.mrb[218].mxu0 }
 0x6bc   :  { %12271 = vst [vmem:[#allocation36_spill] sm:$0xff] %v10877_v24  ;;  %v10880_v28 = vadd.f32 %v7176_v59, %v6133_v19  ;;  %v6149_v34 = vpop.f32.mrb[219].mxu0  ;;  %v6449_v12 = vadd.f32 %v6448_v57, %v6386_v38 }
 0x6be   :  { %12272 = vst [vmem:[#allocation37_spill] sm:$0xff] %v10880_v28 }
 0x6bf   :  { %v5849_v35 = vpop.f32.mrb[96].mxu1 }
 0x6c0   :  { %v7177_v11 = vadd.f32 %v5849_v35, %v10747_v48  ;;  %v5851_v6 = vpop.f32.mrb[97].mxu1  ;;  %v6316_v35 = vadd.f32 %v6315_v31, %v10842_v26 }
 0x6c1   :  { %v5852_v45 = vpop.f32.mrb[98].mxu1  ;;  %v10892_v59 = vpop.f32.mrb[220].mxu0 }
 0x6c2   :  { %v10889_v19 = vadd.f32 %v7177_v11, %v7081_v47  ;;  %v7178_v33 = vadd.f32 %v5852_v45, %v10749_v56  ;;  %v5854_v18 = vpop.f32.mrb[99].mxu1  ;;  %v6162_v48 = vpop.f32.mrb[221].mxu0  ;;  %v6450_v47 = vadd.f32 %v6449_v12, %v6387_v10  ;;  %v6388_v56 = vmul.f32 %v10847_v55, %v10847_v55 }
 0x6c3   :  { %v10898_v9 = vpop.f32.mrb[222].mxu0  ;;  %v6317_v29 = vadd.f32 %v6316_v35, %v10847_v55 }
 0x6c4   :  { %v10896_v13 = vadd.f32 %v7178_v33, %v7082_v2  ;;  %v6165_v6 = vpop.f32.mrb[223].mxu0  ;;  %v6451_v31 = vadd.f32 %v6450_v47, %v6388_v56 }
 0x6c6   :  { %12273 = vst [vmem:[#allocation38_spill] sm:$0xff] %v10896_v13 }
 0x6c7   :  { %v5857_v25 = vpop.f32.mrb[100].mxu1 }
 0x6c8   :  { %v7179_v11 = vadd.f32 %v5857_v25, %v10751_v16  ;;  %v5859_v45 = vpop.f32.mrb[101].mxu1  ;;  %v6389_v16 = vmul.f32 %v10840_v46, %v10840_v46  ;;  %v6318_v25 = vadd.f32 %v6317_v29, %v10840_v46  ;;  %v6391_v29 = vmul.f32 %v10854_v22, %v10854_v22 }
 0x6c9   :  { %v5860_v18 = vpop.f32.mrb[102].mxu1  ;;  %v10908_v33 = vpop.f32.mrb[224].mxu0 }
 0x6ca   :  { %v10905_v57 = vadd.f32 %v7179_v11, %v6146_v41  ;;  %v7180_v2 = vadd.f32 %v5860_v18, %v10753_v43  ;;  %v5862_v38 = vpop.f32.mrb[103].mxu1  ;;  %v10912_v10 = vpop.f32.mrb[225].mxu0  ;;  %v6452_v11 = vadd.f32 %v6451_v31, %v6389_v16  ;;  %v6319_v47 = vadd.f32 %v6318_v25, %v10845_v39 }
 0x6cb   :  { %v10914_v12 = vpop.f32.mrb[226].mxu0 }
 0x6cc   :  { %v10910_v26 = vadd.f32 %v7180_v2, %v6149_v34  ;;  %v10919_v35 = vpop.f32.mrb[227].mxu0  ;;  %v6390_v34 = vmul.f32 %v10845_v39, %v10845_v39 }
 0x6ce   :  { %12274 = vst [vmem:[#allocation39_spill] sm:$0xff] %v10910_v26  ;;  %v6453_v31 = vadd.f32 %v6452_v11, %v6390_v34 }
 0x6cf   :  { %v5865_v41 = vpop.f32.mrb[104].mxu1 }
 0x6d0   :  { %v7181_v43 = vadd.f32 %v5865_v41, %v10755_v4  ;;  %v5867_v45 = vpop.f32.mrb[105].mxu1 }
 0x6d1   :  { %v5868_v18 = vpop.f32.mrb[106].mxu1  ;;  %v10928_v55 = vpop.f32.mrb[228].mxu0  ;;  %v6320_v45 = vadd.f32 %v6319_v47, %v10854_v22 }
 0x6d2   :  { %v10925_v56 = vadd.f32 %v7181_v43, %v7085_v30  ;;  %v7182_v2 = vadd.f32 %v5868_v18, %v10757_v37  ;;  %v5870_v38 = vpop.f32.mrb[107].mxu1  ;;  %v10934_v4 = vpop.f32.mrb[229].mxu0  ;;  %v6454_v43 = vadd.f32 %v6453_v31, %v6391_v29  ;;  %v6392_v37 = vmul.f32 %v10859_v0, %v10859_v0 }
 0x6d3   :  { %v10936_v41 = vpop.f32.mrb[230].mxu0 }
 0x6d4   :  { %12275 = vst [vmem:[#allocation40_spill] sm:$0xff] %v10925_v56  ;;  %v10932_v16 = vadd.f32 %v7182_v2, %v7086_v32  ;;  %v10939_v25 = vpop.f32.mrb[231].mxu0  ;;  %v6321_v32 = vadd.f32 %v6320_v45, %v10859_v0  ;;  %v6455_v47 = vadd.f32 %v6454_v43, %v6392_v37 }
 0x6d6   :  { %12276 = vst [vmem:[#allocation41_spill] sm:$0xff] %v10932_v16 }
 0x6d7   :  { %v5873_v30 = vpop.f32.mrb[108].mxu1 }
 0x6d8   :  { %v7183_v18 = vadd.f32 %v5873_v30, %v10759_v58  ;;  %v5875_v38 = vpop.f32.mrb[109].mxu1  ;;  %v6393_v58 = vmul.f32 %v10865_v40, %v10865_v40  ;;  %v6322_v30 = vadd.f32 %v6321_v32, %v10865_v40 }
 0x6d9   :  { %v5876_v39 = vpop.f32.mrb[110].mxu1  ;;  %v10948_v46 = vpop.f32.mrb[232].mxu0  ;;  %v6395_v38 = vmul.f32 %v10877_v24, %v10877_v24 }
 0x6da   :  { %v10945_v11 = vadd.f32 %v7183_v18, %v6162_v48  ;;  %v7184_v34 = vadd.f32 %v5876_v39, %v10761_v21  ;;  %v5878_v2 = vpop.f32.mrb[111].mxu1  ;;  %v10952_v29 = vpop.f32.mrb[233].mxu0  ;;  %v6456_v18 = vadd.f32 %v6455_v47, %v6393_v58  ;;  %v6323_v37 = vadd.f32 %v6322_v30, %v10870_v20 }
 0x6db   :  { %v10954_v31 = vpop.f32.mrb[234].mxu0 }
 0x6dc   :  { %12277 = vst [vmem:[#allocation42_spill] sm:$0xff] %v10945_v11  ;;  %v10950_v22 = vadd.f32 %v7184_v34, %v6165_v6  ;;  %v10959_v45 = vpop.f32.mrb[235].mxu0  ;;  %v6394_v6 = vmul.f32 %v10870_v20, %v10870_v20 }
 0x6de   :  { %12278 = vst [vmem:[#allocation43_spill] sm:$0xff] %v10950_v22  ;;  %v6457_v47 = vadd.f32 %v6456_v18, %v6394_v6 }
 0x6df   :  { %v5881_v48 = vpop.f32.mrb[112].mxu1 }
 0x6e0   :  { %v7185_v21 = vadd.f32 %v5881_v48, %v10769_v8  ;;  %v5883_v39 = vpop.f32.mrb[113].mxu1  ;;  %v6324_v8 = vadd.f32 %v6323_v37, %v10877_v24  ;;  %v6397_v37 = vmul.f32 %v10889_v19, %v10889_v19 }
 0x6e1   :  { %v5884_v43 = vpop.f32.mrb[114].mxu1  ;;  %v10971_v40 = vpop.f32.mrb[236].mxu0  ;;  %v6458_v39 = vadd.f32 %v6457_v47, %v6395_v38 }
 0x6e2   :  { %v10968_v34 = vadd.f32 %v7185_v21, %v10892_v59  ;;  %v7186_v32 = vadd.f32 %v5884_v43, %v10771_v5  ;;  %v5886_v2 = vpop.f32.mrb[115].mxu1  ;;  %v10977_v48 = vpop.f32.mrb[237].mxu0  ;;  %v6396_v59 = vmul.f32 %v10880_v28, %v10880_v28  ;;  %v6325_v43 = vadd.f32 %v6324_v8, %v10880_v28 }
 0x6e3   :  { %v10979_v30 = vpop.f32.mrb[238].mxu0  ;;  %v6398_v8 = vmul.f32 %v10896_v13, %v10896_v13 }
 0x6e4   :  { %v10975_v58 = vadd.f32 %v7186_v32, %v10898_v9  ;;  %v10983_v21 = vpop.f32.mrb[239].mxu0  ;;  %v6459_v32 = vadd.f32 %v6458_v39, %v6396_v59  ;;  %v6326_v2 = vadd.f32 %v6325_v43, %v10889_v19 }
 0x6e6   :  { %12279 = vst [vmem:[#allocation44_spill] sm:$0xff] %v10975_v58  ;;  %v6460_v0 = vadd.f32 %v6459_v32, %v6397_v37  ;;  %v6327_v59 = vadd.f32 %v6326_v2, %v10896_v13 }
 0x6e7   :  { %v5889_v5 = vpop.f32.mrb[116].mxu1 }
 0x6e8   :  { %v7187_v18 = vadd.f32 %v5889_v5, %v10775_v3  ;;  %v5891_v9 = vpop.f32.mrb[117].mxu1  ;;  %v6461_v5 = vadd.f32 %v6460_v0, %v6398_v8  ;;  %v6328_v43 = vadd.f32 %v6327_v59, %v10905_v57  ;;  %v6401_v8 = vmul.f32 %v10925_v56, %v10925_v56 }
 0x6e9   :  { %v5892_v6 = vpop.f32.mrb[118].mxu1  ;;  %v10994_v20 = vpop.f32.mrb[240].mxu0 }
 0x6ea   :  { %v10991_v38 = vadd.f32 %v7187_v18, %v10912_v10  ;;  %v7188_v47 = vadd.f32 %v5892_v6, %v10777_v36  ;;  %v5894_v24 = vpop.f32.mrb[119].mxu1  ;;  %v11001_v3 = vpop.f32.mrb[241].mxu0  ;;  %v6399_v10 = vmul.f32 %v10905_v57, %v10905_v57  ;;  %v6400_v6 = vmul.f32 %v10910_v26, %v10910_v26 }
 0x6eb   :  { %v11003_v39 = vpop.f32.mrb[242].mxu0  ;;  %v6329_v0 = vadd.f32 %v6328_v43, %v10910_v26  ;;  %v6402_v43 = vmul.f32 %v10932_v16, %v10932_v16 }
 0x6ec   :  { %v10999_v28 = vadd.f32 %v7188_v47, %v10919_v35  ;;  %v11008_v36 = vpop.f32.mrb[243].mxu0  ;;  %v6462_v9 = vadd.f32 %v6461_v5, %v6399_v10 }
 0x6ef   :  { %v5897_v24 = vpop.f32.mrb[120].mxu1 }
 0x6f0   :  { %v7189_v37 = vadd.f32 %v5897_v24, %v10781_v52  ;;  %v5899_v18 = vpop.f32.mrb[121].mxu1  ;;  %v6463_v24 = vadd.f32 %v6462_v9, %v6400_v6 }
 0x6f1   :  { %v5900_v35 = vpop.f32.mrb[122].mxu1  ;;  %v11018_v13 = vpop.f32.mrb[244].mxu0 }
 0x6f2   :  { %v11015_v32 = vadd.f32 %v7189_v37, %v10908_v33  ;;  %v7190_v2 = vadd.f32 %v5900_v35, %v10783_v62  ;;  %v5902_v47 = vpop.f32.mrb[123].mxu1  ;;  %v11026_v59 = vpop.f32.mrb[245].mxu0  ;;  %v6330_v33 = vadd.f32 %v6329_v0, %v10925_v56  ;;  %v6464_v37 = vadd.f32 %v6463_v24, %v6401_v8 }
 0x6f3   :  { %v11028_v10 = vpop.f32.mrb[246].mxu0 }
 0x6f4   :  { %v11024_v52 = vadd.f32 %v7190_v2, %v10914_v12  ;;  %v11031_v5 = vpop.f32.mrb[247].mxu0  ;;  %v6331_v12 = vadd.f32 %v6330_v33, %v10932_v16  ;;  %v6403_v2 = vmul.f32 %v10945_v11, %v10945_v11  ;;  %v6465_v8 = vadd.f32 %v6464_v37, %v6402_v43 }
 0x6f5   :  { %v6405_v37 = vmul.f32 %v10968_v34, %v10968_v34 }
 0x6f6   :  { %v6332_v24 = vadd.f32 %v6331_v12, %v10945_v11 }
 0x6f7   :  { %v5905_v62 = vpop.f32.mrb[124].mxu1 }
 0x6f8   :  { %v7191_v18 = vadd.f32 %v5905_v62, %v10787_v23  ;;  %v5907_v35 = vpop.f32.mrb[125].mxu1 }
 0x6f9   :  { %v5908_v47 = vpop.f32.mrb[126].mxu1  ;;  %v11043_v56 = vpop.f32.mrb[248].mxu0  ;;  %v6466_v35 = vadd.f32 %v6465_v8, %v6403_v2 }
 0x6fa   :  { %v11040_v9 = vadd.f32 %v7191_v18, %v10934_v4  ;;  %v7192_v6 = vadd.f32 %v5908_v47, %v10789_v54  ;;  %v5910_v0 = vpop.f32.mrb[127].mxu1  ;;  %v11049_v62 = vpop.f32.mrb[249].mxu0  ;;  %v6404_v4 = vmul.f32 %v10950_v22, %v10950_v22  ;;  %v6333_v47 = vadd.f32 %v6332_v24, %v10950_v22 }
 0x6fb   :  { %v11051_v33 = vpop.f32.mrb[250].mxu0  ;;  %v6406_v24 = vmul.f32 %v10975_v58, %v10975_v58 }
 0x6fc   :  { %v11047_v23 = vadd.f32 %v7192_v6, %v10939_v25  ;;  %v11055_v18 = vpop.f32.mrb[251].mxu0  ;;  %v6467_v6 = vadd.f32 %v6466_v35, %v6404_v4  ;;  %v6334_v0 = vadd.f32 %v6333_v47, %v10968_v34 }
 0x6fe   :  { %v6468_v26 = vadd.f32 %v6467_v6, %v6405_v37  ;;  %v6335_v4 = vadd.f32 %v6334_v0, %v10975_v58 }
 0x6ff   :  { %v5913_v54 = vpop.f32.mrb[0].mxu1 }
 0x700   :  { %v7193_v43 = vadd.f32 %v5913_v54, %v10611_v44  ;;  %v5915_v25 = vpop.f32.mrb[1].mxu1  ;;  %v6469_v54 = vadd.f32 %v6468_v26, %v6406_v24  ;;  %v6336_v47 = vadd.f32 %v6335_v4, %v10991_v38  ;;  %v6409_v26 = vmul.f32 %v11015_v32, %v11015_v32 }
 0x701   :  { %v5916_v12 = vpop.f32.mrb[2].mxu1  ;;  %v11066_v16 = vpop.f32.mrb[252].mxu0 }
 0x702   :  { %v11063_v2 = vadd.f32 %v7193_v43, %v10928_v55  ;;  %v7194_v8 = vadd.f32 %v5916_v12, %v10613_v17  ;;  %v5918_v11 = vpop.f32.mrb[3].mxu1  ;;  %v11073_v44 = vpop.f32.mrb[253].mxu0  ;;  %v6407_v55 = vmul.f32 %v10991_v38, %v10991_v38  ;;  %v6408_v12 = vmul.f32 %v10999_v28, %v10999_v28 }
 0x703   :  { %v11075_v35 = vpop.f32.mrb[254].mxu0  ;;  %v6337_v58 = vadd.f32 %v6336_v47, %v10999_v28 }
 0x704   :  { %v11071_v22 = vadd.f32 %v7194_v8, %v10936_v41  ;;  %v11080_v17 = vpop.f32.mrb[255].mxu0  ;;  %v6470_v25 = vadd.f32 %v6469_v54, %v6407_v55 }
 0x705   :  { %v6338_v4 = vadd.f32 %v6337_v58, %v11015_v32 }
 0x707   :  { %v5921_v11 = vpop.f32.mrb[4].mxu1  ;;  %v6339_v47 = vadd.f32 %v6338_v4, %v11024_v52 }
 0x708   :  { %v7195_v37 = vadd.f32 %v5921_v11, %v10619_v49  ;;  %v5923_v43 = vpop.f32.mrb[5].mxu1  ;;  %v6471_v49 = vadd.f32 %v6470_v25, %v6408_v12 }
 0x709   :  { %v5924_v41 = vpop.f32.mrb[6].mxu1  ;;  %v6411_v43 = vmul.f32 %v11040_v9, %v11040_v9  ;;  %v6340_v12 = vadd.f32 %v6339_v47, %v11040_v9  ;;  %v6414_v47 = vmul.f32 %v11071_v22, %v11071_v22 }
 0x70a   :  { %v11087_v6 = vadd.f32 %v7195_v37, %v10952_v29  ;;  %v7196_v0 = vadd.f32 %v5924_v41, %v10622_v7  ;;  %v5926_v8 = vpop.f32.mrb[7].mxu1  ;;  %v6472_v11 = vadd.f32 %v6471_v49, %v6409_v26  ;;  %v6410_v29 = vmul.f32 %v11024_v52, %v11024_v52 }
 0x70b   :  { %v6412_v8 = vmul.f32 %v11047_v23, %v11047_v23  ;;  %v6341_v49 = vadd.f32 %v6340_v12, %v11047_v23  ;;  %v12280_v12 = vld [vmem:[#allocation20_spill] sm:$0xff] }
 0x70c   :  { %v11094_v24 = vadd.f32 %v7196_v0, %v10959_v45  ;;  %v6473_v25 = vadd.f32 %v6472_v11, %v6410_v29 }
 0x70d   :  { %v6342_v29 = vadd.f32 %v6341_v49, %v11063_v2 }
 0x70e   :  { %v6416_v49 = vmul.f32 %v11094_v24, %v11094_v24 }
 0x70f   :  { %v5929_v55 = vpop.f32.mrb[8].mxu1 }
 0x710   :  { %v7197_v54 = vadd.f32 %v5929_v55, %v10625_v42  ;;  %v5931_v7 = vpop.f32.mrb[9].mxu1  ;;  %v6474_v42 = vadd.f32 %v6473_v25, %v6411_v43 }
 0x711   :  { %v5932_v37 = vpop.f32.mrb[10].mxu1 }
 0x712   :  { %v11104_v45 = vadd.f32 %v7197_v54, %v10948_v46  ;;  %v7198_v41 = vadd.f32 %v5932_v37, %v10628_v27  ;;  %v5934_v58 = vpop.f32.mrb[11].mxu1  ;;  %v6413_v46 = vmul.f32 %v11063_v2, %v11063_v2  ;;  %v6475_v11 = vadd.f32 %v6474_v42, %v6412_v8 }
 0x714   :  { %v11109_v0 = vadd.f32 %v7198_v41, %v10954_v31  ;;  %v6476_v37 = vadd.f32 %v6475_v11, %v6413_v46  ;;  %v6415_v41 = vmul.f32 %v11087_v6, %v11087_v6  ;;  %v12281_v46 = vld [vmem:[#allocation22_spill] sm:$0xff]  ;;  %v6417_v11 = vmul.f32 %v11104_v45, %v11104_v45 }
 0x716   :  { %v6477_v25 = vadd.f32 %v6476_v37, %v6414_v47 }
 0x717   :  { %v5937_v26 = vpop.f32.mrb[12].mxu1 }
 0x718   :  { %v7199_v4 = vadd.f32 %v5937_v26, %v10633_v14  ;;  %v5939_v27 = vpop.f32.mrb[13].mxu1  ;;  %v6343_v14 = vadd.f32 %v6342_v29, %v11071_v22  ;;  %v6478_v26 = vadd.f32 %v6477_v25, %v6415_v41 }
 0x719   :  { %v5940_v55 = vpop.f32.mrb[14].mxu1 }
 0x71a   :  { %v11119_v31 = vadd.f32 %v7199_v4, %v10977_v48  ;;  %v7200_v54 = vadd.f32 %v5940_v55, %v10636_v53  ;;  %v5942_v7 = vpop.f32.mrb[15].mxu1  ;;  %v6344_v48 = vadd.f32 %v6343_v14, %v11087_v6  ;;  %v12282_v14 = vld [vmem:[#allocation25_spill] sm:$0xff] }
 0x71c   :  { %v11125_v43 = vadd.f32 %v7200_v54, %v10983_v21  ;;  %v6345_v55 = vadd.f32 %v6344_v48, %v11094_v24  ;;  %v6479_v54 = vadd.f32 %v6478_v26, %v6416_v49 }
 0x71e   :  { %v6346_v7 = vadd.f32 %v6345_v55, %v11104_v45  ;;  %v6480_v47 = vadd.f32 %v6479_v54, %v6417_v11  ;;  %v12284_v54 = vld [vmem:[#allocation7_spill] sm:$0xff] }
 0x71f   :  { %v5945_v58 = vpop.f32.mrb[16].mxu1 }
 0x720   :  { %v7201_v42 = vadd.f32 %v5945_v58, %v12280_v12  ;;  %v5947_v53 = vpop.f32.mrb[17].mxu1  ;;  %v6347_v48 = vadd.f32 %v6346_v7, %v11109_v0  ;;  %v6419_v12 = vmul.f32 %v11119_v31, %v11119_v31 }
 0x721   :  { %v5948_v8 = vpop.f32.mrb[18].mxu1 }
 0x722   :  { %v11135_v21 = vadd.f32 %v7201_v42, %v10971_v40  ;;  %v7202_v4 = vadd.f32 %v5948_v8, %v12281_v46  ;;  %v5950_v27 = vpop.f32.mrb[19].mxu1  ;;  %v6418_v40 = vmul.f32 %v11109_v0, %v11109_v0  ;;  %v12283_v42 = vld [vmem:[#allocation5_spill] sm:$0xff]  ;;  %v6348_v49 = vadd.f32 %v6347_v48, %v11119_v31 }
 0x723   :  { %v6420_v27 = vmul.f32 %v11125_v43, %v11125_v43 }
 0x724   :  { %v11142_v29 = vadd.f32 %v7202_v4, %v10979_v30  ;;  %v6481_v26 = vadd.f32 %v6480_v47, %v6418_v40  ;;  %v6349_v11 = vadd.f32 %v6348_v49, %v11125_v43 }
 0x726   :  { %v6482_v4 = vadd.f32 %v6481_v26, %v6419_v12  ;;  %v6350_v40 = vadd.f32 %v6349_v11, %v11135_v21  ;;  %v6422_v12 = vmul.f32 %v11142_v29, %v11142_v29 }
 0x727   :  { %v5953_v37 = vpop.f32.mrb[20].mxu1 }
 0x728   :  { %v7203_v41 = vadd.f32 %v5953_v37, %v12282_v14  ;;  %v5955_v58 = vpop.f32.mrb[21].mxu1  ;;  %v6483_v47 = vadd.f32 %v6482_v4, %v6420_v27  ;;  %v12286_v4 = vld [vmem:[#allocation6_spill] sm:$0xff] }
 0x729   :  { %v5956_v25 = vpop.f32.mrb[22].mxu1 }
 0x72a   :  { %v11152_v30 = vadd.f32 %v7203_v41, %v11001_v3  ;;  %v7204_v53 = vadd.f32 %v5956_v25, %v12283_v42  ;;  %v5958_v8 = vpop.f32.mrb[23].mxu1  ;;  %v6421_v3 = vmul.f32 %v11135_v21, %v11135_v21  ;;  %v12285_v41 = vld [vmem:[#allocation4_spill] sm:$0xff] }
 0x72c   :  { %v11157_v46 = vadd.f32 %v7204_v53, %v11008_v36  ;;  %v6484_v48 = vadd.f32 %v6483_v47, %v6421_v3  ;;  %v6351_v53 = vadd.f32 %v6350_v40, %v11142_v29  ;;  %v6423_v8 = vmul.f32 %v11152_v30, %v11152_v30 }
 0x72e   :  { %v6485_v49 = vadd.f32 %v6484_v48, %v6422_v12 }
 0x72f   :  { %v5961_v55 = vpop.f32.mrb[24].mxu1 }
 0x730   :  { %v7205_v7 = vadd.f32 %v5961_v55, %v12284_v54  ;;  %v5963_v37 = vpop.f32.mrb[25].mxu1  ;;  %v6486_v3 = vadd.f32 %v6485_v49, %v6423_v8  ;;  %v6424_v54 = vmul.f32 %v11157_v46, %v11157_v46 }
 0x731   :  { %v5964_v14 = vpop.f32.mrb[26].mxu1 }
 0x732   :  { %v11167_v36 = vadd.f32 %v7205_v7, %v10994_v20  ;;  %v7206_v58 = vadd.f32 %v5964_v14, %v12285_v41  ;;  %v5966_v25 = vpop.f32.mrb[27].mxu1  ;;  %v6352_v20 = vadd.f32 %v6351_v53, %v11152_v30  ;;  %v12287_v7 = vld [vmem:[#allocation9_spill] sm:$0xff]  ;;  %v12288_v53 = vld [vmem:[#allocation11_spill] sm:$0xff] }
 0x734   :  { %v11173_v42 = vadd.f32 %v7206_v58, %v11003_v39  ;;  %v6353_v47 = vadd.f32 %v6352_v20, %v11157_v46  ;;  %v6425_v40 = vmul.f32 %v11167_v36, %v11167_v36  ;;  %v6487_v58 = vadd.f32 %v6486_v3, %v6424_v54 }
 0x736   :  { %v6354_v25 = vadd.f32 %v6353_v47, %v11167_v36  ;;  %v6488_v12 = vadd.f32 %v6487_v58, %v6425_v40  ;;  %v12290_v58 = vld [vmem:[#allocation15_spill] sm:$0xff] }
 0x737   :  { %v5969_v26 = vpop.f32.mrb[28].mxu1 }
 0x738   :  { %v7207_v27 = vadd.f32 %v5969_v26, %v12286_v4  ;;  %v5971_v55 = vpop.f32.mrb[29].mxu1  ;;  %v6355_v20 = vadd.f32 %v6354_v25, %v11173_v42 }
 0x739   :  { %v5972_v11 = vpop.f32.mrb[30].mxu1 }
 0x73a   :  { %v11183_v39 = vadd.f32 %v7207_v27, %v11026_v59  ;;  %v7208_v37 = vadd.f32 %v5972_v11, %v12287_v7  ;;  %v5974_v14 = vpop.f32.mrb[31].mxu1  ;;  %v6426_v59 = vmul.f32 %v11173_v42, %v11173_v42  ;;  %v12289_v27 = vld [vmem:[#allocation13_spill] sm:$0xff] }
 0x73c   :  { %v11190_v41 = vadd.f32 %v7208_v37, %v11031_v5  ;;  %v6427_v4 = vmul.f32 %v11183_v39, %v11183_v39  ;;  %v6489_v3 = vadd.f32 %v6488_v12, %v6426_v59  ;;  %v6356_v54 = vadd.f32 %v6355_v20, %v11183_v39 }
 0x73e   :  { %v6490_v37 = vadd.f32 %v6489_v3, %v6427_v4  ;;  %v6428_v14 = vmul.f32 %v11190_v41, %v11190_v41  ;;  %v6357_v40 = vadd.f32 %v6356_v54, %v11190_v41 }
 0x73f   :  { %v5977_v48 = vpop.f32.mrb[32].mxu1 }
 0x740   :  { %v7209_v8 = vadd.f32 %v5977_v48, %v12288_v53  ;;  %v5979_v26 = vpop.f32.mrb[33].mxu1  ;;  %v6491_v12 = vadd.f32 %v6490_v37, %v6428_v14  ;;  %v12292_v37 = vld [vmem:[#allocation14_spill] sm:$0xff] }
 0x741   :  { %v5980_v49 = vpop.f32.mrb[34].mxu1 }
 0x742   :  { %v11200_v5 = vadd.f32 %v7209_v8, %v11018_v13  ;;  %v7210_v55 = vadd.f32 %v5980_v49, %v12289_v27  ;;  %v5982_v11 = vpop.f32.mrb[35].mxu1  ;;  %v12291_v8 = vld [vmem:[#allocation12_spill] sm:$0xff] }
 0x744   :  { %v11205_v7 = vadd.f32 %v7210_v55, %v11028_v10  ;;  %v6429_v13 = vmul.f32 %v11200_v5, %v11200_v5  ;;  %v6358_v59 = vadd.f32 %v6357_v40, %v11200_v5 }
 0x746   :  { %v6492_v20 = vadd.f32 %v6491_v12, %v6429_v13  ;;  %v6430_v4 = vmul.f32 %v11205_v7, %v11205_v7  ;;  %v6359_v55 = vadd.f32 %v6358_v59, %v11205_v7 }
 0x747   :  { %v5985_v47 = vpop.f32.mrb[36].mxu1 }
 0x748   :  { %v7211_v25 = vadd.f32 %v5985_v47, %v12290_v58  ;;  %v5987_v48 = vpop.f32.mrb[37].mxu1  ;;  %v6493_v54 = vadd.f32 %v6492_v20, %v6430_v4 }
 0x749   :  { %v5988_v53 = vpop.f32.mrb[38].mxu1 }
 0x74a   :  { %v11215_v10 = vadd.f32 %v7211_v25, %v11049_v62  ;;  %v7212_v26 = vadd.f32 %v5988_v53, %v12291_v8  ;;  %v5990_v49 = vpop.f32.mrb[39].mxu1  ;;  %v12293_v25 = vld [vmem:[#allocation17_spill] sm:$0xff] }
 0x74c   :  { %v11221_v27 = vadd.f32 %v7212_v26, %v11055_v18  ;;  %v6431_v11 = vmul.f32 %v11215_v10, %v11215_v10  ;;  %v6360_v62 = vadd.f32 %v6359_v55, %v11215_v10  ;;  %v12294_v55 = vld [vmem:[#allocation19_spill] sm:$0xff] }
 0x74e   :  { %v6494_v13 = vadd.f32 %v6493_v54, %v6431_v11  ;;  %v6432_v58 = vmul.f32 %v11221_v27, %v11221_v27  ;;  %v6361_v12 = vadd.f32 %v6360_v62, %v11221_v27 }
 0x74f   :  { %v5993_v3 = vpop.f32.mrb[40].mxu1 }
 0x750   :  { %v7213_v14 = vadd.f32 %v5993_v3, %v12292_v37  ;;  %v5995_v47 = vpop.f32.mrb[41].mxu1  ;;  %v6495_v26 = vadd.f32 %v6494_v13, %v6432_v58  ;;  %v12295_v37 = vld [vmem:[#allocation16_spill] sm:$0xff] }
 0x751   :  { %v5996_v40 = vpop.f32.mrb[42].mxu1 }
 0x752   :  { %v11231_v18 = vadd.f32 %v7213_v14, %v11043_v56  ;;  %v7214_v48 = vadd.f32 %v5996_v40, %v12293_v25  ;;  %v5998_v53 = vpop.f32.mrb[43].mxu1 }
 0x754   :  { %v6433_v59 = vmul.f32 %v11231_v18, %v11231_v18  ;;  %v11238_v8 = vadd.f32 %v7214_v48, %v11051_v33  ;;  %v6362_v49 = vadd.f32 %v6361_v12, %v11231_v18 }
 0x756   :  { %v6496_v4 = vadd.f32 %v6495_v26, %v6433_v59  ;;  %v6434_v56 = vmul.f32 %v11238_v8, %v11238_v8  ;;  %v6363_v33 = vadd.f32 %v6362_v49, %v11238_v8  ;;  %v12296_v26 = vld [vmem:[#allocation18_spill] sm:$0xff] }
 0x757   :  { %v6001_v20 = vpop.f32.mrb[44].mxu1 }
 0x758   :  { %v7215_v11 = vadd.f32 %v6001_v20, %v12294_v55  ;;  %v6003_v3 = vpop.f32.mrb[45].mxu1  ;;  %v6497_v58 = vadd.f32 %v6496_v4, %v6434_v56 }
 0x759   :  { %v6004_v54 = vpop.f32.mrb[46].mxu1  ;;  %v12297_v3 = vld [vmem:[#allocation21_spill] sm:$0xff] }
 0x75a   :  { %v7216_v62 = vadd.f32 %v6004_v54, %v12295_v37  ;;  %v11246_v14 = vadd.f32 %v7215_v11, %v11073_v44  ;;  %v6006_v47 = vpop.f32.mrb[47].mxu1 }
 0x75c   :  { %v6364_v40 = vadd.f32 %v6363_v33, %v11246_v14  ;;  %v6435_v13 = vmul.f32 %v11246_v14, %v11246_v14  ;;  %v11253_v25 = vadd.f32 %v7216_v62, %v11080_v17 }
 0x75e   :  { %v6498_v48 = vadd.f32 %v6497_v58, %v6435_v13  ;;  %v6365_v53 = vadd.f32 %v6364_v40, %v11253_v25  ;;  %v6436_v12 = vmul.f32 %v11253_v25, %v11253_v25 }
 0x75f   :  { %v6009_v44 = vpop.f32.mrb[48].mxu1 }
 0x760   :  { %v6499_v59 = vadd.f32 %v6498_v48, %v6436_v12  ;;  %v7217_v49 = vadd.f32 %v6009_v44, %v12296_v26  ;;  %v6011_v20 = vpop.f32.mrb[49].mxu1 }
 0x761   :  { %v6012_v55 = vpop.f32.mrb[50].mxu1 }
 0x762   :  { %v11260_v11 = vadd.f32 %v7217_v49, %v11066_v16  ;;  %v7218_v4 = vadd.f32 %v6012_v55, %v12297_v3  ;;  %v6014_v56 = vpop.f32.mrb[51].mxu1 }
 0x764   :  { %v6366_v17 = vadd.f32 %v6365_v53, %v11260_v11  ;;  %v6437_v54 = vmul.f32 %v11260_v11, %v11260_v11  ;;  %v11267_v37 = vadd.f32 %v7218_v4, %v11075_v35 }
 0x766   :  { %v6500_v62 = vadd.f32 %v6499_v59, %v6437_v54  ;;  %v6367_v33 = vadd.f32 %v6366_v17, %v11267_v37  ;;  %v6438_v47 = vmul.f32 %v11267_v37, %v11267_v37 }
 0x768   :  { %v6368_v40 = vrot.slane %v6367_v33, 4  ;;  %v6501_v16 = vadd.f32 %v6500_v62, %v6438_v47  ;;  %v6512_v62 = vld [vmem:[%s12045_s5] sm:$0x1] }
 0x76a   :  { %v6369_v13 = vadd.f32 %v6368_v40, %v6367_v33  ;;  %v6502_v58 = vrot.slane %v6501_v16, 4  ;;  %v11278_v40 = vld [vmem:[%s12046_s6] sm:$0x1] }
 0x76c   :  { %v6370_v48 = vrot.slane %v6369_v13, 2  ;;  %v6503_v12 = vadd.f32 %v6502_v58, %v6501_v16 }
 0x76e   :  { %v6371_v44 = vadd.f32 %v6370_v48, %v6369_v13  ;;  %v6504_v53 = vrot.slane %v6503_v12, 2  ;;  %v12298_v13 = vld [vmem:[#allocation26_spill] sm:$0xff] }
 0x770   :  { %v6372_v26 = vrot.slane %v6371_v44, 1  ;;  %v6505_v49 = vadd.f32 %v6504_v53, %v6503_v12 }
 0x772   :  { %v6373_v20 = vadd.f32 %v6372_v26, %v6371_v44  ;;  %v6506_v55 = vrot.slane %v6505_v49, 1 }
 0x774   :  { %v6374_v35 = vmul.f32 0.001953125, %v6373_v20  ;;  %v6507_v3 = vadd.f32 %v6506_v55, %v6505_v49  ;;  %v12299_v20 = vld [vmem:[#allocation10_spill] sm:$0xff]  ;;  %v12300_v55 = vld [vmem:[#allocation23_spill] sm:$0xff] }
 0x776   :  { %v6508_v59 = vmul.f32 0.001953125, %v6507_v3  ;;  %v6509_v4 = vmul.f32 %v6374_v35, %v6374_v35  ;;  %v12302_v3 = vld [vmem:[#allocation24_spill] sm:$0xff] }
 0x778   :  { %v6510_v56 = vsub.f32 %v6508_v59, %v6509_v4  ;;  %v12303_v4 = vld [vmem:[#allocation27_spill] sm:$0xff] }
 0x77a   :  { %v6511_v17 = vmax.f32 %v6510_v56, 0.0 }
 0x77c   :  { %v6513_v54 = vadd.f32 1e-05, %v6511_v17  ;;  %v12304_v17 = vld [vmem:[#allocation29_spill] sm:$0xff] }
 0x77e   :  { %7563 = vrsqrt.f32 %v6513_v54 }
 0x788   :  { %v7564_v33 = vpop.eup %7563 }
 0x789   :  { %v6515_v47 = vmul.f32 %v7564_v33, %v6512_v62  ;;  %v12305_v62 = vld [vmem:[#allocation31_spill] sm:$0xff] }
 0x78b   :  { %v11280_v16 = vmul.f32 %v6515_v47, %v6374_v35  ;;  %v11283_v58 = vrot.slane %v6515_v47, %v12298_v13  ;;  %v12301_v35 = vld [vmem:[#allocation8_spill] sm:$0xff] }
 0x78c   :  { %v12306_v47 = vld [vmem:[#allocation28_spill] sm:$0xff] }
 0x78d   :  { %v6518_v48 = vsub.f32 %v11278_v40, %v11280_v16  ;;  %v11289_v12 = vmul.f32 %v11283_v58, %v10797_v63  ;;  %v11293_v44 = vmul.f32 %v11283_v58, %v10802_v60  ;;  %v11297_v53 = vmul.f32 %v11283_v58, %v10794_v15  ;;  %v12307_v40 = vld [vmem:[#allocation30_spill] sm:$0xff]  ;;  %v12309_v16 = vld [vmem:[#allocation32_spill] sm:$0xff] }
 0x78e   :  { %v11301_v26 = vmul.f32 %v11283_v58, %v10799_v51  ;;  %v11305_v49 = vmul.f32 %v11283_v58, %v10808_v50  ;;  %v11309_v63 = vmul.f32 %v11283_v58, %v12299_v20  ;;  %v11313_v60 = vmul.f32 %v11283_v58, %v12300_v55  ;;  %v12310_v55 = vld [vmem:[#allocation33_spill] sm:$0xff] }
 0x78f   :  { %v11317_v15 = vmul.f32 %v11283_v58, %v12301_v35  ;;  %v11321_v51 = vmul.f32 %v11283_v58, %v12302_v3  ;;  %v11325_v50 = vmul.f32 %v11283_v58, %v10831_v61  ;;  %v11329_v59 = vmul.f32 %v11283_v58, %v10822_v1  ;;  %v12312_v3 = vld [vmem:[#allocation34_spill] sm:$0xff] }
 0x790   :  { %v11333_v56 = vmul.f32 %v11283_v58, %v12303_v4  ;;  %v11337_v54 = vmul.f32 %v11283_v58, %v12304_v17  ;;  %v11341_v33 = vmul.f32 %v11283_v58, %v12305_v62  ;;  %v11345_v61 = vmul.f32 %v11283_v58, %v12306_v47  ;;  %v12313_v17 = vld [vmem:[#allocation35_spill] sm:$0xff]  ;;  %v12315_v47 = vld [vmem:[#allocation36_spill] sm:$0xff] }
 0x791   :  { %v11349_v1 = vmul.f32 %v11283_v58, %v12307_v40  ;;  %v11353_v20 = vmul.f32 %v11283_v58, %v12309_v16  ;;  %v11357_v35 = vmul.f32 %v11283_v58, %v12310_v55  ;;  %v11361_v4 = vmul.f32 %v11283_v58, %v12312_v3 }
 0x792   :  { %v11365_v62 = vmul.f32 %v11283_v58, %v12313_v17  ;;  %v11369_v40 = vmul.f32 %v11283_v58, %v12315_v47  ;;  %v11377_v55 = vmul.f32 %v11283_v58, %v10889_v19  ;;  %v11385_v17 = vmul.f32 %v11283_v58, %v10905_v57 }
 0x793   :  { %12308 = vst [vmem:[#allocation20_spill] sm:$0xff] %v11349_v1  ;;  %12311 = vst [vmem:[#allocation22_spill] sm:$0xff] %v11357_v35  ;;  %v12317_v1 = vld [vmem:[#allocation37_spill] sm:$0xff]  ;;  %v12320_v35 = vld [vmem:[#allocation38_spill] sm:$0xff] }
 0x794   :  { %12314 = vst [vmem:[#allocation25_spill] sm:$0xff] %v11365_v62  ;;  %12316 = vst [vmem:[#allocation5_spill] sm:$0xff] %v11369_v40  ;;  %v11373_v16 = vmul.f32 %v11283_v58, %v12317_v1  ;;  %v11381_v3 = vmul.f32 %v11283_v58, %v12320_v35  ;;  %v12322_v62 = vld [vmem:[#allocation39_spill] sm:$0xff]  ;;  %v12324_v40 = vld [vmem:[#allocation40_spill] sm:$0xff] }
 0x795   :  { %12319 = vst [vmem:[#allocation4_spill] sm:$0xff] %v11377_v55  ;;  %v11389_v47 = vmul.f32 %v11283_v58, %v12322_v62  ;;  %v11393_v1 = vmul.f32 %v11283_v58, %v12324_v40  ;;  %v12326_v55 = vld [vmem:[#allocation42_spill] sm:$0xff]  ;;  %v11409_v62 = vmul.f32 %v11283_v58, %v10968_v34  ;;  %v11429_v34 = vmul.f32 %v11283_v58, %v11024_v52 }
 0x796   :  { %12318 = vst [vmem:[#allocation7_spill] sm:$0xff] %v11373_v16  ;;  %12321 = vst [vmem:[#allocation6_spill] sm:$0xff] %v11381_v3  ;;  %v12325_v16 = vld [vmem:[#allocation41_spill] sm:$0xff]  ;;  %v11401_v35 = vmul.f32 %v11283_v58, %v12326_v55  ;;  %v12327_v3 = vld [vmem:[#allocation43_spill] sm:$0xff]  ;;  %v11421_v55 = vmul.f32 %v11283_v58, %v10999_v28  ;;  %v11441_v28 = vmul.f32 %v11283_v58, %v11063_v2 }
 0x797   :  { %12323 = vst [vmem:[#allocation9_spill] sm:$0xff] %v11389_v47  ;;  %v11397_v19 = vmul.f32 %v11283_v58, %v12325_v16  ;;  %v11405_v57 = vmul.f32 %v11283_v58, %v12327_v3  ;;  %v12328_v47 = vld [vmem:[#allocation44_spill] sm:$0xff]  ;;  %v11417_v16 = vmul.f32 %v11283_v58, %v10991_v38  ;;  %v11425_v3 = vmul.f32 %v11283_v58, %v11015_v32 }
 0x798   :  { %v11413_v40 = vmul.f32 %v11283_v58, %v12328_v47  ;;  %v11433_v47 = vmul.f32 %v11283_v58, %v11040_v9  ;;  %v11437_v38 = vmul.f32 %v11283_v58, %v11047_v23  ;;  %v11445_v32 = vmul.f32 %v11283_v58, %v11071_v22 }
 0x799   :  { %v11449_v52 = vmul.f32 %v11283_v58, %v11087_v6  ;;  %v11453_v9 = vmul.f32 %v11283_v58, %v11094_v24  ;;  %v11457_v23 = vmul.f32 %v11283_v58, %v11104_v45  ;;  %v11461_v2 = vmul.f32 %v11283_v58, %v11109_v0 }
 0x79a   :  { %v11465_v22 = vmul.f32 %v11283_v58, %v11119_v31  ;;  %v11469_v6 = vmul.f32 %v11283_v58, %v11125_v43  ;;  %v11473_v24 = vmul.f32 %v11283_v58, %v11135_v21  ;;  %v11477_v45 = vmul.f32 %v11283_v58, %v11142_v29 }
 0x79b   :  { %v11481_v0 = vmul.f32 %v11283_v58, %v11152_v30  ;;  %v11485_v31 = vmul.f32 %v11283_v58, %v11157_v46  ;;  %v11489_v43 = vmul.f32 %v11283_v58, %v11167_v36  ;;  %v11493_v21 = vmul.f32 %v11283_v58, %v11173_v42 }
 0x79c   :  { %v11497_v29 = vmul.f32 %v11283_v58, %v11183_v39  ;;  %v11501_v30 = vmul.f32 %v11283_v58, %v11238_v8  ;;  %v11505_v46 = vmul.f32 %v11283_v58, %v11246_v14  ;;  %v11509_v36 = vmul.f32 %v11283_v58, %v11253_v25 }
 0x79d   :  { %v11513_v42 = vmul.f32 %v11283_v58, %v11260_v11  ;;  %v6578_v39 = vmul.f32 %v11283_v58, %v11190_v41  ;;  %v11521_v8 = vmul.f32 %v11283_v58, %v11267_v37  ;;  %v11524_v14 = vrot.slane %v6518_v48, %v12298_v13 }
 0x79e   :  { %12329 = vst [vmem:[#allocation11_spill] sm:$0xff] %v11497_v29  ;;  %v6579_v29 = vmul.f32 %v11283_v58, %v11200_v5  ;;  %v6580_v25 = vmul.f32 %v11283_v58, %v11205_v7  ;;  %v6581_v11 = vmul.f32 %v11283_v58, %v11215_v10  ;;  %v6583_v41 = vmul.f32 %v11283_v58, %v11231_v18 }
 0x79f   :  { %12330 = vst [vmem:[#allocation13_spill] sm:$0xff] %v11513_v42  ;;  %v6582_v42 = vmul.f32 %v11283_v58, %v11221_v27  ;;  %v11536_v5 = vadd.f32 %v11524_v14, %v11289_v12  ;;  %v11540_v37 = vadd.f32 %v11524_v14, %v11293_v44  ;;  %v11544_v7 = vadd.f32 %v11524_v14, %v11297_v53 }
 0x7a0   :  { %v11548_v10 = vadd.f32 %v11524_v14, %v11301_v26  ;;  %v11552_v27 = vadd.f32 %v11524_v14, %v11305_v49  ;;  %v11556_v18 = vadd.f32 %v11524_v14, %v11309_v63  ;;  %v11560_v13 = vadd.f32 %v11524_v14, %v11313_v60  ;;  %v12331_v60 = vld [vmem:[#allocation20_spill] sm:$0xff] }
 0x7a1   :  { %v11564_v58 = vadd.f32 %v11524_v14, %v11317_v15  ;;  %v11568_v48 = vadd.f32 %v11524_v14, %v11321_v51  ;;  %v11572_v12 = vadd.f32 %v11524_v14, %v11325_v50  ;;  %v11576_v44 = vadd.f32 %v11524_v14, %v11329_v59  ;;  %v12334_v50 = vld [vmem:[#allocation22_spill] sm:$0xff] }
 0x7a2   :  { %v11580_v53 = vadd.f32 %v11524_v14, %v11333_v56  ;;  %v11584_v26 = vadd.f32 %v11524_v14, %v11337_v54  ;;  %v11588_v49 = vadd.f32 %v11524_v14, %v11341_v33  ;;  %v11592_v63 = vadd.f32 %v11524_v14, %v11345_v61  ;;  %v12336_v54 = vld [vmem:[#allocation25_spill] sm:$0xff] }
 0x7a3   :  { %v11596_v15 = vadd.f32 %v11524_v14, %v12331_v60  ;;  %v11600_v51 = vadd.f32 %v11524_v14, %v11353_v20  ;;  %v11604_v59 = vadd.f32 %v11524_v14, %v12334_v50  ;;  %v11608_v56 = vadd.f32 %v11524_v14, %v11361_v4  ;;  %v12338_v61 = vld [vmem:[#allocation5_spill] sm:$0xff] }
 0x7a4   :  { %v11612_v33 = vadd.f32 %v11524_v14, %v12336_v54  ;;  %v11616_v60 = vadd.f32 %v11524_v14, %v12338_v61  ;;  %v11632_v54 = vadd.f32 %v11524_v14, %v11385_v17  ;;  %v11652_v17 = vadd.f32 %v11524_v14, %v11405_v57 }
 0x7a5   :  { %12332 = vst [vmem:[#allocation15_spill] sm:$0xff] %v11596_v15  ;;  %12333 = vst [vmem:[#allocation12_spill] sm:$0xff] %v11600_v51  ;;  %v12339_v15 = vld [vmem:[#allocation7_spill] sm:$0xff]  ;;  %v12340_v51 = vld [vmem:[#allocation4_spill] sm:$0xff]  ;;  %v11672_v57 = vadd.f32 %v11524_v14, %v11425_v3  ;;  %v11692_v3 = vadd.f32 %v11524_v14, %v11445_v32  ;;  %v11712_v32 = vadd.f32 %v11524_v14, %v11465_v22 }
 0x7a6   :  { %12335 = vst [vmem:[#allocation14_spill] sm:$0xff] %v11604_v59  ;;  %12337 = vst [vmem:[#allocation17_spill] sm:$0xff] %v11612_v33  ;;  %v11620_v20 = vadd.f32 %v11524_v14, %v12339_v15  ;;  %v11624_v50 = vadd.f32 %v11524_v14, %v12340_v51  ;;  %v12341_v59 = vld [vmem:[#allocation6_spill] sm:$0xff]  ;;  %v12342_v33 = vld [vmem:[#allocation9_spill] sm:$0xff]  ;;  %v11640_v15 = vadd.f32 %v11524_v14, %v11393_v1 }
 0x7a7   :  { %v11628_v4 = vadd.f32 %v11524_v14, %v12341_v59  ;;  %v11636_v61 = vadd.f32 %v11524_v14, %v12342_v33  ;;  %v11644_v51 = vadd.f32 %v11524_v14, %v11397_v19  ;;  %v11648_v59 = vadd.f32 %v11524_v14, %v11401_v35 }
 0x7a8   :  { %v11656_v33 = vadd.f32 %v11524_v14, %v11409_v62  ;;  %v11660_v1 = vadd.f32 %v11524_v14, %v11413_v40  ;;  %v11664_v19 = vadd.f32 %v11524_v14, %v11417_v16  ;;  %v11668_v35 = vadd.f32 %v11524_v14, %v11421_v55 }
 0x7a9   :  { %v11676_v62 = vadd.f32 %v11524_v14, %v11429_v34  ;;  %v11680_v40 = vadd.f32 %v11524_v14, %v11433_v47  ;;  %v11684_v16 = vadd.f32 %v11524_v14, %v11437_v38  ;;  %v11688_v55 = vadd.f32 %v11524_v14, %v11441_v28 }
 0x7aa   :  { %v11696_v34 = vadd.f32 %v11524_v14, %v11449_v52  ;;  %v11700_v47 = vadd.f32 %v11524_v14, %v11453_v9  ;;  %v11704_v38 = vadd.f32 %v11524_v14, %v11457_v23  ;;  %v11708_v28 = vadd.f32 %v11524_v14, %v11461_v2 }
 0x7ab   :  { %v11716_v52 = vadd.f32 %v11524_v14, %v11469_v6  ;;  %v11720_v9 = vadd.f32 %v11524_v14, %v11473_v24  ;;  %v11724_v23 = vadd.f32 %v11524_v14, %v11477_v45  ;;  %v11728_v2 = vadd.f32 %v11524_v14, %v11481_v0 }
 0x7ac   :  { %v11732_v22 = vadd.f32 %v11524_v14, %v11485_v31  ;;  %v11736_v6 = vadd.f32 %v11524_v14, %v11489_v43  ;;  %v11740_v24 = vadd.f32 %v11524_v14, %v11493_v21  ;;  %v11750_v0 = vadd.f32 %v11524_v14, %v6579_v29 }
 0x7ad   :  { %12343 = vst [vmem:[#allocation19_spill] sm:$0xff] %v11720_v9  ;;  %12344 = vst [vmem:[#allocation16_spill] sm:$0xff] %v11724_v23  ;;  %v12346_v9 = vld [vmem:[#allocation11_spill] sm:$0xff]  ;;  %v11747_v23 = vadd.f32 %v11524_v14, %v6578_v39  ;;  %v11753_v31 = vadd.f32 %v11524_v14, %v6580_v25  ;;  %v11756_v43 = vadd.f32 %v11524_v14, %v6581_v11  ;;  %v12350_v25 = vld [vmem:[#allocation13_spill] sm:$0xff] }
 0x7ae   :  { %12345 = vst [vmem:[#allocation18_spill] sm:$0xff] %v11736_v6  ;;  %v11744_v45 = vadd.f32 %v11524_v14, %v12346_v9  ;;  %v11759_v6 = vadd.f32 %v11524_v14, %v6582_v42  ;;  %v11762_v21 = vadd.f32 %v11524_v14, %v6583_v41  ;;  %v11766_v9 = vadd.f32 %v11524_v14, %v11501_v30 }
 0x7af   :  { %v11770_v29 = vadd.f32 %v11524_v14, %v11505_v46  ;;  %v11774_v39 = vadd.f32 %v11524_v14, %v11509_v36  ;;  %v11778_v11 = vadd.f32 %v11524_v14, %v12350_v25  ;;  %v11782_v42 = vadd.f32 %v11524_v14, %v11521_v8 }
 0x7b0   :  { %12347 = vst [vmem:[#allocation21_spill] sm:$0xff] %v11766_v9  ;;  %v6659_v41 = vmax.f32 %v11536_v5, 0.0  ;;  %v6660_v30 = vmax.f32 %v11540_v37, 0.0  ;;  %v6661_v9 = vmax.f32 %v11544_v7, 0.0  ;;  %v6662_v46 = vmax.f32 %v11548_v10, 0.0 }
 0x7b1   :  { %12348 = vst [vmem:[#allocation26_spill] sm:$0xff] %v11770_v29  ;;  %12349 = vst [vmem:[#allocation10_spill] sm:$0xff] %v11774_v39  ;;  %v6663_v29 = vmax.f32 %v11552_v27, 0.0  ;;  %v6664_v36 = vmax.f32 %v11556_v18, 0.0  ;;  %v6665_v39 = vmax.f32 %v11560_v13, 0.0  ;;  %v6666_v25 = vmax.f32 %v11564_v58, 0.0 }
 0x7b2   :  { %12351 = vst [vmem:[#allocation23_spill] sm:$0xff] %v11778_v11  ;;  %v6667_v11 = vmax.f32 %v11568_v48, 0.0  ;;  %v6668_v8 = vmax.f32 %v11572_v12, 0.0  ;;  %v6669_v14 = vmax.f32 %v11576_v44, 0.0  ;;  %v6670_v5 = vmax.f32 %v11580_v53, 0.0  ;;  %6723 = vst [vmem:[%s12047_s7] sm:$0xff] %v6659_v41  ;;  %v12352_v27 = vld [vmem:[#allocation15_spill] sm:$0xff] }
 0x7b3   :  { %6724 = vst [vmem:[%s12047_s7 + $0x8] sm:$0xff] %v6660_v30  ;;  %6725 = vst [vmem:[%s12047_s7 + $0x10] sm:$0xff] %v6661_v9  ;;  %v6671_v37 = vmax.f32 %v11584_v26, 0.0  ;;  %v6672_v7 = vmax.f32 %v11588_v49, 0.0  ;;  %v6673_v10 = vmax.f32 %v11592_v63, 0.0  ;;  %v6674_v18 = vmax.f32 %v12352_v27, 0.0 }
 0x7b4   :  { %6726 = vst [vmem:[%s12047_s7 + $0x18] sm:$0xff] %v6662_v46  ;;  %6727 = vst [vmem:[%s12047_s7 + $0x20] sm:$0xff] %v6663_v29  ;;  %v12353_v13 = vld [vmem:[#allocation12_spill] sm:$0xff]  ;;  %v12354_v48 = vld [vmem:[#allocation14_spill] sm:$0xff]  ;;  %v6677_v44 = vmax.f32 %v11608_v56, 0.0  ;;  %v6679_v49 = vmax.f32 %v11616_v60, 0.0 }
 0x7b5   :  { %6728 = vst [vmem:[%s12047_s7 + $0x28] sm:$0xff] %v6664_v36  ;;  %6729 = vst [vmem:[%s12047_s7 + $0x30] sm:$0xff] %v6665_v39  ;;  %v6675_v58 = vmax.f32 %v12353_v13, 0.0  ;;  %v6676_v12 = vmax.f32 %v12354_v48, 0.0  ;;  %v12355_v53 = vld [vmem:[#allocation17_spill] sm:$0xff]  ;;  %v6680_v63 = vmax.f32 %v11620_v20, 0.0 }
 0x7b6   :  { %6730 = vst [vmem:[%s12047_s7 + $0x38] sm:$0xff] %v6666_v25  ;;  %v6678_v26 = vmax.f32 %v12355_v53, 0.0  ;;  %6731 = vst [vmem:[%s12047_s7 + $0x40] sm:$0xff] %v6667_v11  ;;  %v6681_v56 = vmax.f32 %v11624_v50, 0.0  ;;  %v6682_v9 = vmax.f32 %v11628_v4, 0.0  ;;  %v6683_v60 = vmax.f32 %v11632_v54, 0.0 }
 0x7b7   :  { %6732 = vst [vmem:[%s12047_s7 + $0x48] sm:$0xff] %v6668_v8  ;;  %6733 = vst [vmem:[%s12047_s7 + $0x50] sm:$0xff] %v6669_v14  ;;  %v6684_v20 = vmax.f32 %v11636_v61, 0.0  ;;  %v6685_v50 = vmax.f32 %v11640_v15, 0.0  ;;  %v6686_v4 = vmax.f32 %v11644_v51, 0.0  ;;  %v6687_v54 = vmax.f32 %v11648_v59, 0.0 }
 0x7b8   :  { %6734 = vst [vmem:[%s12047_s7 + $0x58] sm:$0xff] %v6670_v5  ;;  %6735 = vst [vmem:[%s12047_s7 + $0x60] sm:$0xff] %v6671_v37  ;;  %v6688_v61 = vmax.f32 %v11652_v17, 0.0  ;;  %v6689_v15 = vmax.f32 %v11656_v33, 0.0  ;;  %v6690_v51 = vmax.f32 %v11660_v1, 0.0  ;;  %v6691_v59 = vmax.f32 %v11664_v19, 0.0 }
 0x7b9   :  { %6736 = vst [vmem:[%s12047_s7 + $0x68] sm:$0xff] %v6672_v7  ;;  %6737 = vst [vmem:[%s12047_s7 + $0x70] sm:$0xff] %v6673_v10  ;;  %v6692_v17 = vmax.f32 %v11668_v35, 0.0  ;;  %v6693_v33 = vmax.f32 %v11672_v57, 0.0  ;;  %v6694_v1 = vmax.f32 %v11676_v62, 0.0  ;;  %v6695_v19 = vmax.f32 %v11680_v40, 0.0 }
 0x7ba   :  { %6738 = vst [vmem:[%s12047_s7 + $0x78] sm:$0xff] %v6674_v18  ;;  %6739 = vst [vmem:[%s12047_s7 + $0x80] sm:$0xff] %v6675_v58  ;;  %v6696_v35 = vmax.f32 %v11684_v16, 0.0  ;;  %v6697_v57 = vmax.f32 %v11688_v55, 0.0  ;;  %v6698_v62 = vmax.f32 %v11692_v3, 0.0  ;;  %v6699_v40 = vmax.f32 %v11696_v34, 0.0 }
 0x7bb   :  { %6740 = vst [vmem:[%s12047_s7 + $0x88] sm:$0xff] %v6676_v12  ;;  %6741 = vst [vmem:[%s12047_s7 + $0x90] sm:$0xff] %v6677_v44  ;;  %v6700_v16 = vmax.f32 %v11700_v47, 0.0  ;;  %v6701_v55 = vmax.f32 %v11704_v38, 0.0  ;;  %v6702_v3 = vmax.f32 %v11708_v28, 0.0  ;;  %v6703_v34 = vmax.f32 %v11712_v32, 0.0 }
 0x7bc   :  { %6742 = vst [vmem:[%s12047_s7 + $0x98] sm:$0xff] %v6678_v26  ;;  %6743 = vst [vmem:[%s12047_s7 + $0xa0] sm:$0xff] %v6679_v49  ;;  %v6704_v47 = vmax.f32 %v11716_v52, 0.0  ;;  %v12356_v38 = vld [vmem:[#allocation19_spill] sm:$0xff]  ;;  %v12357_v29 = vld [vmem:[#allocation16_spill] sm:$0xff]  ;;  %v6707_v32 = vmax.f32 %v11728_v2, 0.0 }
 0x7bd   :  { %6744 = vst [vmem:[%s12047_s7 + $0xa8] sm:$0xff] %v6680_v63  ;;  %6745 = vst [vmem:[%s12047_s7 + $0xb0] sm:$0xff] %v6681_v56  ;;  %v6705_v28 = vmax.f32 %v12356_v38, 0.0  ;;  %v6706_v39 = vmax.f32 %v12357_v29, 0.0  ;;  %v6708_v52 = vmax.f32 %v11732_v22, 0.0  ;;  %v12358_v11 = vld [vmem:[#allocation18_spill] sm:$0xff] }
 0x7be   :  { %6746 = vst [vmem:[%s12047_s7 + $0xb8] sm:$0xff] %v6682_v9  ;;  %6747 = vst [vmem:[%s12047_s7 + $0xc0] sm:$0xff] %v6683_v60  ;;  %v6709_v41 = vmax.f32 %v12358_v11, 0.0  ;;  %v6710_v30 = vmax.f32 %v11740_v24, 0.0  ;;  %v6711_v2 = vmax.f32 %v11744_v45, 0.0  ;;  %v6712_v22 = vmax.f32 %v11747_v23, 0.0 }
 0x7bf   :  { %6748 = vst [vmem:[%s12047_s7 + $0xc8] sm:$0xff] %v6684_v20  ;;  %6749 = vst [vmem:[%s12047_s7 + $0xd0] sm:$0xff] %v6685_v50  ;;  %v6713_v24 = vmax.f32 %v11750_v0, 0.0  ;;  %v6714_v46 = vmax.f32 %v11753_v31, 0.0  ;;  %v6715_v23 = vmax.f32 %v11756_v43, 0.0  ;;  %v6716_v45 = vmax.f32 %v11759_v6, 0.0 }
 0x7c0   :  { %6750 = vst [vmem:[%s12047_s7 + $0xd8] sm:$0xff] %v6686_v4  ;;  %6751 = vst [vmem:[%s12047_s7 + $0xe0] sm:$0xff] %v6687_v54  ;;  %v6717_v0 = vmax.f32 %v11762_v21, 0.0  ;;  %v12359_v31 = vld [vmem:[#allocation21_spill] sm:$0xff]  ;;  %v12360_v6 = vld [vmem:[#allocation26_spill] sm:$0xff]  ;;  %v6722_v5 = vmax.f32 %v11782_v42, 0.0 }
 0x7c1   :  { %6752 = vst [vmem:[%s12047_s7 + $0xe8] sm:$0xff] %v6688_v61  ;;  %6753 = vst [vmem:[%s12047_s7 + $0xf0] sm:$0xff] %v6689_v15  ;;  %v6718_v36 = vmax.f32 %v12359_v31, 0.0  ;;  %v6719_v43 = vmax.f32 %v12360_v6, 0.0  ;;  %v12361_v21 = vld [vmem:[#allocation10_spill] sm:$0xff]  ;;  %v12362_v8 = vld [vmem:[#allocation23_spill] sm:$0xff] }
 0x7c2   :  { %6754 = vst [vmem:[%s12047_s7 + $0xf8] sm:$0xff] %v6690_v51  ;;  %6755 = vst [vmem:[%s12047_s7 + $0x100] sm:$0xff] %v6691_v59  ;;  %v6720_v25 = vmax.f32 %v12361_v21, 0.0  ;;  %v6721_v14 = vmax.f32 %v12362_v8, 0.0 }
 0x7c3   :  { %6756 = vst [vmem:[%s12047_s7 + $0x108] sm:$0xff] %v6692_v17  ;;  %6757 = vst [vmem:[%s12047_s7 + $0x110] sm:$0xff] %v6693_v33 }
 0x7c4   :  { %6758 = vst [vmem:[%s12047_s7 + $0x118] sm:$0xff] %v6694_v1  ;;  %6759 = vst [vmem:[%s12047_s7 + $0x120] sm:$0xff] %v6695_v19 }
 0x7c5   :  { %6760 = vst [vmem:[%s12047_s7 + $0x128] sm:$0xff] %v6696_v35  ;;  %6761 = vst [vmem:[%s12047_s7 + $0x130] sm:$0xff] %v6697_v57 }
 0x7c6   :  { %6762 = vst [vmem:[%s12047_s7 + $0x138] sm:$0xff] %v6698_v62  ;;  %6763 = vst [vmem:[%s12047_s7 + $0x140] sm:$0xff] %v6699_v40 }
 0x7c7   :  { %6764 = vst [vmem:[%s12047_s7 + $0x148] sm:$0xff] %v6700_v16  ;;  %6765 = vst [vmem:[%s12047_s7 + $0x150] sm:$0xff] %v6701_v55 }
 0x7c8   :  { %6766 = vst [vmem:[%s12047_s7 + $0x158] sm:$0xff] %v6702_v3  ;;  %6767 = vst [vmem:[%s12047_s7 + $0x160] sm:$0xff] %v6703_v34 }
 0x7c9   :  { %6768 = vst [vmem:[%s12047_s7 + $0x168] sm:$0xff] %v6704_v47  ;;  %6769 = vst [vmem:[%s12047_s7 + $0x170] sm:$0xff] %v6705_v28 }
 0x7ca   :  { %6770 = vst [vmem:[%s12047_s7 + $0x178] sm:$0xff] %v6706_v39  ;;  %6771 = vst [vmem:[%s12047_s7 + $0x180] sm:$0xff] %v6707_v32 }
 0x7cb   :  { %6772 = vst [vmem:[%s12047_s7 + $0x188] sm:$0xff] %v6708_v52  ;;  %6773 = vst [vmem:[%s12047_s7 + $0x190] sm:$0xff] %v6709_v41 }
 0x7cc   :  { %6774 = vst [vmem:[%s12047_s7 + $0x198] sm:$0xff] %v6710_v30  ;;  %6775 = vst [vmem:[%s12047_s7 + $0x1a0] sm:$0xff] %v6711_v2 }
 0x7cd   :  { %6776 = vst [vmem:[%s12047_s7 + $0x1a8] sm:$0xff] %v6712_v22  ;;  %6777 = vst [vmem:[%s12047_s7 + $0x1b0] sm:$0xff] %v6713_v24 }
 0x7ce   :  { %6778 = vst [vmem:[%s12047_s7 + $0x1b8] sm:$0xff] %v6714_v46  ;;  %6779 = vst [vmem:[%s12047_s7 + $0x1c0] sm:$0xff] %v6715_v23 }
 0x7cf   :  { %6780 = vst [vmem:[%s12047_s7 + $0x1c8] sm:$0xff] %v6716_v45  ;;  %6781 = vst [vmem:[%s12047_s7 + $0x1d0] sm:$0xff] %v6717_v0 }
 0x7d0   :  { %6782 = vst [vmem:[%s12047_s7 + $0x1d8] sm:$0xff] %v6718_v36  ;;  %6783 = vst [vmem:[%s12047_s7 + $0x1e0] sm:$0xff] %v6719_v43 }
 0x7d1   :  { %6784 = vst [vmem:[%s12047_s7 + $0x1e8] sm:$0xff] %v6720_v25  ;;  %6785 = vst [vmem:[%s12047_s7 + $0x1f0] sm:$0xff] %v6721_v14 }
 0x7d2   :  { %6786 = vst [vmem:[%s12047_s7 + $0x1f8] sm:$0xff] %v6722_v5 }

</bundles_post_ra>
